<compile_context>
chip_gen: v5e
topology: v5e:2x2
jax: 0.10.0
libtpu: 0.0.40
codegen_flags: <defaults>
</compile_context>

<pallas_src>
import math

import jax
import jax.numpy as jnp
from jax.experimental import pallas as pl
from jax.experimental.pallas import tpu as pltpu


# ----------------------------------------------------------------------------
# Fused Pallas kernel: conv1 + bn1 + PReLU + conv2 + bn2 + residual add
# ----------------------------------------------------------------------------
def _residual_block_kernel(xpad_ref, w1_ref, s1_ref, w2_ref, s2_ref, alpha_ref,
                           o_ref, h_ref, patch_ref):
    """One image per grid step.

    xpad_ref  : (1, H+2, W+2, Cp) bf16   spatially+channel padded input (VMEM block)
    w1_ref    : (9*Cp, Cp) bf16          tap-stacked, BN1-scale-folded conv1 weights
    s1_ref    : (1, Cp)    f32           folded BN1 shift (includes conv1 bias)
    w2_ref    : (9*Cp, Cp) bf16          tap-stacked, BN2-scale-folded conv2 weights
    s2_ref    : (1, Cp)    f32           folded BN2 shift (includes conv2 bias)
    alpha_ref : (1,)       f32           PReLU weight (SMEM scalar)
    o_ref     : (1, H*W, Cp) f32         output block (lane-dense)
    h_ref     : (H+2, W+2, Cp) bf16      VMEM scratch: zero-bordered conv1 output
    patch_ref : (H*W, 9*Cp) bf16         VMEM scratch: tap-stacked patch slab (reused)
    """
    _, Hp, Wp, Cp = xpad_ref.shape
    H, W = Hp - 2, Wp - 2
    HW = H * W

    # ---- conv1: build tap-stacked patch slab from the padded input (bf16) ----
    for kh in range(3):
        for kw in range(3):
            t = kh * 3 + kw
            win = xpad_ref[0, kh:kh + H, kw:kw + W, :]            # (H, W, Cp) bf16
            patch_ref[:, t * Cp:(t + 1) * Cp] = win.reshape(HW, Cp)

    acc1 = jnp.dot(patch_ref[...], w1_ref[...],
                   preferred_element_type=jnp.float32)            # (HW, Cp) f32
    y1 = acc1 + s1_ref[...]                                       # folded BN1 shift
    alpha = alpha_ref[0]                                          # SMEM scalar
    y1 = jnp.where(y1 > 0.0, y1, alpha * y1)                      # PReLU

    # ---- conv1 result -> zero-bordered VMEM scratch (in-VMEM spatial pad) ----
    h_ref[...] = jnp.zeros(h_ref.shape, h_ref.dtype)
    h_ref[1:H + 1, 1:W + 1, :] = y1.reshape(H, W, Cp).astype(h_ref.dtype)

    # ---- conv2: patch slab from the VMEM-resident conv1 output ---------------
    for kh in range(3):
        for kw in range(3):
            t = kh * 3 + kw
            win = h_ref[kh:kh + H, kw:kw + W, :]                  # (H, W, Cp) bf16
            patch_ref[:, t * Cp:(t + 1) * Cp] = win.reshape(HW, Cp)

    acc2 = jnp.dot(patch_ref[...], w2_ref[...],
                   preferred_element_type=jnp.float32)            # (HW, Cp) f32
    y2 = acc2 + s2_ref[...]                                       # folded BN2 shift

    # ---- residual add from the interior of xpad (already in VMEM) ------------
    res = xpad_ref[0, 1:H + 1, 1:W + 1, :].reshape(HW, Cp).astype(jnp.float32)
    o_ref[0] = (res + y2).astype(o_ref.dtype)


# ----------------------------------------------------------------------------
# Host-side parameter folding and forward pass
# ----------------------------------------------------------------------------
def _fold_conv_bn(w, b, bn, cp, eps=1e-5):
    """Fold eval-mode BatchNorm into the conv; return tap-stacked bf16 weights.

    Fold is done in f32; the single bf16 cast happens at the very end.
    Weight layout: (9*cp, cp), rows [t*cp : t*cp+cin] hold tap t's (cin, cout)
    block (padded rows/cols are zero), so conv = one dot over K = 9*cp.
    """
    gamma, beta, mean, var = bn
    scale = gamma / jnp.sqrt(var + eps)                 # (C,)
    shift = (b - mean) * scale + beta                   # (C,)
    kh, kw, cin, cout = w.shape
    w_f = (w * scale[None, None, None, :]).reshape(kh * kw, cin, cout)
    w_p = jnp.zeros((kh * kw, cp, cp), jnp.float32).at[:, :cin, :cout].set(w_f)
    w_p = w_p.reshape(kh * kw * cp, cp).astype(jnp.bfloat16)
    shift_p = jnp.zeros((1, cp), jnp.float32).at[:, :cout].set(shift)
    return w_p, shift_p


def residual_block_forward(x_nchw, params):
    x = jnp.transpose(x_nchw, (0, 2, 3, 1)).astype(jnp.float32)     # NCHW -> NHWC
    N, H, W, C = x.shape
    Cp = ((C + 127) // 128) * 128                                   # lane-dense channels
    Hp, Wp = H + 2, W + 2

    w1, s1 = _fold_conv_bn(params["conv1_w"], params["conv1_b"], params["bn1"], Cp)
    w2, s2 = _fold_conv_bn(params["conv2_w"], params["conv2_b"], params["bn2"], Cp)
    alpha = params["prelu_a"].reshape(1).astype(jnp.float32)

    # One fused pad pass (spatial 1px border + channel pad), then one bf16 cast.
    xpad = jnp.pad(x, ((0, 0), (1, 1), (1, 1), (0, Cp - C))).astype(jnp.bfloat16)

    out = pl.pallas_call(
        _residual_block_kernel,
        out_shape=jax.ShapeDtypeStruct((N, H * W, Cp), jnp.float32),
        grid=(N,),
        in_specs=[
            pl.BlockSpec((1, Hp, Wp, Cp), lambda n: (n, 0, 0, 0)),   # padded x (bf16)
            pl.BlockSpec((9 * Cp, Cp), lambda n: (0, 0)),            # conv1 weights
            pl.BlockSpec((1, Cp), lambda n: (0, 0)),                 # conv1 shift
            pl.BlockSpec((9 * Cp, Cp), lambda n: (0, 0)),            # conv2 weights
            pl.BlockSpec((1, Cp), lambda n: (0, 0)),                 # conv2 shift
            pl.BlockSpec(memory_space=pltpu.MemorySpace.SMEM),       # PReLU alpha
        ],
        out_specs=pl.BlockSpec((1, H * W, Cp), lambda n: (n, 0, 0)),
        scratch_shapes=[
            pltpu.VMEM((Hp, Wp, Cp), jnp.bfloat16),     # zero-bordered conv1 output
            pltpu.VMEM((H * W, 9 * Cp), jnp.bfloat16),  # tap-stacked patch slab
        ],
        compiler_params=pltpu.CompilerParams(
            dimension_semantics=("parallel",),          # megacore / 2-TC friendly
            vmem_limit_bytes=32 * 1024 * 1024,          # valid on v5e/v6e/v7x; >> ~2 MiB used
        ),
    )(xpad, w1, s1, w2, s2, alpha)

    out = out.reshape(N, H, W, Cp)[:, :, :, :C]
    return jnp.transpose(out, (0, 3, 1, 2))                          # NHWC -> NCHW


# ----------------------------------------------------------------------------
# Pure-JAX reference (for correctness check)
# ----------------------------------------------------------------------------
def _reference_forward(x_nchw, params):
    x = jnp.transpose(x_nchw, (0, 2, 3, 1)).astype(jnp.float32)

    def conv(v, w, b):
        y = jax.lax.conv_general_dilated(
            v, w, window_strides=(1, 1), padding="SAME",
            dimension_numbers=("NHWC", "HWIO", "NHWC"),
            precision=jax.lax.Precision.HIGHEST)
        return y + b

    def bn(y, p, eps=1e-5):
        gamma, beta, mean, var = p
        return (y - mean) * (gamma / jnp.sqrt(var + eps)) + beta

    a = params["prelu_a"].reshape(())
    h = bn(conv(x, params["conv1_w"], params["conv1_b"]), params["bn1"])
    h = jnp.where(h > 0.0, h, a * h)
    h = bn(conv(h, params["conv2_w"], params["conv2_b"]), params["bn2"])
    out = x + h
    return jnp.transpose(out, (0, 3, 1, 2))


# ----------------------------------------------------------------------------
# Main
# ----------------------------------------------------------------------------
if __name__ == "__main__":
    key = jax.random.PRNGKey(0)
    N, C, H, W = 2, 64, 16, 16            # SRGAN ResidualBlock uses channels=64
    ks = jax.random.split(key, 13)
    fan_in = 9 * C
    params = {
        "conv1_w": jax.random.normal(ks[0], (3, 3, C, C), jnp.float32) / math.sqrt(fan_in),
        "conv1_b": 0.01 * jax.random.normal(ks[1], (C,), jnp.float32),
        "bn1": (1.0 + 0.1 * jax.random.normal(ks[2], (C,), jnp.float32),
                0.1 * jax.random.normal(ks[3], (C,), jnp.float32),
                0.1 * jax.random.normal(ks[4], (C,), jnp.float32),
                1.0 + 0.1 * jax.random.uniform(ks[5], (C,), jnp.float32)),
        "prelu_a": jnp.full((1,), 0.25, jnp.float32),
        "conv2_w": jax.random.normal(ks[6], (3, 3, C, C), jnp.float32) / math.sqrt(fan_in),
        "conv2_b": 0.01 * jax.random.normal(ks[7], (C,), jnp.float32),
        "bn2": (1.0 + 0.1 * jax.random.normal(ks[8], (C,), jnp.float32),
                0.1 * jax.random.normal(ks[9], (C,), jnp.float32),
                0.1 * jax.random.normal(ks[10], (C,), jnp.float32),
                1.0 + 0.1 * jax.random.uniform(ks[11], (C,), jnp.float32)),
    }
    x = jax.random.normal(ks[12], (N, C, H, W), jnp.float32)

    out = jax.jit(residual_block_forward)(x, params)
    out = jax.block_until_ready(out)

    assert out.shape == (N, C, H, W), out.shape
    assert bool(jnp.all(jnp.isfinite(out)))

    ref = _reference_forward(x, params)
    max_err = float(jnp.max(jnp.abs(out - ref)))
    assert max_err < 1e-1, f"max abs err vs reference: {max_err}"
    print("KERNEL_OK")
</pallas_src>

<mosaic_0001>
module attributes {stable_mosaic.version = 11 : i64} {
  func.func @_residual_block_kernel(%arg0: i32, %arg1: memref<1x18x18x128xbf16, #tpu.memory_space<vmem>>, %arg2: memref<1152x128xbf16, #tpu.memory_space<vmem>>, %arg3: memref<1x128xf32, #tpu.memory_space<vmem>>, %arg4: memref<1152x128xbf16, #tpu.memory_space<vmem>>, %arg5: memref<1x128xf32, #tpu.memory_space<vmem>>, %arg6: memref<1xf32, #tpu.memory_space<smem>>, %arg7: memref<1x256x128xf32, #tpu.memory_space<vmem>>, %arg8: memref<18x18x128xbf16, #tpu.memory_space<vmem>>, %arg9: memref<256x1152xbf16, #tpu.memory_space<vmem>>) attributes {dimension_semantics = [#tpu.dimension_semantics<parallel>], iteration_bounds = array<i64: 2>, scalar_prefetch = 0 : i64, scratch_operands = 2 : i64, tpu.core_type = #tpu.core_type<tc>, window_params = [{transform_indices = @transform_0, window_bounds = array<i64: 1, 18, 18, 128>}, {pipeline_mode = #tpu.pipeline_mode<synchronous>, transform_indices = @transform_1, window_bounds = array<i64: 1152, 128>}, {pipeline_mode = #tpu.pipeline_mode<synchronous>, transform_indices = @transform_2, window_bounds = array<i64: 1, 128>}, {pipeline_mode = #tpu.pipeline_mode<synchronous>, transform_indices = @transform_3, window_bounds = array<i64: 1152, 128>}, {pipeline_mode = #tpu.pipeline_mode<synchronous>, transform_indices = @transform_4, window_bounds = array<i64: 1, 128>}, {transform_indices = @transform_5, window_bounds = array<i64: 1>}, {transform_indices = @transform_6, window_bounds = array<i64: 1, 256, 128>}]} {
    %c0 = arith.constant 0 : index
    %c0_0 = arith.constant 0 : index
    %c0_1 = arith.constant 0 : index
    %c0_2 = arith.constant 0 : index
    %0 = vector.load %arg1[%c0, %c0_0, %c0_1, %c0_2] : memref<1x18x18x128xbf16, #tpu.memory_space<vmem>>, vector<1x16x16x128xbf16>
    %1 = vector.shape_cast %0 : vector<1x16x16x128xbf16> to vector<16x16x128xbf16>
    %2 = vector.shape_cast %1 : vector<16x16x128xbf16> to vector<256x128xbf16>
    %c0_3 = arith.constant 0 : index
    %c0_4 = arith.constant 0 : index
    %3 = vector.load %arg9[%c0_3, %c0_4] : memref<256x1152xbf16, #tpu.memory_space<vmem>>, vector<256x128xbf16>
    tpu.vector_store %arg9[%c0_3, %c0_4], %2 {strides = array<i32>} : memref<256x1152xbf16, #tpu.memory_space<vmem>>, vector<256x128xbf16>,
    %c0_5 = arith.constant 0 : index
    %c0_6 = arith.constant 0 : index
    %c1 = arith.constant 1 : index
    %c0_7 = arith.constant 0 : index
    %4 = vector.load %arg1[%c0_5, %c0_6, %c1, %c0_7] : memref<1x18x18x128xbf16, #tpu.memory_space<vmem>>, vector<1x16x16x128xbf16>
    %5 = vector.shape_cast %4 : vector<1x16x16x128xbf16> to vector<16x16x128xbf16>
    %6 = vector.shape_cast %5 : vector<16x16x128xbf16> to vector<256x128xbf16>
    %c0_8 = arith.constant 0 : index
    %c128 = arith.constant 128 : index
    %7 = vector.load %arg9[%c0_8, %c128] : memref<256x1152xbf16, #tpu.memory_space<vmem>>, vector<256x128xbf16>
    tpu.vector_store %arg9[%c0_8, %c128], %6 {strides = array<i32>} : memref<256x1152xbf16, #tpu.memory_space<vmem>>, vector<256x128xbf16>,
    %c0_9 = arith.constant 0 : index
    %c0_10 = arith.constant 0 : index
    %c2 = arith.constant 2 : index
    %c0_11 = arith.constant 0 : index
    %8 = vector.load %arg1[%c0_9, %c0_10, %c2, %c0_11] : memref<1x18x18x128xbf16, #tpu.memory_space<vmem>>, vector<1x16x16x128xbf16>
    %9 = vector.shape_cast %8 : vector<1x16x16x128xbf16> to vector<16x16x128xbf16>
    %10 = vector.shape_cast %9 : vector<16x16x128xbf16> to vector<256x128xbf16>
    %c0_12 = arith.constant 0 : index
    %c256 = arith.constant 256 : index
    %11 = vector.load %arg9[%c0_12, %c256] : memref<256x1152xbf16, #tpu.memory_space<vmem>>, vector<256x128xbf16>
    tpu.vector_store %arg9[%c0_12, %c256], %10 {strides = array<i32>} : memref<256x1152xbf16, #tpu.memory_space<vmem>>, vector<256x128xbf16>,
    %c0_13 = arith.constant 0 : index
    %c1_14 = arith.constant 1 : index
    %c0_15 = arith.constant 0 : index
    %c0_16 = arith.constant 0 : index
    %12 = vector.load %arg1[%c0_13, %c1_14, %c0_15, %c0_16] : memref<1x18x18x128xbf16, #tpu.memory_space<vmem>>, vector<1x16x16x128xbf16>
    %13 = vector.shape_cast %12 : vector<1x16x16x128xbf16> to vector<16x16x128xbf16>
    %14 = vector.shape_cast %13 : vector<16x16x128xbf16> to vector<256x128xbf16>
    %c0_17 = arith.constant 0 : index
    %c384 = arith.constant 384 : index
    %15 = vector.load %arg9[%c0_17, %c384] : memref<256x1152xbf16, #tpu.memory_space<vmem>>, vector<256x128xbf16>
    tpu.vector_store %arg9[%c0_17, %c384], %14 {strides = array<i32>} : memref<256x1152xbf16, #tpu.memory_space<vmem>>, vector<256x128xbf16>,
    %c0_18 = arith.constant 0 : index
    %c1_19 = arith.constant 1 : index
    %c1_20 = arith.constant 1 : index
    %c0_21 = arith.constant 0 : index
    %16 = vector.load %arg1[%c0_18, %c1_19, %c1_20, %c0_21] : memref<1x18x18x128xbf16, #tpu.memory_space<vmem>>, vector<1x16x16x128xbf16>
    %17 = vector.shape_cast %16 : vector<1x16x16x128xbf16> to vector<16x16x128xbf16>
    %18 = vector.shape_cast %17 : vector<16x16x128xbf16> to vector<256x128xbf16>
    %c0_22 = arith.constant 0 : index
    %c512 = arith.constant 512 : index
    %19 = vector.load %arg9[%c0_22, %c512] : memref<256x1152xbf16, #tpu.memory_space<vmem>>, vector<256x128xbf16>
    tpu.vector_store %arg9[%c0_22, %c512], %18 {strides = array<i32>} : memref<256x1152xbf16, #tpu.memory_space<vmem>>, vector<256x128xbf16>,
    %c0_23 = arith.constant 0 : index
    %c1_24 = arith.constant 1 : index
    %c2_25 = arith.constant 2 : index
    %c0_26 = arith.constant 0 : index
    %20 = vector.load %arg1[%c0_23, %c1_24, %c2_25, %c0_26] : memref<1x18x18x128xbf16, #tpu.memory_space<vmem>>, vector<1x16x16x128xbf16>
    %21 = vector.shape_cast %20 : vector<1x16x16x128xbf16> to vector<16x16x128xbf16>
    %22 = vector.shape_cast %21 : vector<16x16x128xbf16> to vector<256x128xbf16>
    %c0_27 = arith.constant 0 : index
    %c640 = arith.constant 640 : index
    %23 = vector.load %arg9[%c0_27, %c640] : memref<256x1152xbf16, #tpu.memory_space<vmem>>, vector<256x128xbf16>
    tpu.vector_store %arg9[%c0_27, %c640], %22 {strides = array<i32>} : memref<256x1152xbf16, #tpu.memory_space<vmem>>, vector<256x128xbf16>,
    %c0_28 = arith.constant 0 : index
    %c2_29 = arith.constant 2 : index
    %c0_30 = arith.constant 0 : index
    %c0_31 = arith.constant 0 : index
    %24 = vector.load %arg1[%c0_28, %c2_29, %c0_30, %c0_31] : memref<1x18x18x128xbf16, #tpu.memory_space<vmem>>, vector<1x16x16x128xbf16>
    %25 = vector.shape_cast %24 : vector<1x16x16x128xbf16> to vector<16x16x128xbf16>
    %26 = vector.shape_cast %25 : vector<16x16x128xbf16> to vector<256x128xbf16>
    %c0_32 = arith.constant 0 : index
    %c768 = arith.constant 768 : index
    %27 = vector.load %arg9[%c0_32, %c768] : memref<256x1152xbf16, #tpu.memory_space<vmem>>, vector<256x128xbf16>
    tpu.vector_store %arg9[%c0_32, %c768], %26 {strides = array<i32>} : memref<256x1152xbf16, #tpu.memory_space<vmem>>, vector<256x128xbf16>,
    %c0_33 = arith.constant 0 : index
    %c2_34 = arith.constant 2 : index
    %c1_35 = arith.constant 1 : index
    %c0_36 = arith.constant 0 : index
    %28 = vector.load %arg1[%c0_33, %c2_34, %c1_35, %c0_36] : memref<1x18x18x128xbf16, #tpu.memory_space<vmem>>, vector<1x16x16x128xbf16>
    %29 = vector.shape_cast %28 : vector<1x16x16x128xbf16> to vector<16x16x128xbf16>
    %30 = vector.shape_cast %29 : vector<16x16x128xbf16> to vector<256x128xbf16>
    %c0_37 = arith.constant 0 : index
    %c896 = arith.constant 896 : index
    %31 = vector.load %arg9[%c0_37, %c896] : memref<256x1152xbf16, #tpu.memory_space<vmem>>, vector<256x128xbf16>
    tpu.vector_store %arg9[%c0_37, %c896], %30 {strides = array<i32>} : memref<256x1152xbf16, #tpu.memory_space<vmem>>, vector<256x128xbf16>,
    %c0_38 = arith.constant 0 : index
    %c2_39 = arith.constant 2 : index
    %c2_40 = arith.constant 2 : index
    %c0_41 = arith.constant 0 : index
    %32 = vector.load %arg1[%c0_38, %c2_39, %c2_40, %c0_41] : memref<1x18x18x128xbf16, #tpu.memory_space<vmem>>, vector<1x16x16x128xbf16>
    %33 = vector.shape_cast %32 : vector<1x16x16x128xbf16> to vector<16x16x128xbf16>
    %34 = vector.shape_cast %33 : vector<16x16x128xbf16> to vector<256x128xbf16>
    %c0_42 = arith.constant 0 : index
    %c1024 = arith.constant 1024 : index
    %35 = vector.load %arg9[%c0_42, %c1024] : memref<256x1152xbf16, #tpu.memory_space<vmem>>, vector<256x128xbf16>
    tpu.vector_store %arg9[%c0_42, %c1024], %34 {strides = array<i32>} : memref<256x1152xbf16, #tpu.memory_space<vmem>>, vector<256x128xbf16>,
    %c0_43 = arith.constant 0 : index
    %c0_44 = arith.constant 0 : index
    %36 = vector.load %arg9[%c0_43, %c0_44] : memref<256x1152xbf16, #tpu.memory_space<vmem>>, vector<256x1152xbf16>
    %c0_45 = arith.constant 0 : index
    %c0_46 = arith.constant 0 : index
    %37 = vector.load %arg2[%c0_45, %c0_46] : memref<1152x128xbf16, #tpu.memory_space<vmem>>, vector<1152x128xbf16>
    %cst = arith.constant dense<0.000000e+00> : vector<256x128xf32>
    %38 = tpu.matmul %36, %37, %cst {dimension_numbers = #tpu.dot_dimension_numbers<[1], [0], [0], [1], [0, 0, 1, 1], [], []>} : vector<256x1152xbf16>, vector<1152x128xbf16>, vector<256x128xf32> -> vector<256x128xf32>
    %c0_47 = arith.constant 0 : index
    %c0_48 = arith.constant 0 : index
    %39 = vector.load %arg3[%c0_47, %c0_48] : memref<1x128xf32, #tpu.memory_space<vmem>>, vector<1x128xf32>
    %40 = vector.broadcast %39 : vector<1x128xf32> to vector<256x128xf32>
    %41 = arith.addf %38, %40 : vector<256x128xf32>
    %c0_49 = arith.constant 0 : index
    %42 = memref.load %arg6[%c0_49] : memref<1xf32, #tpu.memory_space<smem>>
    %cst_50 = arith.constant 0.000000e+00 : f32
    %43 = vector.broadcast %cst_50 : f32 to vector<256x128xf32>
    %44 = arith.cmpf ogt, %41, %43 : vector<256x128xf32>
    %45 = vector.broadcast %42 : f32 to vector<256x128xf32>
    %46 = arith.mulf %45, %41 : vector<256x128xf32>
    %47 = arith.select %44, %41, %46 : vector<256x128xi1>, vector<256x128xf32>
    %cst_51 = arith.constant 0.000000e+00 : bf16
    %48 = vector.broadcast %cst_51 : bf16 to vector<18x18x128xbf16>
    %c0_52 = arith.constant 0 : index
    %c0_53 = arith.constant 0 : index
    %c0_54 = arith.constant 0 : index
    %49 = vector.load %arg8[%c0_52, %c0_53, %c0_54] : memref<18x18x128xbf16, #tpu.memory_space<vmem>>, vector<18x18x128xbf16>
    tpu.vector_store %arg8[%c0_52, %c0_53, %c0_54], %48 {strides = array<i32>} : memref<18x18x128xbf16, #tpu.memory_space<vmem>>, vector<18x18x128xbf16>,
    %50 = vector.shape_cast %47 : vector<256x128xf32> to vector<16x16x128xf32>
    %51 = arith.truncf %50 : vector<16x16x128xf32> to vector<16x16x128xbf16>
    %c1_55 = arith.constant 1 : index
    %c1_56 = arith.constant 1 : index
    %c0_57 = arith.constant 0 : index
    %52 = vector.load %arg8[%c1_55, %c1_56, %c0_57] : memref<18x18x128xbf16, #tpu.memory_space<vmem>>, vector<16x16x128xbf16>
    tpu.vector_store %arg8[%c1_55, %c1_56, %c0_57], %51 {strides = array<i32>} : memref<18x18x128xbf16, #tpu.memory_space<vmem>>, vector<16x16x128xbf16>,
    %c0_58 = arith.constant 0 : index
    %c0_59 = arith.constant 0 : index
    %c0_60 = arith.constant 0 : index
    %53 = vector.load %arg8[%c0_58, %c0_59, %c0_60] : memref<18x18x128xbf16, #tpu.memory_space<vmem>>, vector<16x16x128xbf16>
    %54 = vector.shape_cast %53 : vector<16x16x128xbf16> to vector<256x128xbf16>
    %c0_61 = arith.constant 0 : index
    %c0_62 = arith.constant 0 : index
    %55 = vector.load %arg9[%c0_61, %c0_62] : memref<256x1152xbf16, #tpu.memory_space<vmem>>, vector<256x128xbf16>
    tpu.vector_store %arg9[%c0_61, %c0_62], %54 {strides = array<i32>} : memref<256x1152xbf16, #tpu.memory_space<vmem>>, vector<256x128xbf16>,
    %c0_63 = arith.constant 0 : index
    %c1_64 = arith.constant 1 : index
    %c0_65 = arith.constant 0 : index
    %56 = vector.load %arg8[%c0_63, %c1_64, %c0_65] : memref<18x18x128xbf16, #tpu.memory_space<vmem>>, vector<16x16x128xbf16>
    %57 = vector.shape_cast %56 : vector<16x16x128xbf16> to vector<256x128xbf16>
    %c0_66 = arith.constant 0 : index
    %c128_67 = arith.constant 128 : index
    %58 = vector.load %arg9[%c0_66, %c128_67] : memref<256x1152xbf16, #tpu.memory_space<vmem>>, vector<256x128xbf16>
    tpu.vector_store %arg9[%c0_66, %c128_67], %57 {strides = array<i32>} : memref<256x1152xbf16, #tpu.memory_space<vmem>>, vector<256x128xbf16>,
    %c0_68 = arith.constant 0 : index
    %c2_69 = arith.constant 2 : index
    %c0_70 = arith.constant 0 : index
    %59 = vector.load %arg8[%c0_68, %c2_69, %c0_70] : memref<18x18x128xbf16, #tpu.memory_space<vmem>>, vector<16x16x128xbf16>
    %60 = vector.shape_cast %59 : vector<16x16x128xbf16> to vector<256x128xbf16>
    %c0_71 = arith.constant 0 : index
    %c256_72 = arith.constant 256 : index
    %61 = vector.load %arg9[%c0_71, %c256_72] : memref<256x1152xbf16, #tpu.memory_space<vmem>>, vector<256x128xbf16>
    tpu.vector_store %arg9[%c0_71, %c256_72], %60 {strides = array<i32>} : memref<256x1152xbf16, #tpu.memory_space<vmem>>, vector<256x128xbf16>,
    %c1_73 = arith.constant 1 : index
    %c0_74 = arith.constant 0 : index
    %c0_75 = arith.constant 0 : index
    %62 = vector.load %arg8[%c1_73, %c0_74, %c0_75] : memref<18x18x128xbf16, #tpu.memory_space<vmem>>, vector<16x16x128xbf16>
    %63 = vector.shape_cast %62 : vector<16x16x128xbf16> to vector<256x128xbf16>
    %c0_76 = arith.constant 0 : index
    %c384_77 = arith.constant 384 : index
    %64 = vector.load %arg9[%c0_76, %c384_77] : memref<256x1152xbf16, #tpu.memory_space<vmem>>, vector<256x128xbf16>
    tpu.vector_store %arg9[%c0_76, %c384_77], %63 {strides = array<i32>} : memref<256x1152xbf16, #tpu.memory_space<vmem>>, vector<256x128xbf16>,
    %c1_78 = arith.constant 1 : index
    %c1_79 = arith.constant 1 : index
    %c0_80 = arith.constant 0 : index
    %65 = vector.load %arg8[%c1_78, %c1_79, %c0_80] : memref<18x18x128xbf16, #tpu.memory_space<vmem>>, vector<16x16x128xbf16>
    %66 = vector.shape_cast %65 : vector<16x16x128xbf16> to vector<256x128xbf16>
    %c0_81 = arith.constant 0 : index
    %c512_82 = arith.constant 512 : index
    %67 = vector.load %arg9[%c0_81, %c512_82] : memref<256x1152xbf16, #tpu.memory_space<vmem>>, vector<256x128xbf16>
    tpu.vector_store %arg9[%c0_81, %c512_82], %66 {strides = array<i32>} : memref<256x1152xbf16, #tpu.memory_space<vmem>>, vector<256x128xbf16>,
    %c1_83 = arith.constant 1 : index
    %c2_84 = arith.constant 2 : index
    %c0_85 = arith.constant 0 : index
    %68 = vector.load %arg8[%c1_83, %c2_84, %c0_85] : memref<18x18x128xbf16, #tpu.memory_space<vmem>>, vector<16x16x128xbf16>
    %69 = vector.shape_cast %68 : vector<16x16x128xbf16> to vector<256x128xbf16>
    %c0_86 = arith.constant 0 : index
    %c640_87 = arith.constant 640 : index
    %70 = vector.load %arg9[%c0_86, %c640_87] : memref<256x1152xbf16, #tpu.memory_space<vmem>>, vector<256x128xbf16>
    tpu.vector_store %arg9[%c0_86, %c640_87], %69 {strides = array<i32>} : memref<256x1152xbf16, #tpu.memory_space<vmem>>, vector<256x128xbf16>,
    %c2_88 = arith.constant 2 : index
    %c0_89 = arith.constant 0 : index
    %c0_90 = arith.constant 0 : index
    %71 = vector.load %arg8[%c2_88, %c0_89, %c0_90] : memref<18x18x128xbf16, #tpu.memory_space<vmem>>, vector<16x16x128xbf16>
    %72 = vector.shape_cast %71 : vector<16x16x128xbf16> to vector<256x128xbf16>
    %c0_91 = arith.constant 0 : index
    %c768_92 = arith.constant 768 : index
    %73 = vector.load %arg9[%c0_91, %c768_92] : memref<256x1152xbf16, #tpu.memory_space<vmem>>, vector<256x128xbf16>
    tpu.vector_store %arg9[%c0_91, %c768_92], %72 {strides = array<i32>} : memref<256x1152xbf16, #tpu.memory_space<vmem>>, vector<256x128xbf16>,
    %c2_93 = arith.constant 2 : index
    %c1_94 = arith.constant 1 : index
    %c0_95 = arith.constant 0 : index
    %74 = vector.load %arg8[%c2_93, %c1_94, %c0_95] : memref<18x18x128xbf16, #tpu.memory_space<vmem>>, vector<16x16x128xbf16>
    %75 = vector.shape_cast %74 : vector<16x16x128xbf16> to vector<256x128xbf16>
    %c0_96 = arith.constant 0 : index
    %c896_97 = arith.constant 896 : index
    %76 = vector.load %arg9[%c0_96, %c896_97] : memref<256x1152xbf16, #tpu.memory_space<vmem>>, vector<256x128xbf16>
    tpu.vector_store %arg9[%c0_96, %c896_97], %75 {strides = array<i32>} : memref<256x1152xbf16, #tpu.memory_space<vmem>>, vector<256x128xbf16>,
    %c2_98 = arith.constant 2 : index
    %c2_99 = arith.constant 2 : index
    %c0_100 = arith.constant 0 : index
    %77 = vector.load %arg8[%c2_98, %c2_99, %c0_100] : memref<18x18x128xbf16, #tpu.memory_space<vmem>>, vector<16x16x128xbf16>
    %78 = vector.shape_cast %77 : vector<16x16x128xbf16> to vector<256x128xbf16>
    %c0_101 = arith.constant 0 : index
    %c1024_102 = arith.constant 1024 : index
    %79 = vector.load %arg9[%c0_101, %c1024_102] : memref<256x1152xbf16, #tpu.memory_space<vmem>>, vector<256x128xbf16>
    tpu.vector_store %arg9[%c0_101, %c1024_102], %78 {strides = array<i32>} : memref<256x1152xbf16, #tpu.memory_space<vmem>>, vector<256x128xbf16>,
    %c0_103 = arith.constant 0 : index
    %c0_104 = arith.constant 0 : index
    %80 = vector.load %arg9[%c0_103, %c0_104] : memref<256x1152xbf16, #tpu.memory_space<vmem>>, vector<256x1152xbf16>
    %c0_105 = arith.constant 0 : index
    %c0_106 = arith.constant 0 : index
    %81 = vector.load %arg4[%c0_105, %c0_106] : memref<1152x128xbf16, #tpu.memory_space<vmem>>, vector<1152x128xbf16>
    %cst_107 = arith.constant dense<0.000000e+00> : vector<256x128xf32>
    %82 = tpu.matmul %80, %81, %cst_107 {dimension_numbers = #tpu.dot_dimension_numbers<[1], [0], [0], [1], [0, 0, 1, 1], [], []>} : vector<256x1152xbf16>, vector<1152x128xbf16>, vector<256x128xf32> -> vector<256x128xf32>
    %c0_108 = arith.constant 0 : index
    %c0_109 = arith.constant 0 : index
    %83 = vector.load %arg5[%c0_108, %c0_109] : memref<1x128xf32, #tpu.memory_space<vmem>>, vector<1x128xf32>
    %84 = vector.broadcast %83 : vector<1x128xf32> to vector<256x128xf32>
    %85 = arith.addf %82, %84 : vector<256x128xf32>
    %c0_110 = arith.constant 0 : index
    %c1_111 = arith.constant 1 : index
    %c1_112 = arith.constant 1 : index
    %c0_113 = arith.constant 0 : index
    %86 = vector.load %arg1[%c0_110, %c1_111, %c1_112, %c0_113] : memref<1x18x18x128xbf16, #tpu.memory_space<vmem>>, vector<1x16x16x128xbf16>
    %87 = vector.shape_cast %86 : vector<1x16x16x128xbf16> to vector<16x16x128xbf16>
    %88 = vector.shape_cast %87 : vector<16x16x128xbf16> to vector<256x128xbf16>
    %89 = arith.extf %88 : vector<256x128xbf16> to vector<256x128xf32>
    %90 = arith.addf %89, %85 : vector<256x128xf32>
    %c0_114 = arith.constant 0 : index
    %c0_115 = arith.constant 0 : index
    %c0_116 = arith.constant 0 : index
    %91 = vector.load %arg7[%c0_114, %c0_115, %c0_116] : memref<1x256x128xf32, #tpu.memory_space<vmem>>, vector<1x256x128xf32>
    %92 = vector.shape_cast %91 : vector<1x256x128xf32> to vector<256x128xf32>
    %93 = vector.shape_cast %90 : vector<256x128xf32> to vector<1x256x128xf32>
    tpu.vector_store %arg7[%c0_114, %c0_115, %c0_116], %93 {strides = array<i32>} : memref<1x256x128xf32, #tpu.memory_space<vmem>>, vector<1x256x128xf32>,
    return
  }
  func.func @transform_0(%arg0: i32) -> (i32, i32, i32, i32) {
    %c0_i32 = arith.constant 0 : i32
    %c0_i32_0 = arith.constant 0 : i32
    %c0_i32_1 = arith.constant 0 : i32
    %c0_i32_2 = arith.constant 0 : i32
    return %arg0, %c0_i32, %c0_i32_0, %c0_i32_1 : i32, i32, i32, i32
  }
  func.func @transform_1(%arg0: i32) -> (i32, i32) {
    %c0_i32 = arith.constant 0 : i32
    %c0_i32_0 = arith.constant 0 : i32
    %c0_i32_1 = arith.constant 0 : i32
    return %c0_i32, %c0_i32_0 : i32, i32
  }
  func.func @transform_2(%arg0: i32) -> (i32, i32) {
    %c0_i32 = arith.constant 0 : i32
    %c0_i32_0 = arith.constant 0 : i32
    %c0_i32_1 = arith.constant 0 : i32
    return %c0_i32, %c0_i32_0 : i32, i32
  }
  func.func @transform_3(%arg0: i32) -> (i32, i32) {
    %c0_i32 = arith.constant 0 : i32
    %c0_i32_0 = arith.constant 0 : i32
    %c0_i32_1 = arith.constant 0 : i32
    return %c0_i32, %c0_i32_0 : i32, i32
  }
  func.func @transform_4(%arg0: i32) -> (i32, i32) {
    %c0_i32 = arith.constant 0 : i32
    %c0_i32_0 = arith.constant 0 : i32
    %c0_i32_1 = arith.constant 0 : i32
    return %c0_i32, %c0_i32_0 : i32, i32
  }
  func.func @transform_5(%arg0: i32) -> i32 {
    %c0_i32 = arith.constant 0 : i32
    %c0_i32_0 = arith.constant 0 : i32
    return %c0_i32 : i32
  }
  func.func @transform_6(%arg0: i32) -> (i32, i32, i32) {
    %c0_i32 = arith.constant 0 : i32
    %c0_i32_0 = arith.constant 0 : i32
    %c0_i32_1 = arith.constant 0 : i32
    return %arg0, %c0_i32, %c0_i32_0 : i32, i32, i32
  }
}

</mosaic_0001>

<bundles_post_ra>
// kernel: residual_block_forward.1
= control target key start
LH: loop header
LB: loop body
LE: loop exit
PB: predicated region body
PF: predicated region fallthrough
CT: control target
= control target key end

     0   :  { %s13698_s23 = smov 0   ;;  %s17016_s0 = inlined_call_operand.vmem [shape: bf16[2,18,18,128], index: 0, kind: input, shape index: {}]   ;;  %s17017_s1 = inlined_call_operand.vmem [shape: bf16[1152,128], index: 1, kind: input, shape index: {}]   ;;  %s17018_s2 = inlined_call_operand.vmem [shape: f32[1,128], index: 2, kind: input, shape index: {}]   ;;  %s17019_s3 = inlined_call_operand.vmem [shape: bf16[1152,128], index: 3, kind: input, shape index: {}]   ;;  %s17020_s4 = inlined_call_operand.vmem [shape: f32[1,128], index: 4, kind: input, shape index: {}]   ;;  %s17021_s5 = inlined_call_operand.<no memory space> [shape: f32[1], index: 5, kind: input, shape index: {}]   ;;  %s17022_s6 = inlined_call_operand.vmem [shape: f32[2,256,128], index: 6, kind: output, shape index: {}]  }
   0x1   :  { %11 = sst [smem:[#allocation4]] %s17021_s5 }
   0x2 LB: > { %s11049_s24 = sadd.s32 4294967295, %s13657_s23   ;;  %p11053_p0 = scmp.ge.s32.totalorder %s13657_s23, 1  ;;  %s13657_s23 = sphi %s13698_s23, %s17_s23  }
   0x3   : > { %p213_p1 = scmp.lt.s32.totalorder %s13657_s23, 3 }
   0x5   : > { %p214_p2 = pnand %p11053_p0, %p213_p1 }
   0x7   : > { %217 = sbr.rel (%p214_p2) target bundleno = 1524 (0x5f4), region = 44 }
   0xc   : > { %v13339_v0 = vld [vmem:[%s17017_s1 + $0x38] sm:$0xff]  ;;  %p243_p3 = scmp.lt.s32.totalorder %s11049_s24, 1  ;;  %v13338_v2 = vld [vmem:[%s17017_s1 + $0x30] sm:$0xff]  ;;  %v13659_v3 = vmov 0   ;;  %v13337_v5 = vld [vmem:[%s17017_s1 + $0x28] sm:$0xff]  ;;  %vm913_vm3 = vcmask 1042432  }
   0xd   : > { %v13347_v1 = vld [vmem:[%s17017_s1 + $0x78] sm:$0xff]  ;;  %4234 = vmatpush.bf16.msra.mxu0 %v13339_v0  ;;  %13620 = vmatpush.bf16.msra.mxu2 %v13339_v0  ;;  %5133 = vst [vmem:[#allocation2] sm:$0xf] %v13659_v3  ;;  %v13346_v4 = vld [vmem:[%s17017_s1 + $0x70] sm:$0xff]  ;;  %v13345_v6 = vld [vmem:[%s17017_s1 + $0x68] sm:$0xff]  ;;  %vm914_vm4 = vcmask 1046532  }
   0xe   : > { %s17126_s24 = smov (!%p243_p3, %s11049_s24), 1  ;;  %13628 = vmatpush.bf16.msra.mxu3 %v13347_v1  ;;  %4323 = vmatpush.bf16.msra.mxu1 %v13347_v1  ;;  %5134 = vst [vmem:[#allocation2 + $0x4] sm:$0xf] %v13659_v3  ;;  %v13336_v9 = vld [vmem:[%s17017_s1 + $0x20] sm:$0xff]  ;;  %v13335_v12 = vld [vmem:[%s17017_s1 + $0x18] sm:$0xff]  ;;  %v13334_v17 = vld [vmem:[%s17017_s1 + $0x10] sm:$0xff] }
   0xf   : > { %s13636_s8 = smul.u32 216, %s17126_s24  ;;  %5135 = vst [vmem:[#allocation2 + $0x8] sm:$0x1] %v13659_v3  ;;  %v13344_v10 = vld [vmem:[%s17017_s1 + $0x60] sm:$0xff]  ;;  %v13343_v14 = vld [vmem:[%s17017_s1 + $0x58] sm:$0xff]  ;;  %v13342_v18 = vld [vmem:[%s17017_s1 + $0x50] sm:$0xff] }
  0x10   : > { %5136 = vst [vmem:[#allocation2 + $0xc] sm:$0xf] %v13659_v3  ;;  %v13333_v19 = vld [vmem:[%s17017_s1 + $0x8] sm:$0xff]  ;;  %v13332_v21 = vld [vmem:[%s17017_s1] sm:$0xff]  ;;  %v13355_v41 = vld [vmem:[%s17017_s1 + $0xb8] sm:$0xff]  ;;  %s15103_s13 = sld [smem:[#allocation4]] }
  0x11   : > { %4235 = vmatpush.bf16.msra.mxu0 %v13338_v2  ;;  %13621 = vmatpush.bf16.msra.mxu2 %v13338_v2  ;;  %s13734_s15 = scalar_lea.vmem %s17016_s0, %s13636_s8  ;;  %5137 = vst [vmem:[#allocation2 + $0x10] sm:$0xf] %v13659_v3  ;;  %v13341_v20 = vld [vmem:[%s17017_s1 + $0x48] sm:$0xff]  ;;  %v13340_v22 = vld [vmem:[%s17017_s1 + $0x40] sm:$0xff]  ;;  %v13363_v42 = vld [vmem:[%s17017_s1 + $0xf8] sm:$0xff]  ;;  %vm5543_vm7 = vcmask 1043456  }
  0x12   : > { %13629 = vmatpush.bf16.msra.mxu3 %v13346_v4  ;;  %4324 = vmatpush.bf16.msra.mxu1 %v13346_v4  ;;  %v254_v7 = vld [vmem:[%s13734_s15] sm:$0xf]  ;;  %v255_v8 = vld [vmem:[%s13734_s15 + $0x4] sm:$0xf]  ;;  %5138 = vst [vmem:[#allocation2 + $0x14] sm:$0x1] %v13659_v3  ;;  %vm14112_vm5 = vmor %vm913_vm3, %vm914_vm4 }
  0x13   : > { %286 = vst [vmem:[#allocation3] sm:$0xf] %v254_v7  ;;  %v342_v23 = vld [vmem:[%s13734_s15 + $0x60] sm:$0xf]  ;;  %v343_v25 = vld [vmem:[%s13734_s15 + $0x64] sm:$0xf] }
  0x14   : > { %287 = vst [vmem:[#allocation3 + $0x24] sm:$0xf] %v255_v8  ;;  %v5660_v11 = vld [vmem:[#allocation2] sm:$0xf]  ;;  %v562_v26 = vshrl.u32 %v342_v23, 16  ;;  %v565_v27 = vshll.u32 %v342_v23, 16 }
  0x15   : > { %4236 = vmatpush.bf16.msra.mxu0 %v13337_v5  ;;  %13622 = vmatpush.bf16.msra.mxu2 %v13337_v5  ;;  %5139 = vst [vmem:[#allocation2 + $0x18] sm:$0xf] %v13659_v3  ;;  %v5661_v13 = vld [vmem:[#allocation2 + $0x4] sm:$0xf]  ;;  %v571_v28 = vshll.u32 %v343_v25, 16  ;;  %v575_v29 = vshrl.u32 %v343_v25, 16 }
  0x16   : > { %13630 = vmatpush.bf16.msra.mxu3 %v13345_v6  ;;  %4325 = vmatpush.bf16.msra.mxu1 %v13345_v6  ;;  %5140 = vst [vmem:[#allocation2 + $0x1c] sm:$0xf] %v13659_v3  ;;  %v564_v30 = vrot.slane %v562_v26, 4  ;;  %v567_v31 = vrot.slane %v565_v27, 5  ;;  %v344_v34 = vld [vmem:[%s13734_s15 + $0x68] sm:$0x1] }
  0x17   : > { %5141 = vst [vmem:[#allocation2 + $0x20] sm:$0x1] %v13659_v3  ;;  %v13797_v32 = vrot.slane %v571_v28, 5  ;;  %v577_v33 = vrot.slane %v575_v29, 4  ;;  %v318_v35 = vld [vmem:[%s13734_s15] sm:$0xf] }
  0x18   : > { %5142 = vst [vmem:[#allocation2 + $0x24] sm:$0xf] %v13659_v3  ;;  %v568_v36 = vor.u32 %v567_v31, %v564_v30  ;;  %v319_v37 = vld [vmem:[%s13734_s15 + $0x4] sm:$0xf]  ;;  %v581_v38 = vshll.u32 %v344_v34, 16  ;;  %v370_v39 = vshrl.u32 %v318_v35, 16 }
  0x19   : > { %4237 = vmatpush.bf16.msra.mxu0 %v13336_v9  ;;  %13623 = vmatpush.bf16.msra.mxu2 %v13336_v9  ;;  %5143 = vst [vmem:[#allocation2 + $0x28] sm:$0xf] %v13659_v3  ;;  %v578_v40 = vor.u32 %v577_v33, %v13797_v32  ;;  %v345_v43 = vld [vmem:[%s13734_s15 + $0x6c] sm:$0xf]  ;;  %v373_v44 = vshll.u32 %v318_v35, 16  ;;  %v379_v45 = vshll.u32 %v319_v37, 16 }
  0x1a   : > { %13631 = vmatpush.bf16.msra.mxu3 %v13344_v10  ;;  %4326 = vmatpush.bf16.msra.mxu1 %v13344_v10  ;;  %v11363_v15 = vld [vmem:[#allocation3] sm:$0xf]  ;;  %5144 = vst [vmem:[#allocation2 + $0x2c] sm:$0x1] %v13659_v3  ;;  %v13817_v46 = vrot.slane %v568_v36, 4  ;;  %v383_v48 = vshrl.u32 %v319_v37, 16 }
  0x1b   : > { %v13192_v16 = vld [vmem:[#allocation3 + $0x20] sm:$0xf0]  ;;  %5692 = vst [vmem:[#allocation3] sm:$0xf] %v5660_v11  ;;  %v13820_v47 = vld [vmem:[%s13734_s15 + $0x8] sm:$0x1] }
  0x1c   : > { %5693 = vst [vmem:[#allocation3 + $0x24] sm:$0xf] %v5661_v13  ;;  %v11364_v24 = vor.u32 %v13192_v16, %v11363_v15  ;;  %vm366_vm0 = vsmask.f32 3328  ;;  %vm367_vm1 = vsmask.f32 7440 }
  0x1d   : > { %4238 = vmatpush.bf16.msra.mxu0 %v13335_v12  ;;  %13624 = vmatpush.bf16.msra.mxu2 %v13335_v12  ;;  %5145 = vst [vmem:[#allocation2 + $0x30] sm:$0xf] %v13659_v3  ;;  %v346_v49 = vld [vmem:[%s13734_s15 + $0x70] sm:$0xf]  ;;  %v586_v50 = vshrl.u32 %v345_v43, 16  ;;  %v589_v51 = vshll.u32 %v345_v43, 16  ;;  %vm13858_vm2 = vmor %vm366_vm0, %vm367_vm1 }
  0x1e   : > { %13632 = vmatpush.bf16.msra.mxu3 %v13343_v14  ;;  %4327 = vmatpush.bf16.msra.mxu1 %v13343_v14  ;;  %5146 = vst [vmem:[#allocation2 + $0x34] sm:$0xf] %v13659_v3  ;;  %v13825_v52 = vrot.slane %v578_v40, 4  ;;  %v13827_v53 = vrot.slane %v581_v38, 5  ;;  %v372_v54 = vrot.slane %v370_v39, 4  ;;  %v13371_v55 = vld [vmem:[%s17017_s1 + $0x138] sm:$0xff] }
  0x1f   : > { %5147 = vst [vmem:[#allocation2 + $0x38] sm:$0x1] %v13659_v3  ;;  %v375_v56 = vrot.slane %v373_v44, 5  ;;  %v13833_v57 = vrot.slane %v379_v45, 5  ;;  %v5724_v58 = vld [vmem:[#allocation2] sm:$0xf] }
  0x20   : > { %5148 = vst [vmem:[#allocation2 + $0x3c] sm:$0xf] %v13659_v3  ;;  %v385_v59 = vrot.slane %v383_v48, 4  ;;  %v389_v60 = vshll.u32 %v13820_v47, 16  ;;  %v595_v61 = vshll.u32 %v346_v49, 16  ;;  %v599_v62 = vshrl.u32 %v346_v49, 16 }
  0x21   : > { %4239 = vmatpush.bf16.msra.mxu0 %v13334_v17  ;;  %13625 = vmatpush.bf16.msra.mxu2 %v13334_v17  ;;  %5149 = vst [vmem:[#allocation2 + $0x40] sm:$0xf] %v13659_v3  ;;  %v5725_v63 = vld [vmem:[#allocation2 + $0x4] sm:$0xf]  ;;  %v13838_v0 = vrot.slane %v586_v50, 4  ;;  %v13840_v1 = vrot.slane %v589_v51, 5  ;;  %v376_v6 = vor.u32 %v375_v56, %v372_v54 }
  0x22   : > { %13633 = vmatpush.bf16.msra.mxu3 %v13342_v18  ;;  %4328 = vmatpush.bf16.msra.mxu1 %v13342_v18  ;;  %5150 = vst [vmem:[#allocation2 + $0x44] sm:$0x1] %v13659_v3  ;;  %v5773_v2 = vshrl.u32 %v5724_v58, 16  ;;  %v5776_v4 = vshll.u32 %v5724_v58, 16  ;;  %v321_v5 = vld [vmem:[%s13734_s15 + $0xc] sm:$0xf] }
  0x23   : > { %5151 = vst [vmem:[#allocation2 + $0x48] sm:$0xf] %v13659_v3  ;;  %v347_v7 = vld [vmem:[%s13734_s15 + $0x74] sm:$0x1]  ;;  %v322_v8 = vld [vmem:[%s13734_s15 + $0x10] sm:$0xf]  ;;  %v592_v30 = vor.u32 %v13840_v1, %v13838_v0 }
  0x24   : > { %5152 = vst [vmem:[#allocation2 + $0x4c] sm:$0xf] %v13659_v3  ;;  %v5726_v9 = vld [vmem:[#allocation2 + $0x8] sm:$0x1]  ;;  %v5782_v10 = vshll.u32 %v5725_v63, 16  ;;  %v5786_v11 = vshrl.u32 %v5725_v63, 16 }
  0x25   : > { %4240 = vmatpush.bf16.msra.mxu0 %v13333_v19  ;;  %13626 = vmatpush.bf16.msra.mxu2 %v13333_v19  ;;  %5153 = vst [vmem:[#allocation2 + $0x50] sm:$0x1] %v13659_v3  ;;  %v13849_v12 = vrot.slane %v595_v61, 5  ;;  %v601_v13 = vrot.slane %v599_v62, 4  ;;  %v394_v14 = vshrl.u32 %v321_v5, 16  ;;  %v397_v15 = vshll.u32 %v321_v5, 16 }
  0x26   : > { %13634 = vmatpush.bf16.msra.mxu3 %v13341_v20  ;;  %4329 = vmatpush.bf16.msra.mxu1 %v13341_v20  ;;  %5154 = vst [vmem:[#allocation2 + $0x54] sm:$0xf] %v13659_v3  ;;  %v5775_v16 = vrot.slane %v5773_v2, 4  ;;  %v5778_v17 = vrot.slane %v5776_v4, 5  ;;  %v403_v18 = vshll.u32 %v322_v8, 16  ;;  %v407_v19 = vshrl.u32 %v322_v8, 16 }
  0x27   : > { %5155 = vst [vmem:[#allocation2 + $0x58] sm:$0xf] %v13659_v3  ;;  %v377_v20 = vrot.slane %v376_v6, 4  ;;  %v605_v23 = vshll.u32 %v347_v7, 16  ;;  %v13862_v26 = vrot.slane %v5782_v10, 5  ;;  %v5788_v27 = vrot.slane %v5786_v11, 4 }
  0x28   : > { %5156 = vst [vmem:[#allocation2 + $0x5c] sm:$0x1] %v13659_v3  ;;  %v323_v28 = vld [vmem:[%s13734_s15 + $0x14] sm:$0x1]  ;;  %v271_v29 = vld [vmem:[%s13734_s15 + $0x64] sm:$0xf]  ;;  %v602_v31 = vor.u32 %v601_v13, %v13849_v12  ;;  %v5779_v36 = vor.u32 %v5778_v17, %v5775_v16 }
  0x29   : > { %4241 = vmatpush.bf16.msra.mxu0 %v13332_v21  ;;  %13627 = vmatpush.bf16.msra.mxu2 %v13332_v21  ;;  %5157 = vst [vmem:[#allocation2 + $0x60] sm:$0xf] %v13659_v3  ;;  %v386_v21 = vor.u32 %v385_v59, %v13833_v57  ;;  %v396_v33 = vrot.slane %v394_v14, 4  ;;  %v399_v34 = vrot.slane %v397_v15, 5  ;;  %v348_v35 = vld [vmem:[%s13734_s15 + $0x78] sm:$0xf]  ;;  %v382_v47 = vsel %vm13858_vm2, %v377_v20, %v13833_v57 }
  0x2a   : > { %13635 = vmatpush.bf16.msra.mxu3 %v13340_v22  ;;  %5158 = vst [vmem:[#allocation2 + $0x64] sm:$0xf] %v13659_v3  ;;  %4330 = vmatpush.bf16.msra.mxu1 %v13340_v22  ;;  %v5792_v22 = vshll.u32 %v5726_v9, 16  ;;  %v13354_v37 = vld [vmem:[%s17017_s1 + $0xb0] sm:$0xff]  ;;  %v13878_v39 = vrot.slane %v403_v18, 5  ;;  %v409_v40 = vrot.slane %v407_v19, 4  ;;  %v5789_v50 = vor.u32 %v5788_v27, %v13862_v26 }
  0x2b   : > { %5159 = vst [vmem:[#allocation2 + $0x68] sm:$0x1] %v13659_v3  ;;  %v13362_v38 = vld [vmem:[%s17017_s1 + $0xf0] sm:$0xff]  ;;  %v387_v43 = vrot.slane %v386_v21, 4  ;;  %v391_v44 = vrot.slane %v389_v60, 5  ;;  %v613_v49 = vshll.u32 %v348_v35, 16  ;;  %v400_v56 = vor.u32 %v399_v34, %v396_v33 }
  0x2c   : > { %4242 = vmatmul.bf16.vlgmr.msra.gmra.mxu0 %v11364_v24  ;;  %5160 = vst [vmem:[#allocation2 + $0x6c] sm:$0xf] %v13659_v3  ;;  %v270_v24 = vld [vmem:[%s13734_s15 + $0x60] sm:$0xf]  ;;  %v349_v45 = vld [vmem:[%s13734_s15 + $0x7c] sm:$0xf]  ;;  %v410_v57 = vor.u32 %v409_v40, %v13878_v39 }
  0x2d   : > { %5161 = vst [vmem:[#allocation2 + $0x70] sm:$0xf] %v13659_v3  ;;  %4412 = vmatpush.bf16.msrb.mxu2 %v13355_v41  ;;  %4590 = vmatpush.bf16.msrb.mxu0 %v13371_v55  ;;  %v574_v41 = vsel %vm13858_vm2, %v13817_v46, %v13797_v32  ;;  %v13894_v48 = vrot.slane %v5792_v22, 5  ;;  %v13370_v32 = vld [vmem:[%s17017_s1 + $0x130] sm:$0xff]  ;;  %v610_v46 = vshrl.u32 %v348_v35, 16  ;;  %v603_v51 = vrot.slane %v602_v31, 4 }
  0x2e   : > { %5162 = vst [vmem:[#allocation2 + $0x74] sm:$0x1] %v13659_v3  ;;  %4501 = vmatpush.bf16.msrb.mxu3 %v13363_v42  ;;  %v584_v42 = vsel %vm13858_vm2, %v13825_v52, %v13827_v53  ;;  %v413_v52 = vshll.u32 %v323_v28, 16  ;;  %v13900_v53 = vrot.slane %v5779_v36, 4  ;;  %v256_v54 = vld [vmem:[%s13734_s15 + $0xc] sm:$0xf]  ;;  %v392_v58 = vsel %vm13858_vm2, %v387_v43, %v391_v44 }
  0x2f   : > { %5163 = vst [vmem:[#allocation2 + $0x78] sm:$0xf] %v13659_v3  ;;  %v607_v55 = vrot.slane %v605_v23, 5  ;;  %v257_v59 = vld [vmem:[%s13734_s15 + $0x10] sm:$0xf]  ;;  %v619_v60 = vshll.u32 %v349_v45, 16 }
  0x30   : > { %5164 = vst [vmem:[#allocation2 + $0x7c] sm:$0xf] %v13659_v3  ;;  %v623_v61 = vshrl.u32 %v349_v45, 16  ;;  %v324_v62 = vld [vmem:[%s13734_s15 + $0x18] sm:$0xf]  ;;  %v612_v0 = vrot.slane %v610_v46, 4 }
  0x31   : > { %5165 = vst [vmem:[#allocation2 + $0x80] sm:$0x1] %v13659_v3  ;;  %4413 = vmatpush.bf16.msrb.mxu2 %v13354_v37  ;;  %4591 = vmatpush.bf16.msrb.mxu0 %v13370_v32  ;;  %v272_v63 = vld [vmem:[%s13734_s15 + $0x6c] sm:$0xf]  ;;  %v615_v1 = vrot.slane %v613_v49, 5  ;;  %v5790_v4 = vrot.slane %v5789_v50, 4 }
  0x32   : > { %5166 = vst [vmem:[#allocation2 + $0x84] sm:$0xf] %v13659_v3  ;;  %4502 = vmatpush.bf16.msrb.mxu3 %v13362_v38  ;;  %v325_v2 = vld [vmem:[%s13734_s15 + $0x1c] sm:$0xf]  ;;  %v273_v5 = vld [vmem:[%s13734_s15 + $0x70] sm:$0xf] }
  0x33   : > { %5167 = vst [vmem:[#allocation2 + $0x88] sm:$0xf] %v13659_v3  ;;  %v13911_v6 = vrot.slane %v413_v52, 5  ;;  %v418_v7 = vshrl.u32 %v324_v62, 16  ;;  %v421_v8 = vshll.u32 %v324_v62, 16  ;;  %v401_v9 = vrot.slane %v400_v56, 4 }
  0x34   : > { %5168 = vst [vmem:[#allocation2 + $0x8c] sm:$0x1] %v13659_v3  ;;  %v411_v10 = vrot.slane %v410_v57, 4  ;;  %v427_v11 = vshll.u32 %v325_v2, 16  ;;  %v431_v13 = vshrl.u32 %v325_v2, 16  ;;  %v13914_v15 = vrot.slane %v619_v60, 5 }
  0x35   : > { %5169 = vst [vmem:[#allocation2 + $0x90] sm:$0xf] %v13659_v3  ;;  %v350_v14 = vld [vmem:[%s13734_s15 + $0x80] sm:$0x1]  ;;  %v625_v16 = vrot.slane %v623_v61, 4  ;;  %v616_v19 = vor.u32 %v615_v1, %v612_v0  ;;  %v420_v21 = vrot.slane %v418_v7, 4  ;;  %v5795_v34 = vsel %vm13858_vm2, %v5790_v4, %v13894_v48 }
  0x36   : > { %5170 = vst [vmem:[#allocation2 + $0x94] sm:$0xf] %v13659_v3  ;;  %v326_v20 = vld [vmem:[%s13734_s15 + $0x20] sm:$0x1]  ;;  %v423_v22 = vrot.slane %v421_v8, 5  ;;  %v13922_v27 = vrot.slane %v427_v11, 5  ;;  %v416_v44 = vsel %vm13858_vm2, %v411_v10, %v13911_v6 }
  0x37   : > { %5171 = vst [vmem:[#allocation2 + $0x98] sm:$0x1] %v13659_v3  ;;  %v433_v28 = vrot.slane %v431_v13, 4  ;;  %v351_v31 = vld [vmem:[%s13734_s15 + $0x84] sm:$0xf]  ;;  %v626_v35 = vor.u32 %v625_v16, %v13914_v15  ;;  %v629_v36 = vshll.u32 %v350_v14, 16 }
  0x38   : > { %5172 = vst [vmem:[#allocation2 + $0x9c] sm:$0xf] %v13659_v3  ;;  %v258_v40 = vld [vmem:[%s13734_s15 + $0x18] sm:$0xf]  ;;  %v259_v45 = vld [vmem:[%s13734_s15 + $0x1c] sm:$0xf] }
  0x39   : > { %5173 = vst [vmem:[#allocation2 + $0xa0] sm:$0xf] %v13659_v3  ;;  %v437_v48 = vshll.u32 %v326_v20, 16  ;;  %v634_v32 = vshrl.u32 %v351_v31, 16  ;;  %v13353_v50 = vld [vmem:[%s17017_s1 + $0xa8] sm:$0xff]  ;;  %vm5550_vm13 = vcmask 1040384  }
  0x3a   : > { %5174 = vst [vmem:[#allocation2 + $0xa4] sm:$0x1] %v13659_v3  ;;  %v275_v52 = vld [vmem:[%s13734_s15 + $0x7c] sm:$0xf]  ;;  %4414 = vmatpush.bf16.msrb.mxu2 %v13353_v50  ;;  %v13369_v57 = vld [vmem:[%s17017_s1 + $0x128] sm:$0xff]  ;;  %v13368_v50 = vld [vmem:[%s17017_s1 + $0x120] sm:$0xff] }
  0x3b   : > { %5175 = vst [vmem:[#allocation2 + $0xa8] sm:$0xf] %v13659_v3  ;;  %v439_v60 = vrot.slane %v437_v48, 5  ;;  %v352_v61 = vld [vmem:[%s13734_s15 + $0x88] sm:$0xf]  ;;  %v636_v0 = vrot.slane %v634_v32, 4  ;;  %4592 = vmatpush.bf16.msrb.mxu0 %v13369_v57 }
  0x3c   : > { %5176 = vst [vmem:[#allocation2 + $0xac] sm:$0xf] %v13659_v3  ;;  %v260_v6 = vld [vmem:[%s13734_s15 + $0x24] sm:$0xf]  ;;  %v643_v8 = vshll.u32 %v352_v61, 16  ;;  %v647_v14 = vshrl.u32 %v352_v61, 16 }
  0x3d   : > { %5177 = vst [vmem:[#allocation2 + $0xb0] sm:$0x1] %v13659_v3  ;;  %v261_v13 = vld [vmem:[%s13734_s15 + $0x28] sm:$0xf]  ;;  %v327_v16 = vld [vmem:[%s13734_s15 + $0x24] sm:$0xf] }
  0x3e   : > { %5178 = vst [vmem:[#allocation2 + $0xb4] sm:$0xf] %v13659_v3  ;;  %v442_v20 = vshrl.u32 %v327_v16, 16  ;;  %v13352_v48 = vld [vmem:[%s17017_s1 + $0xa0] sm:$0xff]  ;;  %vm5544_vm8 = vsmask.f32 7938 }
  0x3f   : > { %5179 = vst [vmem:[#allocation2 + $0xb8] sm:$0xf] %v13659_v3  ;;  %v13360_v32 = vld [vmem:[%s17017_s1 + $0xe0] sm:$0xff]  ;;  %4415 = vmatpush.bf16.msrb.mxu2 %v13352_v48  ;;  %4593 = vmatpush.bf16.msrb.mxu0 %v13368_v50  ;;  %v13367_v50 = vld [vmem:[%s17017_s1 + $0x118] sm:$0xff]  ;;  %vm5219_vm9 = vsmask.f32 256  ;;  %vm15147_vm10 = vmand %vm5543_vm7, %vm5544_vm8 }
  0x40   : > { %5180 = vst [vmem:[#allocation2 + $0xbc] sm:$0x1] %v13659_v3  ;;  %vm5220_vm12 = vsmask.f32 4368  ;;  %vm15182_vm15 = vmand %vm5550_vm13, %vm5219_vm9  ;;  %s13187_s17 = sshll.u32 %s17126_s24, 8 }
  0x41   : > { %5181 = vst [vmem:[#allocation2 + $0xc0] sm:$0xf] %v13659_v3  ;;  %vm15175_vm14 = vmor %vm5219_vm9, %vm5220_vm12  ;;  %s16730_s20 = scalar_lea.vmem %s17022_s6, %s13187_s17 }
  0x42   : > { %5182 = vst [vmem:[#allocation2 + $0xc4] sm:$0xf] %v13659_v3 }
  0x43   : > { %5183 = vst [vmem:[#allocation2 + $0xc8] sm:$0x1] %v13659_v3  ;;  %4594 = vmatpush.bf16.msrb.mxu0 %v13367_v50 }
  0x44   : > { %5184 = vst [vmem:[#allocation2 + $0xcc] sm:$0xf] %v13659_v3 }
  0x45   : > { %5185 = vst [vmem:[#allocation2 + $0xd0] sm:$0xf] %v13659_v3 }
  0x46   : > { %5186 = vst [vmem:[#allocation2 + $0xd4] sm:$0x1] %v13659_v3  ;;  %v593_v3 = vrot.slane %v592_v30, 4 }
  0x47   : > { %302 = vst [vmem:[#allocation3 + $0x240] sm:$0xf] %v270_v24  ;;  %v608_v24 = vsel %vm13858_vm2, %v603_v51, %v607_v55 }
  0x48   : > { %303 = vst [vmem:[#allocation3 + $0x264] sm:$0xf] %v271_v29  ;;  %v598_v18 = vsel %vm13858_vm2, %v593_v3, %v13849_v12  ;;  %v5785_v12 = vsel %vm13858_vm2, %v13900_v53, %v13862_v26  ;;  %v406_v26 = vsel %vm13858_vm2, %v401_v9, %v13878_v39  ;;  %v274_v39 = vld [vmem:[%s13734_s15 + $0x78] sm:$0xf]  ;;  %v13361_v3 = vld [vmem:[%s17017_s1 + $0xe8] sm:$0xff]  ;;  %v627_v53 = vrot.slane %v626_v35, 4 }
  0x49   : > { %801 = vst [vmem:[#allocation3 + $0x244] sm:$0xf] %v574_v41  ;;  %v617_v41 = vrot.slane %v616_v19, 4  ;;  %4503 = vmatpush.bf16.msrb.mxu3 %v13361_v3  ;;  %v645_v19 = vrot.slane %v643_v8, 5  ;;  %v329_v35 = vld [vmem:[%s13734_s15 + $0x2c] sm:$0x1] }
  0x4a   : > { %802 = vst [vmem:[#allocation3 + $0x268] sm:$0xf] %v584_v42  ;;  %v424_v42 = vor.u32 %v423_v22, %v420_v21  ;;  %v277_v22 = vld [vmem:[%s13734_s15 + $0x88] sm:$0xf]  ;;  %v262_v3 = vld [vmem:[%s13734_s15 + $0x30] sm:$0xf] }
  0x4b   : > { %785 = vst [vmem:[#allocation3 + $0x4] sm:$0xf] %v382_v47  ;;  %v434_v47 = vor.u32 %v433_v28, %v13922_v27  ;;  %v622_v62 = vsel %vm13858_vm2, %v617_v41, %v13914_v15 }
  0x4c   : > { %786 = vst [vmem:[#allocation3 + $0x28] sm:$0xf] %v392_v58  ;;  %v425_v56 = vrot.slane %v424_v42, 4  ;;  %v637_v58 = vshll.u32 %v351_v31, 16  ;;  %v328_v31 = vld [vmem:[%s13734_s15 + $0x28] sm:$0xf] }
  0x4d   : > { %288 = vst [vmem:[#allocation3 + $0x48] sm:$0xf] %v256_v54  ;;  %v631_v54 = vrot.slane %v629_v36, 5  ;;  %v444_v36 = vrot.slane %v442_v20, 4  ;;  %v451_v41 = vshll.u32 %v328_v31, 16  ;;  %v455_v42 = vshrl.u32 %v328_v31, 16  ;;  %4504 = vmatpush.bf16.msrb.mxu3 %v13360_v32 }
  0x4e   : > { %v11651_v17 = vld [vmem:[#allocation3 + $0x240] sm:$0xf]  ;;  %289 = vst [vmem:[#allocation3 + $0x6c] sm:$0xf] %v257_v59  ;;  %v435_v59 = vrot.slane %v434_v47, 4  ;;  %v639_v7 = vrot.slane %v637_v58, 5 }
  0x4f   : > { %v13264_v23 = vld [vmem:[#allocation3 + $0x260] sm:$0xf0]  ;;  %304 = vst [vmem:[#allocation3 + $0x288] sm:$0xf] %v272_v63  ;;  %v353_v63 = vld [vmem:[%s13734_s15 + $0x8c] sm:$0x1]  ;;  %v632_v4 = vsel %vm13858_vm2, %v627_v53, %v631_v54 }
  0x50   : > { %v11652_v29 = vor.u32 %v13264_v23, %v11651_v17  ;;  %v13260_v30 = vld [vmem:[#allocation3 + $0x244] sm:$0xf]  ;;  %305 = vst [vmem:[#allocation3 + $0x2ac] sm:$0xf] %v273_v5  ;;  %v430_v5 = vsel %vm13858_vm2, %v425_v56, %v13922_v27  ;;  %v440_v11 = vsel %vm13858_vm2, %v435_v59, %v439_v60  ;;  %v653_v15 = vshll.u32 %v353_v63, 16 }
  0x51   : > { %v11653_v33 = vld [vmem:[#allocation3 + $0x264] sm:$0xf0]  ;;  %803 = vst [vmem:[#allocation3 + $0x28c] sm:$0xf] %v598_v18  ;;  %v276_v17 = vld [vmem:[%s13734_s15 + $0x84] sm:$0xf]  ;;  %v640_v18 = vor.u32 %v639_v7, %v636_v0 }
  0x52   : > { %4282 = vmatmul.bf16.vlgmr.msra.gmra.mxu2 %v11652_v29  ;;  %v11656_v37 = vor.u32 %v13260_v30, %v11653_v33  ;;  %v13188_v38 = vld [vmem:[#allocation3 + $0x4] sm:$0xf]  ;;  %804 = vst [vmem:[#allocation3 + $0x2b0] sm:$0xf] %v608_v24  ;;  %v649_v23 = vrot.slane %v647_v14, 4  ;;  %v655_v29 = vrot.slane %v653_v15, 5 }
  0x53   : > { %v11365_v43 = vld [vmem:[#allocation3 + $0x24] sm:$0xf0]  ;;  %6188 = vst [vmem:[#allocation3 + $0x4] sm:$0xf] %v5785_v12  ;;  %v641_v28 = vrot.slane %v640_v18, 4 }
  0x54   : > { %4371 = vmatmul.bf16.vlgmr.msra.gmra.mxu3 %v11656_v37  ;;  %v11368_v46 = vor.u32 %v13188_v38, %v11365_v43  ;;  %6189 = vst [vmem:[#allocation3 + $0x28] sm:$0xf] %v5795_v34  ;;  %v11399_v49 = vld [vmem:[#allocation3 + $0x48] sm:$0xf]  ;;  %v650_v12 = vor.u32 %v649_v23, %v645_v19  ;;  %v263_v54 = vld [vmem:[%s13734_s15 + $0x34] sm:$0xf] }
  0x55   : > { %v13201_v51 = vld [vmem:[#allocation3 + $0x68] sm:$0xf0]  ;;  %787 = vst [vmem:[#allocation3 + $0x4c] sm:$0xf] %v406_v26  ;;  %v646_v34 = vsel %vm13858_vm2, %v641_v28, %v645_v19  ;;  %v445_v26 = vshll.u32 %v327_v16, 16 }
  0x56   : > { %4331 = vmatmul.bf16.vlgmr.msra.gmra.mxu1 %v11368_v46  ;;  %v11400_v55 = vor.u32 %v13201_v51, %v11399_v49  ;;  %788 = vst [vmem:[#allocation3 + $0x70] sm:$0xf] %v416_v44  ;;  %v11687_v1 = vld [vmem:[#allocation3 + $0x288] sm:$0xf]  ;;  %v651_v38 = vrot.slane %v650_v12, 4  ;;  %v453_v49 = vrot.slane %v451_v41, 5 }
  0x57   : > { %290 = vst [vmem:[#allocation3 + $0x90] sm:$0xf] %v258_v40  ;;  %v13273_v2 = vld [vmem:[#allocation3 + $0x2a8] sm:$0xf0]  ;;  %v447_v44 = vrot.slane %v445_v26, 5  ;;  %v13351_v41 = vld [vmem:[%s17017_s1 + $0x98] sm:$0xff] }
  0x58   : > { %4247 = vmatmul.bf16.gmra.mxu0 %v11400_v55  ;;  %291 = vst [vmem:[#allocation3 + $0xb4] sm:$0xf] %v259_v45  ;;  %v13269_v9 = vld [vmem:[#allocation3 + $0x28c] sm:$0xf]  ;;  %v11688_v24 = vor.u32 %v13273_v2, %v11687_v1  ;;  %v656_v43 = vsel %vm13858_vm2, %v651_v38, %v655_v29  ;;  %v461_v45 = vshll.u32 %v329_v35, 16  ;;  %4416 = vmatpush.bf16.msrb.mxu2 %v13351_v41 }
  0x59   : > { %306 = vst [vmem:[#allocation3 + $0x2d0] sm:$0xf] %v274_v39  ;;  %v11689_v10 = vld [vmem:[#allocation3 + $0x2ac] sm:$0xf0]  ;;  %v448_v46 = vor.u32 %v447_v44, %v444_v36  ;;  %v457_v39 = vrot.slane %v455_v42, 4  ;;  %v13359_v42 = vld [vmem:[%s17017_s1 + $0xd8] sm:$0xff] }
  0x5a   : > { %307 = vst [vmem:[#allocation3 + $0x2f4] sm:$0xf] %v275_v52  ;;  %v11692_v33 = vor.u32 %v13269_v9, %v11689_v10  ;;  %v463_v53 = vrot.slane %v461_v45, 5  ;;  %v278_v55 = vld [vmem:[%s13734_s15 + $0x90] sm:$0xf]  ;;  %4505 = vmatpush.bf16.msrb.mxu3 %v13359_v42 }
  0x5b   : > { %805 = vst [vmem:[#allocation3 + $0x2d4] sm:$0xf] %v622_v62  ;;  %v449_v51 = vrot.slane %v448_v46, 4  ;;  %v458_v52 = vor.u32 %v457_v39, %v453_v49  ;;  %v279_v60 = vld [vmem:[%s13734_s15 + $0x94] sm:$0xf] }
  0x5c   : > { %806 = vst [vmem:[#allocation3 + $0x2f8] sm:$0xf] %v632_v4  ;;  %v13197_v21 = vld [vmem:[#allocation3 + $0x4c] sm:$0xf]  ;;  %v354_v2 = vld [vmem:[%s13734_s15 + $0x90] sm:$0xf] }
  0x5d   : > { %789 = vst [vmem:[#allocation3 + $0x94] sm:$0xf] %v430_v5  ;;  %v11401_v27 = vld [vmem:[#allocation3 + $0x6c] sm:$0xf0]  ;;  %v454_v57 = vsel %vm13858_vm2, %v449_v51, %v453_v49  ;;  %v459_v58 = vrot.slane %v458_v52, 4  ;;  %v661_v7 = vshll.u32 %v354_v2, 16 }
  0x5e   : > { %790 = vst [vmem:[#allocation3 + $0xb8] sm:$0xf] %v440_v11  ;;  %v11435_v30 = vld [vmem:[#allocation3 + $0x90] sm:$0xf]  ;;  %v11404_v40 = vor.u32 %v13197_v21, %v11401_v27  ;;  %v355_v4 = vld [vmem:[%s13734_s15 + $0x94] sm:$0xf] }
  0x5f   : > { %292 = vst [vmem:[#allocation3 + $0xd8] sm:$0xf] %v260_v6  ;;  %v13210_v37 = vld [vmem:[#allocation3 + $0xb0] sm:$0xf0]  ;;  %v464_v1 = vsel %vm13858_vm2, %v459_v58, %v463_v53  ;;  %v356_v5 = vld [vmem:[%s13734_s15 + $0x98] sm:$0x1] }
  0x60   : > { %293 = vst [vmem:[#allocation3 + $0xfc] sm:$0xf] %v261_v13  ;;  %v11436_v47 = vor.u32 %v13210_v37, %v11435_v30  ;;  %v11723_v56 = vld [vmem:[#allocation3 + $0x2d0] sm:$0xf]  ;;  %v658_v6 = vshrl.u32 %v354_v2, 16  ;;  %v667_v8 = vshll.u32 %v355_v4, 16 }
  0x61   : > { %308 = vst [vmem:[#allocation3 + $0x318] sm:$0xf] %v276_v17  ;;  %v13282_v59 = vld [vmem:[#allocation3 + $0x2f0] sm:$0xf0]  ;;  %v671_v9 = vshrl.u32 %v355_v4, 16  ;;  %v677_v11 = vshll.u32 %v356_v5, 16 }
  0x62   : > { %4287 = vmatmul.bf16.gmra.mxu2 %v11688_v24  ;;  %309 = vst [vmem:[#allocation3 + $0x33c] sm:$0xf] %v277_v22  ;;  %v13278_v61 = vld [vmem:[#allocation3 + $0x2d4] sm:$0xf]  ;;  %v11724_v10 = vor.u32 %v13282_v59, %v11723_v56  ;;  %v330_v13 = vld [vmem:[%s13734_s15 + $0x30] sm:$0xf] }
  0x63   : > { %807 = vst [vmem:[#allocation3 + $0x31c] sm:$0xf] %v646_v34  ;;  %v11725_v62 = vld [vmem:[#allocation3 + $0x2f4] sm:$0xf0]  ;;  %v660_v14 = vrot.slane %v658_v6, 4  ;;  %v663_v15 = vrot.slane %v661_v7, 5 }
  0x64   : > { %4376 = vmatmul.bf16.gmra.mxu3 %v11692_v33  ;;  %808 = vst [vmem:[#allocation3 + $0x340] sm:$0xf] %v656_v43  ;;  %v13206_v63 = vld [vmem:[#allocation3 + $0x94] sm:$0xf]  ;;  %v669_v16 = vrot.slane %v667_v8, 5  ;;  %v673_v17 = vrot.slane %v671_v9, 4  ;;  %v11728_v19 = vor.u32 %v13278_v61, %v11725_v62 }
  0x65   : > { %294 = vst [vmem:[#allocation3 + $0x120] sm:$0xf] %v262_v3  ;;  %v11437_v0 = vld [vmem:[#allocation3 + $0xb4] sm:$0xf0]  ;;  %v331_v18 = vld [vmem:[%s13734_s15 + $0x34] sm:$0xf]  ;;  %v664_v27 = vor.u32 %v663_v15, %v660_v14 }
  0x66   : > { %4336 = vmatmul.bf16.gmra.mxu1 %v11404_v40  ;;  %295 = vst [vmem:[#allocation3 + $0x144] sm:$0xf] %v263_v54  ;;  %v11440_v20 = vor.u32 %v13206_v63, %v11437_v0  ;;  %v11471_v21 = vld [vmem:[#allocation3 + $0xd8] sm:$0xf]  ;;  %v332_v22 = vld [vmem:[%s13734_s15 + $0x38] sm:$0x1]  ;;  %v674_v28 = vor.u32 %v673_v17, %v669_v16 }
  0x67   : > { %791 = vst [vmem:[#allocation3 + $0xdc] sm:$0xf] %v454_v57  ;;  %v466_v23 = vshrl.u32 %v330_v13, 16  ;;  %v13219_v24 = vld [vmem:[#allocation3 + $0xf8] sm:$0xf0]  ;;  %v679_v29 = vrot.slane %v677_v11, 5 }
  0x68   : > { %4252 = vmatmul.bf16.gmra.mxu0 %v11436_v47  ;;  %310 = vst [vmem:[#allocation3 + $0x360] sm:$0xf] %v278_v55  ;;  %v469_v30 = vshll.u32 %v330_v13, 16  ;;  %v357_v12 = vld [vmem:[%s13734_s15 + $0x9c] sm:$0xf]  ;;  %v475_v33 = vshll.u32 %v331_v18, 16  ;;  %v11472_v40 = vor.u32 %v13219_v24, %v11471_v21 }
  0x69   : > { %792 = vst [vmem:[#allocation3 + $0x100] sm:$0xf] %v464_v1  ;;  %v468_v31 = vrot.slane %v466_v23, 4  ;;  %v479_v34 = vshrl.u32 %v331_v18, 16  ;;  %v485_v35 = vshll.u32 %v332_v22, 16  ;;  %v665_v36 = vrot.slane %v664_v27, 4 }
  0x6a   : > { %311 = vst [vmem:[#allocation3 + $0x384] sm:$0xf] %v279_v60  ;;  %v675_v37 = vrot.slane %v674_v28, 4  ;;  %v471_v38 = vrot.slane %v469_v30, 5  ;;  %v682_v26 = vshrl.u32 %v357_v12, 16  ;;  %v477_v43 = vrot.slane %v475_v33, 5 }
  0x6b   : > { %v481_v44 = vrot.slane %v479_v34, 4  ;;  %v670_v45 = vsel %vm13858_vm2, %v665_v36, %v669_v16  ;;  %v358_v32 = vld [vmem:[%s13734_s15 + $0xa0] sm:$0xf]  ;;  %v359_v46 = vld [vmem:[%s13734_s15 + $0xa4] sm:$0x1]  ;;  %v487_v39 = vrot.slane %v485_v35, 5 }
  0x6c   : > { %v680_v47 = vsel %vm13858_vm2, %v675_v37, %v679_v29  ;;  %v472_v48 = vor.u32 %v471_v38, %v468_v31  ;;  %809 = vst [vmem:[#allocation3 + $0x364] sm:$0xf] %v670_v45  ;;  %v264_v3 = vld [vmem:[%s13734_s15 + $0x3c] sm:$0xf]  ;;  %v11759_v51 = vld [vmem:[#allocation3 + $0x318] sm:$0xf] }
  0x6d   : > { %v482_v49 = vor.u32 %v481_v44, %v477_v43  ;;  %v13291_v52 = vld [vmem:[#allocation3 + $0x338] sm:$0xf0]  ;;  %810 = vst [vmem:[#allocation3 + $0x388] sm:$0xf] %v680_v47  ;;  %v265_v54 = vld [vmem:[%s13734_s15 + $0x40] sm:$0xf] }
  0x6e   : > { %v473_v53 = vrot.slane %v472_v48, 4  ;;  %v684_v55 = vrot.slane %v682_v26, 4  ;;  %v333_v56 = vld [vmem:[%s13734_s15 + $0x3c] sm:$0xf]  ;;  %296 = vst [vmem:[#allocation3 + $0x168] sm:$0xf] %v264_v3  ;;  %v11760_v9 = vor.u32 %v13291_v52, %v11759_v51 }
  0x6f   : > { %v483_v57 = vrot.slane %v482_v49, 4  ;;  %v280_v58 = vld [vmem:[%s13734_s15 + $0x9c] sm:$0xf]  ;;  %v685_v59 = vshll.u32 %v357_v12, 16  ;;  %297 = vst [vmem:[#allocation3 + $0x18c] sm:$0xf] %v265_v54 }
  0x70   : > { %v478_v60 = vsel %vm13858_vm2, %v473_v53, %v477_v43  ;;  %v281_v61 = vld [vmem:[%s13734_s15 + $0xa0] sm:$0xf]  ;;  %v691_v62 = vshll.u32 %v358_v32, 16  ;;  %v695_v63 = vshrl.u32 %v358_v32, 16  ;;  %v701_v2 = vshll.u32 %v359_v46, 16  ;;  %v13350_v48 = vld [vmem:[%s17017_s1 + $0x90] sm:$0xff] }
  0x71   : > { %v488_v0 = vsel %vm13858_vm2, %v483_v57, %v487_v39  ;;  %793 = vst [vmem:[#allocation3 + $0x124] sm:$0xf] %v478_v60  ;;  %v687_v1 = vrot.slane %v685_v59, 5  ;;  %v334_v4 = vld [vmem:[%s13734_s15 + $0x40] sm:$0xf]  ;;  %v490_v13 = vshrl.u32 %v333_v56, 16  ;;  %4417 = vmatpush.bf16.msrb.mxu2 %v13350_v48 }
  0x72   : > { %4292 = vmatmul.bf16.gmra.mxu2 %v11724_v10  ;;  %v13287_v5 = vld [vmem:[#allocation3 + $0x31c] sm:$0xf]  ;;  %794 = vst [vmem:[#allocation3 + $0x148] sm:$0xf] %v488_v0  ;;  %v693_v6 = vrot.slane %v691_v62, 5  ;;  %v697_v7 = vrot.slane %v695_v63, 4 }
  0x73   : > { %v335_v8 = vld [vmem:[%s13734_s15 + $0x44] sm:$0x1]  ;;  %v11761_v10 = vld [vmem:[#allocation3 + $0x33c] sm:$0xf0]  ;;  %312 = vst [vmem:[#allocation3 + $0x3a8] sm:$0xf] %v280_v58  ;;  %v688_v11 = vor.u32 %v687_v1, %v684_v55 }
  0x74   : > { %4381 = vmatmul.bf16.gmra.mxu3 %v11728_v19  ;;  %v493_v14 = vshll.u32 %v333_v56, 16  ;;  %313 = vst [vmem:[#allocation3 + $0x3cc] sm:$0xf] %v281_v61  ;;  %v698_v15 = vor.u32 %v697_v7, %v693_v6  ;;  %v703_v16 = vrot.slane %v701_v2, 5  ;;  %v499_v17 = vshll.u32 %v334_v4, 16  ;;  %v13358_v32 = vld [vmem:[%s17017_s1 + $0xd0] sm:$0xff] }
  0x75   : > { %v503_v18 = vshrl.u32 %v334_v4, 16  ;;  %v13215_v19 = vld [vmem:[#allocation3 + $0xdc] sm:$0xf]  ;;  %v492_v21 = vrot.slane %v490_v13, 4  ;;  %v509_v23 = vshll.u32 %v335_v8, 16  ;;  %v11764_v30 = vor.u32 %v13287_v5, %v11761_v10  ;;  %4506 = vmatpush.bf16.msrb.mxu3 %v13358_v32 }
  0x76   : > { %4341 = vmatmul.bf16.gmra.mxu1 %v11440_v20  ;;  %v689_v20 = vrot.slane %v688_v11, 4  ;;  %v495_v22 = vrot.slane %v493_v14, 5  ;;  %v11473_v24 = vld [vmem:[#allocation3 + $0xfc] sm:$0xf0]  ;;  %v699_v27 = vrot.slane %v698_v15, 4  ;;  %v501_v28 = vrot.slane %v499_v17, 5 }
  0x77   : > { %v505_v29 = vrot.slane %v503_v18, 4  ;;  %v11507_v12 = vld [vmem:[#allocation3 + $0x120] sm:$0xf]  ;;  %v13228_v31 = vld [vmem:[#allocation3 + $0x140] sm:$0xf0]  ;;  %v511_v38 = vrot.slane %v509_v23, 5 }
  0x78   : > { %4257 = vmatmul.bf16.gmra.mxu0 %v11472_v40  ;;  %v694_v33 = vsel %vm13858_vm2, %v689_v20, %v693_v6  ;;  %v496_v34 = vor.u32 %v495_v22, %v492_v21  ;;  %v360_v35 = vld [vmem:[%s13734_s15 + $0xa8] sm:$0xf]  ;;  %v704_v36 = vsel %vm13858_vm2, %v699_v27, %v703_v16  ;;  %v361_v26 = vld [vmem:[%s13734_s15 + $0xac] sm:$0xf]  ;;  %v11476_v40 = vor.u32 %v13215_v19, %v11473_v24  ;;  %v362_v3 = vld [vmem:[%s13734_s15 + $0xb0] sm:$0x1] }
  0x79   : > { %811 = vst [vmem:[#allocation3 + $0x3ac] sm:$0xf] %v694_v33  ;;  %v506_v37 = vor.u32 %v505_v29, %v501_v28  ;;  %v706_v42 = vshrl.u32 %v360_v35, 16  ;;  %v709_v44 = vshll.u32 %v360_v35, 16  ;;  %v715_v45 = vshll.u32 %v361_v26, 16  ;;  %v13366_v53 = vld [vmem:[%s17017_s1 + $0x110] sm:$0xff] }
  0x7a   : > { %812 = vst [vmem:[#allocation3 + $0x3d0] sm:$0xf] %v704_v36  ;;  %v497_v41 = vrot.slane %v496_v34, 4  ;;  %v11508_v47 = vor.u32 %v13228_v31, %v11507_v12  ;;  %v719_v39 = vshrl.u32 %v361_v26, 16  ;;  %v266_v54 = vld [vmem:[%s13734_s15 + $0x48] sm:$0xf]  ;;  %4595 = vmatpush.bf16.msrb.mxu0 %v13366_v53 }
  0x7b   : > { %v507_v43 = vrot.slane %v506_v37, 4  ;;  %v708_v49 = vrot.slane %v706_v42, 4  ;;  %v711_v51 = vrot.slane %v709_v44, 5  ;;  %v717_v52 = vrot.slane %v715_v45, 5  ;;  %v267_v56 = vld [vmem:[%s13734_s15 + $0x4c] sm:$0xf] }
  0x7c   : > { %v502_v46 = vsel %vm13858_vm2, %v497_v41, %v501_v28  ;;  %v721_v55 = vrot.slane %v719_v39, 4  ;;  %298 = vst [vmem:[#allocation3 + $0x1b0] sm:$0xf] %v266_v54  ;;  %v725_v58 = vshll.u32 %v362_v3, 16  ;;  %v282_v59 = vld [vmem:[%s13734_s15 + $0xa8] sm:$0xf] }
  0x7d   : > { %v512_v50 = vsel %vm13858_vm2, %v507_v43, %v511_v38  ;;  %795 = vst [vmem:[#allocation3 + $0x16c] sm:$0xf] %v502_v46  ;;  %v712_v57 = vor.u32 %v711_v51, %v708_v49  ;;  %v11795_v61 = vld [vmem:[#allocation3 + $0x360] sm:$0xf]  ;;  %v283_v62 = vld [vmem:[%s13734_s15 + $0xac] sm:$0xf] }
  0x7e   : > { %796 = vst [vmem:[#allocation3 + $0x190] sm:$0xf] %v512_v50  ;;  %v722_v60 = vor.u32 %v721_v55, %v717_v52  ;;  %v727_v1 = vrot.slane %v725_v58, 5  ;;  %v13300_v2 = vld [vmem:[#allocation3 + $0x380] sm:$0xf0]  ;;  %v13349_v44 = vld [vmem:[%s17017_s1 + $0x88] sm:$0xff] }
  0x7f   : > { %299 = vst [vmem:[#allocation3 + $0x1d4] sm:$0xf] %v267_v56  ;;  %v713_v63 = vrot.slane %v712_v57, 4  ;;  %v336_v4 = vld [vmem:[%s13734_s15 + $0x48] sm:$0xf]  ;;  %v11796_v16 = vor.u32 %v13300_v2, %v11795_v61  ;;  %4418 = vmatpush.bf16.msrb.mxu2 %v13349_v44  ;;  %v13379_v3 = vld [vmem:[%s17017_s1 + $0x178] sm:$0xff] }
  0x80   : > { %314 = vst [vmem:[#allocation3 + $0x3f0] sm:$0xf] %v282_v59  ;;  %v723_v0 = vrot.slane %v722_v60, 4  ;;  %v337_v5 = vld [vmem:[%s13734_s15 + $0x4c] sm:$0xf]  ;;  %v514_v10 = vshrl.u32 %v336_v4, 16  ;;  %4679 = vmatpush.bf16.msrb.mxu1 %v13379_v3 }
  0x81   : > { %315 = vst [vmem:[#allocation3 + $0x414] sm:$0xf] %v283_v62  ;;  %v13296_v6 = vld [vmem:[#allocation3 + $0x364] sm:$0xf]  ;;  %v718_v7 = vsel %vm13858_vm2, %v713_v63, %v717_v52  ;;  %v517_v11 = vshll.u32 %v336_v4, 16  ;;  %v523_v14 = vshll.u32 %v337_v5, 16 }
  0x82   : > { %4297 = vmatmul.bf16.gmra.mxu2 %v11760_v9  ;;  %v728_v8 = vsel %vm13858_vm2, %v723_v0, %v727_v1  ;;  %v338_v9 = vld [vmem:[%s13734_s15 + $0x50] sm:$0x1]  ;;  %v11797_v13 = vld [vmem:[#allocation3 + $0x384] sm:$0xf0]  ;;  %813 = vst [vmem:[#allocation3 + $0x3f4] sm:$0xf] %v718_v7 }
  0x83   : > { %v527_v15 = vshrl.u32 %v337_v5, 16  ;;  %v13224_v17 = vld [vmem:[#allocation3 + $0x124] sm:$0xf]  ;;  %814 = vst [vmem:[#allocation3 + $0x418] sm:$0xf] %v728_v8  ;;  %v516_v18 = vrot.slane %v514_v10, 4  ;;  %v11800_v24 = vor.u32 %v13296_v6, %v11797_v13 }
  0x84   : > { %4386 = vmatmul.bf16.gmra.mxu3 %v11764_v30  ;;  %v519_v19 = vrot.slane %v517_v11, 5  ;;  %v11509_v20 = vld [vmem:[#allocation3 + $0x144] sm:$0xf0]  ;;  %v525_v21 = vrot.slane %v523_v14, 5  ;;  %v533_v23 = vshll.u32 %v338_v9, 16  ;;  %v13357_v45 = vld [vmem:[%s17017_s1 + $0xc8] sm:$0xff] }
  0x85   : > { %v529_v22 = vrot.slane %v527_v15, 4  ;;  %v11543_v27 = vld [vmem:[#allocation3 + $0x168] sm:$0xf]  ;;  %v363_v29 = vld [vmem:[%s13734_s15 + $0xb4] sm:$0xf]  ;;  %v11512_v36 = vor.u32 %v13224_v17, %v11509_v20  ;;  %v13365_v50 = vld [vmem:[%s17017_s1 + $0x108] sm:$0xff]  ;;  %4507 = vmatpush.bf16.msrb.mxu3 %v13357_v45 }
  0x86   : > { %4346 = vmatmul.bf16.gmra.mxu1 %v11476_v40  ;;  %v520_v28 = vor.u32 %v519_v19, %v516_v18  ;;  %v364_v30 = vld [vmem:[%s13734_s15 + $0xb8] sm:$0xf]  ;;  %v13237_v12 = vld [vmem:[#allocation3 + $0x188] sm:$0xf0]  ;;  %v535_v33 = vrot.slane %v533_v23, 5  ;;  %v730_v34 = vshrl.u32 %v363_v29, 16  ;;  %4596 = vmatpush.bf16.msrb.mxu0 %v13365_v50 }
  0x87   : > { %v530_v31 = vor.u32 %v529_v22, %v525_v21  ;;  %v733_v35 = vshll.u32 %v363_v29, 16  ;;  %v739_v38 = vshll.u32 %v364_v30, 16  ;;  %v743_v26 = vshrl.u32 %v364_v30, 16  ;;  %v365_v49 = vld [vmem:[%s13734_s15 + $0xbc] sm:$0x1] }
  0x88   : > { %4262 = vmatmul.bf16.gmra.mxu0 %v11508_v47  ;;  %v521_v37 = vrot.slane %v520_v28, 4  ;;  %v732_v41 = vrot.slane %v730_v34, 4  ;;  %v11544_v43 = vor.u32 %v13237_v12, %v11543_v27  ;;  %v268_v51 = vld [vmem:[%s13734_s15 + $0x54] sm:$0xf]  ;;  %v269_v53 = vld [vmem:[%s13734_s15 + $0x58] sm:$0xf] }
  0x89   : > { %v531_v40 = vrot.slane %v530_v31, 4  ;;  %v735_v42 = vrot.slane %v733_v35, 5  ;;  %v741_v48 = vrot.slane %v739_v38, 5  ;;  %v745_v32 = vrot.slane %v743_v26, 4  ;;  %300 = vst [vmem:[#allocation3 + $0x1f8] sm:$0xf] %v268_v51 }
  0x8a   : > { %v526_v47 = vsel %vm13858_vm2, %v521_v37, %v525_v21  ;;  %v749_v55 = vshll.u32 %v365_v49, 16  ;;  %301 = vst [vmem:[#allocation3 + $0x21c] sm:$0xf] %v269_v53  ;;  %v284_v56 = vld [vmem:[%s13734_s15 + $0xb4] sm:$0xf]  ;;  %v13377_v49 = vld [vmem:[%s17017_s1 + $0x168] sm:$0xff] }
  0x8b   : > { %v536_v46 = vsel %vm13858_vm2, %v531_v40, %v535_v33  ;;  %797 = vst [vmem:[#allocation3 + $0x1b4] sm:$0xf] %v526_v47  ;;  %v736_v39 = vor.u32 %v735_v42, %v732_v41  ;;  %v746_v52 = vor.u32 %v745_v32, %v741_v48  ;;  %v285_v57 = vld [vmem:[%s13734_s15 + $0xb8] sm:$0xf]  ;;  %v11831_v58 = vld [vmem:[#allocation3 + $0x3a8] sm:$0xf] }
  0x8c   : > { %798 = vst [vmem:[#allocation3 + $0x1d8] sm:$0xf] %v536_v46  ;;  %v13309_v59 = vld [vmem:[#allocation3 + $0x3c8] sm:$0xf0]  ;;  %v751_v62 = vrot.slane %v749_v55, 5 }
  0x8d   : > { %v737_v54 = vrot.slane %v736_v39, 4  ;;  %316 = vst [vmem:[#allocation3 + $0x438] sm:$0xf] %v284_v56  ;;  %v747_v61 = vrot.slane %v746_v52, 4  ;;  %v339_v63 = vld [vmem:[%s13734_s15 + $0x54] sm:$0xf]  ;;  %v11832_v15 = vor.u32 %v13309_v59, %v11831_v58 }
  0x8e   : > { %317 = vst [vmem:[#allocation3 + $0x45c] sm:$0xf] %v285_v57  ;;  %v340_v0 = vld [vmem:[%s13734_s15 + $0x58] sm:$0xf]  ;;  %v341_v1 = vld [vmem:[%s13734_s15 + $0x5c] sm:$0x1] }
  0x8f   : > { %v742_v60 = vsel %vm13858_vm2, %v737_v54, %v741_v48  ;;  %v752_v2 = vsel %vm13858_vm2, %v747_v61, %v751_v62  ;;  %v538_v4 = vshrl.u32 %v339_v63, 16  ;;  %v541_v5 = vshll.u32 %v339_v63, 16  ;;  %v13305_v7 = vld [vmem:[#allocation3 + $0x3ac] sm:$0xf]  ;;  %v11833_v10 = vld [vmem:[#allocation3 + $0x3cc] sm:$0xf0] }
  0x90   : > { %815 = vst [vmem:[#allocation3 + $0x43c] sm:$0xf] %v742_v60  ;;  %v547_v6 = vshll.u32 %v340_v0, 16  ;;  %v551_v8 = vshrl.u32 %v340_v0, 16  ;;  %v557_v9 = vshll.u32 %v341_v1, 16  ;;  %v11836_v21 = vor.u32 %v13305_v7, %v11833_v10  ;;  %v13348_v42 = vld [vmem:[%s17017_s1 + $0x80] sm:$0xff] }
  0x91   : > { %816 = vst [vmem:[#allocation3 + $0x460] sm:$0xf] %v752_v2  ;;  %v540_v11 = vrot.slane %v538_v4, 4  ;;  %v543_v13 = vrot.slane %v541_v5, 5  ;;  %v13233_v17 = vld [vmem:[#allocation3 + $0x16c] sm:$0xf]  ;;  %4419 = vmatpush.bf16.msrb.mxu2 %v13348_v42 }
  0x92   : > { %4302 = vmatmul.bf16.gmra.mxu2 %v11796_v16  ;;  %v549_v14 = vrot.slane %v547_v6, 5  ;;  %v553_v16 = vrot.slane %v551_v8, 4  ;;  %v11545_v18 = vld [vmem:[#allocation3 + $0x18c] sm:$0xf0]  ;;  %v559_v23 = vrot.slane %v557_v9, 5  ;;  %v13364_v39 = vld [vmem:[%s17017_s1 + $0x100] sm:$0xff] }
  0x93   : > { %v11579_v19 = vld [vmem:[#allocation3 + $0x1b0] sm:$0xf]  ;;  %v544_v20 = vor.u32 %v543_v13, %v540_v11  ;;  %v11106_v27 = vld [vmem:[%s13734_s15 + $0x10] sm:$0xf]  ;;  %v13246_v28 = vld [vmem:[#allocation3 + $0x1d0] sm:$0xf0]  ;;  %v11548_v33 = vor.u32 %v13233_v17, %v11545_v18  ;;  %4597 = vmatpush.bf16.msrb.mxu0 %v13364_v39 }
  0x94   : > { %4391 = vmatmul.bf16.gmra.mxu3 %v11800_v24  ;;  %v554_v22 = vor.u32 %v553_v16, %v549_v14  ;;  %v11105_v24 = vld [vmem:[%s13734_s15 + $0xc] sm:$0xf]  ;;  %v1215_v31 = vshll.u32 %v11106_v27, 16  ;;  %v1219_v35 = vshrl.u32 %v11106_v27, 16  ;;  %v11580_v41 = vor.u32 %v13246_v28, %v11579_v19  ;;  %v818_v45 = vld [vmem:[%s13734_s15 + $0x4] sm:$0xf] }
  0x95   : > { %v545_v29 = vrot.slane %v544_v20, 4  ;;  %v1206_v30 = vshrl.u32 %v11105_v24, 16  ;;  %v1209_v12 = vshll.u32 %v11105_v24, 16  ;;  %v918_v47 = vrot.slane %v818_v45, 5  ;;  %v11107_v48 = vld [vmem:[%s13734_s15 + $0x14] sm:$0x1] }
  0x96   : > { %4351 = vmatmul.bf16.gmra.mxu1 %v11512_v36  ;;  %v555_v34 = vrot.slane %v554_v22, 4  ;;  %v13378_v36 = vld [vmem:[%s17017_s1 + $0x170] sm:$0xff]  ;;  %v1217_v40 = vrot.slane %v1215_v31, 5  ;;  %v1221_v46 = vrot.slane %v1219_v35, 4  ;;  %v1225_v50 = vshll.u32 %v11107_v48, 16  ;;  %v13376_v58 = vld [vmem:[%s17017_s1 + $0x160] sm:$0xff] }
  0x97   : > { %v550_v37 = vsel %vm13858_vm2, %v545_v29, %v549_v14  ;;  %v1208_v38 = vrot.slane %v1206_v30, 4  ;;  %v1211_v26 = vrot.slane %v1209_v12, 5  ;;  %4680 = vmatpush.bf16.msrb.mxu1 %v13378_v36  ;;  %v817_v3 = vld [vmem:[%s13734_s15] sm:$0xe]  ;;  %v920_v51 = vrot.slane %v918_v47, 4  ;;  %v13375_v8 = vld [vmem:[%s17017_s1 + $0x158] sm:$0xff] }
  0x98   : > { %4267 = vmatmul.bf16.gmra.mxu0 %v11544_v43  ;;  %v13356_v43 = vld [vmem:[%s17017_s1 + $0xc0] sm:$0xff]  ;;  %v560_v44 = vsel %vm13858_vm2, %v555_v34, %v559_v23  ;;  %799 = vst [vmem:[#allocation3 + $0x1fc] sm:$0xf] %v550_v37  ;;  %v1222_v52 = vor.u32 %v1221_v46, %v1217_v40  ;;  %v819_v53 = vld [vmem:[%s13734_s15 + $0x8] sm:$0x1]  ;;  %v11057_v55 = vrot.slane %v817_v3, 9 }
  0x99   : > { %800 = vst [vmem:[#allocation3 + $0x220] sm:$0xf] %v560_v44  ;;  %v1212_v32 = vor.u32 %v1211_v26, %v1208_v38  ;;  %4508 = vmatpush.bf16.msrb.mxu3 %v13356_v43  ;;  %v1227_v57 = vrot.slane %v1225_v50, 5  ;;  %v921_v59 = vrot.slane %v819_v53, 5  ;;  %v11073_v60 = vld [vmem:[%s13734_s15 + $0xc] sm:$0xf] }
  0x9a   : > { %v1223_v61 = vrot.slane %v1222_v52, 4  ;;  %v919_v62 = vsel %vm14112_vm5, %v11057_v55, %v918_v47  ;;  %v11074_v63 = vld [vmem:[%s13734_s15 + $0x10] sm:$0xf]  ;;  %1125 = vst [vmem:[#allocation3 + $0xc] sm:$0xf] %v11073_v60  ;;  %v13387_v12 = vld [vmem:[%s17017_s1 + $0x1b8] sm:$0xff] }
  0x9b   : > { %v1213_v56 = vrot.slane %v1212_v32, 4  ;;  %4681 = vmatpush.bf16.msrb.mxu1 %v13377_v49  ;;  %v11867_v0 = vld [vmem:[#allocation3 + $0x3f0] sm:$0xf]  ;;  %v13318_v1 = vld [vmem:[#allocation3 + $0x410] sm:$0xf0]  ;;  %v922_v2 = vsel %vm14112_vm5, %v920_v51, %v921_v59  ;;  %v13374_v31 = vld [vmem:[%s17017_s1 + $0x150] sm:$0xff]  ;;  %4768 = vmatpush.bf16.msra.mxu2 %v13387_v12 }
  0x9c   : > { %1060 = vst [vmem:[#allocation3 + $0x8] sm:$0xf] %v919_v62  ;;  %v13314_v5 = vld [vmem:[#allocation3 + $0x3f4] sm:$0xf]  ;;  %v1228_v6 = vsel %vm13858_vm2, %v1223_v61, %v1227_v57  ;;  %v11869_v7 = vld [vmem:[#allocation3 + $0x414] sm:$0xf0]  ;;  %v11868_v9 = vor.u32 %v13318_v1, %v11867_v0 }
  0x9d   : > { %v1218_v4 = vsel %vm13858_vm2, %v1213_v56, %v1217_v40  ;;  %1061 = vst [vmem:[#allocation3 + $0x2c] sm:$0xf] %v922_v2  ;;  %v13242_v10 = vld [vmem:[#allocation3 + $0x1b4] sm:$0xf]  ;;  %v11581_v11 = vld [vmem:[#allocation3 + $0x1d4] sm:$0xf0]  ;;  %v11872_v13 = vor.u32 %v13314_v5, %v11869_v7 }
  0x9e   : > { %1126 = vst [vmem:[#allocation3 + $0x30] sm:$0xf] %v11074_v63  ;;  %v11615_v14 = vld [vmem:[#allocation3 + $0x1f8] sm:$0xf]  ;;  %v13255_v16 = vld [vmem:[#allocation3 + $0x218] sm:$0xf0]  ;;  %v11584_v19 = vor.u32 %v13242_v10, %v11581_v11 }
  0x9f   : > { %4682 = vmatpush.bf16.msrb.mxu1 %v13376_v58  ;;  %1621 = vst [vmem:[#allocation3 + $0x10] sm:$0xf] %v1218_v4  ;;  %v11108_v18 = vld [vmem:[%s13734_s15 + $0x18] sm:$0xf]  ;;  %v6220_v20 = vld [vmem:[#allocation2] sm:$0xe]  ;;  %v11616_v28 = vor.u32 %v13255_v16, %v11615_v14 }
  0xa0   : > { %1622 = vst [vmem:[#allocation3 + $0x34] sm:$0xf] %v1228_v6  ;;  %v6222_v22 = vld [vmem:[#allocation2 + $0x8] sm:$0x1]  ;;  %v12225_v23 = vrot.slane %v6220_v20, 9  ;;  %v13395_v36 = vld [vmem:[%s17017_s1 + $0x1f8] sm:$0xff] }
  0xa1   : > { %v14135_v27 = vld [vmem:[%s13734_s15 + $0x1c] sm:$0xf]  ;;  %v6321_v30 = vrot.slane %v6222_v22, 5  ;;  %v11153_v37 = vld [vmem:[%s13734_s15 + $0xc] sm:$0xe]  ;;  %v1233_v26 = vshll.u32 %v11108_v18, 16  ;;  %4857 = vmatpush.bf16.msra.mxu3 %v13395_v36 }
  0xa2   : > { %4307 = vmatmul.bf16.gmra.mxu2 %v11832_v15  ;;  %v11154_v15 = vld [vmem:[%s13734_s15 + $0x10] sm:$0xf]  ;;  %v13373_v43 = vld [vmem:[%s17017_s1 + $0x148] sm:$0xff]  ;;  %v11201_v44 = vrot.slane %v11153_v37, 9  ;;  %v1239_v48 = vshll.u32 %v14135_v27, 16  ;;  %v13372_v60 = vld [vmem:[%s17017_s1 + $0x140] sm:$0xff] }
  0xa3   : > { %4683 = vmatpush.bf16.msrb.mxu1 %v13375_v8  ;;  %v1751_v17 = vrot.slane %v11154_v15, 5  ;;  %v14137_v29 = vld [vmem:[#allocation3 + $0x8] sm:$0xf]  ;;  %v820_v47 = vld [vmem:[%s13734_s15 + $0xc] sm:$0xe]  ;;  %v1235_v62 = vrot.slane %v1233_v26, 5 }
  0xa4   : > { %4396 = vmatmul.bf16.gmra.mxu3 %v11836_v21  ;;  %v6221_v21 = vld [vmem:[#allocation2 + $0x4] sm:$0xf]  ;;  %v821_v32 = vld [vmem:[%s13734_s15 + $0x10] sm:$0xf]  ;;  %v822_v46 = vld [vmem:[%s13734_s15 + $0x14] sm:$0x1] }
  0xa5   : > { %v6318_v24 = vrot.slane %v6221_v21, 5  ;;  %v1753_v38 = vrot.slane %v1751_v17, 4  ;;  %v14151_v40 = vld [vmem:[#allocation3 + $0x28] sm:$0xf0]  ;;  %v11903_v49 = vld [vmem:[#allocation3 + $0x438] sm:$0xf]  ;;  %v1752_v50 = vsel %vm14112_vm5, %v11201_v44, %v1751_v17 }
  0xa6   : > { %4356 = vmatmul.bf16.gmra.mxu1 %v11548_v33  ;;  %v1230_v33 = vshrl.u32 %v11108_v18, 16  ;;  %v13327_v39 = vld [vmem:[#allocation3 + $0x458] sm:$0xf0]  ;;  %v11058_v51 = vrot.slane %v820_v47, 9  ;;  %v11075_v52 = vld [vmem:[%s13734_s15 + $0x18] sm:$0xf] }
  0xa7   : > { %v6319_v34 = vsel %vm14112_vm5, %v12225_v23, %v6318_v24  ;;  %v6320_v35 = vrot.slane %v6318_v24, 4  ;;  %4684 = vmatpush.bf16.msrb.mxu1 %v13374_v31  ;;  %v11076_v53 = vld [vmem:[%s13734_s15 + $0x1c] sm:$0xf]  ;;  %1893 = vst [vmem:[#allocation3 + $0x14] sm:$0xf] %v1752_v50  ;;  %v925_v55 = vrot.slane %v821_v32, 5 }
  0xa8   : > { %4272 = vmatmul.bf16.gmra.mxu0 %v11580_v41  ;;  %6460 = vst [vmem:[#allocation3 + $0x8] sm:$0xf] %v6319_v34  ;;  %v11155_v41 = vld [vmem:[%s13734_s15 + $0x14] sm:$0x1]  ;;  %v928_v56 = vrot.slane %v822_v46, 5  ;;  %v1232_v61 = vrot.slane %v1230_v33, 4 }
  0xa9   : > { %v6322_v42 = vsel %vm14112_vm5, %v6320_v35, %v6321_v30  ;;  %v1754_v45 = vrot.slane %v11155_v41, 5  ;;  %v11110_v57 = vld [vmem:[%s13734_s15 + $0x20] sm:$0x1]  ;;  %v13323_v58 = vld [vmem:[#allocation3 + $0x43c] sm:$0xf]  ;;  %v1241_v63 = vrot.slane %v1239_v48, 5  ;;  %v926_v1 = vsel %vm14112_vm5, %v11058_v51, %v925_v55  ;;  %v4243_v21 = vpop.f32.mrf.mxu0 }
  0xaa   : > { %6461 = vst [vmem:[#allocation3 + $0x2c] sm:$0xf] %v6322_v42  ;;  %v11905_v59 = vld [vmem:[#allocation3 + $0x45c] sm:$0xf0]  ;;  %v927_v2 = vrot.slane %v925_v55, 4  ;;  %v1243_v4 = vshrl.u32 %v14135_v27, 16  ;;  %v1236_v8 = vor.u32 %v1235_v62, %v1232_v61 }
  0xab   : > { %v1755_v3 = vsel %vm14112_vm5, %v1753_v38, %v1754_v45  ;;  %4685 = vmatpush.bf16.msrb.mxu1 %v13373_v43  ;;  %v13403_v0 = vld [vmem:[%s17017_s1 + $0x238] sm:$0xff]  ;;  %1127 = vst [vmem:[#allocation3 + $0x54] sm:$0xf] %v11075_v52  ;;  %v1249_v5 = vshll.u32 %v11110_v57, 16  ;;  %v13251_v6 = vld [vmem:[#allocation3 + $0x1fc] sm:$0xf]  ;;  %v11908_v16 = vor.u32 %v13323_v58, %v11905_v59 }
  0xac   : > { %1894 = vst [vmem:[#allocation3 + $0x38] sm:$0xf] %v1755_v3  ;;  %v11617_v7 = vld [vmem:[#allocation3 + $0x21c] sm:$0xf0]  ;;  %v11379_v10 = vld [vmem:[#allocation3 + $0x10] sm:$0xf]  ;;  %4946 = vmatpush.bf16.msra.mxu0 %v13403_v0  ;;  %v929_v11 = vsel %vm14112_vm5, %v927_v2, %v928_v56 }
  0xad   : > { %1062 = vst [vmem:[#allocation3 + $0x50] sm:$0xf] %v926_v1  ;;  %v13194_v14 = vld [vmem:[#allocation3 + $0x30] sm:$0xf0]  ;;  %v1237_v15 = vrot.slane %v1236_v8, 4  ;;  %v1251_v18 = vrot.slane %v1249_v5, 5  ;;  %v11620_v24 = vor.u32 %v13251_v6, %v11617_v7  ;;  %v11372_v1 = vor.u32 %v14151_v40, %v14137_v29 }
  0xae   : > { %1128 = vst [vmem:[#allocation3 + $0x78] sm:$0xf] %v11076_v53  ;;  %v11111_v20 = vld [vmem:[%s13734_s15 + $0x24] sm:$0xf]  ;;  %v11380_v30 = vor.u32 %v13194_v14, %v11379_v10  ;;  %v11156_v12 = vld [vmem:[%s13734_s15 + $0x18] sm:$0xe] }
  0xaf   : > { %4686 = vmatpush.bf16.msrb.mxu1 %v13372_v60  ;;  %1063 = vst [vmem:[#allocation3 + $0x74] sm:$0xf] %v929_v11  ;;  %v1242_v22 = vsel %vm13858_vm2, %v1237_v15, %v1241_v63  ;;  %v11158_v31 = vld [vmem:[%s13734_s15 + $0x20] sm:$0x1]  ;;  %v1254_v33 = vshrl.u32 %v11111_v20, 16  ;;  %v1257_v34 = vshll.u32 %v11111_v20, 16 }
  0xb0   : > { %1623 = vst [vmem:[#allocation3 + $0x58] sm:$0xf] %v1242_v22  ;;  %v11202_v36 = vrot.slane %v11156_v12, 9  ;;  %v1761_v38 = vrot.slane %v11158_v31, 5  ;;  %v824_v26 = vld [vmem:[%s13734_s15 + $0x1c] sm:$0xf] }
  0xb1   : > { %v823_v44 = vld [vmem:[%s13734_s15 + $0x18] sm:$0xe]  ;;  %v825_v45 = vld [vmem:[%s13734_s15 + $0x20] sm:$0x1]  ;;  %v932_v48 = vrot.slane %v824_v26, 5  ;;  %v14202_v58 = vpop.f32.mrf.mxu0 }
  0xb2   : > { %4312 = vmatmul.bf16.gmra.mxu2 %v11868_v9  ;;  %v11904_v9 = vor.u32 %v13327_v39, %v11903_v49  ;;  %v11059_v47 = vrot.slane %v823_v44, 9  ;;  %v935_v32 = vrot.slane %v825_v45, 5  ;;  %v11113_v46 = vld [vmem:[%s13734_s15 + $0x2c] sm:$0x1]  ;;  %v1256_v49 = vrot.slane %v1254_v33, 4 }
  0xb3   : > { %v1259_v39 = vrot.slane %v1257_v34, 5  ;;  %v934_v3 = vrot.slane %v932_v48, 4  ;;  %v11077_v51 = vld [vmem:[%s13734_s15 + $0x24] sm:$0xf]  ;;  %v11078_v53 = vld [vmem:[%s13734_s15 + $0x28] sm:$0xf] }
  0xb4   : > { %4401 = vmatmul.bf16.gmra.mxu3 %v11872_v13  ;;  %v1245_v13 = vrot.slane %v1243_v4, 4  ;;  %v933_v50 = vsel %vm14112_vm5, %v11059_v47, %v932_v48  ;;  %v1273_v57 = vshll.u32 %v11113_v46, 16  ;;  %1129 = vst [vmem:[#allocation3 + $0x9c] sm:$0xf] %v11077_v51  ;;  %v13189_v62 = vld [vmem:[#allocation3 + $0xc] sm:$0xf] }
  0xb5   : > { %1064 = vst [vmem:[#allocation3 + $0x98] sm:$0xf] %v933_v50  ;;  %v1260_v55 = vor.u32 %v1259_v39, %v1256_v49  ;;  %v936_v59 = vsel %vm14112_vm5, %v934_v3, %v935_v32  ;;  %v14209_v0 = vld [vmem:[%s17018_s2] ss:$0 sm:$0xff]  ;;  %v13190_v6 = vld [vmem:[#allocation3 + $0x14] sm:$0xf] }
  0xb6   : > { %4361 = vmatmul.bf16.gmra.mxu1 %v11584_v19  ;;  %v1246_v17 = vor.u32 %v1245_v13, %v1241_v63  ;;  %v11157_v19 = vld [vmem:[%s13734_s15 + $0x1c] sm:$0xf]  ;;  %1065 = vst [vmem:[#allocation3 + $0xbc] sm:$0xf] %v936_v59  ;;  %v11373_v63 = vld [vmem:[#allocation3 + $0x2c] sm:$0xf0]  ;;  %v4244_v8 = vadd.f32 %v14209_v0, %v4243_v21 }
  0xb7   : > { %v1758_v23 = vrot.slane %v11157_v19, 5  ;;  %v1261_v60 = vrot.slane %v1260_v55, 4  ;;  %1130 = vst [vmem:[#allocation3 + $0xc0] sm:$0xf] %v11078_v53  ;;  %v1275_v5 = vrot.slane %v1273_v57, 5 }
  0xb8   : > { %4277 = vmatmul.bf16.gmra.mxu0 %v11616_v28  ;;  %v1247_v27 = vrot.slane %v1246_v17, 4  ;;  %v11112_v28 = vld [vmem:[%s13734_s15 + $0x28] sm:$0xf]  ;;  %v11381_v7 = vld [vmem:[#allocation3 + $0x34] sm:$0xf0] }
  0xb9   : > { %v1760_v37 = vrot.slane %v1758_v23, 4  ;;  %v1263_v41 = vshll.u32 %v11112_v28, 16  ;;  %v1759_v42 = vsel %vm14112_vm5, %v11202_v36, %v1758_v23  ;;  %v1267_v56 = vshrl.u32 %v11112_v28, 16  ;;  %v11160_v11 = vld [vmem:[%s13734_s15 + $0x28] sm:$0xf]  ;;  %v13386_v28 = vld [vmem:[%s17017_s1 + $0x1b0] sm:$0xff] }
  0xba   : > { %v1252_v35 = vsel %vm13858_vm2, %v1247_v27, %v1251_v18  ;;  %1895 = vst [vmem:[#allocation3 + $0x5c] sm:$0xf] %v1759_v42  ;;  %v11114_v13 = vld [vmem:[%s13734_s15 + $0x30] sm:$0xf]  ;;  %v1765_v29 = vrot.slane %v11160_v11, 5  ;;  %4769 = vmatpush.bf16.msra.mxu2 %v13386_v28 }
  0xbb   : > { %1624 = vst [vmem:[#allocation3 + $0x7c] sm:$0xf] %v1252_v35  ;;  %v1762_v43 = vsel %vm14112_vm5, %v1760_v37, %v1761_v38  ;;  %v1265_v52 = vrot.slane %v1263_v41, 5  ;;  %v1269_v61 = vrot.slane %v1267_v56, 4  ;;  %v11415_v14 = vld [vmem:[#allocation3 + $0x58] sm:$0xf] }
  0xbc   : > { %1896 = vst [vmem:[#allocation3 + $0x80] sm:$0xf] %v1762_v43  ;;  %v1278_v40 = vshrl.u32 %v11114_v13, 16  ;;  %v11159_v18 = vld [vmem:[%s13734_s15 + $0x24] sm:$0xe]  ;;  %v1767_v23 = vrot.slane %v1765_v29, 4 }
  0xbd   : > { %v1266_v2 = vsel %vm13858_vm2, %v1261_v60, %v1265_v52  ;;  %v1270_v4 = vor.u32 %v1269_v61, %v1265_v52  ;;  %v11161_v19 = vld [vmem:[%s13734_s15 + $0x2c] sm:$0x1]  ;;  %v11115_v20 = vld [vmem:[%s13734_s15 + $0x34] sm:$0xf]  ;;  %v11203_v21 = vrot.slane %v11159_v18, 9  ;;  %v1281_v37 = vshll.u32 %v11114_v13, 16 }
  0xbe   : > { %1625 = vst [vmem:[#allocation3 + $0xa0] sm:$0xf] %v1266_v2  ;;  %v1768_v12 = vrot.slane %v11161_v19, 5  ;;  %v827_v35 = vld [vmem:[%s13734_s15 + $0x28] sm:$0xf]  ;;  %v1280_v36 = vrot.slane %v1278_v40, 4 }
  0xbf   : > { %v1271_v10 = vrot.slane %v1270_v4, 4  ;;  %v1766_v34 = vsel %vm14112_vm5, %v11203_v21, %v1765_v29  ;;  %v1287_v38 = vshll.u32 %v11115_v20, 16  ;;  %v826_v42 = vld [vmem:[%s13734_s15 + $0x24] sm:$0xe]  ;;  %v11116_v43 = vld [vmem:[%s13734_s15 + $0x38] sm:$0x1] }
  0xc0   : > { %v1769_v41 = vsel %vm14112_vm5, %v1767_v23, %v1768_v12  ;;  %1897 = vst [vmem:[#allocation3 + $0xa4] sm:$0xf] %v1766_v34  ;;  %v828_v45 = vld [vmem:[%s13734_s15 + $0x2c] sm:$0x1]  ;;  %v11060_v47 = vrot.slane %v826_v42, 9  ;;  %v939_v48 = vrot.slane %v827_v35, 5 }
  0xc1   : > { %v1276_v17 = vsel %vm13858_vm2, %v1271_v10, %v1275_v5  ;;  %1898 = vst [vmem:[#allocation3 + $0xc8] sm:$0xf] %v1769_v41  ;;  %v942_v46 = vrot.slane %v828_v45, 5  ;;  %v1283_v49 = vrot.slane %v1281_v37, 5  ;;  %v11407_v39 = vld [vmem:[#allocation3 + $0x50] sm:$0xf] }
  0xc2   : > { %4317 = vmatmul.bf16.gmra.mxu2 %v11904_v9  ;;  %v11376_v9 = vor.u32 %v13189_v62, %v11373_v63  ;;  %v13203_v15 = vld [vmem:[#allocation3 + $0x78] sm:$0xf0]  ;;  %1626 = vst [vmem:[#allocation3 + $0xc4] sm:$0xf] %v1276_v17  ;;  %v940_v50 = vsel %vm14112_vm5, %v11060_v47, %v939_v48  ;;  %v941_v3 = vrot.slane %v939_v48, 4  ;;  %v1289_v52 = vrot.slane %v1287_v38, 5 }
  0xc3   : > { %v11416_v27 = vor.u32 %v13203_v15, %v11415_v14  ;;  %v11079_v51 = vld [vmem:[%s13734_s15 + $0x30] sm:$0xf]  ;;  %v1291_v53 = vshrl.u32 %v11115_v20, 16  ;;  %1066 = vst [vmem:[#allocation3 + $0xe0] sm:$0xf] %v940_v50  ;;  %v1284_v56 = vor.u32 %v1283_v49, %v1280_v36  ;;  %v1297_v57 = vshll.u32 %v11116_v43, 16 }
  0xc4   : > { %4406 = vmatmul.bf16.gmra.mxu3 %v11908_v16  ;;  %v11384_v16 = vor.u32 %v13190_v6, %v11381_v7  ;;  %v11080_v55 = vld [vmem:[%s13734_s15 + $0x34] sm:$0xf]  ;;  %v13202_v60 = vld [vmem:[#allocation3 + $0x70] sm:$0xf0]  ;;  %v943_v61 = vsel %vm14112_vm5, %v941_v3, %v942_v46  ;;  %1131 = vst [vmem:[#allocation3 + $0xe4] sm:$0xf] %v11079_v51 }
  0xc5   : > { %v1293_v62 = vrot.slane %v1291_v53, 4  ;;  %v13198_v63 = vld [vmem:[#allocation3 + $0x54] sm:$0xf]  ;;  %1067 = vst [vmem:[#allocation3 + $0x104] sm:$0xf] %v943_v61  ;;  %v1285_v2 = vrot.slane %v1284_v56, 4  ;;  %v11408_v10 = vor.u32 %v13202_v60, %v11407_v39 }
  0xc6   : > { %4366 = vmatmul.bf16.gmra.mxu1 %v11620_v24  ;;  %v11409_v5 = vld [vmem:[#allocation3 + $0x74] sm:$0xf0]  ;;  %1132 = vst [vmem:[#allocation3 + $0x108] sm:$0xf] %v11080_v55  ;;  %v13199_v11 = vld [vmem:[#allocation3 + $0x5c] sm:$0xf] }
  0xc7   : > { %v1294_v7 = vor.u32 %v1293_v62, %v1289_v52  ;;  %v1290_v13 = vsel %vm13858_vm2, %v1285_v2, %v1289_v52  ;;  %v11417_v15 = vld [vmem:[#allocation3 + $0x7c] sm:$0xf0]  ;;  %v11412_v17 = vor.u32 %v13198_v63, %v11409_v5  ;;  %v11163_v19 = vld [vmem:[%s13734_s15 + $0x34] sm:$0xf]  ;;  %v11117_v20 = vld [vmem:[%s13734_s15 + $0x3c] sm:$0xf] }
  0xc8   : > { %4598 = vmatmul.bf16.vlgmr.msrb.gmra.mxu0 %v11380_v30  ;;  %v13394_v30 = vld [vmem:[%s17017_s1 + $0x1f0] sm:$0xff]  ;;  %1627 = vst [vmem:[#allocation3 + $0xe8] sm:$0xf] %v1290_v13  ;;  %v11451_v18 = vld [vmem:[#allocation3 + $0xa0] sm:$0xf]  ;;  %v1772_v23 = vrot.slane %v11163_v19, 5 }
  0xc9   : > { %4858 = vmatpush.bf16.msra.mxu3 %v13394_v30  ;;  %v1295_v29 = vrot.slane %v1294_v7, 4  ;;  %v1305_v28 = vshll.u32 %v11117_v20, 16  ;;  %v11420_v30 = vor.u32 %v13199_v11, %v11417_v15  ;;  %v11162_v12 = vld [vmem:[%s13734_s15 + $0x30] sm:$0xe]  ;;  %v11164_v34 = vld [vmem:[%s13734_s15 + $0x38] sm:$0x1] }
  0xca   : > { %v1774_v35 = vrot.slane %v1772_v23, 4  ;;  %v1775_v38 = vrot.slane %v11164_v34, 5  ;;  %v11118_v47 = vld [vmem:[%s13734_s15 + $0x40] sm:$0xf]  ;;  %v829_v39 = vld [vmem:[%s13734_s15 + $0x30] sm:$0xe] }
  0xcb   : > { %v1307_v48 = vrot.slane %v1305_v28, 5  ;;  %v831_v51 = vld [vmem:[%s13734_s15 + $0x38] sm:$0x1]  ;;  %v11061_v52 = vrot.slane %v829_v39, 9  ;;  %v11119_v60 = vld [vmem:[%s13734_s15 + $0x44] sm:$0x1] }
  0xcc   : > { %v1776_v49 = vsel %vm14112_vm5, %v1774_v35, %v1775_v38  ;;  %v1311_v61 = vshll.u32 %v11118_v47, 16  ;;  %v1315_v62 = vshrl.u32 %v11118_v47, 16  ;;  %v11443_v63 = vld [vmem:[#allocation3 + $0x98] sm:$0xf]  ;;  %v11081_v2 = vld [vmem:[%s13734_s15 + $0x3c] sm:$0xf] }
  0xcd   : > { %1900 = vst [vmem:[#allocation3 + $0x110] sm:$0xf] %v1776_v49  ;;  %v11082_v5 = vld [vmem:[%s13734_s15 + $0x40] sm:$0xf]  ;;  %v1321_v11 = vshll.u32 %v11119_v60, 16 }
  0xce   : > { %v1313_v7 = vrot.slane %v1311_v61, 5  ;;  %1133 = vst [vmem:[#allocation3 + $0x12c] sm:$0xf] %v11081_v2  ;;  %v11166_v34 = vld [vmem:[%s13734_s15 + $0x40] sm:$0xf] }
  0xcf   : > { %1134 = vst [vmem:[#allocation3 + $0x150] sm:$0xf] %v11082_v5  ;;  %v1323_v19 = vrot.slane %v1321_v11, 5  ;;  %v11487_v35 = vld [vmem:[#allocation3 + $0xe8] sm:$0xf] }
  0xd0   : > { %v11167_v47 = vld [vmem:[%s13734_s15 + $0x44] sm:$0x1]  ;;  %v833_v60 = vld [vmem:[%s13734_s15 + $0x40] sm:$0xf]  ;;  %v11122_v61 = vld [vmem:[%s13734_s15 + $0x50] sm:$0x1] }
  0xd1   : > { %v834_v5 = vld [vmem:[%s13734_s15 + $0x44] sm:$0x1] }
  0xd2   : > { %4420 = vmatmul.bf16.vlgmr.msrb.gmra.mxu2 %v11372_v1  ;;  %v13402_v1 = vld [vmem:[%s17017_s1 + $0x230] sm:$0xff] }
  0xd3   : > { %v4332_v22 = vpop.f32.mrf.mxu1  ;;  %4947 = vmatpush.bf16.msra.mxu0 %v13402_v1 }
  0xd4   : > { %4509 = vmatmul.bf16.vlgmr.msrb.gmra.mxu3 %v11376_v9  ;;  %v14223_v24 = vadd.f32 %v4332_v22, %v4244_v8  ;;  %v1299_v8 = vrot.slane %v1297_v57, 5  ;;  %v13212_v22 = vld [vmem:[#allocation3 + $0xc0] sm:$0xf0]  ;;  %v949_v57 = vrot.slane %v831_v51, 5  ;;  %v1782_v51 = vrot.slane %v11167_v47, 5 }
  0xd5   : > { %v4283_v31 = vpop.f32.mrf.mxu2  ;;  %v4248_v33 = vpop.f32.mrf.mxu0  ;;  %v11452_v37 = vor.u32 %v13212_v22, %v11451_v18 }
  0xd6   : > { %v4284_v26 = vadd.f32 %v14209_v0, %v4283_v31  ;;  %4687 = vmatmul.bf16.vlgmr.msrb.gmra.mxu1 %v11384_v16  ;;  %v4249_v16 = vadd.f32 %v14209_v0, %v4248_v33  ;;  %v1300_v21 = vsel %vm13858_vm2, %v1295_v29, %v1299_v8  ;;  %v11204_v33 = vrot.slane %v11162_v12, 9 }
  0xd7   : > { %v4372_v44 = vpop.f32.mrf.mxu3  ;;  %1628 = vst [vmem:[#allocation3 + $0x10c] sm:$0xf] %v1300_v21 }
  0xd8   : > { %v14240_v32 = vadd.f32 %v4372_v44, %v4284_v26  ;;  %4603 = vmatmul.bf16.gmra.mxu0 %v11416_v27  ;;  %v1302_v27 = vshrl.u32 %v11117_v20, 16  ;;  %v830_v26 = vld [vmem:[%s13734_s15 + $0x34] sm:$0xf]  ;;  %v1773_v44 = vsel %vm14112_vm5, %v11204_v33, %v1772_v23  ;;  %v13208_v23 = vld [vmem:[#allocation3 + $0xa4] sm:$0xf] }
  0xd9   : > { %v946_v45 = vrot.slane %v830_v26, 5  ;;  %1899 = vst [vmem:[#allocation3 + $0xec] sm:$0xf] %v1773_v44  ;;  %v11120_v33 = vld [vmem:[%s13734_s15 + $0x48] sm:$0xf]  ;;  %v1779_v26 = vrot.slane %v11166_v34, 5 }
  0xda   : > { %v1304_v41 = vrot.slane %v1302_v27, 4  ;;  %v11453_v27 = vld [vmem:[#allocation3 + $0xc4] sm:$0xf0]  ;;  %v11165_v44 = vld [vmem:[%s13734_s15 + $0x3c] sm:$0xe] }
  0xdb   : > { %v14246_v59 = vpop.f32.mrf.mxu1  ;;  %v948_v53 = vrot.slane %v946_v45, 4  ;;  %v947_v1 = vsel %vm14112_vm5, %v11061_v52, %v946_v45  ;;  %v11121_v52 = vld [vmem:[%s13734_s15 + $0x4c] sm:$0xf] }
  0xdc   : > { %v1308_v55 = vor.u32 %v1307_v48, %v1304_v41  ;;  %1068 = vst [vmem:[#allocation3 + $0x128] sm:$0xf] %v947_v1  ;;  %v1326_v41 = vshrl.u32 %v11120_v33, 16  ;;  %v1781_v48 = vrot.slane %v1779_v26, 4 }
  0xdd   : > { %v4285_v4 = vpop.f32.mrf.mxu2  ;;  %v4250_v6 = vpop.f32.mrf.mxu0 }
  0xde   : > { %v4286_v9 = vadd.f32 %v14209_v0, %v4285_v4  ;;  %v4251_v3 = vadd.f32 %v14209_v0, %v4250_v6  ;;  %v950_v4 = vsel %vm14112_vm5, %v948_v53, %v949_v57  ;;  %v1309_v6 = vrot.slane %v1308_v55, 4 }
  0xdf   : > { %v4374_v14 = vpop.f32.mrf.mxu3  ;;  %1069 = vst [vmem:[#allocation3 + $0x14c] sm:$0xf] %v950_v4  ;;  %v1783_v2 = vsel %vm14112_vm5, %v1781_v48, %v1782_v51  ;;  %v832_v4 = vld [vmem:[%s13734_s15 + $0x3c] sm:$0xe] }
  0xe0   : > { %v14256_v40 = vadd.f32 %v4374_v14, %v4286_v9  ;;  %v13211_v9 = vld [vmem:[#allocation3 + $0xb8] sm:$0xf0]  ;;  %v1314_v15 = vsel %vm13858_vm2, %v1309_v6, %v1313_v7  ;;  %1902 = vst [vmem:[#allocation3 + $0x158] sm:$0xf] %v1783_v2  ;;  %v11168_v2 = vld [vmem:[%s13734_s15 + $0x48] sm:$0xe] }
  0xe1   : > { %v13207_v14 = vld [vmem:[#allocation3 + $0x9c] sm:$0xf]  ;;  %v11444_v22 = vor.u32 %v13211_v9, %v11443_v63  ;;  %1629 = vst [vmem:[#allocation3 + $0x130] sm:$0xf] %v1314_v15  ;;  %v956_v9 = vrot.slane %v834_v5, 5  ;;  %v1339_v15 = vshrl.u32 %v11121_v52, 16 }
  0xe2   : > { %4425 = vmatmul.bf16.gmra.mxu2 %v11408_v10  ;;  %v1317_v10 = vrot.slane %v1315_v62, 4  ;;  %v1328_v62 = vrot.slane %v1326_v41, 4  ;;  %v11481_v41 = vld [vmem:[#allocation3 + $0x104] sm:$0xf0] }
  0xe3   : > { %v4337_v31 = vpop.f32.mrf.mxu1 }
  0xe4   : > { %4514 = vmatmul.bf16.gmra.mxu3 %v11412_v17  ;;  %v14265_v36 = vadd.f32 %v4337_v31, %v4249_v16  ;;  %v11445_v16 = vld [vmem:[#allocation3 + $0xbc] sm:$0xf0]  ;;  %v1318_v18 = vor.u32 %v1317_v10, %v1313_v7  ;;  %v11062_v7 = vrot.slane %v832_v4, 9  ;;  %v11170_v4 = vld [vmem:[%s13734_s15 + $0x50] sm:$0x1] }
  0xe5   : > { %v4288_v42 = vpop.f32.mrf.mxu2  ;;  %v4253_v43 = vpop.f32.mrf.mxu0  ;;  %v11448_v31 = vor.u32 %v13207_v14, %v11445_v16  ;;  %v1335_v14 = vshll.u32 %v11121_v52, 16  ;;  %v11479_v16 = vld [vmem:[#allocation3 + $0xe0] sm:$0xf] }
  0xe6   : > { %v4289_v46 = vadd.f32 %v14209_v0, %v4288_v42  ;;  %4692 = vmatmul.bf16.gmra.mxu1 %v11420_v30  ;;  %v1319_v28 = vrot.slane %v1318_v18, 4  ;;  %v4254_v12 = vadd.f32 %v14209_v0, %v4253_v43  ;;  %v11456_v42 = vor.u32 %v13208_v23, %v11453_v27 }
  0xe7   : > { %v4377_v50 = vpop.f32.mrf.mxu3  ;;  %v11205_v43 = vrot.slane %v11165_v44, 9  ;;  %v1341_v23 = vrot.slane %v1339_v15, 4 }
  0xe8   : > { %v14277_v56 = vadd.f32 %v4377_v50, %v4289_v46  ;;  %4608 = vmatmul.bf16.gmra.mxu0 %v11452_v37  ;;  %v13221_v37 = vld [vmem:[#allocation3 + $0x108] sm:$0xf0]  ;;  %v1324_v38 = vsel %vm13858_vm2, %v1319_v28, %v1323_v19  ;;  %v1329_v46 = vshll.u32 %v11120_v33, 16  ;;  %v13385_v50 = vld [vmem:[%s17017_s1 + $0x1a8] sm:$0xff]  ;;  %v13220_v28 = vld [vmem:[#allocation3 + $0x100] sm:$0xf0] }
  0xe9   : > { %1630 = vst [vmem:[#allocation3 + $0x154] sm:$0xf] %v1324_v38  ;;  %v11488_v39 = vor.u32 %v13221_v37, %v11487_v35  ;;  %v1780_v57 = vsel %vm14112_vm5, %v11205_v43, %v1779_v26  ;;  %4770 = vmatpush.bf16.msra.mxu2 %v13385_v50  ;;  %v11083_v19 = vld [vmem:[%s13734_s15 + $0x48] sm:$0xf]  ;;  %v13216_v26 = vld [vmem:[#allocation3 + $0xe4] sm:$0xf]  ;;  %v11480_v47 = vor.u32 %v13220_v28, %v11479_v16 }
  0xea   : > { %1901 = vst [vmem:[#allocation3 + $0x134] sm:$0xf] %v1780_v57  ;;  %v1331_v10 = vrot.slane %v1329_v46, 5  ;;  %v13401_v33 = vld [vmem:[%s17017_s1 + $0x228] sm:$0xff]  ;;  %v13217_v46 = vld [vmem:[#allocation3 + $0xec] sm:$0xf]  ;;  %v11484_v51 = vor.u32 %v13216_v26, %v11481_v41 }
  0xeb   : > { %v4339_v8 = vpop.f32.mrf.mxu1  ;;  %1135 = vst [vmem:[#allocation3 + $0x174] sm:$0xf] %v11083_v19  ;;  %4948 = vmatpush.bf16.msra.mxu0 %v13401_v33  ;;  %v11523_v52 = vld [vmem:[#allocation3 + $0x130] sm:$0xf]  ;;  %v11169_v57 = vld [vmem:[%s13734_s15 + $0x4c] sm:$0xf] }
  0xec   : > { %v14286_v13 = vadd.f32 %v4339_v8, %v4251_v3  ;;  %v13393_v3 = vld [vmem:[%s17017_s1 + $0x1e8] sm:$0xff]  ;;  %v953_v8 = vrot.slane %v833_v60, 5  ;;  %v11123_v60 = vld [vmem:[%s13734_s15 + $0x54] sm:$0xf]  ;;  %v11125_v19 = vld [vmem:[%s13734_s15 + $0x5c] sm:$0x1] }
  0xed   : > { %v4290_v29 = vpop.f32.mrf.mxu2  ;;  %v4255_v17 = vpop.f32.mrf.mxu0  ;;  %4859 = vmatpush.bf16.msra.mxu3 %v13393_v3  ;;  %v1369_v41 = vshll.u32 %v11125_v19, 16  ;;  %v11172_v19 = vld [vmem:[%s13734_s15 + $0x58] sm:$0xf] }
  0xee   : > { %v4291_v20 = vadd.f32 %v14209_v0, %v4290_v29  ;;  %v4256_v1 = vadd.f32 %v14209_v0, %v4255_v17  ;;  %v1345_v29 = vshll.u32 %v11122_v61, 16  ;;  %v954_v17 = vsel %vm14112_vm5, %v11062_v7, %v953_v8 }
  0xef   : > { %v4379_v21 = vpop.f32.mrf.mxu3  ;;  %v955_v18 = vrot.slane %v953_v8, 4  ;;  %1070 = vst [vmem:[#allocation3 + $0x170] sm:$0xf] %v954_v17  ;;  %v1789_v7 = vrot.slane %v11170_v4, 5 }
  0xf0   : > { %v14291_v30 = vadd.f32 %v4379_v21, %v4291_v20  ;;  %v1332_v20 = vor.u32 %v1331_v10, %v1328_v62  ;;  %v1337_v21 = vrot.slane %v1335_v14, 5  ;;  %v1347_v37 = vrot.slane %v1345_v29, 5  ;;  %v13230_v61 = vld [vmem:[#allocation3 + $0x150] sm:$0xf0] }
  0xf1   : > { %v1786_v62 = vrot.slane %v11169_v57, 5  ;;  %v836_v10 = vld [vmem:[%s13734_s15 + $0x4c] sm:$0xf]  ;;  %v13225_v57 = vld [vmem:[#allocation3 + $0x12c] sm:$0xf] }
  0xf2   : > { %4430 = vmatmul.bf16.gmra.mxu2 %v11444_v22  ;;  %v11084_v22 = vld [vmem:[%s13734_s15 + $0x4c] sm:$0xf]  ;;  %v1342_v35 = vor.u32 %v1341_v23, %v1337_v21  ;;  %v960_v17 = vrot.slane %v836_v10, 5  ;;  %v835_v23 = vld [vmem:[%s13734_s15 + $0x48] sm:$0xe] }
  0xf3   : > { %v4342_v45 = vpop.f32.mrf.mxu1  ;;  %1136 = vst [vmem:[#allocation3 + $0x198] sm:$0xf] %v11084_v22 }
  0xf4   : > { %4519 = vmatmul.bf16.gmra.mxu3 %v11448_v31  ;;  %v14300_v49 = vadd.f32 %v4342_v45, %v4254_v12  ;;  %v957_v12 = vsel %vm14112_vm5, %v955_v18, %v956_v9  ;;  %v1333_v31 = vrot.slane %v1332_v20, 4  ;;  %v1343_v43 = vrot.slane %v1342_v35, 4  ;;  %v11124_v18 = vld [vmem:[%s13734_s15 + $0x58] sm:$0xf] }
  0xf5   : > { %v4293_v53 = vpop.f32.mrf.mxu2  ;;  %v4258_v55 = vpop.f32.mrf.mxu0  ;;  %1071 = vst [vmem:[#allocation3 + $0x194] sm:$0xf] %v957_v12  ;;  %v11524_v9 = vor.u32 %v13230_v61, %v11523_v52  ;;  %v11063_v12 = vrot.slane %v835_v23, 9  ;;  %v1353_v35 = vshll.u32 %v11123_v60, 16  ;;  %v1363_v26 = vshrl.u32 %v11124_v18, 16 }
  0xf6   : > { %v4294_v63 = vadd.f32 %v14209_v0, %v4293_v53  ;;  %4697 = vmatmul.bf16.gmra.mxu1 %v11456_v42  ;;  %v1338_v44 = vsel %vm13858_vm2, %v1333_v31, %v1337_v21  ;;  %v4259_v3 = vadd.f32 %v14209_v0, %v4258_v55  ;;  %v1348_v53 = vsel %vm13858_vm2, %v1343_v43, %v1347_v37  ;;  %v11086_v43 = vld [vmem:[%s13734_s15 + $0x58] sm:$0xf] }
  0xf7   : > { %v4382_v6 = vpop.f32.mrf.mxu3  ;;  %1631 = vst [vmem:[#allocation3 + $0x178] sm:$0xf] %v1338_v44  ;;  %v11206_v55 = vrot.slane %v11168_v2, 9  ;;  %v962_v31 = vrot.slane %v960_v17, 4  ;;  %v1371_v61 = vrot.slane %v1369_v41, 5  ;;  %v13384_v41 = vld [vmem:[%s17017_s1 + $0x1a0] sm:$0xff] }
  0xf8   : > { %v14319_v11 = vadd.f32 %v4382_v6, %v4294_v63  ;;  %4613 = vmatmul.bf16.gmra.mxu0 %v11488_v39  ;;  %v11489_v39 = vld [vmem:[#allocation3 + $0x10c] sm:$0xf0]  ;;  %1632 = vst [vmem:[#allocation3 + $0x19c] sm:$0xf] %v1348_v53  ;;  %v1350_v63 = vshrl.u32 %v11123_v60, 16  ;;  %v1788_v6 = vrot.slane %v1786_v62, 4  ;;  %4771 = vmatpush.bf16.msra.mxu2 %v13384_v41 }
  0xf9   : > { %v1787_v29 = vsel %vm14112_vm5, %v11206_v55, %v1786_v62  ;;  %1138 = vst [vmem:[#allocation3 + $0x1e0] sm:$0xf] %v11086_v43 }
  0xfa   : > { %v1790_v16 = vsel %vm14112_vm5, %v1788_v6, %v1789_v7  ;;  %v1352_v20 = vrot.slane %v1350_v63, 4  ;;  %1903 = vst [vmem:[#allocation3 + $0x17c] sm:$0xf] %v1787_v29  ;;  %v11517_v63 = vld [vmem:[#allocation3 + $0x14c] sm:$0xf0] }
  0xfb   : > { %v4344_v27 = vpop.f32.mrf.mxu1  ;;  %1904 = vst [vmem:[#allocation3 + $0x1a0] sm:$0xf] %v1790_v16  ;;  %v13226_v7 = vld [vmem:[#allocation3 + $0x134] sm:$0xf] }
  0xfc   : > { %v14327_v34 = vadd.f32 %v4344_v27, %v4256_v1  ;;  %v11492_v1 = vor.u32 %v13217_v46, %v11489_v39  ;;  %v837_v27 = vld [vmem:[%s13734_s15 + $0x50] sm:$0x1]  ;;  %v1365_v46 = vrot.slane %v1363_v26, 4 }
  0xfd   : > { %v4295_v38 = vpop.f32.mrf.mxu2  ;;  %v4260_v42 = vpop.f32.mrf.mxu0  ;;  %v963_v33 = vrot.slane %v837_v27, 5 }
  0xfe   : > { %v4296_v45 = vadd.f32 %v14209_v0, %v4295_v38  ;;  %v4261_v21 = vadd.f32 %v14209_v0, %v4260_v42  ;;  %v1359_v38 = vshll.u32 %v11124_v18, 16  ;;  %v961_v42 = vsel %vm14112_vm5, %v11063_v12, %v960_v17  ;;  %v11559_v10 = vld [vmem:[#allocation3 + $0x178] sm:$0xf]  ;;  %v11173_v12 = vld [vmem:[%s13734_s15 + $0x5c] sm:$0x1] }
  0xff   : > { %v4384_v48 = vpop.f32.mrf.mxu3  ;;  %v964_v44 = vsel %vm14112_vm5, %v962_v31, %v963_v33  ;;  %1072 = vst [vmem:[#allocation3 + $0x1b8] sm:$0xf] %v961_v42  ;;  %v11520_v17 = vor.u32 %v13225_v57, %v11517_v63  ;;  %v13392_v42 = vld [vmem:[%s17017_s1 + $0x1e0] sm:$0xff]  ;;  %v840_v57 = vld [vmem:[%s13734_s15 + $0x5c] sm:$0x1] }
 0x100   : > { %v14335_v50 = vadd.f32 %v4384_v48, %v4296_v45  ;;  %v11085_v45 = vld [vmem:[%s13734_s15 + $0x54] sm:$0xf]  ;;  %v1361_v48 = vrot.slane %v1359_v38, 5  ;;  %1073 = vst [vmem:[#allocation3 + $0x1dc] sm:$0xf] %v964_v44  ;;  %4860 = vmatpush.bf16.msra.mxu3 %v13392_v42 }
 0x101   : > { %1137 = vst [vmem:[#allocation3 + $0x1bc] sm:$0xf] %v11085_v45 }
 0x102   : > { %4435 = vmatmul.bf16.gmra.mxu2 %v11480_v47  ;;  %v1355_v47 = vrot.slane %v1353_v35, 5  ;;  %v1366_v60 = vor.u32 %v1365_v46, %v1361_v48  ;;  %v1796_v35 = vrot.slane %v11173_v12, 5  ;;  %v839_v46 = vld [vmem:[%s13734_s15 + $0x58] sm:$0xf]  ;;  %v13400_v12 = vld [vmem:[%s17017_s1 + $0x220] sm:$0xff] }
 0x103   : > { %v4347_v5 = vpop.f32.mrf.mxu1  ;;  %v967_v63 = vrot.slane %v839_v46, 5  ;;  %4949 = vmatpush.bf16.msra.mxu0 %v13400_v12  ;;  %v11561_v46 = vld [vmem:[#allocation3 + $0x19c] sm:$0xf0] }
 0x104   : > { %4524 = vmatmul.bf16.gmra.mxu3 %v11484_v51  ;;  %v14344_v8 = vadd.f32 %v4347_v5, %v4259_v3  ;;  %v11515_v3 = vld [vmem:[#allocation3 + $0x128] sm:$0xf]  ;;  %v13229_v51 = vld [vmem:[#allocation3 + $0x148] sm:$0xf0]  ;;  %v1356_v52 = vor.u32 %v1355_v47, %v1352_v20  ;;  %v1367_v55 = vrot.slane %v1366_v60, 4 }
 0x105   : > { %v4298_v14 = vpop.f32.mrf.mxu2  ;;  %v4263_v15 = vpop.f32.mrf.mxu0  ;;  %v11516_v5 = vor.u32 %v13229_v51, %v11515_v3  ;;  %v11126_v20 = vld [vmem:[%s13734_s15 + $0x60] sm:$0xf] }
 0x106   : > { %v4299_v22 = vadd.f32 %v14209_v0, %v4298_v14  ;;  %4702 = vmatmul.bf16.gmra.mxu1 %v11492_v1  ;;  %v1357_v2 = vrot.slane %v1356_v52, 4  ;;  %v4264_v16 = vadd.f32 %v14209_v0, %v4263_v15  ;;  %v1372_v18 = vsel %vm13858_vm2, %v1367_v55, %v1371_v61  ;;  %v838_v52 = vld [vmem:[%s13734_s15 + $0x54] sm:$0xe] }
 0x107   : > { %v4387_v28 = vpop.f32.mrf.mxu3  ;;  %1634 = vst [vmem:[#allocation3 + $0x1e4] sm:$0xf] %v1372_v18  ;;  %v1374_v23 = vshrl.u32 %v11126_v20, 16  ;;  %v1377_v44 = vshll.u32 %v11126_v20, 16 }
 0x108   : > { %v14357_v37 = vadd.f32 %v4387_v28, %v4299_v22  ;;  %4618 = vmatmul.bf16.gmra.mxu0 %v11524_v9  ;;  %v11525_v9 = vld [vmem:[#allocation3 + $0x154] sm:$0xf0]  ;;  %v1362_v14 = vsel %vm13858_vm2, %v1357_v2, %v1361_v48  ;;  %v13239_v22 = vld [vmem:[#allocation3 + $0x198] sm:$0xf0]  ;;  %v11128_v2 = vld [vmem:[%s13734_s15 + $0x68] sm:$0x1] }
 0x109   : > { %1633 = vst [vmem:[#allocation3 + $0x1c0] sm:$0xf] %v1362_v14  ;;  %v11528_v27 = vor.u32 %v13226_v7, %v11525_v9  ;;  %v11171_v28 = vld [vmem:[%s13734_s15 + $0x54] sm:$0xe]  ;;  %v11560_v26 = vor.u32 %v13239_v22, %v11559_v10  ;;  %v1376_v3 = vrot.slane %v1374_v23, 4  ;;  %v1379_v55 = vrot.slane %v1377_v44, 5 }
 0x10a   : > { %v11207_v33 = vrot.slane %v11171_v28, 9  ;;  %v11551_v7 = vld [vmem:[#allocation3 + $0x170] sm:$0xf]  ;;  %v969_v10 = vrot.slane %v967_v63, 4  ;;  %v11087_v14 = vld [vmem:[%s13734_s15 + $0x60] sm:$0xf] }
 0x10b   : > { %v4349_v39 = vpop.f32.mrf.mxu1  ;;  %v13238_v22 = vld [vmem:[#allocation3 + $0x190] sm:$0xf0]  ;;  %1139 = vst [vmem:[#allocation3 + $0x204] sm:$0xf] %v11087_v14 }
 0x10c   : > { %v14365_v53 = vadd.f32 %v4349_v39, %v4261_v21  ;;  %v1793_v21 = vrot.slane %v11172_v19, 5  ;;  %v11127_v39 = vld [vmem:[%s13734_s15 + $0x64] sm:$0xf]  ;;  %v1393_v19 = vshll.u32 %v11128_v2, 16  ;;  %v13234_v28 = vld [vmem:[#allocation3 + $0x174] sm:$0xf]  ;;  %v11552_v44 = vor.u32 %v13238_v22, %v11551_v7 }
 0x10d   : > { %v4300_v62 = vpop.f32.mrf.mxu2  ;;  %v4265_v1 = vpop.f32.mrf.mxu0  ;;  %v11174_v7 = vld [vmem:[%s13734_s15 + $0x60] sm:$0xe] }
 0x10e   : > { %v4301_v4 = vadd.f32 %v14209_v0, %v4300_v62  ;;  %v1795_v15 = vrot.slane %v1793_v21, 4  ;;  %v1794_v43 = vsel %vm14112_vm5, %v11207_v33, %v1793_v21  ;;  %v4266_v61 = vadd.f32 %v14209_v0, %v4265_v1  ;;  %v11088_v1 = vld [vmem:[%s13734_s15 + $0x64] sm:$0xf] }
 0x10f   : > { %v4389_v6 = vpop.f32.mrf.mxu3  ;;  %1905 = vst [vmem:[#allocation3 + $0x1c4] sm:$0xf] %v1794_v43  ;;  %v11064_v62 = vrot.slane %v838_v52, 9  ;;  %v1395_v41 = vrot.slane %v1393_v19, 5 }
 0x110   : > { %v14370_v29 = vadd.f32 %v4389_v6, %v4301_v4  ;;  %v1797_v48 = vsel %vm14112_vm5, %v1795_v15, %v1796_v35  ;;  %v1383_v6 = vshll.u32 %v11127_v39, 16  ;;  %v11553_v15 = vld [vmem:[#allocation3 + $0x194] sm:$0xf0]  ;;  %1140 = vst [vmem:[#allocation3 + $0x228] sm:$0xf] %v11088_v1 }
 0x111   : > { %1906 = vst [vmem:[#allocation3 + $0x1e8] sm:$0xf] %v1797_v48  ;;  %v968_v9 = vsel %vm14112_vm5, %v11064_v62, %v967_v63  ;;  %v11556_v52 = vor.u32 %v13234_v28, %v11553_v15  ;;  %v13248_v62 = vld [vmem:[#allocation3 + $0x1e0] sm:$0xf0]  ;;  %v11130_v28 = vld [vmem:[%s13734_s15 + $0x70] sm:$0xf] }
 0x112   : > { %4440 = vmatmul.bf16.gmra.mxu2 %v11516_v5  ;;  %v970_v5 = vrot.slane %v840_v57, 5  ;;  %1074 = vst [vmem:[#allocation3 + $0x200] sm:$0xf] %v968_v9  ;;  %v1385_v18 = vrot.slane %v1383_v6, 5  ;;  %v11595_v57 = vld [vmem:[#allocation3 + $0x1c0] sm:$0xf] }
 0x113   : > { %v4352_v31 = vpop.f32.mrf.mxu1  ;;  %v11596_v1 = vor.u32 %v13248_v62, %v11595_v57  ;;  %v841_v15 = vld [vmem:[%s13734_s15 + $0x60] sm:$0xe]  ;;  %v11587_v57 = vld [vmem:[#allocation3 + $0x1b8] sm:$0xf] }
 0x114   : > { %4529 = vmatmul.bf16.gmra.mxu3 %v11520_v17  ;;  %v14379_v38 = vadd.f32 %v4352_v31, %v4264_v16  ;;  %v1387_v16 = vshrl.u32 %v11127_v39, 16  ;;  %v1380_v17 = vor.u32 %v1379_v55, %v1376_v3  ;;  %v971_v21 = vsel %vm14112_vm5, %v969_v10, %v970_v5  ;;  %v11176_v10 = vld [vmem:[%s13734_s15 + $0x68] sm:$0x1]  ;;  %v11090_v62 = vld [vmem:[%s13734_s15 + $0x70] sm:$0xf] }
 0x115   : > { %v4303_v45 = vpop.f32.mrf.mxu2  ;;  %v4268_v47 = vpop.f32.mrf.mxu0  ;;  %1075 = vst [vmem:[#allocation3 + $0x224] sm:$0xf] %v971_v21 }
 0x116   : > { %v4304_v51 = vadd.f32 %v14209_v0, %v4303_v45  ;;  %4707 = vmatmul.bf16.gmra.mxu1 %v11528_v27  ;;  %v1389_v23 = vrot.slane %v1387_v16, 4  ;;  %v1381_v31 = vrot.slane %v1380_v17, 4  ;;  %v13235_v45 = vld [vmem:[#allocation3 + $0x17c] sm:$0xf]  ;;  %v1803_v17 = vrot.slane %v11176_v10, 5 }
 0x117   : > { %v4392_v60 = vpop.f32.mrf.mxu3  ;;  %v11564_v6 = vor.u32 %v13235_v45, %v11561_v46  ;;  %v13243_v10 = vld [vmem:[#allocation3 + $0x1bc] sm:$0xf]  ;;  %1142 = vst [vmem:[#allocation3 + $0x270] sm:$0xf] %v11090_v62 }
 0x118   : > { %v14398_v4 = vadd.f32 %v4392_v60, %v4304_v51  ;;  %4623 = vmatmul.bf16.gmra.mxu0 %v11560_v26  ;;  %v1390_v26 = vor.u32 %v1389_v23, %v1385_v18  ;;  %v1386_v43 = vsel %vm13858_vm2, %v1381_v31, %v1385_v18  ;;  %v4269_v51 = vadd.f32 %v14209_v0, %v4268_v47  ;;  %v11175_v60 = vld [vmem:[%s13734_s15 + $0x64] sm:$0xf] }
 0x119   : > { %1635 = vst [vmem:[#allocation3 + $0x208] sm:$0xf] %v1386_v43  ;;  %v1800_v2 = vrot.slane %v11175_v60, 5  ;;  %v11208_v47 = vrot.slane %v11174_v7, 9  ;;  %v842_v18 = vld [vmem:[%s13734_s15 + $0x64] sm:$0xf] }
 0x11a   : > { %v1391_v39 = vrot.slane %v1390_v26, 4  ;;  %v974_v23 = vrot.slane %v842_v18, 5 }
 0x11b   : > { %v4354_v20 = vpop.f32.mrf.mxu1  ;;  %v1802_v14 = vrot.slane %v1800_v2, 4  ;;  %v1801_v21 = vsel %vm14112_vm5, %v11208_v47, %v1800_v2 }
 0x11c   : > { %v14406_v27 = vadd.f32 %v4354_v20, %v4266_v61  ;;  %v11129_v61 = vld [vmem:[%s13734_s15 + $0x6c] sm:$0xf]  ;;  %v1396_v63 = vsel %vm13858_vm2, %v1391_v39, %v1395_v41  ;;  %1907 = vst [vmem:[#allocation3 + $0x20c] sm:$0xf] %v1801_v21  ;;  %v976_v45 = vrot.slane %v974_v23, 4 }
 0x11d   : > { %v4305_v33 = vpop.f32.mrf.mxu2  ;;  %v4270_v35 = vpop.f32.mrf.mxu0  ;;  %v1398_v5 = vshrl.u32 %v11129_v61, 16  ;;  %v1401_v55 = vshll.u32 %v11129_v61, 16  ;;  %1636 = vst [vmem:[#allocation3 + $0x22c] sm:$0xf] %v1396_v63  ;;  %v11131_v39 = vld [vmem:[%s13734_s15 + $0x74] sm:$0x1] }
 0x11e   : > { %v4306_v42 = vadd.f32 %v14209_v0, %v4305_v33  ;;  %v1804_v33 = vsel %vm14112_vm5, %v1802_v14, %v1803_v17  ;;  %v4271_v41 = vadd.f32 %v14209_v0, %v4270_v35  ;;  %v11089_v61 = vld [vmem:[%s13734_s15 + $0x6c] sm:$0xf]  ;;  %v1417_v7 = vshll.u32 %v11131_v39, 16 }
 0x11f   : > { %v4394_v48 = vpop.f32.mrf.mxu3  ;;  %v1400_v19 = vrot.slane %v1398_v5, 4  ;;  %v1403_v12 = vrot.slane %v1401_v55, 5  ;;  %1908 = vst [vmem:[#allocation3 + $0x230] sm:$0xf] %v1804_v33  ;;  %v13247_v55 = vld [vmem:[#allocation3 + $0x1d8] sm:$0xf0] }
 0x120   : > { %v14414_v3 = vadd.f32 %v4394_v48, %v4306_v42  ;;  %v843_v42 = vld [vmem:[%s13734_s15 + $0x68] sm:$0x1]  ;;  %1141 = vst [vmem:[#allocation3 + $0x24c] sm:$0xf] %v11089_v61  ;;  %v11588_v21 = vor.u32 %v13247_v55, %v11587_v57  ;;  %v11133_v55 = vld [vmem:[%s13734_s15 + $0x7c] sm:$0xf] }
 0x121   : > { %v1404_v43 = vor.u32 %v1403_v12, %v1400_v19  ;;  %v977_v46 = vrot.slane %v843_v42, 5  ;;  %v1419_v19 = vrot.slane %v1417_v7, 5  ;;  %v11597_v12 = vld [vmem:[#allocation3 + $0x1e4] sm:$0xf0]  ;;  %v11132_v42 = vld [vmem:[%s13734_s15 + $0x78] sm:$0xf] }
 0x122   : > { %4445 = vmatmul.bf16.gmra.mxu2 %v11552_v44  ;;  %v11065_v44 = vrot.slane %v841_v15, 9  ;;  %v1422_v39 = vshrl.u32 %v11132_v42, 16  ;;  %v1425_v61 = vshll.u32 %v11132_v42, 16 }
 0x123   : > { %v4357_v9 = vpop.f32.mrf.mxu1  ;;  %v978_v35 = vsel %vm14112_vm5, %v976_v45, %v977_v46  ;;  %v1405_v63 = vrot.slane %v1404_v43, 4 }
 0x124   : > { %4534 = vmatmul.bf16.gmra.mxu3 %v11556_v52  ;;  %v14423_v16 = vadd.f32 %v4357_v9, %v4269_v51  ;;  %v1407_v51 = vshll.u32 %v11130_v28, 16  ;;  %v1411_v52 = vshrl.u32 %v11130_v28, 16  ;;  %v975_v60 = vsel %vm14112_vm5, %v11065_v44, %v974_v23  ;;  %1077 = vst [vmem:[#allocation3 + $0x26c] sm:$0xf] %v978_v35  ;;  %v13244_v28 = vld [vmem:[#allocation3 + $0x1c4] sm:$0xf] }
 0x125   : > { %v4308_v20 = vpop.f32.mrf.mxu2  ;;  %v4273_v22 = vpop.f32.mrf.mxu0  ;;  %1076 = vst [vmem:[#allocation3 + $0x248] sm:$0xf] %v975_v60  ;;  %v11631_v44 = vld [vmem:[#allocation3 + $0x208] sm:$0xf]  ;;  %v13257_v45 = vld [vmem:[#allocation3 + $0x228] sm:$0xf0] }
 0x126   : > { %v4309_v31 = vadd.f32 %v14209_v0, %v4308_v20  ;;  %4712 = vmatmul.bf16.gmra.mxu1 %v11564_v6  ;;  %v1409_v2 = vrot.slane %v1407_v51, 5  ;;  %v1413_v6 = vrot.slane %v1411_v52, 4  ;;  %v4274_v15 = vadd.f32 %v14209_v0, %v4273_v22  ;;  %v11177_v52 = vld [vmem:[%s13734_s15 + $0x6c] sm:$0xe]  ;;  %v11179_v60 = vld [vmem:[%s13734_s15 + $0x74] sm:$0x1] }
 0x127   : > { %v4397_v26 = vpop.f32.mrf.mxu3  ;;  %v11600_v51 = vor.u32 %v13244_v28, %v11597_v12  ;;  %v11632_v62 = vor.u32 %v13257_v45, %v11631_v44  ;;  %v846_v28 = vld [vmem:[%s13734_s15 + $0x74] sm:$0x1]  ;;  %v1435_v44 = vshrl.u32 %v11133_v55, 16 }
 0x128   : > { %v14435_v48 = vadd.f32 %v4397_v26, %v4309_v31  ;;  %4628 = vmatmul.bf16.gmra.mxu0 %v11596_v1  ;;  %v1410_v47 = vsel %vm13858_vm2, %v1405_v63, %v1409_v2  ;;  %v11589_v1 = vld [vmem:[#allocation3 + $0x1dc] sm:$0xf0]  ;;  %v1414_v18 = vor.u32 %v1413_v6, %v1409_v2 }
 0x129   : > { %1637 = vst [vmem:[#allocation3 + $0x250] sm:$0xf] %v1410_v47  ;;  %v11592_v26 = vor.u32 %v13243_v10, %v11589_v1  ;;  %v13383_v63 = vld [vmem:[%s17017_s1 + $0x198] sm:$0xff]  ;;  %v845_v47 = vld [vmem:[%s13734_s15 + $0x70] sm:$0xf]  ;;  %v1424_v1 = vrot.slane %v1422_v39, 4 }
 0x12a   : > { %v1415_v31 = vrot.slane %v1414_v18, 4  ;;  %v13391_v2 = vld [vmem:[%s17017_s1 + $0x1d8] sm:$0xff]  ;;  %v14474_v18 = vld [vmem:[%s17018_s2] ss:$0 sm:$0xff]  ;;  %4772 = vmatpush.bf16.msra.mxu2 %v13383_v63 }
 0x12b   : > { %v4359_v5 = vpop.f32.mrf.mxu1  ;;  %4861 = vmatpush.bf16.msra.mxu3 %v13391_v2  ;;  %v13256_v63 = vld [vmem:[#allocation3 + $0x220] sm:$0xf0] }
 0x12c   : > { %v14444_v9 = vadd.f32 %v4359_v5, %v4271_v41  ;;  %v11178_v41 = vld [vmem:[%s13734_s15 + $0x70] sm:$0xf]  ;;  %v1420_v43 = vsel %vm13858_vm2, %v1415_v31, %v1419_v19  ;;  %v1810_v5 = vrot.slane %v11179_v60, 5 }
 0x12d   : > { %v4310_v14 = vpop.f32.mrf.mxu2  ;;  %v4275_v17 = vpop.f32.mrf.mxu0  ;;  %v1807_v46 = vrot.slane %v11178_v41, 5  ;;  %1638 = vst [vmem:[#allocation3 + $0x274] sm:$0xf] %v1420_v43  ;;  %v1427_v41 = vrot.slane %v1425_v61, 5  ;;  %v11623_v43 = vld [vmem:[#allocation3 + $0x200] sm:$0xf] }
 0x12e   : > { %v4311_v20 = vadd.f32 %v14209_v0, %v4310_v14  ;;  %v11209_v0 = vrot.slane %v11177_v52, 9  ;;  %v11134_v14 = vld [vmem:[%s13734_s15 + $0x80] sm:$0x1] }
 0x12f   : > { %v4399_v23 = vpop.f32.mrf.mxu3  ;;  %v1809_v22 = vrot.slane %v1807_v46, 4  ;;  %v1441_v45 = vshll.u32 %v11134_v14, 16  ;;  %v1428_v52 = vor.u32 %v1427_v41, %v1424_v1  ;;  %v11625_v14 = vld [vmem:[#allocation3 + $0x224] sm:$0xf0] }
 0x130   : > { %v14449_v33 = vadd.f32 %v4399_v23, %v4311_v20  ;;  %v1808_v10 = vsel %vm14112_vm5, %v11209_v0, %v1807_v46  ;;  %v4276_v20 = vadd.f32 %v14474_v18, %v4275_v17  ;;  %v844_v23 = vld [vmem:[%s13734_s15 + $0x6c] sm:$0xe]  ;;  %v1431_v17 = vshll.u32 %v11133_v55, 16 }
 0x131   : > { %1909 = vst [vmem:[#allocation3 + $0x254] sm:$0xf] %v1808_v10  ;;  %v11066_v31 = vrot.slane %v844_v23, 9  ;;  %v1437_v0 = vrot.slane %v1435_v44, 4 }
 0x132   : > { %4450 = vmatmul.bf16.gmra.mxu2 %v11588_v21  ;;  %v1811_v21 = vsel %vm14112_vm5, %v1809_v22, %v1810_v5  ;;  %v1433_v60 = vrot.slane %v1431_v17, 5  ;;  %v13399_v5 = vld [vmem:[%s17017_s1 + $0x218] sm:$0xff]  ;;  %v11667_v17 = vld [vmem:[#allocation3 + $0x250] sm:$0xf] }
 0x133   : > { %v4362_v57 = vpop.f32.mrf.mxu1  ;;  %1910 = vst [vmem:[#allocation3 + $0x278] sm:$0xf] %v1811_v21  ;;  %v11624_v21 = vor.u32 %v13256_v63, %v11623_v43  ;;  %4950 = vmatpush.bf16.msra.mxu0 %v13399_v5  ;;  %v848_v5 = vld [vmem:[%s13734_s15 + $0x7c] sm:$0xf] }
 0x134   : > { %4539 = vmatmul.bf16.gmra.mxu3 %v11592_v26  ;;  %v14458_v35 = vadd.f32 %v4362_v57, %v4274_v15  ;;  %v981_v15 = vrot.slane %v845_v47, 5  ;;  %v984_v26 = vrot.slane %v846_v28, 5  ;;  %v11092_v57 = vld [vmem:[%s13734_s15 + $0x7c] sm:$0xf]  ;;  %v1438_v55 = vor.u32 %v1437_v0, %v1433_v60  ;;  %v13266_v43 = vld [vmem:[#allocation3 + $0x270] sm:$0xf0] }
 0x135   : > { %v4313_v6 = vpop.f32.mrf.mxu2  ;;  %v4278_v7 = vpop.f32.mrf.mxu0  ;;  %v13252_v47 = vld [vmem:[#allocation3 + $0x204] sm:$0xf]  ;;  %1144 = vst [vmem:[#allocation3 + $0x2b8] sm:$0xf] %v11092_v57  ;;  %v11180_v57 = vld [vmem:[%s13734_s15 + $0x78] sm:$0xe] }
 0x136   : > { %v4314_v19 = vadd.f32 %v14474_v18, %v4313_v6  ;;  %4717 = vmatmul.bf16.gmra.mxu1 %v11600_v51  ;;  %v982_v46 = vsel %vm14112_vm5, %v11066_v31, %v981_v15  ;;  %v983_v39 = vrot.slane %v981_v15, 4  ;;  %v11091_v51 = vld [vmem:[%s13734_s15 + $0x78] sm:$0xf]  ;;  %v1443_v6 = vrot.slane %v1441_v45, 5  ;;  %v11633_v31 = vld [vmem:[#allocation3 + $0x22c] sm:$0xf0] }
 0x137   : > { %v4402_v12 = vpop.f32.mrf.mxu3  ;;  %1078 = vst [vmem:[#allocation3 + $0x290] sm:$0xf] %v982_v46  ;;  %v1439_v23 = vrot.slane %v1438_v55, 4  ;;  %v11628_v41 = vor.u32 %v13252_v47, %v11625_v14  ;;  %v11181_v45 = vld [vmem:[%s13734_s15 + $0x7c] sm:$0xf]  ;;  %v988_v14 = vrot.slane %v848_v5, 5 }
 0x138   : > { %v14482_v42 = vadd.f32 %v4402_v12, %v4314_v19  ;;  %4633 = vmatmul.bf16.gmra.mxu0 %v11632_v62  ;;  %v985_v61 = vsel %vm14112_vm5, %v983_v39, %v984_v26  ;;  %1143 = vst [vmem:[#allocation3 + $0x294] sm:$0xf] %v11091_v51  ;;  %v1429_v62 = vrot.slane %v1428_v52, 4  ;;  %v13253_v12 = vld [vmem:[#allocation3 + $0x20c] sm:$0xf]  ;;  %v4279_v26 = vadd.f32 %v14474_v18, %v4278_v7 }
 0x139   : > { %1079 = vst [vmem:[#allocation3 + $0x2b4] sm:$0xf] %v985_v61  ;;  %v1444_v44 = vsel %vm13858_vm2, %v1439_v23, %v1443_v6  ;;  %v11135_v46 = vld [vmem:[%s13734_s15 + $0x84] sm:$0xf]  ;;  %v1814_v39 = vrot.slane %v11181_v45, 5  ;;  %v11636_v52 = vor.u32 %v13253_v12, %v11633_v31  ;;  %v11210_v7 = vrot.slane %v11180_v57, 9 }
 0x13a   : > { %v1434_v19 = vsel %vm13858_vm2, %v1429_v62, %v1433_v60  ;;  %1640 = vst [vmem:[#allocation3 + $0x2bc] sm:$0xf] %v1444_v44  ;;  %v1446_v51 = vshrl.u32 %v11135_v46, 16  ;;  %v11182_v60 = vld [vmem:[%s13734_s15 + $0x80] sm:$0x1]  ;;  %v11668_v62 = vor.u32 %v13266_v43, %v11667_v17  ;;  %v990_v17 = vrot.slane %v988_v14, 4 }
 0x13b   : > { %v4364_v22 = vpop.f32.mrf.mxu1  ;;  %1639 = vst [vmem:[#allocation3 + $0x298] sm:$0xf] %v1434_v19  ;;  %v1817_v63 = vrot.slane %v11182_v60, 5  ;;  %v11136_v19 = vld [vmem:[%s13734_s15 + $0x88] sm:$0xf]  ;;  %v1449_v45 = vshll.u32 %v11135_v46, 16 }
 0x13c   : > { %v14490_v2 = vadd.f32 %v4364_v22, %v4276_v20  ;;  %v1816_v22 = vrot.slane %v1814_v39, 4  ;;  %v847_v12 = vld [vmem:[%s13734_s15 + $0x78] sm:$0xe]  ;;  %v849_v31 = vld [vmem:[%s13734_s15 + $0x80] sm:$0x1] }
 0x13d   : > { %v4315_v10 = vpop.f32.mrf.mxu2  ;;  %v4280_v1 = vpop.f32.mrf.mxu0  ;;  %v991_v44 = vrot.slane %v849_v31, 5  ;;  %v11093_v60 = vld [vmem:[%s13734_s15 + $0x84] sm:$0xf]  ;;  %v11659_v46 = vld [vmem:[#allocation3 + $0x248] sm:$0xf] }
 0x13e   : > { %v4316_v20 = vadd.f32 %v14474_v18, %v4315_v10  ;;  %v1815_v10 = vsel %vm14112_vm5, %v11210_v7, %v1814_v39  ;;  %v1818_v47 = vsel %vm14112_vm5, %v1816_v22, %v1817_v63  ;;  %v1455_v39 = vshll.u32 %v11136_v19, 16  ;;  %v11094_v7 = vld [vmem:[%s13734_s15 + $0x88] sm:$0xf]  ;;  %1145 = vst [vmem:[#allocation3 + $0x2dc] sm:$0xf] %v11093_v60 }
 0x13f   : > { %v4404_v28 = vpop.f32.mrf.mxu3  ;;  %1911 = vst [vmem:[#allocation3 + $0x29c] sm:$0xf] %v1815_v10  ;;  %v11138_v60 = vld [vmem:[%s13734_s15 + $0x90] sm:$0xf] }
 0x140   : > { %v14498_v15 = vadd.f32 %v4404_v28, %v4316_v20  ;;  %v11137_v20 = vld [vmem:[%s13734_s15 + $0x8c] sm:$0x1]  ;;  %v4281_v28 = vadd.f32 %v14474_v18, %v4280_v1  ;;  %1912 = vst [vmem:[#allocation3 + $0x2c0] sm:$0xf] %v1818_v47  ;;  %v1457_v22 = vrot.slane %v1455_v39, 5 }
 0x141   : > { %v1465_v57 = vshll.u32 %v11137_v20, 16  ;;  %v13261_v47 = vld [vmem:[#allocation3 + $0x24c] sm:$0xf]  ;;  %1146 = vst [vmem:[#allocation3 + $0x300] sm:$0xf] %v11094_v7 }
 0x142   : > { %4455 = vmatmul.bf16.gmra.mxu2 %v11624_v21  ;;  %v1448_v21 = vrot.slane %v1446_v51, 4  ;;  %v1459_v51 = vshrl.u32 %v11136_v19, 16 }
 0x143   : > { %v4367_v0 = vpop.f32.mrf.mxu1 }
 0x144   : > { %4544 = vmatmul.bf16.gmra.mxu3 %v11628_v41  ;;  %v14507_v61 = vadd.f32 %v4367_v0, %v4279_v26  ;;  %v11067_v41 = vrot.slane %v847_v12, 9  ;;  %v1451_v0 = vrot.slane %v1449_v45, 5  ;;  %v1461_v63 = vrot.slane %v1459_v51, 4  ;;  %v11703_v45 = vld [vmem:[#allocation3 + $0x298] sm:$0xf] }
 0x145   : > { %v4318_v55 = vpop.f32.mrf.mxu2  ;;  %v14510_v6 = vpop.f32.mrf.mxu0 }
 0x146   : > { %v4319_v23 = vadd.f32 %v14474_v18, %v4318_v55  ;;  %4722 = vmatmul.bf16.gmra.mxu1 %v11636_v52  ;;  %v989_v1 = vsel %vm14112_vm5, %v11067_v41, %v988_v14  ;;  %v992_v52 = vsel %vm14112_vm5, %v990_v17, %v991_v44  ;;  %v13265_v55 = vld [vmem:[#allocation3 + $0x268] sm:$0xf0]  ;;  %v1462_v19 = vor.u32 %v1461_v63, %v1457_v22 }
 0x147   : > { %v4407_v26 = vpop.f32.mrf.mxu3  ;;  %1080 = vst [vmem:[#allocation3 + $0x2d8] sm:$0xf] %v989_v1  ;;  %v1467_v14 = vrot.slane %v1465_v57, 5  ;;  %v11660_v41 = vor.u32 %v13265_v55, %v11659_v46  ;;  %v1470_v63 = vshrl.u32 %v11138_v60, 16  ;;  %v11183_v46 = vld [vmem:[%s13734_s15 + $0x84] sm:$0xe] }
 0x148   : > { %v14522_v43 = vadd.f32 %v4407_v26, %v4319_v23  ;;  %4638 = vmatmul.bf16.gmra.mxu0 %v11668_v62  ;;  %1081 = vst [vmem:[#allocation3 + $0x2fc] sm:$0xf] %v992_v52  ;;  %v1452_v62 = vor.u32 %v1451_v0, %v1448_v21  ;;  %v11661_v23 = vld [vmem:[#allocation3 + $0x26c] sm:$0xf0]  ;;  %v1463_v17 = vrot.slane %v1462_v19, 4 }
 0x149   : > { %v13262_v21 = vld [vmem:[#allocation3 + $0x254] sm:$0xf]  ;;  %v11664_v57 = vor.u32 %v13261_v47, %v11661_v23  ;;  %v11184_v52 = vld [vmem:[%s13734_s15 + $0x88] sm:$0xf]  ;;  %v13275_v0 = vld [vmem:[#allocation3 + $0x2b8] sm:$0xf0] }
 0x14a   : > { %v1453_v31 = vrot.slane %v1452_v62, 4  ;;  %v1468_v1 = vsel %vm13858_vm2, %v1463_v17, %v1467_v14  ;;  %v1821_v7 = vrot.slane %v11184_v52, 5  ;;  %v11185_v55 = vld [vmem:[%s13734_s15 + $0x8c] sm:$0x1]  ;;  %v11211_v62 = vrot.slane %v11183_v46, 9  ;;  %v13382_v14 = vld [vmem:[%s17017_s1 + $0x190] sm:$0xff] }
 0x14b   : > { %v4369_v5 = vpop.f32.mrf.mxu1  ;;  %1642 = vst [vmem:[#allocation3 + $0x304] sm:$0xf] %v1468_v1  ;;  %v1824_v47 = vrot.slane %v11185_v55, 5  ;;  %v13555_v23 = vld [vmem:[%s17019_s3 + $0x38] sm:$0xff]  ;;  %v13390_v17 = vld [vmem:[%s17017_s1 + $0x1d0] sm:$0xff]  ;;  %4773 = vmatpush.bf16.msra.mxu2 %v13382_v14  ;;  %v4246_v46 = vadd.f32 %v14474_v18, %v14202_v58 }
 0x14c   : > { %v14530_v10 = vadd.f32 %v4369_v5, %v4281_v28  ;;  %v11669_v28 = vld [vmem:[#allocation3 + $0x274] sm:$0xf0]  ;;  %v1458_v39 = vsel %vm13858_vm2, %v1453_v31, %v1457_v22  ;;  %v1823_v19 = vrot.slane %v1821_v7, 4  ;;  %v1473_v31 = vshll.u32 %v11138_v60, 16  ;;  %v850_v1 = vld [vmem:[%s13734_s15 + $0x84] sm:$0xe]  ;;  %9633 = vmatpush.bf16.msra.mxu1 %v13555_v23  ;;  %4862 = vmatpush.bf16.msra.mxu3 %v13390_v17 }
 0x14d   : > { %v4320_v20 = vpop.f32.mrf.mxu2  ;;  %v14532_v12 = vpop.f32.mrf.mxu0  ;;  %1641 = vst [vmem:[#allocation3 + $0x2e0] sm:$0xf] %v1458_v39  ;;  %v11672_v5 = vor.u32 %v13262_v21, %v11669_v28  ;;  %v851_v28 = vld [vmem:[%s13734_s15 + $0x88] sm:$0xf]  ;;  %v1472_v39 = vrot.slane %v1470_v63, 4 }
 0x14e   : > { %v4321_v26 = vadd.f32 %v14474_v18, %v4320_v20  ;;  %v11704_v20 = vor.u32 %v13275_v0, %v11703_v45  ;;  %v1825_v21 = vsel %vm14112_vm5, %v1823_v19, %v1824_v47  ;;  %v11139_v45 = vld [vmem:[%s13734_s15 + $0x94] sm:$0xf]  ;;  %v852_v52 = vld [vmem:[%s13734_s15 + $0x8c] sm:$0x1]  ;;  %v11068_v0 = vrot.slane %v850_v1, 9 }
 0x14f   : > { %v4409_v44 = vpop.f32.mrf.mxu3  ;;  %1914 = vst [vmem:[#allocation3 + $0x308] sm:$0xf] %v1825_v21  ;;  %v11695_v55 = vld [vmem:[#allocation3 + $0x290] sm:$0xf]  ;;  %v13274_v19 = vld [vmem:[#allocation3 + $0x2b0] sm:$0xf0] }
 0x150   : > { %v14537_v51 = vadd.f32 %v4409_v44, %v4321_v26  ;;  %v1822_v44 = vsel %vm14112_vm5, %v11211_v62, %v1821_v7  ;;  %v995_v7 = vrot.slane %v851_v28, 5  ;;  %v1475_v62 = vrot.slane %v1473_v31, 5  ;;  %v11095_v23 = vld [vmem:[%s13734_s15 + $0x90] sm:$0xf] }
 0x151   : > { %1913 = vst [vmem:[#allocation3 + $0x2e4] sm:$0xf] %v1822_v44  ;;  %v11096_v44 = vld [vmem:[%s13734_s15 + $0x94] sm:$0xf]  ;;  %v1483_v28 = vshrl.u32 %v11139_v45, 16 }
 0x152   : > { %4460 = vmatmul.bf16.gmra.mxu2 %v11660_v41  ;;  %v996_v47 = vsel %vm14112_vm5, %v11068_v0, %v995_v7  ;;  %v997_v14 = vrot.slane %v995_v7, 4  ;;  %v1476_v21 = vor.u32 %v1475_v62, %v1472_v39  ;;  %1147 = vst [vmem:[#allocation3 + $0x324] sm:$0xf] %v11095_v23  ;;  %v13270_v0 = vld [vmem:[#allocation3 + $0x294] sm:$0xf] }
 0x153   : > { %v4688_v22 = vpop.f32.mrf.mxu1  ;;  %1082 = vst [vmem:[#allocation3 + $0x320] sm:$0xf] %v996_v47  ;;  %v11697_v7 = vld [vmem:[#allocation3 + $0x2b4] sm:$0xf0]  ;;  %v13271_v62 = vld [vmem:[#allocation3 + $0x29c] sm:$0xf] }
 0x154   : > { %4549 = vmatmul.bf16.gmra.mxu3 %v11664_v57  ;;  %1148 = vst [vmem:[#allocation3 + $0x348] sm:$0xf] %v11096_v44  ;;  %v11705_v47 = vld [vmem:[#allocation3 + $0x2bc] sm:$0xf0]  ;;  %v11187_v23 = vld [vmem:[%s13734_s15 + $0x94] sm:$0xf] }
 0x155   : > { %v4421_v26 = vpop.f32.mrf.mxu2  ;;  %v14551_v41 = vpop.f32.mrf.mxu0  ;;  %v13284_v44 = vld [vmem:[#allocation3 + $0x300] sm:$0xf0] }
 0x156   : > { %v4422_v57 = vadd.f32 %v4421_v26, %v14223_v24  ;;  %4727 = vmatmul.bf16.gmra.mxu1 %v11672_v5  ;;  %v998_v24 = vrot.slane %v852_v52, 5  ;;  %v11140_v5 = vld [vmem:[%s13734_s15 + $0x98] sm:$0x1]  ;;  %v1479_v26 = vshll.u32 %v11139_v45, 16  ;;  %v13398_v52 = vld [vmem:[%s17017_s1 + $0x210] sm:$0xff]  ;;  %v11696_v45 = vor.u32 %v13274_v19, %v11695_v55 }
 0x157   : > { %v4510_v60 = vpop.f32.mrf.mxu3  ;;  %v1489_v58 = vshll.u32 %v11140_v5, 16  ;;  %4951 = vmatpush.bf16.msra.mxu0 %v13398_v52  ;;  %v11700_v19 = vor.u32 %v13270_v0, %v11697_v7  ;;  %v11188_v52 = vld [vmem:[%s13734_s15 + $0x98] sm:$0x1] }
 0x158   : > { %v4511_v63 = vadd.f32 %v4510_v60, %v4422_v57  ;;  %4643 = vmatmul.bf16.gmra.mxu0 %v11704_v20  ;;  %v999_v20 = vsel %vm14112_vm5, %v997_v14, %v998_v24  ;;  %v1481_v31 = vrot.slane %v1479_v26, 5  ;;  %v4335_v57 = vadd.f32 %v14246_v59, %v4246_v46  ;;  %v11141_v26 = vld [vmem:[%s13734_s15 + $0x9c] sm:$0xf] }
 0x159   : > { %1083 = vst [vmem:[#allocation3 + $0x344] sm:$0xf] %v999_v20  ;;  %v1485_v60 = vrot.slane %v1483_v28, 4  ;;  %v1491_v46 = vrot.slane %v1489_v58, 5  ;;  %v1494_v28 = vshrl.u32 %v11141_v26, 16  ;;  %v11708_v58 = vor.u32 %v13271_v62, %v11705_v47 }
 0x15a   : > { %v4600_v17 = vadd.f32 %v14510_v6, %v4511_v63  ;;  %v1477_v6 = vrot.slane %v1476_v21, 4  ;;  %v1828_v21 = vrot.slane %v11187_v23, 5  ;;  %v1497_v47 = vshll.u32 %v11141_v26, 16 }
 0x15b   : > { %v4690_v18 = vpop.f32.mrf.mxu1  ;;  %v1496_v62 = vrot.slane %v1494_v28, 4 }
 0x15c   : > { %v14576_v1 = vadd.f32 %v4688_v22, %v4600_v17  ;;  %v1482_v59 = vsel %vm13858_vm2, %v1477_v6, %v1481_v31  ;;  %v1486_v22 = vor.u32 %v1485_v60, %v1481_v31  ;;  %v11739_v17 = vld [vmem:[#allocation3 + $0x2e0] sm:$0xf]  ;;  %v1499_v26 = vrot.slane %v1497_v47, 5 }
 0x15d   : > { %v4423_v39 = vpop.f32.mrf.mxu2  ;;  %v14581_v63 = vpop.f32.mrf.mxu0  ;;  %1643 = vst [vmem:[#allocation3 + $0x328] sm:$0xf] %v1482_v59  ;;  %v11740_v7 = vor.u32 %v13284_v44, %v11739_v17  ;;  %v855_v17 = vld [vmem:[%s13734_s15 + $0x98] sm:$0x1] }
 0x15e   : > { %v4424_v24 = vadd.f32 %v4423_v39, %v4335_v57  ;;  %v1487_v14 = vrot.slane %v1486_v22, 4  ;;  %v11186_v57 = vld [vmem:[%s13734_s15 + $0x90] sm:$0xe]  ;;  %v1830_v39 = vrot.slane %v1828_v21, 4  ;;  %v1005_v28 = vrot.slane %v855_v17, 5 }
 0x15f   : > { %v4512_v5 = vpop.f32.mrf.mxu3  ;;  %v11212_v60 = vrot.slane %v11186_v57, 9  ;;  %v11097_v57 = vld [vmem:[%s13734_s15 + $0x9c] sm:$0xf] }
 0x160   : > { %v4513_v55 = vadd.f32 %v4512_v5, %v4424_v24  ;;  %v1492_v31 = vsel %vm13858_vm2, %v1487_v14, %v1491_v46  ;;  %v854_v24 = vld [vmem:[%s13734_s15 + $0x94] sm:$0xf]  ;;  %v11142_v5 = vld [vmem:[%s13734_s15 + $0xa0] sm:$0xf]  ;;  %v11143_v14 = vld [vmem:[%s13734_s15 + $0xa4] sm:$0x1] }
 0x161   : > { %1644 = vst [vmem:[#allocation3 + $0x34c] sm:$0xf] %v1492_v31  ;;  %v1829_v22 = vsel %vm14112_vm5, %v11212_v60, %v1828_v21  ;;  %v1002_v46 = vrot.slane %v854_v24, 5  ;;  %v1503_v31 = vshll.u32 %v11142_v5, 16  ;;  %v1513_v60 = vshll.u32 %v11143_v14, 16 }
 0x162   : > { %4465 = vmatmul.bf16.gmra.mxu2 %v11696_v45  ;;  %v4602_v20 = vadd.f32 %v14532_v12, %v4513_v55  ;;  %v1831_v45 = vrot.slane %v11188_v52, 5  ;;  %1915 = vst [vmem:[#allocation3 + $0x32c] sm:$0xf] %v1829_v22  ;;  %v1507_v52 = vshrl.u32 %v11142_v5, 16  ;;  %v11098_v24 = vld [vmem:[%s13734_s15 + $0xa0] sm:$0xf] }
 0x163   : > { %v4693_v6 = vpop.f32.mrf.mxu1  ;;  %v1004_v21 = vrot.slane %v1002_v46, 4  ;;  %v1505_v22 = vrot.slane %v1503_v31, 5  ;;  %1149 = vst [vmem:[#allocation3 + $0x36c] sm:$0xf] %v11097_v57  ;;  %v11733_v14 = vld [vmem:[#allocation3 + $0x2fc] sm:$0xf0] }
 0x164   : > { %4554 = vmatmul.bf16.gmra.mxu3 %v11700_v19  ;;  %v14592_v0 = vadd.f32 %v4690_v18, %v4602_v20  ;;  %v1832_v18 = vsel %vm14112_vm5, %v1830_v39, %v1831_v45  ;;  %v853_v19 = vld [vmem:[%s13734_s15 + $0x90] sm:$0xe]  ;;  %v1509_v47 = vrot.slane %v1507_v52, 4  ;;  %1150 = vst [vmem:[#allocation3 + $0x390] sm:$0xf] %v11098_v24  ;;  %v1515_v17 = vrot.slane %v1513_v60, 5 }
 0x165   : > { %v4426_v12 = vpop.f32.mrf.mxu2  ;;  %v14595_v59 = vpop.f32.mrf.mxu0  ;;  %1916 = vst [vmem:[#allocation3 + $0x350] sm:$0xf] %v1832_v18  ;;  %v11069_v44 = vrot.slane %v853_v19, 9  ;;  %v1006_v45 = vsel %vm14112_vm5, %v1004_v21, %v1005_v28  ;;  %v13279_v19 = vld [vmem:[#allocation3 + $0x2dc] sm:$0xf] }
 0x166   : > { %v4427_v55 = vadd.f32 %v4426_v12, %v14265_v36  ;;  %4732 = vmatmul.bf16.gmra.mxu1 %v11708_v58  ;;  %v11731_v36 = vld [vmem:[#allocation3 + $0x2d8] sm:$0xf]  ;;  %v1500_v12 = vor.u32 %v1499_v26, %v1496_v62  ;;  %1085 = vst [vmem:[#allocation3 + $0x38c] sm:$0xf] %v1006_v45  ;;  %v13280_v21 = vld [vmem:[#allocation3 + $0x2e4] sm:$0xf] }
 0x167   : > { %v4515_v23 = vpop.f32.mrf.mxu3  ;;  %v1003_v58 = vsel %vm14112_vm5, %v11069_v44, %v1002_v46  ;;  %v11741_v28 = vld [vmem:[#allocation3 + $0x304] sm:$0xf0] }
 0x168   : > { %v4516_v20 = vadd.f32 %v4515_v23, %v4427_v55  ;;  %4648 = vmatmul.bf16.gmra.mxu0 %v11740_v7  ;;  %1084 = vst [vmem:[#allocation3 + $0x368] sm:$0xf] %v1003_v58  ;;  %v13283_v7 = vld [vmem:[#allocation3 + $0x2f8] sm:$0xf0]  ;;  %v1501_v46 = vrot.slane %v1500_v12, 4  ;;  %v1510_v23 = vor.u32 %v1509_v47, %v1505_v22  ;;  %v11736_v58 = vor.u32 %v13279_v19, %v11733_v14 }
 0x169   : > { %v11732_v44 = vor.u32 %v13283_v7, %v11731_v36  ;;  %v11775_v57 = vld [vmem:[#allocation3 + $0x328] sm:$0xf]  ;;  %v13293_v45 = vld [vmem:[#allocation3 + $0x348] sm:$0xf0]  ;;  %v11189_v7 = vld [vmem:[%s13734_s15 + $0x9c] sm:$0xe] }
 0x16a   : > { %v4605_v39 = vadd.f32 %v14551_v41, %v4516_v20  ;;  %v1511_v26 = vrot.slane %v1510_v23, 4  ;;  %v11190_v52 = vld [vmem:[%s13734_s15 + $0xa0] sm:$0xf]  ;;  %v11191_v19 = vld [vmem:[%s13734_s15 + $0xa4] sm:$0x1]  ;;  %v11776_v23 = vor.u32 %v13293_v45, %v11775_v57 }
 0x16b   : > { %v4695_v55 = vpop.f32.mrf.mxu1  ;;  %v1835_v36 = vrot.slane %v11190_v52, 5  ;;  %v856_v52 = vld [vmem:[%s13734_s15 + $0x9c] sm:$0xe]  ;;  %v858_v45 = vld [vmem:[%s13734_s15 + $0xa4] sm:$0x1] }
 0x16c   : > { %v14613_v18 = vadd.f32 %v4693_v6, %v4605_v39  ;;  %v1506_v6 = vsel %vm13858_vm2, %v1501_v46, %v1505_v22  ;;  %v11144_v39 = vld [vmem:[%s13734_s15 + $0xa8] sm:$0xf]  ;;  %v11744_v22 = vor.u32 %v13280_v21, %v11741_v28  ;;  %v11213_v46 = vrot.slane %v11189_v7, 9  ;;  %v857_v28 = vld [vmem:[%s13734_s15 + $0xa0] sm:$0xf] }
 0x16d   : > { %v4428_v5 = vpop.f32.mrf.mxu2  ;;  %v14615_v41 = vpop.f32.mrf.mxu0  ;;  %1645 = vst [vmem:[#allocation3 + $0x370] sm:$0xf] %v1506_v6  ;;  %v1518_v60 = vshrl.u32 %v11144_v39, 16  ;;  %v1521_v24 = vshll.u32 %v11144_v39, 16 }
 0x16e   : > { %v4429_v62 = vadd.f32 %v4428_v5, %v14286_v13  ;;  %v1516_v13 = vsel %vm13858_vm2, %v1511_v26, %v1515_v17  ;;  %v1837_v5 = vrot.slane %v1835_v36, 4  ;;  %v13381_v17 = vld [vmem:[%s17017_s1 + $0x188] sm:$0xff] }
 0x16f   : > { %v4517_v20 = vpop.f32.mrf.mxu3  ;;  %1646 = vst [vmem:[#allocation3 + $0x394] sm:$0xf] %v1516_v13  ;;  %v11145_v26 = vld [vmem:[%s13734_s15 + $0xac] sm:$0xf]  ;;  %4774 = vmatpush.bf16.msra.mxu2 %v13381_v17  ;;  %v11070_v13 = vrot.slane %v856_v52, 9 }
 0x170   : > { %v4518_v31 = vadd.f32 %v4517_v20, %v4429_v62  ;;  %v1838_v62 = vrot.slane %v11191_v19, 5  ;;  %v1836_v20 = vsel %vm14112_vm5, %v11213_v46, %v1835_v36  ;;  %v1009_v36 = vrot.slane %v857_v28, 5  ;;  %v11767_v19 = vld [vmem:[#allocation3 + $0x320] sm:$0xf]  ;;  %v11099_v17 = vld [vmem:[%s13734_s15 + $0xa8] sm:$0xf] }
 0x171   : > { %1917 = vst [vmem:[#allocation3 + $0x374] sm:$0xf] %v1836_v20  ;;  %v1531_v7 = vshrl.u32 %v11145_v26, 16 }
 0x172   : > { %4470 = vmatmul.bf16.gmra.mxu2 %v11732_v44  ;;  %v4607_v12 = vadd.f32 %v14581_v63, %v4518_v31  ;;  %v13554_v63 = vld [vmem:[%s17019_s3 + $0x30] sm:$0xff]  ;;  %v1520_v44 = vrot.slane %v1518_v60, 4  ;;  %v1523_v31 = vrot.slane %v1521_v24, 5  ;;  %v1839_v57 = vsel %vm14112_vm5, %v1837_v5, %v1838_v62  ;;  %1151 = vst [vmem:[#allocation3 + $0x3b4] sm:$0xf] %v11099_v17 }
 0x173   : > { %v4698_v47 = vpop.f32.mrf.mxu1  ;;  %9634 = vmatpush.bf16.msra.mxu1 %v13554_v63  ;;  %1918 = vst [vmem:[#allocation3 + $0x398] sm:$0xf] %v1839_v57  ;;  %v1010_v46 = vsel %vm14112_vm5, %v11070_v13, %v1009_v36  ;;  %v1011_v5 = vrot.slane %v1009_v36, 4  ;;  %v1533_v20 = vrot.slane %v1531_v7, 4  ;;  %v13397_v57 = vld [vmem:[%s17017_s1 + $0x208] sm:$0xff] }
 0x174   : > { %4559 = vmatmul.bf16.gmra.mxu3 %v11736_v58  ;;  %v14627_v14 = vadd.f32 %v4695_v55, %v4607_v12  ;;  %v13389_v55 = vld [vmem:[%s17017_s1 + $0x1c8] sm:$0xff]  ;;  %v1524_v60 = vor.u32 %v1523_v31, %v1520_v44  ;;  %v11146_v12 = vld [vmem:[%s13734_s15 + $0xb0] sm:$0x1]  ;;  %1086 = vst [vmem:[#allocation3 + $0x3b0] sm:$0xf] %v1010_v46  ;;  %4952 = vmatpush.bf16.msra.mxu0 %v13397_v57 }
 0x175   : > { %v4431_v21 = vpop.f32.mrf.mxu2  ;;  %v14635_v6 = vpop.f32.mrf.mxu0  ;;  %4863 = vmatpush.bf16.msra.mxu3 %v13389_v55  ;;  %v13292_v44 = vld [vmem:[#allocation3 + $0x340] sm:$0xf0] }
 0x176   : > { %v4432_v58 = vadd.f32 %v4431_v21, %v14300_v49  ;;  %4737 = vmatmul.bf16.gmra.mxu1 %v11744_v22  ;;  %v1012_v49 = vrot.slane %v858_v45, 5  ;;  %v1527_v22 = vshll.u32 %v11145_v26, 16  ;;  %v1525_v63 = vrot.slane %v1524_v60, 4  ;;  %v11100_v21 = vld [vmem:[%s13734_s15 + $0xac] sm:$0xf] }
 0x177   : > { %v4520_v39 = vpop.f32.mrf.mxu3  ;;  %v1537_v26 = vshll.u32 %v11146_v12, 16  ;;  %v11769_v45 = vld [vmem:[#allocation3 + $0x344] sm:$0xf0]  ;;  %1152 = vst [vmem:[#allocation3 + $0x3d8] sm:$0xf] %v11100_v21  ;;  %v11768_v60 = vor.u32 %v13292_v44, %v11767_v19 }
 0x178   : > { %v4521_v24 = vadd.f32 %v4520_v39, %v4432_v58  ;;  %4653 = vmatmul.bf16.gmra.mxu0 %v11776_v23  ;;  %v1529_v55 = vrot.slane %v1527_v22, 5  ;;  %v1013_v23 = vsel %vm14112_vm5, %v1011_v5, %v1012_v49  ;;  %v13288_v58 = vld [vmem:[#allocation3 + $0x324] sm:$0xf]  ;;  %v13289_v12 = vld [vmem:[#allocation3 + $0x32c] sm:$0xf] }
 0x179   : > { %1087 = vst [vmem:[#allocation3 + $0x3d4] sm:$0xf] %v1013_v23  ;;  %v1539_v36 = vrot.slane %v1537_v26, 5  ;;  %v11777_v22 = vld [vmem:[#allocation3 + $0x34c] sm:$0xf0]  ;;  %v11772_v46 = vor.u32 %v13288_v58, %v11769_v45 }
 0x17a   : > { %v4610_v62 = vadd.f32 %v14595_v59, %v4521_v24  ;;  %v1530_v59 = vsel %vm13858_vm2, %v1525_v63, %v1529_v55  ;;  %v1534_v52 = vor.u32 %v1533_v20, %v1529_v55  ;;  %v11811_v5 = vld [vmem:[#allocation3 + $0x370] sm:$0xf]  ;;  %v11193_v63 = vld [vmem:[%s13734_s15 + $0xac] sm:$0xf]  ;;  %v11780_v20 = vor.u32 %v13289_v12, %v11777_v22  ;;  %v11194_v23 = vld [vmem:[%s13734_s15 + $0xb0] sm:$0x1] }
 0x17b   : > { %v4700_v28 = vpop.f32.mrf.mxu1  ;;  %1647 = vst [vmem:[#allocation3 + $0x3b8] sm:$0xf] %v1530_v59  ;;  %v13302_v21 = vld [vmem:[#allocation3 + $0x390] sm:$0xf0]  ;;  %v11192_v44 = vld [vmem:[%s13734_s15 + $0xa8] sm:$0xe] }
 0x17c   : > { %v14657_v31 = vadd.f32 %v4698_v47, %v4610_v62  ;;  %v1535_v24 = vrot.slane %v1534_v52, 4  ;;  %v11147_v62 = vld [vmem:[%s13734_s15 + $0xb4] sm:$0xf]  ;;  %v11214_v58 = vrot.slane %v11192_v44, 9  ;;  %v1845_v59 = vrot.slane %v11194_v23, 5 }
 0x17d   : > { %v4433_v39 = vpop.f32.mrf.mxu2  ;;  %v14664_v13 = vpop.f32.mrf.mxu0  ;;  %v1542_v19 = vshrl.u32 %v11147_v62, 16  ;;  %v860_v45 = vld [vmem:[%s13734_s15 + $0xac] sm:$0xf]  ;;  %v11149_v12 = vld [vmem:[%s13734_s15 + $0xbc] sm:$0x1] }
 0x17e   : > { %v4434_v47 = vadd.f32 %v4433_v39, %v14327_v34  ;;  %v1540_v17 = vsel %vm13858_vm2, %v1535_v24, %v1539_v36  ;;  %v1842_v34 = vrot.slane %v11193_v63, 5  ;;  %v11812_v39 = vor.u32 %v13302_v21, %v11811_v5 }
 0x17f   : > { %v4522_v49 = vpop.f32.mrf.mxu3  ;;  %1648 = vst [vmem:[#allocation3 + $0x3dc] sm:$0xf] %v1540_v17  ;;  %v1016_v24 = vrot.slane %v860_v45, 5  ;;  %v1544_v22 = vrot.slane %v1542_v19, 4  ;;  %v11102_v45 = vld [vmem:[%s13734_s15 + $0xb8] sm:$0xf] }
 0x180   : > { %v4523_v7 = vadd.f32 %v4522_v49, %v4434_v47  ;;  %v1844_v57 = vrot.slane %v1842_v34, 4  ;;  %v11148_v49 = vld [vmem:[%s13734_s15 + $0xb8] sm:$0xf]  ;;  %1154 = vst [vmem:[#allocation3 + $0x420] sm:$0xf] %v11102_v45 }
 0x181   : > { %v1018_v63 = vrot.slane %v1016_v24, 4  ;;  %v1551_v44 = vshll.u32 %v11148_v49, 16  ;;  %v1555_v23 = vshrl.u32 %v11148_v49, 16 }
 0x182   : > { %4475 = vmatmul.bf16.gmra.mxu2 %v11768_v60  ;;  %v4612_v55 = vadd.f32 %v14615_v41, %v4523_v7  ;;  %v1843_v41 = vsel %vm14112_vm5, %v11214_v58, %v1842_v34  ;;  %v1846_v60 = vsel %vm14112_vm5, %v1844_v57, %v1845_v59  ;;  %v1545_v34 = vshll.u32 %v11147_v62, 16  ;;  %v11803_v62 = vld [vmem:[#allocation3 + $0x368] sm:$0xf] }
 0x183   : > { %v4703_v26 = vpop.f32.mrf.mxu1  ;;  %1919 = vst [vmem:[#allocation3 + $0x3bc] sm:$0xf] %v1843_v41  ;;  %v1561_v58 = vshll.u32 %v11149_v12, 16  ;;  %v1557_v41 = vrot.slane %v1555_v23, 4 }
 0x184   : > { %4564 = vmatmul.bf16.gmra.mxu3 %v11772_v46  ;;  %v14674_v52 = vadd.f32 %v4700_v28, %v4612_v55  ;;  %v859_v28 = vld [vmem:[%s13734_s15 + $0xa8] sm:$0xe]  ;;  %v861_v46 = vld [vmem:[%s13734_s15 + $0xb0] sm:$0x1]  ;;  %1920 = vst [vmem:[#allocation3 + $0x3e0] sm:$0xf] %v1846_v60 }
 0x185   : > { %v4436_v36 = vpop.f32.mrf.mxu2  ;;  %v14677_v47 = vpop.f32.mrf.mxu0  ;;  %v11071_v17 = vrot.slane %v859_v28, 9  ;;  %v1019_v21 = vrot.slane %v861_v46, 5  ;;  %v1547_v57 = vrot.slane %v1545_v34, 5  ;;  %v13301_v60 = vld [vmem:[#allocation3 + $0x388] sm:$0xf0]  ;;  %v1563_v28 = vrot.slane %v1561_v58, 5 }
 0x186   : > { %v4437_v7 = vadd.f32 %v4436_v36, %v14344_v8  ;;  %4742 = vmatmul.bf16.gmra.mxu1 %v11780_v20  ;;  %v11101_v20 = vld [vmem:[%s13734_s15 + $0xb4] sm:$0xf]  ;;  %v1553_v36 = vrot.slane %v1551_v44, 5  ;;  %v11847_v44 = vld [vmem:[#allocation3 + $0x3b8] sm:$0xf] }
 0x187   : > { %v4525_v5 = vpop.f32.mrf.mxu3  ;;  %v1017_v8 = vsel %vm14112_vm5, %v11071_v17, %v1016_v24  ;;  %v1020_v19 = vsel %vm14112_vm5, %v1018_v63, %v1019_v21  ;;  %v1548_v49 = vor.u32 %v1547_v57, %v1544_v22  ;;  %1153 = vst [vmem:[#allocation3 + $0x3fc] sm:$0xf] %v11101_v20  ;;  %v11804_v21 = vor.u32 %v13301_v60, %v11803_v62  ;;  %v13298_v22 = vld [vmem:[#allocation3 + $0x374] sm:$0xf]  ;;  %v11196_v20 = vld [vmem:[%s13734_s15 + $0xb8] sm:$0xf] }
 0x188   : > { %v4526_v55 = vadd.f32 %v4525_v5, %v4437_v7  ;;  %4658 = vmatmul.bf16.gmra.mxu0 %v11812_v39  ;;  %1088 = vst [vmem:[#allocation3 + $0x3f8] sm:$0xf] %v1017_v8  ;;  %v13297_v7 = vld [vmem:[#allocation3 + $0x36c] sm:$0xf]  ;;  %v1558_v24 = vor.u32 %v1557_v41, %v1553_v36  ;;  %v11805_v5 = vld [vmem:[#allocation3 + $0x38c] sm:$0xf0] }
 0x189   : > { %1089 = vst [vmem:[#allocation3 + $0x41c] sm:$0xf] %v1020_v19  ;;  %v11808_v8 = vor.u32 %v13297_v7, %v11805_v5  ;;  %v11150_v57 = vld [vmem:[%s13734_s15 + $0xc0] sm:$0xf]  ;;  %v11195_v60 = vld [vmem:[%s13734_s15 + $0xb4] sm:$0xe] }
 0x18a   : > { %v4615_v59 = vadd.f32 %v14635_v6, %v4526_v55  ;;  %v1549_v6 = vrot.slane %v1548_v49, 4  ;;  %v1559_v34 = vrot.slane %v1558_v24, 4  ;;  %v1566_v45 = vshrl.u32 %v11150_v57, 16  ;;  %v11197_v49 = vld [vmem:[%s13734_s15 + $0xbc] sm:$0x1] }
 0x18b   : > { %v4705_v39 = vpop.f32.mrf.mxu1  ;;  %v11215_v7 = vrot.slane %v11195_v60, 9  ;;  %v11152_v60 = vld [vmem:[%s13734_s15 + $0xc8] sm:$0x1] }
 0x18c   : > { %v14695_v12 = vadd.f32 %v4703_v26, %v4615_v59  ;;  %v11813_v26 = vld [vmem:[#allocation3 + $0x394] sm:$0xf0]  ;;  %v1554_v23 = vsel %vm13858_vm2, %v1549_v6, %v1553_v36  ;;  %v1564_v19 = vsel %vm13858_vm2, %v1559_v34, %v1563_v28  ;;  %v1849_v59 = vrot.slane %v11196_v20, 5  ;;  %v13380_v6 = vld [vmem:[%s17017_s1 + $0x180] sm:$0xff] }
 0x18d   : > { %v4438_v46 = vpop.f32.mrf.mxu2  ;;  %v14697_v17 = vpop.f32.mrf.mxu0  ;;  %1649 = vst [vmem:[#allocation3 + $0x400] sm:$0xf] %v1554_v23  ;;  %v11816_v62 = vor.u32 %v13298_v22, %v11813_v26  ;;  %v863_v26 = vld [vmem:[%s13734_s15 + $0xb8] sm:$0xf]  ;;  %v1568_v23 = vrot.slane %v1566_v45, 4  ;;  %4775 = vmatpush.bf16.msra.mxu2 %v13380_v6 }
 0x18e   : > { %v4439_v63 = vadd.f32 %v4438_v46, %v14365_v53  ;;  %v13311_v53 = vld [vmem:[#allocation3 + $0x3d8] sm:$0xf0]  ;;  %1650 = vst [vmem:[#allocation3 + $0x424] sm:$0xf] %v1564_v19  ;;  %v1851_v24 = vrot.slane %v1849_v59, 4  ;;  %v1852_v46 = vrot.slane %v11197_v49, 5 }
 0x18f   : > { %v4527_v55 = vpop.f32.mrf.mxu3  ;;  %v11848_v5 = vor.u32 %v13311_v53, %v11847_v44  ;;  %v11151_v44 = vld [vmem:[%s13734_s15 + $0xc4] sm:$0xf]  ;;  %v864_v19 = vld [vmem:[%s13734_s15 + $0xbc] sm:$0x1]  ;;  %v1023_v53 = vrot.slane %v863_v26, 5 }
 0x190   : > { %v4528_v58 = vadd.f32 %v4527_v55, %v4439_v63  ;;  %v1569_v63 = vshll.u32 %v11150_v57, 16  ;;  %v1850_v55 = vsel %vm14112_vm5, %v11215_v7, %v1849_v59  ;;  %v1853_v22 = vsel %vm14112_vm5, %v1851_v24, %v1852_v46  ;;  %v13310_v49 = vld [vmem:[#allocation3 + $0x3d0] sm:$0xf0]  ;;  %v11103_v24 = vld [vmem:[%s13734_s15 + $0xc0] sm:$0xf] }
 0x191   : > { %1921 = vst [vmem:[#allocation3 + $0x404] sm:$0xf] %v1850_v55  ;;  %v1026_v45 = vrot.slane %v864_v19, 5  ;;  %v1025_v7 = vrot.slane %v1023_v53, 4  ;;  %v1575_v46 = vshll.u32 %v11151_v44, 16  ;;  %v1585_v55 = vshll.u32 %v11152_v60, 16 }
 0x192   : > { %4480 = vmatmul.bf16.gmra.mxu2 %v11804_v21  ;;  %v4617_v41 = vadd.f32 %v14664_v13, %v4528_v58  ;;  %v13553_v13 = vld [vmem:[%s17019_s3 + $0x28] sm:$0xff]  ;;  %1922 = vst [vmem:[#allocation3 + $0x428] sm:$0xf] %v1853_v22 }
 0x193   : > { %v4708_v36 = vpop.f32.mrf.mxu1  ;;  %9635 = vmatpush.bf16.msra.mxu1 %v13553_v13  ;;  %v11104_v13 = vld [vmem:[%s13734_s15 + $0xc4] sm:$0xf]  ;;  %1155 = vst [vmem:[#allocation3 + $0x444] sm:$0xf] %v11103_v24 }
 0x194   : > { %4569 = vmatmul.bf16.gmra.mxu3 %v11808_v8  ;;  %v14709_v28 = vadd.f32 %v4705_v39, %v4617_v41  ;;  %v13388_v39 = vld [vmem:[%s17017_s1 + $0x1c0] sm:$0xff]  ;;  %v862_v8 = vld [vmem:[%s13734_s15 + $0xb4] sm:$0xe]  ;;  %v11839_v41 = vld [vmem:[#allocation3 + $0x3b0] sm:$0xf] }
 0x195   : > { %v4441_v21 = vpop.f32.mrf.mxu2  ;;  %v14717_v34 = vpop.f32.mrf.mxu0  ;;  %4864 = vmatpush.bf16.msra.mxu3 %v13388_v39  ;;  %v11072_v57 = vrot.slane %v862_v8, 9  ;;  %v1579_v39 = vshrl.u32 %v11151_v44, 16  ;;  %v13306_v44 = vld [vmem:[#allocation3 + $0x3b4] sm:$0xf]  ;;  %1156 = vst [vmem:[#allocation3 + $0x468] sm:$0xf] %v11104_v13 }
 0x196   : > { %v4442_v58 = vadd.f32 %v4441_v21, %v14379_v38  ;;  %4747 = vmatmul.bf16.gmra.mxu1 %v11816_v62  ;;  %v1571_v38 = vrot.slane %v1569_v63, 5  ;;  %v1577_v63 = vrot.slane %v1575_v46, 5  ;;  %v11199_v24 = vld [vmem:[%s13734_s15 + $0xc4] sm:$0xf]  ;;  %v11249_v46 = vld [vmem:[%s13734_s15 + $0x18] sm:$0xf] }
 0x197   : > { %v4530_v20 = vpop.f32.mrf.mxu3  ;;  %v1024_v62 = vsel %vm14112_vm5, %v11072_v57, %v1023_v53  ;;  %v1581_v8 = vrot.slane %v1579_v39, 4  ;;  %v1856_v13 = vrot.slane %v11199_v24, 5  ;;  %v11298_v24 = vld [vmem:[%s13734_s15 + $0x1c] sm:$0xf] }
 0x198   : > { %v4531_v59 = vadd.f32 %v4530_v20, %v4442_v58  ;;  %4663 = vmatmul.bf16.gmra.mxu0 %v11848_v5  ;;  %1090 = vst [vmem:[#allocation3 + $0x440] sm:$0xf] %v1024_v62  ;;  %v1572_v21 = vor.u32 %v1571_v38, %v1568_v23  ;;  %v1027_v5 = vsel %vm14112_vm5, %v1025_v7, %v1026_v45  ;;  %v13396_v58 = vld [vmem:[%s17017_s1 + $0x200] sm:$0xff]  ;;  %v11841_v20 = vld [vmem:[#allocation3 + $0x3d4] sm:$0xf0]  ;;  %v1587_v45 = vrot.slane %v1585_v55, 5 }
 0x199   : > { %1091 = vst [vmem:[#allocation3 + $0x464] sm:$0xf] %v1027_v5  ;;  %v11840_v23 = vor.u32 %v13310_v49, %v11839_v41  ;;  %4953 = vmatpush.bf16.msra.mxu0 %v13396_v58  ;;  %v13307_v38 = vld [vmem:[#allocation3 + $0x3bc] sm:$0xf]  ;;  %v11849_v62 = vld [vmem:[#allocation3 + $0x3dc] sm:$0xf0]  ;;  %v11844_v49 = vor.u32 %v13306_v44, %v11841_v20 }
 0x19a   : > { %v4620_v6 = vadd.f32 %v14677_v47, %v4531_v59  ;;  %v1573_v47 = vrot.slane %v1572_v21, 4  ;;  %v1582_v59 = vor.u32 %v1581_v8, %v1577_v63  ;;  %v2039_v21 = vshrl.u32 %v11249_v46, 16  ;;  %v11200_v58 = vld [vmem:[%s13734_s15 + $0xc8] sm:$0x1] }
 0x19b   : > { %v14737_v22 = vpop.f32.mrf.mxu1  ;;  %v11852_v55 = vor.u32 %v13307_v38, %v11849_v62  ;;  %v1858_v44 = vrot.slane %v1856_v13, 4 }
 0x19c   : > { %v14741_v26 = vadd.f32 %v4708_v36, %v4620_v6  ;;  %v1578_v36 = vsel %vm13858_vm2, %v1573_v47, %v1577_v63  ;;  %v1583_v7 = vrot.slane %v1582_v59, 4  ;;  %v11883_v6 = vld [vmem:[#allocation3 + $0x400] sm:$0xf]  ;;  %v11198_v63 = vld [vmem:[%s13734_s15 + $0xc0] sm:$0xe] }
 0x19d   : > { %v4443_v19 = vpop.f32.mrf.mxu2  ;;  %v14746_v57 = vpop.f32.mrf.mxu0  ;;  %1651 = vst [vmem:[#allocation3 + $0x448] sm:$0xf] %v1578_v36  ;;  %v11250_v47 = vld [vmem:[%s13734_s15 + $0x1c] sm:$0xf]  ;;  %v11251_v36 = vld [vmem:[%s13734_s15 + $0x20] sm:$0x1] }
 0x19e   : > { %v4444_v53 = vadd.f32 %v4443_v19, %v14406_v27  ;;  %v13320_v27 = vld [vmem:[#allocation3 + $0x420] sm:$0xf0]  ;;  %v1588_v5 = vsel %vm13858_vm2, %v1583_v7, %v1587_v45  ;;  %v11216_v19 = vrot.slane %v11198_v63, 9  ;;  %v2041_v45 = vrot.slane %v2039_v21, 4  ;;  %v11297_v21 = vld [vmem:[%s13734_s15 + $0x18] sm:$0xe] }
 0x19f   : > { %v4532_v60 = vpop.f32.mrf.mxu3  ;;  %1652 = vst [vmem:[#allocation3 + $0x46c] sm:$0xf] %v1588_v5  ;;  %v11884_v20 = vor.u32 %v13320_v27, %v11883_v6  ;;  %v2048_v38 = vshll.u32 %v11250_v47, 16  ;;  %v2058_v7 = vshll.u32 %v11251_v36, 16  ;;  %v11299_v63 = vld [vmem:[%s13734_s15 + $0x20] sm:$0x1] }
 0x1a0   : > { %v4533_v41 = vadd.f32 %v4532_v60, %v4444_v53  ;;  %v1859_v53 = vrot.slane %v11200_v58, 5  ;;  %v2042_v60 = vshll.u32 %v11249_v46, 16  ;;  %v11218_v58 = vld [vmem:[%s13734_s15 + $0x1c] sm:$0xf] }
 0x1a1   : > { %1959 = vst [vmem:[#allocation3 + $0x3c] sm:$0xf] %v11218_v58 }
 0x1a2   : > { %4485 = vmatmul.bf16.gmra.mxu2 %v11840_v23  ;;  %v14754_v39 = vadd.f32 %v14697_v17, %v4533_v41  ;;  %v1857_v17 = vsel %vm14112_vm5, %v11216_v19, %v1856_v13  ;;  %v1860_v41 = vsel %vm14112_vm5, %v1858_v44, %v1859_v53  ;;  %v2044_v27 = vrot.slane %v2042_v60, 5 }
 0x1a3   : > { %v4713_v8 = vpop.f32.mrf.mxu1  ;;  %1923 = vst [vmem:[#allocation3 + $0x44c] sm:$0xf] %v1857_v17  ;;  %v2050_v13 = vrot.slane %v2048_v38, 5  ;;  %v2587_v44 = vrot.slane %v11299_v63, 5  ;;  %v2060_v17 = vrot.slane %v2058_v7, 5 }
 0x1a4   : > { %4574 = vmatmul.bf16.gmra.mxu3 %v11844_v49  ;;  %v2052_v49 = vshrl.u32 %v11250_v47, 16  ;;  %1924 = vst [vmem:[#allocation3 + $0x470] sm:$0xf] %v1860_v41  ;;  %v2045_v19 = vor.u32 %v2044_v27, %v2041_v45  ;;  %v11875_v47 = vld [vmem:[#allocation3 + $0x3f8] sm:$0xf] }
 0x1a5   : > { %v4446_v23 = vpop.f32.mrf.mxu2  ;;  %v14762_v59 = vpop.f32.mrf.mxu0  ;;  %v13319_v41 = vld [vmem:[#allocation3 + $0x418] sm:$0xf0]  ;;  %v11919_v58 = vld [vmem:[#allocation3 + $0x448] sm:$0xf] }
 0x1a6   : > { %v4447_v62 = vadd.f32 %v4446_v23, %v14423_v16  ;;  %4752 = vmatmul.bf16.gmra.mxu1 %v11852_v55  ;;  %v2054_v5 = vrot.slane %v2052_v49, 4  ;;  %v11345_v16 = vrot.slane %v11297_v21, 9  ;;  %v11217_v55 = vld [vmem:[%s13734_s15 + $0x18] sm:$0xf]  ;;  %v2584_v23 = vrot.slane %v11298_v24, 5 }
 0x1a7   : > { %v4535_v6 = vpop.f32.mrf.mxu3  ;;  %1958 = vst [vmem:[#allocation3 + $0x18] sm:$0xf] %v11217_v55  ;;  %v2046_v38 = vrot.slane %v2045_v19, 4  ;;  %v11885_v55 = vld [vmem:[#allocation3 + $0x424] sm:$0xf0] }
 0x1a8   : > { %v4536_v46 = vadd.f32 %v4535_v6, %v4447_v62  ;;  %4668 = vmatmul.bf16.gmra.mxu0 %v11884_v20  ;;  %v2055_v36 = vor.u32 %v2054_v5, %v2050_v13  ;;  %v2585_v20 = vsel %vm14112_vm5, %v11345_v16, %v2584_v23  ;;  %v2586_v62 = vrot.slane %v2584_v23, 4  ;;  %v13315_v6 = vld [vmem:[#allocation3 + $0x3fc] sm:$0xf] }
 0x1a9   : > { %2726 = vst [vmem:[#allocation3 + $0x20] sm:$0xf] %v2585_v20  ;;  %v2051_v7 = vsel %vm13858_vm2, %v2046_v38, %v2050_v13  ;;  %v11876_v5 = vor.u32 %v13319_v41, %v11875_v47  ;;  %v11253_v13 = vld [vmem:[%s13734_s15 + $0x28] sm:$0xf] }
 0x1aa   : > { %v4625_v53 = vadd.f32 %v14717_v34, %v4536_v46  ;;  %v2056_v45 = vrot.slane %v2055_v36, 4  ;;  %v11877_v34 = vld [vmem:[#allocation3 + $0x41c] sm:$0xf0]  ;;  %v2588_v21 = vsel %vm14112_vm5, %v2586_v62, %v2587_v44  ;;  %2454 = vst [vmem:[#allocation3 + $0x1c] sm:$0xf] %v2051_v7  ;;  %v2072_v47 = vshll.u32 %v11253_v13, 16 }
 0x1ab   : > { %v14775_v60 = vpop.f32.mrf.mxu1  ;;  %v11880_v23 = vor.u32 %v13315_v6, %v11877_v34  ;;  %2727 = vst [vmem:[#allocation3 + $0x44] sm:$0xf] %v2588_v21  ;;  %v13329_v36 = vld [vmem:[#allocation3 + $0x468] sm:$0xf0]  ;;  %v2076_v41 = vshrl.u32 %v11253_v13, 16 }
 0x1ac   : > { %v14779_v49 = vadd.f32 %v4713_v8, %v4625_v53  ;;  %v13316_v8 = vld [vmem:[#allocation3 + $0x404] sm:$0xf]  ;;  %v2061_v63 = vsel %vm13858_vm2, %v2056_v45, %v2060_v17  ;;  %v11252_v53 = vld [vmem:[%s13734_s15 + $0x24] sm:$0xf]  ;;  %v11920_v6 = vor.u32 %v13329_v36, %v11919_v58  ;;  %v11254_v7 = vld [vmem:[%s13734_s15 + $0x2c] sm:$0x1] }
 0x1ad   : > { %v4448_v24 = vpop.f32.mrf.mxu2  ;;  %v14781_v27 = vpop.f32.mrf.mxu0  ;;  %2455 = vst [vmem:[#allocation3 + $0x40] sm:$0xf] %v2061_v63  ;;  %v2063_v44 = vshrl.u32 %v11252_v53, 16  ;;  %v11888_v38 = vor.u32 %v13316_v8, %v11885_v55  ;;  %v13552_v34 = vld [vmem:[%s17019_s3 + $0x20] sm:$0xff]  ;;  %v2078_v21 = vrot.slane %v2076_v41, 4  ;;  %v2082_v8 = vshll.u32 %v11254_v7, 16 }
 0x1ae   : > { %v4449_v46 = vadd.f32 %v4448_v24, %v14444_v9  ;;  %v2066_v9 = vshll.u32 %v11252_v53, 16  ;;  %v2074_v24 = vrot.slane %v2072_v47, 5  ;;  %v11300_v58 = vld [vmem:[%s13734_s15 + $0x24] sm:$0xe]  ;;  %9636 = vmatpush.bf16.msra.mxu1 %v13552_v34  ;;  %v11911_v34 = vld [vmem:[#allocation3 + $0x440] sm:$0xf] }
 0x1af   : > { %v4537_v16 = vpop.f32.mrf.mxu3  ;;  %v2065_v62 = vrot.slane %v2063_v44, 4  ;;  %v2084_v36 = vrot.slane %v2082_v8, 5  ;;  %v11346_v44 = vrot.slane %v11300_v58, 9  ;;  %v13324_v8 = vld [vmem:[#allocation3 + $0x444] sm:$0xf] }
 0x1b0   : > { %v4538_v19 = vadd.f32 %v4537_v16, %v4449_v46  ;;  %v2068_v45 = vrot.slane %v2066_v9, 5  ;;  %v11301_v46 = vld [vmem:[%s13734_s15 + $0x28] sm:$0xf] }
 0x1b1   : > { %v2591_v16 = vrot.slane %v11301_v46, 5 }
 0x1b2   : > { %4490 = vmatmul.bf16.gmra.mxu2 %v11876_v5  ;;  %v14793_v17 = vadd.f32 %v14746_v57, %v4538_v19  ;;  %v2069_v57 = vor.u32 %v2068_v45, %v2065_v62  ;;  %v2079_v19 = vor.u32 %v2078_v21, %v2074_v24  ;;  %v11219_v62 = vld [vmem:[%s13734_s15 + $0x24] sm:$0xf]  ;;  %v11220_v45 = vld [vmem:[%s13734_s15 + $0x28] sm:$0xf]  ;;  %v13328_v21 = vld [vmem:[#allocation3 + $0x460] sm:$0xf0] }
 0x1b3   : > { %v4718_v20 = vpop.f32.mrf.mxu1  ;;  %v2593_v41 = vrot.slane %v2591_v16, 4  ;;  %1960 = vst [vmem:[#allocation3 + $0x60] sm:$0xf] %v11219_v62 }
 0x1b4   : > { %4579 = vmatmul.bf16.gmra.mxu3 %v11880_v23  ;;  %v11302_v23 = vld [vmem:[%s13734_s15 + $0x2c] sm:$0x1]  ;;  %v2070_v13 = vrot.slane %v2069_v57, 4  ;;  %v2080_v47 = vrot.slane %v2079_v19, 4  ;;  %1961 = vst [vmem:[#allocation3 + $0x84] sm:$0xf] %v11220_v45 }
 0x1b5   : > { %v4451_v5 = vpop.f32.mrf.mxu2  ;;  %v14800_v63 = vpop.f32.mrf.mxu0  ;;  %v2594_v46 = vrot.slane %v11302_v23, 5  ;;  %v11912_v23 = vor.u32 %v13328_v21, %v11911_v34 }
 0x1b6   : > { %v4452_v55 = vadd.f32 %v4451_v5, %v14458_v35  ;;  %4757 = vmatmul.bf16.gmra.mxu1 %v11888_v38  ;;  %v2075_v7 = vsel %vm13858_vm2, %v2070_v13, %v2074_v24  ;;  %v2085_v38 = vsel %vm13858_vm2, %v2080_v47, %v2084_v36  ;;  %v11256_v47 = vld [vmem:[%s13734_s15 + $0x34] sm:$0xf] }
 0x1b7   : > { %v4540_v53 = vpop.f32.mrf.mxu3  ;;  %2456 = vst [vmem:[#allocation3 + $0x64] sm:$0xf] %v2075_v7  ;;  %v2595_v24 = vsel %vm14112_vm5, %v2593_v41, %v2594_v46  ;;  %v13196_v41 = vld [vmem:[#allocation3 + $0x40] sm:$0xf0]  ;;  %v2096_v7 = vshll.u32 %v11256_v47, 16  ;;  %v2100_v46 = vshrl.u32 %v11256_v47, 16 }
 0x1b8   : > { %v4541_v9 = vadd.f32 %v4540_v53, %v4452_v55  ;;  %4673 = vmatmul.bf16.gmra.mxu0 %v11920_v6  ;;  %v2592_v6 = vsel %vm14112_vm5, %v11346_v44, %v2591_v16  ;;  %v11913_v55 = vld [vmem:[#allocation3 + $0x464] sm:$0xf0]  ;;  %2457 = vst [vmem:[#allocation3 + $0x88] sm:$0xf] %v2085_v38  ;;  %v13325_v16 = vld [vmem:[#allocation3 + $0x44c] sm:$0xf] }
 0x1b9   : > { %2728 = vst [vmem:[#allocation3 + $0x68] sm:$0xf] %v2592_v6  ;;  %v11916_v36 = vor.u32 %v13324_v8, %v11913_v55  ;;  %v11395_v44 = vld [vmem:[#allocation3 + $0x20] sm:$0xf]  ;;  %v2098_v6 = vrot.slane %v2096_v7, 5  ;;  %v2102_v8 = vrot.slane %v2100_v46, 4 }
 0x1ba   : > { %v4630_v35 = vadd.f32 %v14762_v59, %v4541_v9  ;;  %2729 = vst [vmem:[#allocation3 + $0x8c] sm:$0xf] %v2595_v24  ;;  %v11255_v9 = vld [vmem:[%s13734_s15 + $0x30] sm:$0xf]  ;;  %v11396_v24 = vor.u32 %v13196_v41, %v11395_v44 }
 0x1bb   : > { %v14812_v5 = vpop.f32.mrf.mxu1  ;;  %v2087_v62 = vshrl.u32 %v11255_v9, 16  ;;  %v2090_v45 = vshll.u32 %v11255_v9, 16 }
 0x1bc   : > { %v14816_v57 = vadd.f32 %v4718_v20, %v4630_v35  ;;  %v11921_v20 = vld [vmem:[#allocation3 + $0x46c] sm:$0xf0] }
 0x1bd   : > { %v4453_v59 = vpop.f32.mrf.mxu2  ;;  %v14820_v19 = vpop.f32.mrf.mxu0  ;;  %v11924_v35 = vor.u32 %v13325_v16, %v11921_v20  ;;  %v2089_v34 = vrot.slane %v2087_v62, 4  ;;  %v2092_v21 = vrot.slane %v2090_v45, 5  ;;  %v2103_v16 = vor.u32 %v2102_v8, %v2098_v6  ;;  %v11303_v20 = vld [vmem:[%s13734_s15 + $0x30] sm:$0xe] }
 0x1be   : > { %v4454_v58 = vadd.f32 %v4453_v59, %v14490_v2  ;;  %v11257_v59 = vld [vmem:[%s13734_s15 + $0x38] sm:$0x1]  ;;  %v11347_v44 = vrot.slane %v11303_v20, 9 }
 0x1bf   : > { %v4542_v53 = vpop.f32.mrf.mxu3  ;;  %v2106_v9 = vshll.u32 %v11257_v59, 16  ;;  %v2104_v45 = vrot.slane %v2103_v16, 4  ;;  %v11389_v16 = vld [vmem:[#allocation3 + $0x3c] sm:$0xf0] }
 0x1c0   : > { %v4543_v13 = vadd.f32 %v4542_v53, %v4454_v58  ;;  %v2093_v53 = vor.u32 %v2092_v21, %v2089_v34  ;;  %v11221_v34 = vld [vmem:[%s13734_s15 + $0x30] sm:$0xf]  ;;  %v11222_v21 = vld [vmem:[%s13734_s15 + $0x34] sm:$0xf] }
 0x1c1   : > { %1962 = vst [vmem:[#allocation3 + $0xa8] sm:$0xf] %v11221_v34 }
 0x1c2   : > { %4495 = vmatmul.bf16.gmra.mxu2 %v11912_v23  ;;  %v14826_v2 = vadd.f32 %v14781_v27, %v4543_v13  ;;  %v11304_v23 = vld [vmem:[%s13734_s15 + $0x34] sm:$0xf]  ;;  %v11305_v13 = vld [vmem:[%s13734_s15 + $0x38] sm:$0x1]  ;;  %v2094_v62 = vrot.slane %v2093_v53, 4 }
 0x1c3   : > { %v4723_v38 = vpop.f32.mrf.mxu1  ;;  %v2598_v7 = vrot.slane %v11304_v23, 5  ;;  %v2601_v46 = vrot.slane %v11305_v13, 5  ;;  %v13195_v53 = vld [vmem:[#allocation3 + $0x38] sm:$0xf0]  ;;  %1963 = vst [vmem:[#allocation3 + $0xcc] sm:$0xf] %v11222_v21 }
 0x1c4   : > { %4584 = vmatmul.bf16.gmra.mxu3 %v11916_v36  ;;  %v2108_v36 = vrot.slane %v2106_v9, 5  ;;  %v2099_v59 = vsel %vm13858_vm2, %v2094_v62, %v2098_v6 }
 0x1c5   : > { %v4456_v55 = vpop.f32.mrf.mxu2  ;;  %v14829_v58 = vpop.f32.mrf.mxu0  ;;  %v2600_v8 = vrot.slane %v2598_v7, 4  ;;  %2458 = vst [vmem:[#allocation3 + $0xac] sm:$0xf] %v2099_v59 }
 0x1c6   : > { %v4457_v27 = vadd.f32 %v4456_v55, %v14507_v61  ;;  %4762 = vmatmul.bf16.gmra.mxu1 %v11924_v35  ;;  %v2109_v35 = vsel %vm13858_vm2, %v2104_v45, %v2108_v36  ;;  %v11387_v55 = vld [vmem:[#allocation3 + $0x18] sm:$0xf]  ;;  %v11259_v45 = vld [vmem:[%s13734_s15 + $0x40] sm:$0xf] }
 0x1c7   : > { %v4545_v47 = vpop.f32.mrf.mxu3  ;;  %2459 = vst [vmem:[#allocation3 + $0xd0] sm:$0xf] %v2109_v35  ;;  %v2120_v21 = vshll.u32 %v11259_v45, 16  ;;  %v2124_v59 = vshrl.u32 %v11259_v45, 16 }
 0x1c8   : > { %v4546_v41 = vadd.f32 %v4545_v47, %v4457_v27  ;;  %4954 = vmatmul.bf16.vlgmr.msra.gmra.mxu0 %v11396_v24  ;;  %v2599_v24 = vsel %vm14112_vm5, %v11347_v44, %v2598_v7  ;;  %v13191_v27 = vld [vmem:[#allocation3 + $0x1c] sm:$0xf]  ;;  %v11388_v47 = vor.u32 %v13195_v53, %v11387_v55  ;;  %v11431_v44 = vld [vmem:[#allocation3 + $0x68] sm:$0xf]  ;;  %v13205_v7 = vld [vmem:[#allocation3 + $0x88] sm:$0xf0] }
 0x1c9   : > { %2730 = vst [vmem:[#allocation3 + $0xb0] sm:$0xf] %v2599_v24  ;;  %v11392_v36 = vor.u32 %v13191_v27, %v11389_v16  ;;  %v2122_v55 = vrot.slane %v2120_v21, 5  ;;  %v11432_v53 = vor.u32 %v13205_v7, %v11431_v44  ;;  %v13551_v24 = vld [vmem:[%s17019_s3 + $0x18] sm:$0xff]  ;;  %v11308_v44 = vld [vmem:[%s13734_s15 + $0x44] sm:$0x1] }
 0x1ca   : > { %v4635_v61 = vadd.f32 %v14800_v63, %v4546_v41  ;;  %v2602_v63 = vsel %vm14112_vm5, %v2600_v8, %v2601_v46  ;;  %v11258_v41 = vld [vmem:[%s13734_s15 + $0x3c] sm:$0xf]  ;;  %9637 = vmatpush.bf16.msra.mxu1 %v13551_v24 }
 0x1cb   : > { %v14842_v9 = vpop.f32.mrf.mxu1  ;;  %2731 = vst [vmem:[#allocation3 + $0xd4] sm:$0xf] %v2602_v63  ;;  %v2111_v46 = vshrl.u32 %v11258_v41, 16  ;;  %v2114_v34 = vshll.u32 %v11258_v41, 16  ;;  %v11260_v63 = vld [vmem:[%s13734_s15 + $0x44] sm:$0x1] }
 0x1cc   : > { %17028 = vst [vmem:[#allocation5_spill] sm:$0xff] %v14842_v9  ;;  %v14846_v23 = vadd.f32 %v4723_v38, %v4635_v61  ;;  %v2608_v9 = vrot.slane %v11308_v44, 5 }
 0x1cd   : > { %v4458_v6 = vpop.f32.mrf.mxu2  ;;  %v14850_v20 = vpop.f32.mrf.mxu0  ;;  %v2113_v35 = vrot.slane %v2111_v46, 4  ;;  %v2116_v8 = vrot.slane %v2114_v34, 5 }
 0x1ce   : > { %v4459_v13 = vadd.f32 %v4458_v6, %v14530_v10  ;;  %v2126_v6 = vrot.slane %v2124_v59, 4 }
 0x1cf   : > { %v4547_v62 = vpop.f32.mrf.mxu3 }
 0x1d0   : > { %v4548_v38 = vadd.f32 %v4547_v62, %v4459_v13  ;;  %v2117_v13 = vor.u32 %v2116_v8, %v2113_v35  ;;  %v11223_v35 = vld [vmem:[%s13734_s15 + $0x3c] sm:$0xf]  ;;  %v11224_v8 = vld [vmem:[%s13734_s15 + $0x40] sm:$0xf] }
 0x1d1   : > { %1964 = vst [vmem:[#allocation3 + $0xf0] sm:$0xf] %v11223_v35 }
 0x1d2   : > { %4776 = vmatmul.bf16.vlgmr.msra.gmra.mxu2 %v11388_v47  ;;  %v14856_v61 = vadd.f32 %v14820_v19, %v4548_v38  ;;  %v2130_v19 = vshll.u32 %v11260_v63, 16  ;;  %v11307_v47 = vld [vmem:[%s13734_s15 + $0x40] sm:$0xf]  ;;  %v2127_v38 = vor.u32 %v2126_v6, %v2122_v55  ;;  %v2118_v45 = vrot.slane %v2117_v13, 4  ;;  %v13204_v13 = vld [vmem:[#allocation3 + $0x80] sm:$0xf0] }
 0x1d3   : > { %v4728_v10 = vpop.f32.mrf.mxu1  ;;  %v2605_v59 = vrot.slane %v11307_v47, 5  ;;  %1965 = vst [vmem:[#allocation3 + $0x114] sm:$0xf] %v11224_v8 }
 0x1d4   : > { %4865 = vmatmul.bf16.vlgmr.msra.gmra.mxu3 %v11392_v36  ;;  %v11306_v36 = vld [vmem:[%s13734_s15 + $0x3c] sm:$0xe]  ;;  %v2132_v7 = vrot.slane %v2130_v19, 5  ;;  %v2128_v21 = vrot.slane %v2127_v38, 4  ;;  %v2123_v63 = vsel %vm13858_vm2, %v2118_v45, %v2122_v55  ;;  %v11425_v38 = vld [vmem:[#allocation3 + $0x84] sm:$0xf0] }
 0x1d5   : > { %v4461_v27 = vpop.f32.mrf.mxu2  ;;  %v14862_v16 = vpop.f32.mrf.mxu0  ;;  %v11348_v46 = vrot.slane %v11306_v36, 9  ;;  %v2607_v6 = vrot.slane %v2605_v59, 4  ;;  %2460 = vst [vmem:[#allocation3 + $0xf4] sm:$0xf] %v2123_v63 }
 0x1d6   : > { %v4462_v62 = vadd.f32 %v4461_v27, %v14240_v32  ;;  %v2133_v24 = vsel %vm13858_vm2, %v2128_v21, %v2132_v7  ;;  %v11423_v27 = vld [vmem:[#allocation3 + $0x60] sm:$0xf]  ;;  %v11262_v21 = vld [vmem:[%s13734_s15 + $0x4c] sm:$0xf] }
 0x1d7   : > { %v4550_v41 = vpop.f32.mrf.mxu3  ;;  %2461 = vst [vmem:[#allocation3 + $0x118] sm:$0xf] %v2133_v24  ;;  %v2144_v8 = vshll.u32 %v11262_v21, 16  ;;  %v2148_v63 = vshrl.u32 %v11262_v21, 16 }
 0x1d8   : > { %v4551_v34 = vadd.f32 %v4550_v41, %v4462_v62  ;;  %4959 = vmatmul.bf16.gmra.mxu0 %v11432_v53  ;;  %v2606_v53 = vsel %vm14112_vm5, %v11348_v46, %v2605_v59  ;;  %v13200_v62 = vld [vmem:[#allocation3 + $0x64] sm:$0xf]  ;;  %v11424_v41 = vor.u32 %v13204_v13, %v11423_v27  ;;  %v11467_v46 = vld [vmem:[#allocation3 + $0xb0] sm:$0xf]  ;;  %v13214_v59 = vld [vmem:[#allocation3 + $0xd0] sm:$0xf0] }
 0x1d9   : > { %2732 = vst [vmem:[#allocation3 + $0xf8] sm:$0xf] %v2606_v53  ;;  %v11428_v7 = vor.u32 %v13200_v62, %v11425_v38  ;;  %v2146_v27 = vrot.slane %v2144_v8, 5  ;;  %v11468_v13 = vor.u32 %v13214_v59, %v11467_v46  ;;  %v11263_v53 = vld [vmem:[%s13734_s15 + $0x50] sm:$0x1] }
 0x1da   : > { %v4640_v32 = vadd.f32 %v14829_v58, %v4551_v34  ;;  %v2609_v58 = vsel %vm14112_vm5, %v2607_v6, %v2608_v9  ;;  %v11261_v34 = vld [vmem:[%s13734_s15 + $0x48] sm:$0xf] }
 0x1db   : > { %v14875_v19 = vpop.f32.mrf.mxu1  ;;  %2733 = vst [vmem:[#allocation3 + $0x11c] sm:$0xf] %v2609_v58  ;;  %v2135_v9 = vshrl.u32 %v11261_v34, 16  ;;  %v2138_v35 = vshll.u32 %v11261_v34, 16  ;;  %v2150_v58 = vrot.slane %v2148_v63, 4 }
 0x1dc   : > { %17029 = vst [vmem:[#allocation6_spill] sm:$0xff] %v14875_v19  ;;  %v14879_v47 = vadd.f32 %v4728_v10, %v4640_v32  ;;  %v11311_v34 = vld [vmem:[%s13734_s15 + $0x50] sm:$0x1]  ;;  %v11225_v19 = vld [vmem:[%s13734_s15 + $0x48] sm:$0xf] }
 0x1dd   : > { %v4463_v55 = vpop.f32.mrf.mxu2  ;;  %v14883_v36 = vpop.f32.mrf.mxu0  ;;  %v2137_v24 = vrot.slane %v2135_v9, 4  ;;  %v2140_v6 = vrot.slane %v2138_v35, 5  ;;  %v2615_v63 = vrot.slane %v11311_v34, 5  ;;  %1966 = vst [vmem:[#allocation3 + $0x138] sm:$0xf] %v11225_v19 }
 0x1de   : > { %v4464_v44 = vadd.f32 %v4463_v55, %v14256_v40 }
 0x1df   : > { %v4552_v45 = vpop.f32.mrf.mxu3  ;;  %v2141_v38 = vor.u32 %v2140_v6, %v2137_v24  ;;  %v11226_v24 = vld [vmem:[%s13734_s15 + $0x4c] sm:$0xf] }
 0x1e0   : > { %v4553_v10 = vadd.f32 %v4552_v45, %v4464_v44  ;;  %v2154_v44 = vshll.u32 %v11263_v53, 16  ;;  %v2151_v45 = vor.u32 %v2150_v58, %v2146_v27  ;;  %1967 = vst [vmem:[#allocation3 + $0x15c] sm:$0xf] %v11226_v24 }
 0x1e1   : > { %v2142_v9 = vrot.slane %v2141_v38, 4  ;;  %v13213_v38 = vld [vmem:[#allocation3 + $0xc8] sm:$0xf0] }
 0x1e2   : > { %4781 = vmatmul.bf16.gmra.mxu2 %v11424_v41  ;;  %v14889_v32 = vadd.f32 %v14850_v20, %v4553_v10  ;;  %v11310_v41 = vld [vmem:[%s13734_s15 + $0x4c] sm:$0xf]  ;;  %v11309_v10 = vld [vmem:[%s13734_s15 + $0x48] sm:$0xe]  ;;  %v2156_v35 = vrot.slane %v2154_v44, 5  ;;  %v2152_v59 = vrot.slane %v2151_v45, 4 }
 0x1e3   : > { %v4733_v40 = vpop.f32.mrf.mxu1  ;;  %v2612_v8 = vrot.slane %v11310_v41, 5  ;;  %v2147_v6 = vsel %vm13858_vm2, %v2142_v9, %v2146_v27  ;;  %v13209_v27 = vld [vmem:[#allocation3 + $0xac] sm:$0xf] }
 0x1e4   : > { %4870 = vmatmul.bf16.gmra.mxu3 %v11428_v7  ;;  %v11349_v7 = vrot.slane %v11309_v10, 9  ;;  %2462 = vst [vmem:[#allocation3 + $0x13c] sm:$0xf] %v2147_v6 }
 0x1e5   : > { %v4466_v55 = vpop.f32.mrf.mxu2  ;;  %v14892_v62 = vpop.f32.mrf.mxu0  ;;  %v2614_v58 = vrot.slane %v2612_v8, 4 }
 0x1e6   : > { %v4467_v20 = vadd.f32 %v4466_v55, %v14277_v56  ;;  %v2157_v56 = vsel %vm13858_vm2, %v2152_v59, %v2156_v35  ;;  %v11459_v55 = vld [vmem:[#allocation3 + $0xa8] sm:$0xf]  ;;  %v11503_v35 = vld [vmem:[#allocation3 + $0xf8] sm:$0xf]  ;;  %v13223_v59 = vld [vmem:[#allocation3 + $0x118] sm:$0xf0] }
 0x1e7   : > { %v4555_v21 = vpop.f32.mrf.mxu3  ;;  %2463 = vst [vmem:[#allocation3 + $0x160] sm:$0xf] %v2157_v56  ;;  %v11460_v34 = vor.u32 %v13213_v38, %v11459_v55  ;;  %v11504_v38 = vor.u32 %v13223_v59, %v11503_v35  ;;  %v11314_v35 = vld [vmem:[%s13734_s15 + $0x5c] sm:$0x1] }
 0x1e8   : > { %v4556_v46 = vadd.f32 %v4555_v21, %v4467_v20  ;;  %4964 = vmatmul.bf16.gmra.mxu0 %v11468_v13  ;;  %v2613_v13 = vsel %vm14112_vm5, %v11349_v7, %v2612_v8  ;;  %v11461_v20 = vld [vmem:[#allocation3 + $0xcc] sm:$0xf0]  ;;  %v11264_v7 = vld [vmem:[%s13734_s15 + $0x54] sm:$0xf] }
 0x1e9   : > { %2734 = vst [vmem:[#allocation3 + $0x140] sm:$0xf] %v2613_v13  ;;  %v11464_v9 = vor.u32 %v13209_v27, %v11461_v20  ;;  %v2159_v8 = vshrl.u32 %v11264_v7, 16  ;;  %v13550_v13 = vld [vmem:[%s17019_s3 + $0x10] sm:$0xff] }
 0x1ea   : > { %v4645_v53 = vadd.f32 %v14862_v16, %v4556_v46  ;;  %v2616_v16 = vsel %vm14112_vm5, %v2614_v58, %v2615_v63  ;;  %v11265_v46 = vld [vmem:[%s13734_s15 + $0x58] sm:$0xf]  ;;  %v2162_v63 = vshll.u32 %v11264_v7, 16  ;;  %9638 = vmatpush.bf16.msra.mxu1 %v13550_v13 }
 0x1eb   : > { %v14905_v44 = vpop.f32.mrf.mxu1  ;;  %2735 = vst [vmem:[#allocation3 + $0x164] sm:$0xf] %v2616_v16  ;;  %v2168_v24 = vshll.u32 %v11265_v46, 16  ;;  %v2172_v6 = vshrl.u32 %v11265_v46, 16  ;;  %v2161_v56 = vrot.slane %v2159_v8, 4 }
 0x1ec   : > { %17030 = vst [vmem:[#allocation7_spill] sm:$0xff] %v14905_v44  ;;  %v14909_v41 = vadd.f32 %v4733_v40, %v4645_v53  ;;  %v2164_v58 = vrot.slane %v2162_v63, 5  ;;  %v11266_v16 = vld [vmem:[%s13734_s15 + $0x5c] sm:$0x1]  ;;  %v2622_v44 = vrot.slane %v11314_v35, 5 }
 0x1ed   : > { %v4468_v19 = vpop.f32.mrf.mxu2  ;;  %v14913_v45 = vpop.f32.mrf.mxu0  ;;  %v2170_v55 = vrot.slane %v2168_v24, 5 }
 0x1ee   : > { %v4469_v10 = vadd.f32 %v4468_v19, %v14291_v30  ;;  %v2174_v19 = vrot.slane %v2172_v6, 4 }
 0x1ef   : > { %v4557_v21 = vpop.f32.mrf.mxu3 }
 0x1f0   : > { %v4558_v40 = vadd.f32 %v4557_v21, %v4469_v10  ;;  %v2165_v10 = vor.u32 %v2164_v58, %v2161_v56  ;;  %v11227_v56 = vld [vmem:[%s13734_s15 + $0x54] sm:$0xf]  ;;  %v11228_v58 = vld [vmem:[%s13734_s15 + $0x58] sm:$0xf] }
 0x1f1   : > { %1968 = vst [vmem:[#allocation3 + $0x180] sm:$0xf] %v11227_v56 }
 0x1f2   : > { %4786 = vmatmul.bf16.gmra.mxu2 %v11460_v34  ;;  %v14919_v53 = vadd.f32 %v14883_v36, %v4558_v40  ;;  %v2178_v36 = vshll.u32 %v11266_v16, 16  ;;  %v11313_v34 = vld [vmem:[%s13734_s15 + $0x58] sm:$0xf]  ;;  %v2175_v40 = vor.u32 %v2174_v19, %v2170_v55  ;;  %v2166_v46 = vrot.slane %v2165_v10, 4  ;;  %v13222_v10 = vld [vmem:[#allocation3 + $0x110] sm:$0xf0] }
 0x1f3   : > { %v4738_v30 = vpop.f32.mrf.mxu1  ;;  %v2619_v6 = vrot.slane %v11313_v34, 5  ;;  %1969 = vst [vmem:[#allocation3 + $0x1a4] sm:$0xf] %v11228_v58 }
 0x1f4   : > { %4875 = vmatmul.bf16.gmra.mxu3 %v11464_v9  ;;  %v11312_v9 = vld [vmem:[%s13734_s15 + $0x54] sm:$0xe]  ;;  %v2180_v59 = vrot.slane %v2178_v36, 5  ;;  %v2176_v24 = vrot.slane %v2175_v40, 4  ;;  %v2171_v16 = vsel %vm13858_vm2, %v2166_v46, %v2170_v55  ;;  %v11497_v40 = vld [vmem:[#allocation3 + $0x114] sm:$0xf0] }
 0x1f5   : > { %v4471_v27 = vpop.f32.mrf.mxu2  ;;  %v14925_v20 = vpop.f32.mrf.mxu0  ;;  %v11350_v8 = vrot.slane %v11312_v9, 9  ;;  %v2621_v19 = vrot.slane %v2619_v6, 4  ;;  %2464 = vst [vmem:[#allocation3 + $0x184] sm:$0xf] %v2171_v16 }
 0x1f6   : > { %v4472_v21 = vadd.f32 %v4471_v27, %v14319_v11  ;;  %v2181_v13 = vsel %vm13858_vm2, %v2176_v24, %v2180_v59  ;;  %v11495_v27 = vld [vmem:[#allocation3 + $0xf0] sm:$0xf]  ;;  %v11268_v24 = vld [vmem:[%s13734_s15 + $0x64] sm:$0xf] }
 0x1f7   : > { %v4560_v7 = vpop.f32.mrf.mxu3  ;;  %2465 = vst [vmem:[#allocation3 + $0x1a8] sm:$0xf] %v2181_v13  ;;  %v2192_v58 = vshll.u32 %v11268_v24, 16  ;;  %v2196_v16 = vshrl.u32 %v11268_v24, 16 }
 0x1f8   : > { %v4561_v63 = vadd.f32 %v4560_v7, %v4472_v21  ;;  %4969 = vmatmul.bf16.gmra.mxu0 %v11504_v38  ;;  %v2620_v38 = vsel %vm14112_vm5, %v11350_v8, %v2619_v6  ;;  %v13218_v21 = vld [vmem:[#allocation3 + $0xf4] sm:$0xf]  ;;  %v11496_v7 = vor.u32 %v13222_v10, %v11495_v27  ;;  %v11539_v8 = vld [vmem:[#allocation3 + $0x140] sm:$0xf]  ;;  %v13232_v6 = vld [vmem:[#allocation3 + $0x160] sm:$0xf0] }
 0x1f9   : > { %2736 = vst [vmem:[#allocation3 + $0x188] sm:$0xf] %v2620_v38  ;;  %v11500_v59 = vor.u32 %v13218_v21, %v11497_v40  ;;  %v2194_v27 = vrot.slane %v2192_v58, 5  ;;  %v11540_v10 = vor.u32 %v13232_v6, %v11539_v8  ;;  %v11269_v38 = vld [vmem:[%s13734_s15 + $0x68] sm:$0x1] }
 0x1fa   : > { %v4650_v11 = vadd.f32 %v14892_v62, %v4561_v63  ;;  %v2623_v62 = vsel %vm14112_vm5, %v2621_v19, %v2622_v44  ;;  %v11267_v63 = vld [vmem:[%s13734_s15 + $0x60] sm:$0xf] }
 0x1fb   : > { %v14938_v36 = vpop.f32.mrf.mxu1  ;;  %2737 = vst [vmem:[#allocation3 + $0x1ac] sm:$0xf] %v2623_v62  ;;  %v2183_v44 = vshrl.u32 %v11267_v63, 16  ;;  %v2186_v56 = vshll.u32 %v11267_v63, 16  ;;  %v2198_v62 = vrot.slane %v2196_v16, 4 }
 0x1fc   : > { %17031 = vst [vmem:[#allocation8_spill] sm:$0xff] %v14938_v36  ;;  %v14942_v34 = vadd.f32 %v4738_v30, %v4650_v11  ;;  %v11317_v63 = vld [vmem:[%s13734_s15 + $0x68] sm:$0x1]  ;;  %v11229_v36 = vld [vmem:[%s13734_s15 + $0x60] sm:$0xf] }
 0x1fd   : > { %v4473_v55 = vpop.f32.mrf.mxu2  ;;  %v14946_v9 = vpop.f32.mrf.mxu0  ;;  %v2185_v13 = vrot.slane %v2183_v44, 4  ;;  %v2188_v19 = vrot.slane %v2186_v56, 5  ;;  %v2629_v16 = vrot.slane %v11317_v63, 5  ;;  %1970 = vst [vmem:[#allocation3 + $0x1c8] sm:$0xf] %v11229_v36 }
 0x1fe   : > { %v4474_v35 = vadd.f32 %v4473_v55, %v14335_v50 }
 0x1ff   : > { %v4562_v46 = vpop.f32.mrf.mxu3  ;;  %v2189_v40 = vor.u32 %v2188_v19, %v2185_v13  ;;  %v11230_v13 = vld [vmem:[%s13734_s15 + $0x64] sm:$0xf] }
 0x200   : > { %v4563_v30 = vadd.f32 %v4562_v46, %v4474_v35  ;;  %v2202_v35 = vshll.u32 %v11269_v38, 16  ;;  %v2199_v46 = vor.u32 %v2198_v62, %v2194_v27  ;;  %1971 = vst [vmem:[#allocation3 + $0x1ec] sm:$0xf] %v11230_v13 }
 0x201   : > { %v2190_v44 = vrot.slane %v2189_v40, 4  ;;  %v13231_v40 = vld [vmem:[#allocation3 + $0x158] sm:$0xf0] }
 0x202   : > { %4791 = vmatmul.bf16.gmra.mxu2 %v11496_v7  ;;  %v14952_v11 = vadd.f32 %v14913_v45, %v4563_v30  ;;  %v11316_v7 = vld [vmem:[%s13734_s15 + $0x64] sm:$0xf]  ;;  %v11315_v30 = vld [vmem:[%s13734_s15 + $0x60] sm:$0xe]  ;;  %v2204_v56 = vrot.slane %v2202_v35, 5  ;;  %v2200_v6 = vrot.slane %v2199_v46, 4 }
 0x203   : > { %v4743_v50 = vpop.f32.mrf.mxu1  ;;  %v2626_v58 = vrot.slane %v11316_v7, 5  ;;  %v2195_v19 = vsel %vm13858_vm2, %v2190_v44, %v2194_v27  ;;  %v13227_v27 = vld [vmem:[#allocation3 + $0x13c] sm:$0xf] }
 0x204   : > { %4880 = vmatmul.bf16.gmra.mxu3 %v11500_v59  ;;  %v11351_v59 = vrot.slane %v11315_v30, 9  ;;  %2466 = vst [vmem:[#allocation3 + $0x1cc] sm:$0xf] %v2195_v19 }
 0x205   : > { %v4476_v55 = vpop.f32.mrf.mxu2  ;;  %v14955_v21 = vpop.f32.mrf.mxu0  ;;  %v2628_v62 = vrot.slane %v2626_v58, 4 }
 0x206   : > { %v4477_v45 = vadd.f32 %v4476_v55, %v14357_v37  ;;  %v2205_v37 = vsel %vm13858_vm2, %v2200_v6, %v2204_v56  ;;  %v11531_v55 = vld [vmem:[#allocation3 + $0x138] sm:$0xf]  ;;  %v11575_v56 = vld [vmem:[#allocation3 + $0x188] sm:$0xf]  ;;  %v13241_v6 = vld [vmem:[#allocation3 + $0x1a8] sm:$0xf0] }
 0x207   : > { %v4565_v24 = vpop.f32.mrf.mxu3  ;;  %2467 = vst [vmem:[#allocation3 + $0x1f0] sm:$0xf] %v2205_v37  ;;  %v11532_v63 = vor.u32 %v13231_v40, %v11531_v55  ;;  %v11576_v40 = vor.u32 %v13241_v6, %v11575_v56  ;;  %v11320_v56 = vld [vmem:[%s13734_s15 + $0x74] sm:$0x1] }
 0x208   : > { %v4566_v8 = vadd.f32 %v4565_v24, %v4477_v45  ;;  %4974 = vmatmul.bf16.gmra.mxu0 %v11540_v10  ;;  %v2627_v10 = vsel %vm14112_vm5, %v11351_v59, %v2626_v58  ;;  %v11533_v45 = vld [vmem:[#allocation3 + $0x15c] sm:$0xf0]  ;;  %v11270_v59 = vld [vmem:[%s13734_s15 + $0x6c] sm:$0xf] }
 0x209   : > { %2738 = vst [vmem:[#allocation3 + $0x1d0] sm:$0xf] %v2627_v10  ;;  %v11536_v44 = vor.u32 %v13227_v27, %v11533_v45  ;;  %v2207_v58 = vshrl.u32 %v11270_v59, 16  ;;  %v13549_v10 = vld [vmem:[%s17019_s3 + $0x8] sm:$0xff] }
 0x20a   : > { %v4655_v38 = vadd.f32 %v14925_v20, %v4566_v8  ;;  %v2630_v20 = vsel %vm14112_vm5, %v2628_v62, %v2629_v16  ;;  %v11271_v8 = vld [vmem:[%s13734_s15 + $0x70] sm:$0xf]  ;;  %v2210_v16 = vshll.u32 %v11270_v59, 16  ;;  %9639 = vmatpush.bf16.msra.mxu1 %v13549_v10 }
 0x20b   : > { %v14968_v35 = vpop.f32.mrf.mxu1  ;;  %2739 = vst [vmem:[#allocation3 + $0x1f4] sm:$0xf] %v2630_v20  ;;  %v2216_v13 = vshll.u32 %v11271_v8, 16  ;;  %v2220_v19 = vshrl.u32 %v11271_v8, 16  ;;  %v2209_v37 = vrot.slane %v2207_v58, 4 }
 0x20c   : > { %17032 = vst [vmem:[#allocation9_spill] sm:$0xff] %v14968_v35  ;;  %v14972_v7 = vadd.f32 %v4743_v50, %v4655_v38  ;;  %v2212_v62 = vrot.slane %v2210_v16, 5  ;;  %v11272_v20 = vld [vmem:[%s13734_s15 + $0x74] sm:$0x1]  ;;  %v2636_v35 = vrot.slane %v11320_v56, 5 }
 0x20d   : > { %v4478_v36 = vpop.f32.mrf.mxu2  ;;  %v14976_v46 = vpop.f32.mrf.mxu0  ;;  %v2218_v55 = vrot.slane %v2216_v13, 5 }
 0x20e   : > { %v4479_v30 = vadd.f32 %v4478_v36, %v14370_v29  ;;  %v2222_v36 = vrot.slane %v2220_v19, 4 }
 0x20f   : > { %v4567_v24 = vpop.f32.mrf.mxu3 }
 0x210   : > { %v4568_v50 = vadd.f32 %v4567_v24, %v4479_v30  ;;  %v2213_v30 = vor.u32 %v2212_v62, %v2209_v37  ;;  %v11231_v37 = vld [vmem:[%s13734_s15 + $0x6c] sm:$0xf]  ;;  %v11232_v62 = vld [vmem:[%s13734_s15 + $0x70] sm:$0xf] }
 0x211   : > { %1972 = vst [vmem:[#allocation3 + $0x210] sm:$0xf] %v11231_v37 }
 0x212   : > { %4796 = vmatmul.bf16.gmra.mxu2 %v11532_v63  ;;  %v14982_v38 = vadd.f32 %v14946_v9, %v4568_v50  ;;  %v2226_v9 = vshll.u32 %v11272_v20, 16  ;;  %v11319_v63 = vld [vmem:[%s13734_s15 + $0x70] sm:$0xf]  ;;  %v2223_v50 = vor.u32 %v2222_v36, %v2218_v55  ;;  %v2214_v8 = vrot.slane %v2213_v30, 4  ;;  %v13240_v30 = vld [vmem:[#allocation3 + $0x1a0] sm:$0xf0] }
 0x213   : > { %v4748_v29 = vpop.f32.mrf.mxu1  ;;  %v2633_v19 = vrot.slane %v11319_v63, 5  ;;  %1973 = vst [vmem:[#allocation3 + $0x234] sm:$0xf] %v11232_v62 }
 0x214   : > { %4885 = vmatmul.bf16.gmra.mxu3 %v11536_v44  ;;  %v11318_v44 = vld [vmem:[%s13734_s15 + $0x6c] sm:$0xe]  ;;  %v2228_v6 = vrot.slane %v2226_v9, 5  ;;  %v2224_v13 = vrot.slane %v2223_v50, 4  ;;  %v2219_v20 = vsel %vm13858_vm2, %v2214_v8, %v2218_v55  ;;  %v11569_v50 = vld [vmem:[#allocation3 + $0x1a4] sm:$0xf0] }
 0x215   : > { %v4481_v27 = vpop.f32.mrf.mxu2  ;;  %v14988_v45 = vpop.f32.mrf.mxu0  ;;  %v11352_v58 = vrot.slane %v11318_v44, 9  ;;  %v2635_v36 = vrot.slane %v2633_v19, 4  ;;  %2468 = vst [vmem:[#allocation3 + $0x214] sm:$0xf] %v2219_v20 }
 0x216   : > { %v4482_v24 = vadd.f32 %v4481_v27, %v14398_v4  ;;  %v2229_v10 = vsel %vm13858_vm2, %v2224_v13, %v2228_v6  ;;  %v11567_v27 = vld [vmem:[#allocation3 + $0x180] sm:$0xf]  ;;  %v11274_v13 = vld [vmem:[%s13734_s15 + $0x7c] sm:$0xf] }
 0x217   : > { %v4570_v59 = vpop.f32.mrf.mxu3  ;;  %2469 = vst [vmem:[#allocation3 + $0x238] sm:$0xf] %v2229_v10  ;;  %v2240_v62 = vshll.u32 %v11274_v13, 16  ;;  %v2244_v20 = vshrl.u32 %v11274_v13, 16 }
 0x218   : > { %v4571_v16 = vadd.f32 %v4570_v59, %v4482_v24  ;;  %4979 = vmatmul.bf16.gmra.mxu0 %v11576_v40  ;;  %v2634_v40 = vsel %vm14112_vm5, %v11352_v58, %v2633_v19  ;;  %v13236_v24 = vld [vmem:[#allocation3 + $0x184] sm:$0xf]  ;;  %v11568_v59 = vor.u32 %v13240_v30, %v11567_v27  ;;  %v11611_v58 = vld [vmem:[#allocation3 + $0x1d0] sm:$0xf]  ;;  %v13250_v19 = vld [vmem:[#allocation3 + $0x1f0] sm:$0xf0] }
 0x219   : > { %2740 = vst [vmem:[#allocation3 + $0x218] sm:$0xf] %v2634_v40  ;;  %v11572_v6 = vor.u32 %v13236_v24, %v11569_v50  ;;  %v2242_v27 = vrot.slane %v2240_v62, 5  ;;  %v11612_v30 = vor.u32 %v13250_v19, %v11611_v58  ;;  %v11275_v40 = vld [vmem:[%s13734_s15 + $0x80] sm:$0x1] }
 0x21a   : > { %v4660_v4 = vadd.f32 %v14955_v21, %v4571_v16  ;;  %v2637_v21 = vsel %vm14112_vm5, %v2635_v36, %v2636_v35  ;;  %v11273_v16 = vld [vmem:[%s13734_s15 + $0x78] sm:$0xf] }
 0x21b   : > { %v15001_v9 = vpop.f32.mrf.mxu1  ;;  %2741 = vst [vmem:[#allocation3 + $0x23c] sm:$0xf] %v2637_v21  ;;  %v2231_v35 = vshrl.u32 %v11273_v16, 16  ;;  %v2234_v37 = vshll.u32 %v11273_v16, 16  ;;  %v2246_v21 = vrot.slane %v2244_v20, 4 }
 0x21c   : > { %17033 = vst [vmem:[#allocation10_spill] sm:$0xff] %v15001_v9  ;;  %v15005_v63 = vadd.f32 %v4748_v29, %v4660_v4  ;;  %v11323_v16 = vld [vmem:[%s13734_s15 + $0x80] sm:$0x1]  ;;  %v11233_v9 = vld [vmem:[%s13734_s15 + $0x78] sm:$0xf] }
 0x21d   : > { %v4483_v55 = vpop.f32.mrf.mxu2  ;;  %v15009_v44 = vpop.f32.mrf.mxu0  ;;  %v2233_v10 = vrot.slane %v2231_v35, 4  ;;  %v2236_v36 = vrot.slane %v2234_v37, 5  ;;  %v2643_v20 = vrot.slane %v11323_v16, 5  ;;  %1974 = vst [vmem:[#allocation3 + $0x258] sm:$0xf] %v11233_v9 }
 0x21e   : > { %v4484_v56 = vadd.f32 %v4483_v55, %v14414_v3 }
 0x21f   : > { %v4572_v8 = vpop.f32.mrf.mxu3  ;;  %v2237_v50 = vor.u32 %v2236_v36, %v2233_v10  ;;  %v11234_v10 = vld [vmem:[%s13734_s15 + $0x7c] sm:$0xf] }
 0x220   : > { %v4573_v29 = vadd.f32 %v4572_v8, %v4484_v56  ;;  %v2250_v56 = vshll.u32 %v11275_v40, 16  ;;  %v2247_v8 = vor.u32 %v2246_v21, %v2242_v27  ;;  %1975 = vst [vmem:[#allocation3 + $0x27c] sm:$0xf] %v11234_v10 }
 0x221   : > { %v2238_v35 = vrot.slane %v2237_v50, 4  ;;  %v13249_v50 = vld [vmem:[#allocation3 + $0x1e8] sm:$0xf0] }
 0x222   : > { %4801 = vmatmul.bf16.gmra.mxu2 %v11568_v59  ;;  %v15015_v4 = vadd.f32 %v14976_v46, %v4573_v29  ;;  %v11322_v59 = vld [vmem:[%s13734_s15 + $0x7c] sm:$0xf]  ;;  %v11321_v29 = vld [vmem:[%s13734_s15 + $0x78] sm:$0xe]  ;;  %v2252_v37 = vrot.slane %v2250_v56, 5  ;;  %v2248_v19 = vrot.slane %v2247_v8, 4 }
 0x223   : > { %v4753_v3 = vpop.f32.mrf.mxu1  ;;  %v2640_v62 = vrot.slane %v11322_v59, 5  ;;  %v2243_v36 = vsel %vm13858_vm2, %v2238_v35, %v2242_v27  ;;  %v13245_v27 = vld [vmem:[#allocation3 + $0x1cc] sm:$0xf] }
 0x224   : > { %4890 = vmatmul.bf16.gmra.mxu3 %v11572_v6  ;;  %v11353_v6 = vrot.slane %v11321_v29, 9  ;;  %2470 = vst [vmem:[#allocation3 + $0x25c] sm:$0xf] %v2243_v36 }
 0x225   : > { %v4486_v55 = vpop.f32.mrf.mxu2  ;;  %v15018_v24 = vpop.f32.mrf.mxu0  ;;  %v2642_v21 = vrot.slane %v2640_v62, 4 }
 0x226   : > { %v4487_v46 = vadd.f32 %v4486_v55, %v14435_v48  ;;  %v2253_v48 = vsel %vm13858_vm2, %v2248_v19, %v2252_v37  ;;  %v11603_v55 = vld [vmem:[#allocation3 + $0x1c8] sm:$0xf]  ;;  %v11647_v37 = vld [vmem:[#allocation3 + $0x218] sm:$0xf]  ;;  %v13259_v19 = vld [vmem:[#allocation3 + $0x238] sm:$0xf0] }
 0x227   : > { %v4575_v13 = vpop.f32.mrf.mxu3  ;;  %2471 = vst [vmem:[#allocation3 + $0x280] sm:$0xf] %v2253_v48  ;;  %v11604_v16 = vor.u32 %v13249_v50, %v11603_v55  ;;  %v11648_v50 = vor.u32 %v13259_v19, %v11647_v37  ;;  %v11326_v37 = vld [vmem:[%s13734_s15 + $0x8c] sm:$0x1] }
 0x228   : > { %v4576_v58 = vadd.f32 %v4575_v13, %v4487_v46  ;;  %4984 = vmatmul.bf16.gmra.mxu0 %v11612_v30  ;;  %v2641_v30 = vsel %vm14112_vm5, %v11353_v6, %v2640_v62  ;;  %v11605_v46 = vld [vmem:[#allocation3 + $0x1ec] sm:$0xf0]  ;;  %v11276_v6 = vld [vmem:[%s13734_s15 + $0x84] sm:$0xf] }
 0x229   : > { %2742 = vst [vmem:[#allocation3 + $0x260] sm:$0xf] %v2641_v30  ;;  %v11608_v35 = vor.u32 %v13245_v27, %v11605_v46  ;;  %v2255_v62 = vshrl.u32 %v11276_v6, 16  ;;  %v13548_v30 = vld [vmem:[%s17019_s3] sm:$0xff] }
 0x22a   : > { %v4665_v40 = vadd.f32 %v14988_v45, %v4576_v58  ;;  %v2644_v45 = vsel %vm14112_vm5, %v2642_v21, %v2643_v20  ;;  %v11277_v58 = vld [vmem:[%s13734_s15 + $0x88] sm:$0xf]  ;;  %v2258_v20 = vshll.u32 %v11276_v6, 16  ;;  %9640 = vmatpush.bf16.msra.mxu1 %v13548_v30 }
 0x22b   : > { %v15031_v56 = vpop.f32.mrf.mxu1  ;;  %2743 = vst [vmem:[#allocation3 + $0x284] sm:$0xf] %v2644_v45  ;;  %v2264_v10 = vshll.u32 %v11277_v58, 16  ;;  %v2268_v36 = vshrl.u32 %v11277_v58, 16  ;;  %v11278_v45 = vld [vmem:[%s13734_s15 + $0x8c] sm:$0x1] }
 0x22c   : > { %17034 = vst [vmem:[#allocation11_spill] sm:$0xff] %v15031_v56  ;;  %v15035_v59 = vadd.f32 %v4753_v3, %v4665_v40  ;;  %v2260_v48 = vrot.slane %v2258_v20, 5  ;;  %v2650_v56 = vrot.slane %v11326_v37, 5 }
 0x22d   : > { %v4488_v9 = vpop.f32.mrf.mxu2  ;;  %v15039_v8 = vpop.f32.mrf.mxu0  ;;  %v2266_v21 = vrot.slane %v2264_v10, 5 }
 0x22e   : > { %17035 = vst [vmem:[#allocation12_spill] sm:$0xff] %v15035_v59  ;;  %v4489_v29 = vadd.f32 %v4488_v9, %v14449_v33  ;;  %v2257_v33 = vrot.slane %v2255_v62, 4  ;;  %v2270_v9 = vrot.slane %v2268_v36, 4 }
 0x22f   : > { %v4577_v13 = vpop.f32.mrf.mxu3 }
 0x230   : > { %v4578_v3 = vadd.f32 %v4577_v13, %v4489_v29  ;;  %v2261_v29 = vor.u32 %v2260_v48, %v2257_v33  ;;  %v11235_v33 = vld [vmem:[%s13734_s15 + $0x84] sm:$0xf]  ;;  %v11236_v48 = vld [vmem:[%s13734_s15 + $0x88] sm:$0xf] }
 0x231   : > { %1976 = vst [vmem:[#allocation3 + $0x2a0] sm:$0xf] %v11235_v33 }
 0x232   : > { %4806 = vmatmul.bf16.gmra.mxu2 %v11604_v16  ;;  %v15045_v40 = vadd.f32 %v15009_v44, %v4578_v3  ;;  %v2274_v44 = vshll.u32 %v11278_v45, 16  ;;  %v11325_v16 = vld [vmem:[%s13734_s15 + $0x88] sm:$0xf]  ;;  %v2271_v3 = vor.u32 %v2270_v9, %v2266_v21  ;;  %v2262_v58 = vrot.slane %v2261_v29, 4  ;;  %v13258_v29 = vld [vmem:[#allocation3 + $0x230] sm:$0xf0] }
 0x233   : > { %v4758_v55 = vpop.f32.mrf.mxu1  ;;  %v2647_v36 = vrot.slane %v11325_v16, 5  ;;  %1977 = vst [vmem:[#allocation3 + $0x2c4] sm:$0xf] %v11236_v48  ;;  %v13254_v16 = vld [vmem:[#allocation3 + $0x214] sm:$0xf] }
 0x234   : > { %17036 = vst [vmem:[#allocation13_spill] sm:$0xff] %v15045_v40  ;;  %4895 = vmatmul.bf16.gmra.mxu3 %v11608_v35  ;;  %v11324_v35 = vld [vmem:[%s13734_s15 + $0x84] sm:$0xe]  ;;  %v2276_v19 = vrot.slane %v2274_v44, 5  ;;  %v2272_v10 = vrot.slane %v2271_v3, 4  ;;  %v2267_v45 = vsel %vm13858_vm2, %v2262_v58, %v2266_v21 }
 0x235   : > { %v4491_v27 = vpop.f32.mrf.mxu2  ;;  %v15051_v46 = vpop.f32.mrf.mxu0  ;;  %v11354_v62 = vrot.slane %v11324_v35, 9  ;;  %v2649_v9 = vrot.slane %v2647_v36, 4  ;;  %2472 = vst [vmem:[#allocation3 + $0x2a4] sm:$0xf] %v2267_v45 }
 0x236   : > { %v4492_v13 = vadd.f32 %v4491_v27, %v14482_v42  ;;  %v2277_v30 = vsel %vm13858_vm2, %v2272_v10, %v2276_v19  ;;  %v11639_v27 = vld [vmem:[#allocation3 + $0x210] sm:$0xf]  ;;  %v13268_v10 = vld [vmem:[#allocation3 + $0x280] sm:$0xf0] }
 0x237   : > { %v4580_v6 = vpop.f32.mrf.mxu3  ;;  %v2651_v21 = vsel %vm14112_vm5, %v2649_v9, %v2650_v56  ;;  %2473 = vst [vmem:[#allocation3 + $0x2c8] sm:$0xf] %v2277_v30  ;;  %v11640_v37 = vor.u32 %v13258_v29, %v11639_v27  ;;  %v11279_v56 = vld [vmem:[%s13734_s15 + $0x90] sm:$0xf]  ;;  %v11281_v29 = vld [vmem:[%s13734_s15 + $0x98] sm:$0x1] }
 0x238   : > { %v4581_v20 = vadd.f32 %v4580_v6, %v4492_v13  ;;  %4989 = vmatmul.bf16.gmra.mxu0 %v11648_v50  ;;  %v2648_v50 = vsel %vm14112_vm5, %v11354_v62, %v2647_v36  ;;  %v11641_v13 = vld [vmem:[#allocation3 + $0x234] sm:$0xf0]  ;;  %2745 = vst [vmem:[#allocation3 + $0x2cc] sm:$0xf] %v2651_v21  ;;  %v11683_v62 = vld [vmem:[#allocation3 + $0x260] sm:$0xf] }
 0x239   : > { %2744 = vst [vmem:[#allocation3 + $0x2a8] sm:$0xf] %v2648_v50  ;;  %v11644_v19 = vor.u32 %v13254_v16, %v11641_v13  ;;  %v2279_v36 = vshrl.u32 %v11279_v56, 16  ;;  %v2282_v33 = vshll.u32 %v11279_v56, 16  ;;  %v11684_v27 = vor.u32 %v13268_v10, %v11683_v62  ;;  %v11328_v56 = vld [vmem:[%s13734_s15 + $0x94] sm:$0xf] }
 0x23a   : > { %v4670_v42 = vadd.f32 %v15018_v24, %v4581_v20  ;;  %v11280_v20 = vld [vmem:[%s13734_s15 + $0x94] sm:$0xf]  ;;  %v11329_v10 = vld [vmem:[%s13734_s15 + $0x98] sm:$0x1] }
 0x23b   : > { %v15073_v58 = vpop.f32.mrf.mxu1  ;;  %v2288_v48 = vshll.u32 %v11280_v20, 16  ;;  %v2292_v45 = vshrl.u32 %v11280_v20, 16  ;;  %v2284_v30 = vrot.slane %v2282_v33, 5 }
 0x23c   : > { %v15066_v44 = vadd.f32 %v4758_v55, %v4670_v42  ;;  %17038 = vst [vmem:[#allocation15_spill] sm:$0xff] %v15073_v58  ;;  %v2281_v42 = vrot.slane %v2279_v36, 4 }
 0x23d   : > { %v4493_v24 = vpop.f32.mrf.mxu2  ;;  %v15070_v3 = vpop.f32.mrf.mxu0  ;;  %v2290_v9 = vrot.slane %v2288_v48, 5  ;;  %v2294_v50 = vrot.slane %v2292_v45, 4  ;;  %v11675_v48 = vld [vmem:[#allocation3 + $0x258] sm:$0xf]  ;;  %v12275_v45 = vld [vmem:[#allocation3] sm:$0xf] }
 0x23e   : > { %17037 = vst [vmem:[#allocation14_spill] sm:$0xff] %v15066_v44  ;;  %v4494_v35 = vadd.f32 %v4493_v24, %v14498_v15  ;;  %v2285_v16 = vor.u32 %v2284_v30, %v2281_v42  ;;  %v13408_v42 = vld [vmem:[#allocation3 + $0x20] sm:$0xf0]  ;;  %v11237_v30 = vld [vmem:[%s13734_s15 + $0x90] sm:$0xf] }
 0x23f   : > { %v4582_v6 = vpop.f32.mrf.mxu3  ;;  %1978 = vst [vmem:[#allocation3 + $0x2e8] sm:$0xf] %v11237_v30  ;;  %v13277_v30 = vld [vmem:[#allocation3 + $0x2c8] sm:$0xf0] }
 0x240   : > { %v4583_v55 = vadd.f32 %v4582_v6, %v4494_v35  ;;  %v2295_v35 = vor.u32 %v2294_v50, %v2290_v9  ;;  %v2286_v6 = vrot.slane %v2285_v16, 4  ;;  %v12276_v50 = vor.u32 %v13408_v42, %v12275_v45  ;;  %v11719_v45 = vld [vmem:[#allocation3 + $0x2a8] sm:$0xf]  ;;  %v11282_v42 = vld [vmem:[%s13734_s15 + $0x9c] sm:$0xf] }
 0x241   : > { %v2654_v16 = vrot.slane %v11328_v56, 5 }
 0x242   : > { %4811 = vmatmul.bf16.gmra.mxu2 %v11640_v37  ;;  %v15078_v15 = vadd.f32 %v15039_v8, %v4583_v55  ;;  %v2298_v8 = vshll.u32 %v11281_v29, 16  ;;  %v11327_v55 = vld [vmem:[%s13734_s15 + $0x90] sm:$0xe]  ;;  %9641 = vmatmul.bf16.vlgmr.msra.gmra.mxu1 %v12276_v50  ;;  %v2306_v50 = vshll.u32 %v11282_v42, 16 }
 0x243   : > { %v11355_v36 = vrot.slane %v11327_v55, 9  ;;  %v4763_v33 = vpop.f32.mrf.mxu1  ;;  %v11677_v55 = vld [vmem:[#allocation3 + $0x27c] sm:$0xf0] }
 0x244   : > { %17039 = vst [vmem:[#allocation16_spill] sm:$0xff] %v15078_v15  ;;  %4900 = vmatmul.bf16.gmra.mxu3 %v11644_v19  ;;  %v2296_v19 = vrot.slane %v2295_v35, 4  ;;  %v2300_v62 = vrot.slane %v2298_v8, 5  ;;  %v2657_v35 = vrot.slane %v11329_v10, 5 }
 0x245   : > { %v4496_v21 = vpop.f32.mrf.mxu2  ;;  %v15081_v24 = vpop.f32.mrf.mxu0 }
 0x246   : > { %v4497_v13 = vadd.f32 %v4496_v21, %v14522_v43  ;;  %v2291_v43 = vsel %vm13858_vm2, %v2286_v6, %v2290_v9  ;;  %v11238_v21 = vld [vmem:[%s13734_s15 + $0x94] sm:$0xf]  ;;  %v2656_v9 = vrot.slane %v2654_v16, 4 }
 0x247   : > { %v4585_v37 = vpop.f32.mrf.mxu3  ;;  %1979 = vst [vmem:[#allocation3 + $0x30c] sm:$0xf] %v11238_v21  ;;  %v13263_v6 = vld [vmem:[#allocation3 + $0x25c] sm:$0xf] }
 0x248   : > { %v4586_v20 = vadd.f32 %v4585_v37, %v4497_v13  ;;  %4994 = vmatmul.bf16.gmra.mxu0 %v11684_v27  ;;  %v2301_v27 = vsel %vm13858_vm2, %v2296_v19, %v2300_v62  ;;  %v13267_v13 = vld [vmem:[#allocation3 + $0x278] sm:$0xf0]  ;;  %2474 = vst [vmem:[#allocation3 + $0x2ec] sm:$0xf] %v2291_v43  ;;  %v2655_v37 = vsel %vm14112_vm5, %v11355_v36, %v2654_v16  ;;  %v11283_v43 = vld [vmem:[%s13734_s15 + $0xa0] sm:$0xf] }
 0x249   : > { %2475 = vst [vmem:[#allocation3 + $0x310] sm:$0xf] %v2301_v27  ;;  %v11676_v19 = vor.u32 %v13267_v13, %v11675_v48  ;;  %v2658_v62 = vsel %vm14112_vm5, %v2656_v9, %v2657_v35  ;;  %v2312_v48 = vshll.u32 %v11283_v43, 16  ;;  %v2316_v21 = vshrl.u32 %v11283_v43, 16  ;;  %v11284_v35 = vld [vmem:[%s13734_s15 + $0xa4] sm:$0x1] }
 0x24a   : > { %v4675_v29 = vadd.f32 %v15051_v46, %v4586_v20  ;;  %2746 = vst [vmem:[#allocation3 + $0x2f0] sm:$0xf] %v2655_v37  ;;  %v2308_v16 = vrot.slane %v2306_v50, 5  ;;  %v11720_v13 = vor.u32 %v13277_v30, %v11719_v45 }
 0x24b   : > { %2747 = vst [vmem:[#allocation3 + $0x314] sm:$0xf] %v2658_v62  ;;  %v2314_v37 = vrot.slane %v2312_v48, 5  ;;  %v2318_v9 = vrot.slane %v2316_v21, 4 }
 0x24c   : > { %v15094_v8 = vadd.f32 %v4763_v33, %v4675_v29  ;;  %v11680_v33 = vor.u32 %v13263_v6, %v11677_v55  ;;  %v2303_v29 = vshrl.u32 %v11282_v42, 16 }
 0x24d   : > { %v4498_v46 = vpop.f32.mrf.mxu2  ;;  %v15098_v20 = vpop.f32.mrf.mxu0  ;;  %v2319_v62 = vor.u32 %v2318_v9, %v2314_v37 }
 0x24e   : > { %17040 = vst [vmem:[#allocation17_spill] sm:$0xff] %v15094_v8  ;;  %v4499_v56 = vadd.f32 %v4498_v46, %v14537_v51  ;;  %v2305_v27 = vrot.slane %v2303_v29, 4  ;;  %v11334_v8 = vld [vmem:[%s13734_s15 + $0xac] sm:$0xf] }
 0x24f   : > { %v4587_v10 = vpop.f32.mrf.mxu3  ;;  %v2320_v50 = vrot.slane %v2319_v62, 4  ;;  %v13272_v62 = vld [vmem:[#allocation3 + $0x2a4] sm:$0xf] }
 0x250   : > { %v4588_v36 = vadd.f32 %v4587_v10, %v4499_v56  ;;  %v2309_v55 = vor.u32 %v2308_v16, %v2305_v27  ;;  %v2322_v56 = vshll.u32 %v11284_v35, 16  ;;  %v11330_v10 = vld [vmem:[%s13734_s15 + $0x9c] sm:$0xe]  ;;  %v15118_v27 = vstv %s15103_s13  ;;  %v11240_v35 = vld [vmem:[%s13734_s15 + $0xa0] sm:$0xf] }
 0x251   : > { %v11356_v43 = vrot.slane %v11330_v10, 9  ;;  %v11239_v16 = vld [vmem:[%s13734_s15 + $0x9c] sm:$0xf]  ;;  %1981 = vst [vmem:[#allocation3 + $0x354] sm:$0xf] %v11240_v35 }
 0x252   : > { %4816 = vmatmul.bf16.gmra.mxu2 %v11676_v19  ;;  %v15108_v51 = vadd.f32 %v15070_v3, %v4588_v36  ;;  %v11331_v19 = vld [vmem:[%s13734_s15 + $0xa0] sm:$0xf]  ;;  %v11332_v36 = vld [vmem:[%s13734_s15 + $0xa4] sm:$0x1]  ;;  %v2310_v45 = vrot.slane %v2309_v55, 4  ;;  %v2324_v30 = vrot.slane %v2322_v56, 5 }
 0x253   : > { %v2661_v42 = vrot.slane %v11331_v19, 5  ;;  %v2664_v21 = vrot.slane %v11332_v36, 5  ;;  %1980 = vst [vmem:[#allocation3 + $0x330] sm:$0xf] %v11239_v16  ;;  %v11711_v55 = vld [vmem:[#allocation3 + $0x2a0] sm:$0xf] }
 0x254   : > { %17041 = vst [vmem:[#allocation18_spill] sm:$0xff] %v15108_v51  ;;  %4905 = vmatmul.bf16.gmra.mxu3 %v11680_v33  ;;  %v13276_v56 = vld [vmem:[#allocation3 + $0x2c0] sm:$0xf0]  ;;  %v11285_v16 = vld [vmem:[%s13734_s15 + $0xa8] sm:$0xf] }
 0x255   : > { %v4777_v46 = vpop.f32.mrf.mxu2  ;;  %v15111_v6 = vpop.f32.mrf.mxu0  ;;  %v2663_v48 = vrot.slane %v2661_v42, 4  ;;  %v11333_v51 = vld [vmem:[%s13734_s15 + $0xa8] sm:$0xe] }
 0x256   : > { %v4778_v3 = vadd.f32 %v4777_v46, %v14576_v1  ;;  %v2315_v1 = vsel %vm13858_vm2, %v2310_v45, %v2314_v37  ;;  %v2325_v46 = vsel %vm13858_vm2, %v2320_v50, %v2324_v30  ;;  %v11712_v45 = vor.u32 %v13276_v56, %v11711_v55  ;;  %v11755_v50 = vld [vmem:[#allocation3 + $0x2f0] sm:$0xf]  ;;  %v13563_v56 = vld [vmem:[%s17019_s3 + $0x78] sm:$0xff] }
 0x257   : > { %v4866_v33 = vpop.f32.mrf.mxu3  ;;  %2476 = vst [vmem:[#allocation3 + $0x334] sm:$0xf] %v2315_v1  ;;  %v11286_v1 = vld [vmem:[%s13734_s15 + $0xac] sm:$0xf]  ;;  %9722 = vmatpush.bf16.msrb.mxu2 %v13563_v56 }
 0x258   : > { %v4867_v29 = vadd.f32 %v4866_v33, %v4778_v3  ;;  %4999 = vmatmul.bf16.gmra.mxu0 %v11720_v13  ;;  %v2662_v13 = vsel %vm14112_vm5, %v11356_v43, %v2661_v42  ;;  %v2665_v3 = vsel %vm14112_vm5, %v2663_v48, %v2664_v21  ;;  %2477 = vst [vmem:[#allocation3 + $0x358] sm:$0xf] %v2325_v46  ;;  %v13286_v48 = vld [vmem:[#allocation3 + $0x310] sm:$0xf0] }
 0x259   : > { %2748 = vst [vmem:[#allocation3 + $0x338] sm:$0xf] %v2662_v13  ;;  %v13571_v13 = vld [vmem:[%s17019_s3 + $0xb8] sm:$0xff] }
 0x25a   : > { %v4956_v9 = vadd.f32 %v15081_v24, %v4867_v29  ;;  %v11713_v24 = vld [vmem:[#allocation3 + $0x2c4] sm:$0xf0]  ;;  %2749 = vst [vmem:[#allocation3 + $0x35c] sm:$0xf] %v2665_v3  ;;  %v2336_v3 = vshll.u32 %v11286_v1, 16  ;;  %9811 = vmatpush.bf16.msrb.mxu3 %v13571_v13 }
 0x25b   : > { %v11716_v29 = vor.u32 %v13272_v62, %v11713_v24 }
 0x25c   : > { %vm5036_vm6 = vcmp.gt.f32.partialorder %v4956_v9, 0.0  ;;  %v5069_v19 = vmul.f32 %v15118_v27, %v4956_v9 }
 0x25d   : > { %v4779_v37 = vpop.f32.mrf.mxu2  ;;  %v15132_v10 = vpop.f32.mrf.mxu0 }
 0x25e   : > { %v5101_v36 = vsel %vm5036_vm6, %v4956_v9, %v5069_v19  ;;  %v4780_v33 = vadd.f32 %v4779_v37, %v14592_v0  ;;  %v2327_v0 = vshrl.u32 %v11285_v16, 16  ;;  %v2330_v9 = vshll.u32 %v11285_v16, 16  ;;  %v5546_v37 = vld [vmem:[#allocation2 + $0xc] sm:$0xf] }
 0x25f   : > { %v5187_v42 = vpack.c.bf16 %v5101_v36, %v5101_v36  ;;  %v4868_v30 = vpop.f32.mrf.mxu3  ;;  %v11756_v19 = vor.u32 %v13286_v48, %v11755_v50  ;;  %v2340_v16 = vshrl.u32 %v11286_v1, 16 }
 0x260   : > { %v4869_v43 = vadd.f32 %v4868_v30, %v4780_v33  ;;  %v2329_v24 = vrot.slane %v2327_v0, 4  ;;  %v2332_v36 = vrot.slane %v2330_v9, 5  ;;  %v11287_v30 = vld [vmem:[%s13734_s15 + $0xb0] sm:$0x1] }
 0x261   : > { %v5223_v21 = vshrl.u32 %v5187_v42, 16  ;;  %v5226_v55 = vshll.u32 %v5187_v42, 16 }
 0x262   : > { %v4958_v35 = vadd.f32 %v15098_v20, %v4869_v43  ;;  %4821 = vmatmul.bf16.gmra.mxu2 %v11712_v45  ;;  %v2338_v43 = vrot.slane %v2336_v3, 5 }
 0x263   : > { %v15138_v46 = vrot.slane %v5223_v21, 7  ;;  %v2333_v21 = vor.u32 %v2332_v36, %v2329_v24  ;;  %v11335_v24 = vld [vmem:[%s13734_s15 + $0xb0] sm:$0x1]  ;;  %v11357_v36 = vrot.slane %v11333_v51, 9 }
 0x264   : > { %vm5037_vm11 = vcmp.gt.f32.partialorder %v4958_v35, 0.0  ;;  %v5070_v62 = vmul.f32 %v15118_v27, %v4958_v35  ;;  %4910 = vmatmul.bf16.gmra.mxu3 %v11716_v29  ;;  %v2671_v58 = vrot.slane %v11335_v24, 5 }
 0x265   : > { %v5228_v33 = vor.u32 %v5226_v55, %v15138_v46  ;;  %v4782_v45 = vpop.f32.mrf.mxu2  ;;  %v15153_v42 = vpop.f32.mrf.mxu0  ;;  %v2346_v55 = vshll.u32 %v11287_v30, 16  ;;  %v2334_v13 = vrot.slane %v2333_v21, 4  ;;  %v13579_v30 = vld [vmem:[%s17019_s3 + $0xf8] sm:$0xff]  ;;  %v2668_v21 = vrot.slane %v11334_v8, 5 }
 0x266   : > { %v5102_v50 = vsel %vm5037_vm11, %v4958_v35, %v5070_v62  ;;  %v4783_v48 = vadd.f32 %v4782_v45, %v14613_v18  ;;  %v2342_v35 = vrot.slane %v2340_v16, 4  ;;  %v5229_v18 = vrot.slane %v15138_v46, 4  ;;  %v11747_v62 = vld [vmem:[#allocation3 + $0x2e8] sm:$0xf]  ;;  %v13281_v16 = vld [vmem:[#allocation3 + $0x2ec] sm:$0xf]  ;;  %9900 = vmatpush.bf16.msrb.mxu0 %v13579_v30 }
 0x267   : > { %v5547_v29 = vsel %vm15147_vm10, %v5228_v33, %v5546_v37  ;;  %v5188_v0 = vpack.c.bf16 %v5102_v50, %v5102_v50  ;;  %v4871_v9 = vpop.f32.mrf.mxu3  ;;  %v13285_v37 = vld [vmem:[#allocation3 + $0x308] sm:$0xf0]  ;;  %v5552_v33 = vld [vmem:[#allocation2 + $0x14] sm:$0x1]  ;;  %v11241_v50 = vld [vmem:[%s13734_s15 + $0xa8] sm:$0xf]  ;;  %v2339_v46 = vsel %vm13858_vm2, %v2334_v13, %v2338_v43  ;;  %v2669_v13 = vsel %vm14112_vm5, %v11357_v36, %v2668_v21 }
 0x268   : > { %5548 = vst [vmem:[#allocation2 + $0xc] sm:$0xf] %v5547_v29  ;;  %v4872_v56 = vadd.f32 %v4871_v9, %v4783_v48  ;;  %5004 = vmatmul.bf16.gmra.mxu0 %v11756_v19  ;;  %v13587_v19 = vld [vmem:[%s17019_s3 + $0x138] sm:$0xff]  ;;  %v2343_v48 = vor.u32 %v2342_v35, %v2338_v43  ;;  %v11242_v29 = vld [vmem:[%s13734_s15 + $0xac] sm:$0xf]  ;;  %v2670_v44 = vrot.slane %v2668_v21, 4  ;;  %v11748_v59 = vor.u32 %v13285_v37, %v11747_v62 }
 0x269   : > { %v5231_v3 = vshrl.u32 %v5188_v0, 16  ;;  %v5234_v1 = vshll.u32 %v5188_v0, 16  ;;  %1982 = vst [vmem:[#allocation3 + $0x378] sm:$0xf] %v11241_v50  ;;  %v2348_v0 = vrot.slane %v2346_v55, 5  ;;  %9989 = vmatpush.bf16.msrb.mxu1 %v13587_v19 }
 0x26a   : > { %v4961_v45 = vadd.f32 %v15111_v6, %v4872_v56  ;;  %v11749_v43 = vld [vmem:[#allocation3 + $0x30c] sm:$0xf0]  ;;  %1983 = vst [vmem:[#allocation3 + $0x39c] sm:$0xf] %v11242_v29  ;;  %v2344_v56 = vrot.slane %v2343_v48, 4  ;;  %v2672_v37 = vsel %vm14112_vm5, %v2670_v44, %v2671_v58 }
 0x26b   : > { %v5233_v6 = vrot.slane %v5231_v3, 7  ;;  %2478 = vst [vmem:[#allocation3 + $0x37c] sm:$0xf] %v2339_v46  ;;  %v11752_v29 = vor.u32 %v13281_v16, %v11749_v43  ;;  %v11791_v46 = vld [vmem:[#allocation3 + $0x338] sm:$0xf] }
 0x26c   : > { %vm5038_vm0 = vcmp.gt.f32.partialorder %v4961_v45, 0.0  ;;  %v5071_v8 = vmul.f32 %v15118_v27, %v4961_v45  ;;  %2750 = vst [vmem:[#allocation3 + $0x380] sm:$0xf] %v2669_v13  ;;  %v2349_v24 = vsel %vm13858_vm2, %v2344_v56, %v2348_v0  ;;  %v13295_v62 = vld [vmem:[#allocation3 + $0x358] sm:$0xf0] }
 0x26d   : > { %v5236_v35 = vor.u32 %v5234_v1, %v5233_v6  ;;  %v5238_v3 = vrot.slane %v5233_v6, 4  ;;  %v4784_v55 = vpop.f32.mrf.mxu2  ;;  %v15189_v50 = vpop.f32.mrf.mxu0  ;;  %2479 = vst [vmem:[#allocation3 + $0x3a0] sm:$0xf] %v2349_v24  ;;  %v11792_v21 = vor.u32 %v13295_v62, %v11791_v46  ;;  %v13570_v46 = vld [vmem:[%s17019_s3 + $0xb0] sm:$0xff] }
 0x26e   : > { %v5103_v15 = vsel %vm5038_vm0, %v4961_v45, %v5071_v8  ;;  %v4785_v40 = vadd.f32 %v4784_v55, %v14627_v14  ;;  %v5555_v45 = vld [vmem:[#allocation2 + $0x18] sm:$0xf]  ;;  %2751 = vst [vmem:[#allocation3 + $0x3a4] sm:$0xf] %v2672_v37  ;;  %v5559_v55 = vld [vmem:[#allocation2 + $0x20] sm:$0x1]  ;;  %9812 = vmatpush.bf16.msrb.mxu3 %v13570_v46 }
 0x26f   : > { %v5237_v30 = vsel %vm15175_vm14, %v5229_v18, %v5236_v35  ;;  %v5553_v19 = vsel %vm15182_vm15, %v5238_v3, %v5552_v33  ;;  %v5189_v36 = vpack.c.bf16 %v5103_v15, %v5103_v15  ;;  %v4873_v1 = vpop.f32.mrf.mxu3  ;;  %v5662_v48 = vld [vmem:[#allocation2 + $0xc] sm:$0xf]  ;;  %v11288_v35 = vld [vmem:[%s13734_s15 + $0xb4] sm:$0xf] }
 0x270   : > { %5549 = vst [vmem:[#allocation2 + $0x10] sm:$0xf] %v5237_v30  ;;  %v4874_v6 = vadd.f32 %v4873_v1, %v4785_v40  ;;  %v2351_v24 = vshrl.u32 %v11288_v35, 16  ;;  %v11243_v62 = vld [vmem:[%s13734_s15 + $0xb4] sm:$0xf]  ;;  %v2354_v37 = vshll.u32 %v11288_v35, 16 }
 0x271   : > { %5554 = vst [vmem:[#allocation2 + $0x14] sm:$0x1] %v5553_v19  ;;  %v5240_v14 = vshrl.u32 %v5189_v36, 16  ;;  %v5243_v33 = vshll.u32 %v5189_v36, 16  ;;  %v11783_v19 = vld [vmem:[#allocation3 + $0x330] sm:$0xf] }
 0x272   : > { %v4963_v18 = vadd.f32 %v15132_v10, %v4874_v6  ;;  %4826 = vmatmul.bf16.gmra.mxu2 %v11748_v59  ;;  %5694 = vst [vmem:[#allocation3 + $0x48] sm:$0xf] %v5662_v48  ;;  %v13294_v36 = vld [vmem:[#allocation3 + $0x350] sm:$0xf0]  ;;  %v11785_v6 = vld [vmem:[#allocation3 + $0x354] sm:$0xf0] }
 0x273   : > { %v5242_v15 = vrot.slane %v5240_v14, 7  ;;  %v13290_v48 = vld [vmem:[#allocation3 + $0x334] sm:$0xf]  ;;  %1984 = vst [vmem:[#allocation3 + $0x3c0] sm:$0xf] %v11243_v62  ;;  %v13586_v62 = vld [vmem:[%s17019_s3 + $0x130] sm:$0xff] }
 0x274   : > { %vm5039_vm1 = vcmp.gt.f32.partialorder %v4963_v18, 0.0  ;;  %v5072_v40 = vmul.f32 %v15118_v27, %v4963_v18  ;;  %4915 = vmatmul.bf16.gmra.mxu3 %v11752_v29  ;;  %v13562_v29 = vld [vmem:[%s17019_s3 + $0x70] sm:$0xff]  ;;  %9990 = vmatpush.bf16.msrb.mxu1 %v13586_v62 }
 0x275   : > { %v5245_v16 = vor.u32 %v5243_v33, %v5242_v15  ;;  %v4787_v0 = vpop.f32.mrf.mxu2  ;;  %v15202_v8 = vpop.f32.mrf.mxu0  ;;  %v5246_v14 = vrot.slane %v5242_v15, 4  ;;  %9723 = vmatpush.bf16.msrb.mxu2 %v13562_v29  ;;  %v11784_v15 = vor.u32 %v13294_v36, %v11783_v19 }
 0x276   : > { %v5104_v44 = vsel %vm5039_vm1, %v4963_v18, %v5072_v40  ;;  %v4788_v58 = vadd.f32 %v4787_v0, %v14657_v31 }
 0x277   : > { %v5556_v59 = vsel %vm15147_vm10, %v5245_v16, %v5555_v45  ;;  %v5190_v10 = vpack.c.bf16 %v5104_v44, %v5104_v44  ;;  %v4876_v43 = vpop.f32.mrf.mxu3  ;;  %v5663_v56 = vld [vmem:[#allocation2 + $0x10] sm:$0xf]  ;;  %v2353_v16 = vrot.slane %v2351_v24, 4 }
 0x278   : > { %v4877_v13 = vadd.f32 %v4876_v43, %v4788_v58  ;;  %5009 = vmatmul.bf16.gmra.mxu0 %v11792_v21  ;;  %5557 = vst [vmem:[#allocation2 + $0x18] sm:$0xf] %v5556_v59  ;;  %v11244_v21 = vld [vmem:[%s13734_s15 + $0xb8] sm:$0xf]  ;;  %v2356_v59 = vrot.slane %v2354_v37, 5 }
 0x279   : > { %v5248_v3 = vshrl.u32 %v5190_v10, 16  ;;  %5695 = vst [vmem:[#allocation3 + $0x6c] sm:$0xf] %v5663_v56  ;;  %v5251_v31 = vshll.u32 %v5190_v10, 16  ;;  %v11289_v58 = vld [vmem:[%s13734_s15 + $0xb8] sm:$0xf] }
 0x27a   : > { %v4966_v30 = vadd.f32 %v15153_v42, %v4877_v13  ;;  %1985 = vst [vmem:[#allocation3 + $0x3e4] sm:$0xf] %v11244_v21  ;;  %v2360_v19 = vshll.u32 %v11289_v58, 16  ;;  %v12311_v29 = vld [vmem:[#allocation3 + $0x48] sm:$0xf]  ;;  %v2364_v24 = vshrl.u32 %v11289_v58, 16 }
 0x27b   : > { %v5250_v1 = vrot.slane %v5248_v3, 7  ;;  %v11788_v3 = vor.u32 %v13290_v48, %v11785_v6  ;;  %v5562_v37 = vld [vmem:[#allocation2 + $0x24] sm:$0xf] }
 0x27c   : > { %vm5040_vm3 = vcmp.gt.f32.partialorder %v4966_v30, 0.0  ;;  %v5073_v42 = vmul.f32 %v15118_v27, %v4966_v30  ;;  %v2366_v58 = vrot.slane %v2364_v24, 4  ;;  %v11338_v24 = vld [vmem:[%s13734_s15 + $0xbc] sm:$0x1] }
 0x27d   : > { %v5253_v18 = vor.u32 %v5251_v31, %v5250_v1  ;;  %v5255_v33 = vrot.slane %v5250_v1, 4  ;;  %v4789_v45 = vpop.f32.mrf.mxu2  ;;  %v15217_v40 = vpop.f32.mrf.mxu0  ;;  %v11827_v1 = vld [vmem:[#allocation3 + $0x380] sm:$0xf]  ;;  %v2357_v31 = vor.u32 %v2356_v59, %v2353_v16 }
 0x27e   : > { %v5105_v0 = vsel %vm5040_vm3, %v4966_v30, %v5073_v42  ;;  %v4790_v44 = vadd.f32 %v4789_v45, %v14674_v52  ;;  %v13304_v52 = vld [vmem:[#allocation3 + $0x3a0] sm:$0xf0] }
 0x27f   : > { %v5254_v10 = vsel %vm15175_vm14, %v5246_v14, %v5253_v18  ;;  %v5560_v43 = vsel %vm15182_vm15, %v5255_v33, %v5559_v55  ;;  %v5191_v56 = vpack.c.bf16 %v5105_v0, %v5105_v0  ;;  %v4878_v13 = vpop.f32.mrf.mxu3  ;;  %v13578_v55 = vld [vmem:[%s17019_s3 + $0xf0] sm:$0xff]  ;;  %v5664_v6 = vld [vmem:[#allocation2 + $0x18] sm:$0xf]  ;;  %v11828_v18 = vor.u32 %v13304_v52, %v11827_v1  ;;  %v11290_v1 = vld [vmem:[%s13734_s15 + $0xbc] sm:$0x1] }
 0x280   : > { %5558 = vst [vmem:[#allocation2 + $0x1c] sm:$0xf] %v5254_v10  ;;  %v4879_v35 = vadd.f32 %v4878_v13, %v4790_v44  ;;  %v13417_v46 = vld [vmem:[#allocation3 + $0x68] sm:$0xf0]  ;;  %9901 = vmatpush.bf16.msrb.mxu0 %v13578_v55  ;;  %v2358_v33 = vrot.slane %v2357_v31, 4  ;;  %v2362_v0 = vrot.slane %v2360_v19, 5 }
 0x281   : > { %5561 = vst [vmem:[#allocation2 + $0x20] sm:$0x1] %v5560_v43  ;;  %v5257_v30 = vshrl.u32 %v5191_v56, 16  ;;  %v5260_v42 = vshll.u32 %v5191_v56, 16  ;;  %v12312_v48 = vor.u32 %v13417_v46, %v12311_v29  ;;  %v15242_v56 = vld [vmem:[#allocation3 + $0x378] sm:$0xf] }
 0x282   : > { %v4968_v36 = vadd.f32 %v15189_v50, %v4879_v35  ;;  %4831 = vmatmul.bf16.gmra.mxu2 %v11784_v15  ;;  %5696 = vst [vmem:[#allocation3 + $0x90] sm:$0xf] %v5664_v6  ;;  %v13303_v13 = vld [vmem:[#allocation3 + $0x398] sm:$0xf0]  ;;  %v2363_v31 = vsel %vm13858_vm2, %v2358_v33, %v2362_v0  ;;  %v11337_v19 = vld [vmem:[%s13734_s15 + $0xb8] sm:$0xf] }
 0x283   : > { %v15230_v14 = vrot.slane %v5257_v30, 7  ;;  %9646 = vmatmul.bf16.gmra.mxu1 %v12312_v48  ;;  %v11336_v30 = vld [vmem:[%s13734_s15 + $0xb4] sm:$0xe]  ;;  %v5566_v29 = vld [vmem:[#allocation2 + $0x2c] sm:$0x1]  ;;  %v11820_v55 = vor.u32 %v13303_v13, %v15242_v56 }
 0x284   : > { %vm5041_vm4 = vcmp.gt.f32.partialorder %v4968_v36, 0.0  ;;  %v5074_v50 = vmul.f32 %v15118_v27, %v4968_v36  ;;  %4920 = vmatmul.bf16.gmra.mxu3 %v11788_v3  ;;  %v13299_v6 = vld [vmem:[#allocation3 + $0x37c] sm:$0xf]  ;;  %2480 = vst [vmem:[#allocation3 + $0x3c4] sm:$0xf] %v2363_v31 }
 0x285   : > { %v5262_v45 = vor.u32 %v5260_v42, %v15230_v14  ;;  %v4792_v21 = vpop.f32.mrf.mxu2  ;;  %v15237_v16 = vpop.f32.mrf.mxu0  ;;  %v11245_v33 = vld [vmem:[%s13734_s15 + $0xc0] sm:$0xf] }
 0x286   : > { %v5106_v44 = vsel %vm5041_vm4, %v4968_v36, %v5074_v50  ;;  %v4793_v15 = vadd.f32 %v4792_v21, %v14695_v12  ;;  %v2367_v12 = vor.u32 %v2366_v58, %v2362_v0  ;;  %v5263_v36 = vrot.slane %v15230_v14, 4  ;;  %v11821_v0 = vld [vmem:[#allocation3 + $0x39c] sm:$0xf0]  ;;  %1986 = vst [vmem:[#allocation3 + $0x408] sm:$0xf] %v11245_v33 }
 0x287   : > { %v5563_v59 = vsel %vm15147_vm10, %v5262_v45, %v5562_v37  ;;  %v5192_v10 = vpack.c.bf16 %v5106_v44, %v5106_v44  ;;  %v4881_v43 = vpop.f32.mrf.mxu3  ;;  %v5665_v35 = vld [vmem:[#allocation2 + $0x1c] sm:$0xf]  ;;  %v2370_v37 = vshll.u32 %v11290_v1, 16  ;;  %v2675_v14 = vrot.slane %v11337_v19, 5  ;;  %v11291_v13 = vld [vmem:[%s13734_s15 + $0xc0] sm:$0xf] }
 0x288   : > { %v4882_v3 = vadd.f32 %v4881_v43, %v4793_v15  ;;  %5014 = vmatmul.bf16.gmra.mxu0 %v11828_v18  ;;  %5564 = vst [vmem:[#allocation2 + $0x24] sm:$0xf] %v5563_v59  ;;  %v2368_v62 = vrot.slane %v2367_v12, 4  ;;  %v11358_v18 = vrot.slane %v11336_v30, 9  ;;  %v2678_v58 = vrot.slane %v11338_v24, 5 }
 0x289   : > { %v5265_v52 = vshrl.u32 %v5192_v10, 16  ;;  %5697 = vst [vmem:[#allocation3 + $0xb4] sm:$0xf] %v5665_v35  ;;  %v5268_v48 = vshll.u32 %v5192_v10, 16  ;;  %v2372_v15 = vrot.slane %v2370_v37, 5  ;;  %v2677_v56 = vrot.slane %v2675_v14, 4 }
 0x28a   : > { %v4971_v46 = vadd.f32 %v15202_v8, %v4882_v3  ;;  %v2676_v43 = vsel %vm14112_vm5, %v11358_v18, %v2675_v14  ;;  %v12347_v12 = vld [vmem:[#allocation3 + $0x90] sm:$0xf]  ;;  %v11292_v30 = vld [vmem:[%s13734_s15 + $0xc4] sm:$0xf]  ;;  %v11824_v19 = vor.u32 %v13299_v6, %v11821_v0  ;;  %v2375_v14 = vshrl.u32 %v11291_v13, 16 }
 0x28b   : > { %v5267_v42 = vrot.slane %v5265_v52, 7  ;;  %2752 = vst [vmem:[#allocation3 + $0x3c8] sm:$0xf] %v2676_v43  ;;  %v2378_v33 = vshll.u32 %v11291_v13, 16  ;;  %v11339_v6 = vld [vmem:[%s13734_s15 + $0xc0] sm:$0xe] }
 0x28c   : > { %vm5042_vm6 = vcmp.gt.f32.partialorder %v4971_v46, 0.0  ;;  %v5075_v50 = vmul.f32 %v15118_v27, %v4971_v46 }
 0x28d   : > { %v5270_v45 = vor.u32 %v5268_v48, %v5267_v42  ;;  %v5272_v21 = vrot.slane %v5267_v42, 4  ;;  %v4794_v8 = vpop.f32.mrf.mxu2  ;;  %v15255_v44 = vpop.f32.mrf.mxu0  ;;  %v11293_v42 = vld [vmem:[%s13734_s15 + $0xc8] sm:$0x1] }
 0x28e   : > { %v5107_v59 = vsel %vm5042_vm6, %v4971_v46, %v5075_v50  ;;  %v4795_v10 = vadd.f32 %v4794_v8, %v14709_v28  ;;  %v2373_v28 = vsel %vm13858_vm2, %v2368_v62, %v2372_v15  ;;  %v2679_v46 = vsel %vm14112_vm5, %v2677_v56, %v2678_v58  ;;  %v5569_v50 = vld [vmem:[#allocation2 + $0x30] sm:$0xf]  ;;  %v11340_v56 = vld [vmem:[%s13734_s15 + $0xc4] sm:$0xf] }
 0x28f   : > { %v5271_v35 = vsel %vm15175_vm14, %v5263_v36, %v5270_v45  ;;  %v5567_v3 = vsel %vm15182_vm15, %v5272_v21, %v5566_v29  ;;  %v5193_v1 = vpack.c.bf16 %v5107_v59, %v5107_v59  ;;  %v4883_v31 = vpop.f32.mrf.mxu3  ;;  %v5666_v24 = vld [vmem:[#allocation2 + $0x24] sm:$0xf]  ;;  %2481 = vst [vmem:[#allocation3 + $0x3e8] sm:$0xf] %v2373_v28  ;;  %v2384_v21 = vshll.u32 %v11292_v30, 16 }
 0x290   : > { %5565 = vst [vmem:[#allocation2 + $0x28] sm:$0xf] %v5271_v35  ;;  %v4884_v52 = vadd.f32 %v4883_v31, %v4795_v10  ;;  %v11246_v36 = vld [vmem:[%s13734_s15 + $0xc4] sm:$0xf]  ;;  %v13426_v37 = vld [vmem:[#allocation3 + $0xb0] sm:$0xf0] }
 0x291   : > { %5568 = vst [vmem:[#allocation2 + $0x2c] sm:$0x1] %v5567_v3  ;;  %v5274_v29 = vshrl.u32 %v5193_v1, 16  ;;  %v5277_v48 = vshll.u32 %v5193_v1, 16  ;;  %v12348_v62 = vor.u32 %v13426_v37, %v12347_v12  ;;  %v2388_v8 = vshrl.u32 %v11292_v30, 16 }
 0x292   : > { %v4973_v18 = vadd.f32 %v15217_v40, %v4884_v52  ;;  %4836 = vmatmul.bf16.gmra.mxu2 %v11820_v55  ;;  %2753 = vst [vmem:[#allocation3 + $0x3ec] sm:$0xf] %v2679_v46  ;;  %v2394_v0 = vshll.u32 %v11293_v42, 16  ;;  %v2377_v58 = vrot.slane %v2375_v14, 4  ;;  %v2380_v40 = vrot.slane %v2378_v33, 5 }
 0x293   : > { %v15274_v45 = vrot.slane %v5274_v29, 7  ;;  %5698 = vst [vmem:[#allocation3 + $0xd8] sm:$0xf] %v5666_v24  ;;  %9651 = vmatmul.bf16.gmra.mxu1 %v12348_v62  ;;  %v2386_v43 = vrot.slane %v2384_v21, 5  ;;  %v2390_v1 = vrot.slane %v2388_v8, 4  ;;  %v11359_v46 = vrot.slane %v11339_v6, 9 }
 0x294   : > { %vm5043_vm7 = vcmp.gt.f32.partialorder %v4973_v18, 0.0  ;;  %v5076_v15 = vmul.f32 %v15118_v27, %v4973_v18  ;;  %4925 = vmatmul.bf16.gmra.mxu3 %v11824_v19  ;;  %1987 = vst [vmem:[#allocation3 + $0x42c] sm:$0xf] %v11246_v36  ;;  %v2381_v3 = vor.u32 %v2380_v40, %v2377_v58  ;;  %v11863_v30 = vld [vmem:[#allocation3 + $0x3c8] sm:$0xf]  ;;  %v2396_v19 = vrot.slane %v2394_v0, 5 }
 0x295   : > { %v5279_v55 = vor.u32 %v5277_v48, %v15274_v45  ;;  %v4797_v59 = vpop.f32.mrf.mxu2  ;;  %v15278_v10 = vpop.f32.mrf.mxu0  ;;  %v13561_v36 = vld [vmem:[%s17019_s3 + $0x68] sm:$0xff]  ;;  %v2391_v29 = vor.u32 %v2390_v1, %v2386_v43  ;;  %v2682_v48 = vrot.slane %v11340_v56, 5  ;;  %v4711_v37 = vadd.f32 %v14737_v22, %v14754_v39  ;;  %v11855_v62 = vld [vmem:[#allocation3 + $0x3c0] sm:$0xf]  ;;  %v13312_v8 = vld [vmem:[#allocation3 + $0x3e0] sm:$0xf0] }
 0x296   : > { %v5108_v13 = vsel %vm5043_vm7, %v4973_v18, %v5076_v15  ;;  %v4798_v35 = vadd.f32 %v4797_v59, %v14741_v26  ;;  %v13569_v26 = vld [vmem:[%s17019_s3 + $0xa8] sm:$0xff]  ;;  %v2382_v42 = vrot.slane %v2381_v3, 4  ;;  %v5573_v6 = vld [vmem:[#allocation2 + $0x38] sm:$0x1]  ;;  %9724 = vmatpush.bf16.msrb.mxu2 %v13561_v36  ;;  %v13308_v22 = vld [vmem:[#allocation3 + $0x3c4] sm:$0xf] }
 0x297   : > { %v5570_v31 = vsel %vm15147_vm10, %v5279_v55, %v5569_v50  ;;  %v5194_v12 = vpack.c.bf16 %v5108_v13, %v5108_v13  ;;  %v4886_v28 = vpop.f32.mrf.mxu3  ;;  %v5667_v52 = vld [vmem:[#allocation2 + $0x28] sm:$0xf]  ;;  %v5280_v50 = vrot.slane %v15274_v45, 4  ;;  %9813 = vmatpush.bf16.msrb.mxu3 %v13569_v26  ;;  %v2392_v58 = vrot.slane %v2391_v29, 4  ;;  %v11857_v59 = vld [vmem:[#allocation3 + $0x3e4] sm:$0xf0] }
 0x298   : > { %5571 = vst [vmem:[#allocation2 + $0x30] sm:$0xf] %v5570_v31  ;;  %v4887_v24 = vadd.f32 %v4886_v28, %v4798_v35  ;;  %v11341_v14 = vld [vmem:[%s13734_s15 + $0xc8] sm:$0x1]  ;;  %v2387_v15 = vsel %vm13858_vm2, %v2382_v42, %v2386_v43  ;;  %v2683_v45 = vsel %vm14112_vm5, %v11359_v46, %v2682_v48  ;;  %v2684_v55 = vrot.slane %v2682_v48, 4 }
 0x299   : > { %v5282_v18 = vshrl.u32 %v5194_v12, 16  ;;  %5699 = vst [vmem:[#allocation3 + $0xfc] sm:$0xf] %v5667_v52  ;;  %v5285_v33 = vshll.u32 %v5194_v12, 16  ;;  %v13313_v0 = vld [vmem:[#allocation3 + $0x3e8] sm:$0xf0]  ;;  %v2397_v56 = vsel %vm13858_vm2, %v2392_v58, %v2396_v19  ;;  %v11856_v52 = vor.u32 %v13312_v8, %v11855_v62 }
 0x29a   : > { %v4976_v21 = vadd.f32 %v15237_v16, %v4887_v24  ;;  %v11864_v39 = vor.u32 %v13313_v0, %v11863_v30  ;;  %2482 = vst [vmem:[#allocation3 + $0x40c] sm:$0xf] %v2387_v15  ;;  %v2685_v13 = vrot.slane %v11341_v14, 5  ;;  %v13577_v31 = vld [vmem:[%s17019_s3 + $0xe8] sm:$0xff]  ;;  %v12383_v19 = vld [vmem:[#allocation3 + $0xd8] sm:$0xf]  ;;  %v11860_v62 = vor.u32 %v13308_v22, %v11857_v59 }
 0x29b   : > { %v5284_v40 = vrot.slane %v5282_v18, 7  ;;  %2754 = vst [vmem:[#allocation3 + $0x410] sm:$0xf] %v2683_v45  ;;  %v11247_v12 = vld [vmem:[%s13734_s15 + $0xcc] sm:$0xf]  ;;  %9902 = vmatpush.bf16.msrb.mxu0 %v13577_v31  ;;  %v13568_v15 = vld [vmem:[%s17019_s3 + $0xa0] sm:$0xff] }
 0x29c   : > { %vm5044_vm8 = vcmp.gt.f32.partialorder %v4976_v21, 0.0  ;;  %v5077_v16 = vmul.f32 %v15118_v27, %v4976_v21  ;;  %5019 = vmatmul.bf16.gmra.mxu0 %v11864_v39  ;;  %2483 = vst [vmem:[#allocation3 + $0x430] sm:$0xf] %v2397_v56  ;;  %v2686_v46 = vsel %vm14112_vm5, %v2684_v55, %v2685_v13  ;;  %v11294_v24 = vld [vmem:[%s13734_s15 + $0xcc] sm:$0xf]  ;;  %v13576_v58 = vld [vmem:[%s17019_s3 + $0xe0] sm:$0xff]  ;;  %9814 = vmatpush.bf16.msrb.mxu3 %v13568_v15 }
 0x29d   : > { %v5287_v43 = vor.u32 %v5285_v33, %v5284_v40  ;;  %v5289_v35 = vrot.slane %v5284_v40, 4  ;;  %v4799_v3 = vpop.f32.mrf.mxu2  ;;  %v15302_v1 = vpop.f32.mrf.mxu0  ;;  %1988 = vst [vmem:[#allocation3 + $0x450] sm:$0xf] %v11247_v12  ;;  %v11295_v33 = vld [vmem:[%s13734_s15 + $0xd0] sm:$0xf]  ;;  %v2399_v39 = vshrl.u32 %v11294_v24, 16 }
 0x29e   : > { %v5109_v28 = vsel %vm5044_vm8, %v4976_v21, %v5077_v16  ;;  %v4800_v30 = vadd.f32 %v4799_v3, %v4711_v37  ;;  %2755 = vst [vmem:[#allocation3 + $0x434] sm:$0xf] %v2686_v46  ;;  %v11248_v37 = vld [vmem:[%s13734_s15 + $0xd0] sm:$0xf]  ;;  %v5576_v45 = vld [vmem:[#allocation2 + $0x3c] sm:$0xf] }
 0x29f   : > { %v5288_v36 = vsel %vm15175_vm14, %v5280_v50, %v5287_v43  ;;  %v5574_v26 = vsel %vm15182_vm15, %v5289_v35, %v5573_v6  ;;  %v5195_v42 = vpack.c.bf16 %v5109_v28, %v5109_v28  ;;  %v4888_v29 = vpop.f32.mrf.mxu3  ;;  %v5668_v48 = vld [vmem:[#allocation2 + $0x30] sm:$0xf]  ;;  %v13585_v50 = vld [vmem:[%s17019_s3 + $0x128] sm:$0xff]  ;;  %v13560_v6 = vld [vmem:[%s17019_s3 + $0x60] sm:$0xff]  ;;  %1989 = vst [vmem:[#allocation3 + $0x474] sm:$0xf] %v11248_v37  ;;  %9903 = vmatpush.bf16.msrb.mxu0 %v13576_v58 }
 0x2a0   : > { %5572 = vst [vmem:[#allocation2 + $0x34] sm:$0xf] %v5288_v36  ;;  %v4889_v18 = vadd.f32 %v4888_v29, %v4800_v30  ;;  %v13435_v14 = vld [vmem:[#allocation3 + $0xf8] sm:$0xf0]  ;;  %9991 = vmatpush.bf16.msrb.mxu1 %v13585_v50  ;;  %9725 = vmatpush.bf16.msrb.mxu2 %v13560_v6  ;;  %v2402_v55 = vshll.u32 %v11294_v24, 16  ;;  %v2408_v16 = vshll.u32 %v11295_v33, 16 }
 0x2a1   : > { %5575 = vst [vmem:[#allocation2 + $0x38] sm:$0x1] %v5574_v26  ;;  %v5291_v21 = vshrl.u32 %v5195_v42, 16  ;;  %v12384_v8 = vor.u32 %v13435_v14, %v12383_v19  ;;  %v5294_v22 = vshll.u32 %v5195_v42, 16  ;;  %v11296_v35 = vld [vmem:[%s13734_s15 + $0xd4] sm:$0x1] }
 0x2a2   : > { %v4978_v0 = vadd.f32 %v15255_v44, %v4889_v18  ;;  %4841 = vmatmul.bf16.gmra.mxu2 %v11856_v52  ;;  %5700 = vst [vmem:[#allocation3 + $0x120] sm:$0xf] %v5668_v48  ;;  %v11899_v43 = vld [vmem:[#allocation3 + $0x410] sm:$0xf]  ;;  %v2401_v3 = vrot.slane %v2399_v39, 4  ;;  %v2404_v52 = vrot.slane %v2402_v55, 5  ;;  %v4716_v48 = vadd.f32 %v14775_v60, %v14793_v17 }
 0x2a3   : > { %v15330_v40 = vrot.slane %v5291_v21, 7  ;;  %9656 = vmatmul.bf16.gmra.mxu1 %v12384_v8  ;;  %v15338_v28 = vld [vmem:[#allocation3 + $0x408] sm:$0xf]  ;;  %v11342_v19 = vld [vmem:[%s13734_s15 + $0xcc] sm:$0xe]  ;;  %v2412_v29 = vshrl.u32 %v11295_v33, 16 }
 0x2a4   : > { %vm5045_vm9 = vcmp.gt.f32.partialorder %v4978_v0, 0.0  ;;  %v5078_v44 = vmul.f32 %v15118_v27, %v4978_v0  ;;  %4930 = vmatmul.bf16.gmra.mxu3 %v11860_v62  ;;  %v15343_v26 = vld [vmem:[#allocation3 + $0x428] sm:$0xf0]  ;;  %v2405_v37 = vor.u32 %v2404_v52, %v2401_v3  ;;  %v2410_v18 = vrot.slane %v2408_v16, 5  ;;  %v11343_v62 = vld [vmem:[%s13734_s15 + $0xd0] sm:$0xf] }
 0x2a5   : > { %v5296_v59 = vor.u32 %v5294_v22, %v15330_v40  ;;  %v4802_v56 = vpop.f32.mrf.mxu2  ;;  %v15334_v13 = vpop.f32.mrf.mxu0  ;;  %v13322_v30 = vld [vmem:[#allocation3 + $0x430] sm:$0xf0]  ;;  %v2418_v8 = vshll.u32 %v11296_v35, 16  ;;  %v11360_v50 = vrot.slane %v11342_v19, 9  ;;  %v5297_v6 = vrot.slane %v15330_v40, 4  ;;  %v13567_v40 = vld [vmem:[%s17019_s3 + $0x98] sm:$0xff] }
 0x2a6   : > { %v5110_v31 = vsel %vm5045_vm9, %v4978_v0, %v5078_v44  ;;  %v4803_v12 = vadd.f32 %v4802_v56, %v14779_v49  ;;  %v11900_v21 = vor.u32 %v13322_v30, %v11899_v43  ;;  %v5580_v0 = vld [vmem:[#allocation2 + $0x44] sm:$0x1]  ;;  %v2406_v33 = vrot.slane %v2405_v37, 4  ;;  %v15351_v22 = vld [vmem:[%s13734_s15 + $0xd4] sm:$0x1]  ;;  %v13559_v44 = vld [vmem:[%s17019_s3 + $0x58] sm:$0xff]  ;;  %9815 = vmatpush.bf16.msrb.mxu3 %v13567_v40 }
 0x2a7   : > { %v5577_v46 = vsel %vm15147_vm10, %v5296_v59, %v5576_v45  ;;  %v5196_v24 = vpack.c.bf16 %v5110_v31, %v5110_v31  ;;  %v4891_v36 = vpop.f32.mrf.mxu3  ;;  %v5669_v42 = vld [vmem:[#allocation2 + $0x34] sm:$0xf]  ;;  %v2414_v58 = vrot.slane %v2412_v29, 4  ;;  %v11892_v39 = vor.u32 %v15343_v26, %v15338_v28  ;;  %v13317_v16 = vld [vmem:[#allocation3 + $0x40c] sm:$0xf]  ;;  %9726 = vmatpush.bf16.msrb.mxu2 %v13559_v44 }
 0x2a8   : > { %5578 = vst [vmem:[#allocation2 + $0x3c] sm:$0xf] %v5577_v46  ;;  %v4892_v49 = vadd.f32 %v4891_v36, %v4803_v12  ;;  %v2689_v45 = vrot.slane %v11343_v62, 5  ;;  %v2411_v59 = vsel %vm13858_vm2, %v2406_v33, %v2410_v18  ;;  %v6492_v43 = vld [vmem:[#allocation2 + $0xc] sm:$0xf]  ;;  %v2420_v30 = vrot.slane %v2418_v8, 5 }
 0x2a9   : > { %v5299_v14 = vshrl.u32 %v5196_v24, 16  ;;  %5701 = vst [vmem:[#allocation3 + $0x144] sm:$0xf] %v5669_v42  ;;  %v5302_v17 = vshll.u32 %v5196_v24, 16  ;;  %v2415_v56 = vor.u32 %v2414_v58, %v2410_v18  ;;  %v11893_v12 = vld [vmem:[#allocation3 + $0x42c] sm:$0xf0] }
 0x2aa   : > { %v4981_v15 = vadd.f32 %v15278_v10, %v4892_v49  ;;  %v13575_v10 = vld [vmem:[%s17019_s3 + $0xd8] sm:$0xff]  ;;  %2484 = vst [vmem:[#allocation3 + $0x454] sm:$0xf] %v2411_v59  ;;  %v2690_v52 = vsel %vm14112_vm5, %v11360_v50, %v2689_v45  ;;  %v2692_v26 = vrot.slane %v15351_v22, 5  ;;  %v15377_v18 = vld [vmem:[#allocation3 + $0x450] sm:$0xf]  ;;  %v11896_v8 = vor.u32 %v13317_v16, %v11893_v12 }
 0x2ab   : > { %v5301_v60 = vrot.slane %v5299_v14, 7  ;;  %v12419_v24 = vld [vmem:[#allocation3 + $0x120] sm:$0xf]  ;;  %v2416_v36 = vrot.slane %v2415_v56, 4  ;;  %2756 = vst [vmem:[#allocation3 + $0x458] sm:$0xf] %v2690_v52  ;;  %9904 = vmatpush.bf16.msrb.mxu0 %v13575_v10 }
 0x2ac   : > { %vm5046_vm11 = vcmp.gt.f32.partialorder %v4981_v15, 0.0  ;;  %v5079_v55 = vmul.f32 %v15118_v27, %v4981_v15  ;;  %5024 = vmatmul.bf16.gmra.mxu0 %v11900_v21  ;;  %v2691_v62 = vrot.slane %v2689_v45, 4  ;;  %v13566_v14 = vld [vmem:[%s17019_s3 + $0x90] sm:$0xff]  ;;  %6524 = vst [vmem:[#allocation3 + $0xc] sm:$0xf] %v6492_v43 }
 0x2ad   : > { %v5304_v35 = vor.u32 %v5302_v17, %v5301_v60  ;;  %v5306_v3 = vrot.slane %v5301_v60, 4  ;;  %v4804_v31 = vpop.f32.mrf.mxu2  ;;  %v15367_v28 = vpop.f32.mrf.mxu0  ;;  %v7355_v58 = vld [vmem:[#allocation2 + $0xcc] sm:$0xf]  ;;  %v2421_v22 = vsel %vm13858_vm2, %v2416_v36, %v2420_v30  ;;  %v7356_v17 = vld [vmem:[#allocation2 + $0xd0] sm:$0xf]  ;;  %9816 = vmatpush.bf16.msrb.mxu3 %v13566_v14 }
 0x2ae   : > { %v5111_v19 = vsel %vm5046_vm11, %v4981_v15, %v5079_v55  ;;  %v4805_v46 = vadd.f32 %v4804_v31, %v4716_v48  ;;  %v13558_v48 = vld [vmem:[%s17019_s3 + $0x50] sm:$0xff]  ;;  %7387 = vst [vmem:[#allocation3 + $0x450] sm:$0xf] %v7355_v58  ;;  %v7434_v45 = vld [vmem:[#allocation2 + $0xcc] sm:$0xf]  ;;  %v2693_v55 = vsel %vm14112_vm5, %v2691_v62, %v2692_v26 }
 0x2af   : > { %v5305_v42 = vsel %vm15175_vm14, %v5297_v6, %v5304_v35  ;;  %v5581_v29 = vsel %vm15182_vm15, %v5306_v3, %v5580_v0  ;;  %v5197_v49 = vpack.c.bf16 %v5111_v19, %v5111_v19  ;;  %v4893_v37 = vpop.f32.mrf.mxu3  ;;  %v15385_v6 = vld [vmem:[#allocation3 + $0x470] sm:$0xf0]  ;;  %9727 = vmatpush.bf16.msrb.mxu2 %v13558_v48  ;;  %v7435_v40 = vld [vmem:[#allocation2 + $0xd0] sm:$0xf]  ;;  %v7798_v10 = vshrl.u32 %v7434_v45, 16 }
 0x2b0   : > { %5579 = vst [vmem:[#allocation2 + $0x40] sm:$0xf] %v5305_v42  ;;  %v4894_v21 = vadd.f32 %v4893_v37, %v4805_v46  ;;  %v13444_v50 = vld [vmem:[#allocation3 + $0x140] sm:$0xf0]  ;;  %v5583_v16 = vld [vmem:[#allocation2 + $0x48] sm:$0xf] }
 0x2b1   : > { %5582 = vst [vmem:[#allocation2 + $0x44] sm:$0x1] %v5581_v29  ;;  %v5308_v0 = vshrl.u32 %v5197_v49, 16  ;;  %v5311_v15 = vshll.u32 %v5197_v49, 16  ;;  %v12420_v33 = vor.u32 %v13444_v50, %v12419_v24  ;;  %v7436_v3 = vld [vmem:[#allocation2 + $0xd4] sm:$0x1] }
 0x2b2   : > { %v4983_v60 = vadd.f32 %v15302_v1, %v4894_v21  ;;  %4846 = vmatmul.bf16.gmra.mxu2 %v11892_v39  ;;  %7388 = vst [vmem:[#allocation3 + $0x474] sm:$0xf] %v7356_v17  ;;  %v7801_v1 = vshll.u32 %v7434_v45, 16  ;;  %v7800_v31 = vrot.slane %v7798_v10, 4  ;;  %v7807_v12 = vshll.u32 %v7435_v40, 16  ;;  %v13574_v30 = vld [vmem:[%s17019_s3 + $0xd0] sm:$0xff] }
 0x2b3   : > { %v15390_v44 = vrot.slane %v5308_v0, 7  ;;  %2485 = vst [vmem:[#allocation3 + $0x478] sm:$0xf] %v2421_v22  ;;  %9661 = vmatmul.bf16.gmra.mxu1 %v12420_v33  ;;  %v7811_v24 = vshrl.u32 %v7435_v40, 16  ;;  %v5670_v36 = vld [vmem:[#allocation2 + $0x3c] sm:$0xf]  ;;  %9905 = vmatpush.bf16.msrb.mxu0 %v13574_v30 }
 0x2b4   : > { %vm5047_vm12 = vcmp.gt.f32.partialorder %v4983_v60, 0.0  ;;  %v5080_v59 = vmul.f32 %v15118_v27, %v4983_v60  ;;  %4935 = vmatmul.bf16.gmra.mxu3 %v11896_v8  ;;  %v7803_v46 = vrot.slane %v7801_v1, 5  ;;  %2757 = vst [vmem:[#allocation3 + $0x47c] sm:$0xf] %v2693_v55  ;;  %v7809_v49 = vrot.slane %v7807_v12, 5  ;;  %v13573_v30 = vld [vmem:[%s17019_s3 + $0xc8] sm:$0xff] }
 0x2b5   : > { %v5313_v39 = vor.u32 %v5311_v15, %v15390_v44  ;;  %v5314_v56 = vrot.slane %v15390_v44, 4  ;;  %v4807_v43 = vpop.f32.mrf.mxu2  ;;  %v15397_v35 = vpop.f32.mrf.mxu0  ;;  %v7817_v37 = vshll.u32 %v7436_v3, 16  ;;  %v7930_v62 = vld [vmem:[#allocation2 + $0xcc] sm:$0xe]  ;;  %v7931_v48 = vld [vmem:[#allocation2 + $0xd0] sm:$0xf] }
 0x2b6   : > { %v5112_v52 = vsel %vm5047_vm12, %v4983_v60, %v5080_v59  ;;  %v4808_v19 = vadd.f32 %v4807_v43, %v14816_v57  ;;  %v7804_v21 = vor.u32 %v7803_v46, %v7800_v31  ;;  %v7813_v8 = vrot.slane %v7811_v24, 4  ;;  %v7932_v50 = vld [vmem:[#allocation2 + $0xd4] sm:$0x1]  ;;  %v5587_v60 = vld [vmem:[#allocation2 + $0x50] sm:$0x1]  ;;  %v13572_v44 = vld [vmem:[%s17019_s3 + $0xc0] sm:$0xff] }
 0x2b7   : > { %v5584_v26 = vsel %vm15147_vm10, %v5313_v39, %v5583_v16  ;;  %v5198_v42 = vpack.c.bf16 %v5112_v52, %v5112_v52  ;;  %v4896_v29 = vpop.f32.mrf.mxu3  ;;  %v12272_v57 = vrot.slane %v7930_v62, 9  ;;  %v7819_v33 = vrot.slane %v7817_v37, 5  ;;  %v5671_v22 = vld [vmem:[#allocation2 + $0x40] sm:$0xf]  ;;  %v15406_v45 = vld [vmem:[#allocation3 + $0x454] sm:$0xf]  ;;  %9906 = vmatpush.bf16.msrb.mxu0 %v13573_v30 }
 0x2b8   : > { %5585 = vst [vmem:[#allocation2 + $0x48] sm:$0xf] %v5584_v26  ;;  %v4897_v14 = vadd.f32 %v4896_v29, %v4808_v19  ;;  %v8088_v58 = vrot.slane %v7931_v48, 5  ;;  %v7805_v40 = vrot.slane %v7804_v21, 4  ;;  %v7814_v10 = vor.u32 %v7813_v8, %v7809_v49  ;;  %v11935_v55 = vld [vmem:[#allocation3 + $0x458] sm:$0xf] }
 0x2b9   : > { %v5316_v0 = vshrl.u32 %v5198_v42, 16  ;;  %v5319_v15 = vshll.u32 %v5198_v42, 16  ;;  %v8091_v16 = vrot.slane %v7932_v50, 5  ;;  %5702 = vst [vmem:[#allocation3 + $0x168] sm:$0xf] %v5670_v36  ;;  %v4721_v59 = vadd.f32 %v14812_v5, %v14826_v2  ;;  %v13557_v5 = vld [vmem:[%s17019_s3 + $0x48] sm:$0xff] }
 0x2ba   : > { %v4986_v17 = vadd.f32 %v15334_v13, %v4897_v14  ;;  %v15410_v39 = vld [vmem:[#allocation3 + $0x474] sm:$0xf0]  ;;  %v8089_v43 = vsel %vm14112_vm5, %v12272_v57, %v8088_v58  ;;  %v8090_v3 = vrot.slane %v8088_v58, 4  ;;  %5703 = vst [vmem:[#allocation3 + $0x18c] sm:$0xf] %v5671_v22  ;;  %v11928_v31 = vor.u32 %v15385_v6, %v15377_v18  ;;  %v13565_v2 = vld [vmem:[%s17019_s3 + $0x88] sm:$0xff]  ;;  %9728 = vmatpush.bf16.msrb.mxu2 %v13557_v5 }
 0x2bb   : > { %v5318_v1 = vrot.slane %v5316_v0, 7  ;;  %v7810_v12 = vsel %vm13858_vm2, %v7805_v40, %v7809_v49  ;;  %8155 = vst [vmem:[#allocation3 + $0x458] sm:$0xf] %v8089_v43  ;;  %v7815_v18 = vrot.slane %v7814_v10, 4  ;;  %v13331_v6 = vld [vmem:[#allocation3 + $0x478] sm:$0xf0]  ;;  %9817 = vmatpush.bf16.msrb.mxu3 %v13565_v2  ;;  %9907 = vmatpush.bf16.msrb.mxu0 %v13572_v44 }
 0x2bc   : > { %vm5048_vm13 = vcmp.gt.f32.partialorder %v4986_v17, 0.0  ;;  %v5081_v13 = vmul.f32 %v15118_v27, %v4986_v17  ;;  %7883 = vst [vmem:[#allocation3 + $0x454] sm:$0xf] %v7810_v12  ;;  %v8092_v24 = vsel %vm14112_vm5, %v8090_v3, %v8091_v16  ;;  %v11936_v29 = vor.u32 %v13331_v6, %v11935_v55  ;;  %v13564_v49 = vld [vmem:[%s17019_s3 + $0x80] sm:$0xff]  ;;  %v5727_v37 = vld [vmem:[#allocation2 + $0xc] sm:$0xf] }
 0x2bd   : > { %v5321_v52 = vor.u32 %v5319_v15, %v5318_v1  ;;  %v5323_v19 = vrot.slane %v5318_v1, 4  ;;  %v4809_v46 = vpop.f32.mrf.mxu2  ;;  %v15430_v36 = vpop.f32.mrf.mxu0  ;;  %8156 = vst [vmem:[#allocation3 + $0x47c] sm:$0xf] %v8092_v24  ;;  %v7820_v8 = vsel %vm13858_vm2, %v7815_v18, %v7819_v33  ;;  %v13556_v50 = vld [vmem:[%s17019_s3 + $0x40] sm:$0xff]  ;;  %v6493_v15 = vld [vmem:[#allocation2 + $0x10] sm:$0xf] }
 0x2be   : > { %v5113_v26 = vsel %vm5048_vm13, %v4986_v17, %v5081_v13  ;;  %v4810_v42 = vadd.f32 %v4809_v46, %v4721_v59  ;;  %5029 = vmatmul.bf16.gmra.mxu0 %v11936_v29  ;;  %v5728_v33 = vld [vmem:[#allocation2 + $0x10] sm:$0xf]  ;;  %v5797_v22 = vshrl.u32 %v5727_v37, 16  ;;  %7884 = vst [vmem:[#allocation3 + $0x478] sm:$0xf] %v7820_v8  ;;  %9729 = vmatpush.bf16.msrb.mxu2 %v13556_v50  ;;  %v13584_v1 = vld [vmem:[%s17019_s3 + $0x120] sm:$0xff] }
 0x2bf   : > { %v5322_v62 = vsel %vm15175_vm14, %v5314_v56, %v5321_v52  ;;  %v5588_v48 = vsel %vm15182_vm15, %v5323_v19, %v5587_v60  ;;  %v5199_v14 = vpack.c.bf16 %v5113_v26, %v5113_v26  ;;  %v4898_v21 = vpop.f32.mrf.mxu3  ;;  %v11932_v56 = vor.u32 %v15406_v45, %v15410_v39  ;;  %v5672_v0 = vld [vmem:[#allocation2 + $0x48] sm:$0xf]  ;;  %v5590_v60 = vld [vmem:[#allocation2 + $0x54] sm:$0xf]  ;;  %9818 = vmatpush.bf16.msrb.mxu3 %v13564_v49  ;;  %v15455_v45 = vld [vmem:[#allocation3 + $0x4] sm:$0xf] }
 0x2c0   : > { %5586 = vst [vmem:[#allocation2 + $0x4c] sm:$0xf] %v5322_v62  ;;  %v4899_v57 = vadd.f32 %v4898_v21, %v4810_v42  ;;  %v12455_v40 = vld [vmem:[#allocation3 + $0x168] sm:$0xf]  ;;  %v5729_v39 = vld [vmem:[#allocation2 + $0x14] sm:$0x1]  ;;  %9992 = vmatpush.bf16.msrb.mxu1 %v13584_v1 }
 0x2c1   : > { %5589 = vst [vmem:[#allocation2 + $0x50] sm:$0x1] %v5588_v48  ;;  %v5325_v58 = vshrl.u32 %v5199_v14, 16  ;;  %v13453_v10 = vld [vmem:[#allocation3 + $0x188] sm:$0xf0]  ;;  %v5328_v16 = vshll.u32 %v5199_v14, 16 }
 0x2c2   : > { %v4988_v17 = vadd.f32 %v15367_v28, %v4899_v57  ;;  %4851 = vmatmul.bf16.gmra.mxu2 %v11928_v31  ;;  %v12456_v59 = vor.u32 %v13453_v10, %v12455_v40  ;;  %5704 = vst [vmem:[#allocation3 + $0x1b0] sm:$0xf] %v5672_v0  ;;  %v15464_v31 = vld [vmem:[#allocation3 + $0x24] sm:$0xf0]  ;;  %v5799_v12 = vrot.slane %v5797_v22, 4  ;;  %v5800_v5 = vshll.u32 %v5727_v37, 16 }
 0x2c3   : > { %v15453_v55 = vrot.slane %v5325_v58, 7  ;;  %6525 = vst [vmem:[#allocation3 + $0x30] sm:$0xf] %v6493_v15  ;;  %v5806_v2 = vshll.u32 %v5728_v33, 16  ;;  %v5810_v19 = vshrl.u32 %v5728_v33, 16  ;;  %v5816_v46 = vshll.u32 %v5729_v39, 16 }
 0x2c4   : > { %vm5049_vm0 = vcmp.gt.f32.partialorder %v4988_v17, 0.0  ;;  %v5082_v28 = vmul.f32 %v15118_v27, %v4988_v17  ;;  %4940 = vmatmul.bf16.gmra.mxu3 %v11932_v56  ;;  %9666 = vmatmul.bf16.gmra.mxu1 %v12456_v59  ;;  %v6223_v18 = vld [vmem:[#allocation2 + $0xc] sm:$0xe]  ;;  %v6224_v6 = vld [vmem:[#allocation2 + $0x10] sm:$0xf]  ;;  %v5802_v49 = vrot.slane %v5800_v5, 5 }
 0x2c5   : > { %v5330_v43 = vor.u32 %v5328_v16, %v15453_v55  ;;  %v4812_v3 = vpop.f32.mrf.mxu2  ;;  %v15462_v13 = vpop.f32.mrf.mxu0  ;;  %v5808_v62 = vrot.slane %v5806_v2, 5  ;;  %v17048_v48 = vld [vmem:[#allocation5_spill] sm:$0xff]  ;;  %v5812_v21 = vrot.slane %v5810_v19, 4  ;;  %v12226_v44 = vrot.slane %v6223_v18, 9  ;;  %v6225_v22 = vld [vmem:[#allocation2 + $0x14] sm:$0x1] }
 0x2c6   : > { %v5114_v30 = vsel %vm5049_vm0, %v4988_v17, %v5082_v28  ;;  %v4813_v52 = vadd.f32 %v4812_v3, %v14846_v23  ;;  %v4726_v37 = vadd.f32 %v17048_v48, %v14856_v61  ;;  %v12280_v23 = vor.u32 %v15455_v45, %v15464_v31  ;;  %v5594_v0 = vld [vmem:[#allocation2 + $0x5c] sm:$0x1]  ;;  %v6494_v61 = vld [vmem:[#allocation2 + $0x18] sm:$0xf]  ;;  %v12283_v40 = vld [vmem:[#allocation3 + $0x8] sm:$0xf] }
 0x2c7   : > { %v5591_v24 = vsel %vm15147_vm10, %v5330_v43, %v5590_v60  ;;  %v5200_v26 = vpack.c.bf16 %v5114_v30, %v5114_v30  ;;  %v4901_v42 = vpop.f32.mrf.mxu3  ;;  %v5673_v29 = vld [vmem:[#allocation2 + $0x4c] sm:$0xf]  ;;  %v5803_v50 = vor.u32 %v5802_v49, %v5799_v12  ;;  %v6325_v57 = vrot.slane %v6224_v6, 5  ;;  %v13409_v10 = vld [vmem:[#allocation3 + $0x28] sm:$0xf0] }
 0x2c8   : > { %5592 = vst [vmem:[#allocation2 + $0x54] sm:$0xf] %v5591_v24  ;;  %v4902_v14 = vadd.f32 %v4901_v42, %v4813_v52  ;;  %v5331_v56 = vrot.slane %v15453_v55, 4  ;;  %v5813_v58 = vor.u32 %v5812_v21, %v5808_v62  ;;  %v5818_v33 = vrot.slane %v5816_v46, 5  ;;  %v13405_v16 = vld [vmem:[#allocation3 + $0xc] sm:$0xf] }
 0x2c9   : > { %v5333_v8 = vshrl.u32 %v5200_v26, 16  ;;  %5705 = vst [vmem:[#allocation3 + $0x1d4] sm:$0xf] %v5673_v29  ;;  %v5336_v17 = vshll.u32 %v5200_v26, 16  ;;  %v5804_v45 = vrot.slane %v5803_v50, 4  ;;  %v6326_v1 = vsel %vm14112_vm5, %v12226_v44, %v6325_v57 }
 0x2ca   : > { %v4991_v15 = vadd.f32 %v15397_v35, %v4902_v14  ;;  %v12285_v59 = vld [vmem:[#allocation3 + $0x2c] sm:$0xf0]  ;;  %v5814_v28 = vrot.slane %v5813_v58, 4  ;;  %v6327_v39 = vrot.slane %v6325_v57, 4  ;;  %6462 = vst [vmem:[#allocation3 + $0x50] sm:$0xf] %v6326_v1 }
 0x2cb   : > { %v5335_v60 = vrot.slane %v5333_v8, 7  ;;  %v5809_v12 = vsel %vm13858_vm2, %v5804_v45, %v5808_v62  ;;  %v6328_v5 = vrot.slane %v6225_v22, 5  ;;  %6526 = vst [vmem:[#allocation3 + $0x54] sm:$0xf] %v6494_v61  ;;  %v5730_v2 = vld [vmem:[#allocation2 + $0x18] sm:$0xf]  ;;  %v12288_v46 = vor.u32 %v13405_v16, %v12285_v59 }
 0x2cc   : > { %vm5050_vm1 = vcmp.gt.f32.partialorder %v4991_v15, 0.0  ;;  %v5083_v55 = vmul.f32 %v15118_v27, %v4991_v15  ;;  %v12491_v19 = vld [vmem:[#allocation3 + $0x1b0] sm:$0xf]  ;;  %v5819_v18 = vsel %vm13858_vm2, %v5814_v28, %v5818_v33  ;;  %6190 = vst [vmem:[#allocation3 + $0x4c] sm:$0xf] %v5809_v12  ;;  %v5821_v49 = vshrl.u32 %v5730_v2, 16 }
 0x2cd   : > { %v5338_v35 = vor.u32 %v5336_v17, %v5335_v60  ;;  %v5340_v43 = vrot.slane %v5335_v60, 4  ;;  %v4814_v3 = vpop.f32.mrf.mxu2  ;;  %v15478_v31 = vpop.f32.mrf.mxu0  ;;  %6191 = vst [vmem:[#allocation3 + $0x70] sm:$0xf] %v5819_v18  ;;  %v5731_v29 = vld [vmem:[#allocation2 + $0x1c] sm:$0xf]  ;;  %v6329_v14 = vsel %vm14112_vm5, %v6327_v39, %v6328_v5 }
 0x2ce   : > { %v5115_v30 = vsel %vm5050_vm1, %v4991_v15, %v5083_v55  ;;  %v4815_v52 = vadd.f32 %v4814_v3, %v4726_v37  ;;  %v12284_v37 = vor.u32 %v13409_v10, %v12283_v40  ;;  %9908 = vmatmul.bf16.vlgmr.msrb.gmra.mxu0 %v12288_v46  ;;  %v6495_v21 = vld [vmem:[#allocation2 + $0x1c] sm:$0xf]  ;;  %v5597_v57 = vld [vmem:[#allocation2 + $0x60] sm:$0xf]  ;;  %v5824_v15 = vshll.u32 %v5730_v2, 16 }
 0x2cf   : > { %v5339_v6 = vsel %vm15175_vm14, %v5331_v56, %v5338_v35  ;;  %v5595_v24 = vsel %vm15182_vm15, %v5340_v43, %v5594_v0  ;;  %v5201_v26 = vpack.c.bf16 %v5115_v30, %v5115_v30  ;;  %v4903_v42 = vpop.f32.mrf.mxu3  ;;  %v5674_v44 = vld [vmem:[#allocation2 + $0x54] sm:$0xf]  ;;  %v5823_v0 = vrot.slane %v5821_v49, 4  ;;  %6463 = vst [vmem:[#allocation3 + $0x74] sm:$0xf] %v6329_v14 }
 0x2d0   : > { %5593 = vst [vmem:[#allocation2 + $0x58] sm:$0xf] %v5339_v6  ;;  %v4904_v62 = vadd.f32 %v4903_v42, %v4815_v52  ;;  %v13462_v48 = vld [vmem:[#allocation3 + $0x1d0] sm:$0xf0]  ;;  %v5830_v58 = vshll.u32 %v5731_v29, 16  ;;  %v5834_v61 = vshrl.u32 %v5731_v29, 16 }
 0x2d1   : > { %5596 = vst [vmem:[#allocation2 + $0x5c] sm:$0x1] %v5595_v24  ;;  %v5342_v8 = vshrl.u32 %v5201_v26, 16  ;;  %v12492_v50 = vor.u32 %v13462_v48, %v12491_v19  ;;  %v5345_v22 = vshll.u32 %v5201_v26, 16  ;;  %v5732_v17 = vld [vmem:[#allocation2 + $0x20] sm:$0x1] }
 0x2d2   : > { %v4993_v56 = vadd.f32 %v15430_v36, %v4904_v62  ;;  %9730 = vmatmul.bf16.vlgmr.msrb.gmra.mxu2 %v12280_v23  ;;  %5706 = vst [vmem:[#allocation3 + $0x1f8] sm:$0xf] %v5674_v44  ;;  %v5826_v40 = vrot.slane %v5824_v15, 5  ;;  %v5832_v16 = vrot.slane %v5830_v58, 5  ;;  %v5836_v55 = vrot.slane %v5834_v61, 4  ;;  %v17049_v48 = vld [vmem:[#allocation6_spill] sm:$0xff] }
 0x2d3   : > { %v15491_v33 = vrot.slane %v5342_v8, 7  ;;  %6527 = vst [vmem:[#allocation3 + $0x78] sm:$0xf] %v6495_v21  ;;  %v6226_v28 = vld [vmem:[#allocation2 + $0x18] sm:$0xe]  ;;  %v5840_v12 = vshll.u32 %v5732_v17, 16 }
 0x2d4   : > { %vm5051_vm3 = vcmp.gt.f32.partialorder %v4993_v56, 0.0  ;;  %v5084_v60 = vmul.f32 %v15118_v27, %v4993_v56  ;;  %9819 = vmatmul.bf16.vlgmr.msrb.gmra.mxu3 %v12284_v37  ;;  %9671 = vmatmul.bf16.gmra.mxu1 %v12492_v50  ;;  %v5827_v1 = vor.u32 %v5826_v40, %v5823_v0  ;;  %v5837_v52 = vor.u32 %v5836_v55, %v5832_v16  ;;  %v13414_v46 = vld [vmem:[#allocation3 + $0x54] sm:$0xf]  ;;  %v5601_v24 = vld [vmem:[#allocation2 + $0x68] sm:$0x1] }
 0x2d5   : > { %v5347_v10 = vor.u32 %v5345_v22, %v15491_v33  ;;  %v4817_v36 = vpop.f32.mrf.mxu2  ;;  %v15495_v23 = vpop.f32.mrf.mxu0  ;;  %v5348_v5 = vrot.slane %v15491_v33, 4  ;;  %v12227_v18 = vrot.slane %v6226_v28, 9  ;;  %v6228_v49 = vld [vmem:[#allocation2 + $0x20] sm:$0x1]  ;;  %v6496_v62 = vld [vmem:[#allocation2 + $0x24] sm:$0xf]  ;;  %v4731_v37 = vadd.f32 %v17049_v48, %v14889_v32 }
 0x2d6   : > { %v5116_v59 = vsel %vm5051_vm3, %v4993_v56, %v5084_v60  ;;  %v4818_v45 = vadd.f32 %v4817_v36, %v14879_v47  ;;  %v5828_v30 = vrot.slane %v5827_v1, 4  ;;  %v6227_v47 = vld [vmem:[#allocation2 + $0x1c] sm:$0xf]  ;;  %v5838_v29 = vrot.slane %v5837_v52, 4  ;;  %v12313_v21 = vld [vmem:[#allocation3 + $0x6c] sm:$0xf0] }
 0x2d7   : > { %v5598_v39 = vsel %vm15147_vm10, %v5347_v10, %v5597_v57  ;;  %v5202_v35 = vpack.c.bf16 %v5116_v59, %v5116_v59  ;;  %v4906_v43 = vpop.f32.mrf.mxu3  ;;  %v5675_v3 = vld [vmem:[#allocation2 + $0x58] sm:$0xf]  ;;  %v5842_v50 = vrot.slane %v5840_v12, 5  ;;  %v6332_v56 = vrot.slane %v6227_v47, 5  ;;  %6528 = vst [vmem:[#allocation3 + $0x9c] sm:$0xf] %v6496_v62 }
 0x2d8   : > { %5599 = vst [vmem:[#allocation2 + $0x60] sm:$0xf] %v5598_v39  ;;  %v4907_v2 = vadd.f32 %v4906_v43, %v4818_v45  ;;  %v5833_v42 = vsel %vm13858_vm2, %v5828_v30, %v5832_v16  ;;  %v13413_v33 = vld [vmem:[#allocation3 + $0x4c] sm:$0xf]  ;;  %v6335_v61 = vrot.slane %v6228_v49, 5 }
 0x2d9   : > { %v5350_v19 = vshrl.u32 %v5202_v35, 16  ;;  %5707 = vst [vmem:[#allocation3 + $0x21c] sm:$0xf] %v5675_v3  ;;  %v5353_v6 = vshll.u32 %v5202_v35, 16  ;;  %v5843_v32 = vsel %vm13858_vm2, %v5838_v29, %v5842_v50  ;;  %v5733_v60 = vld [vmem:[#allocation2 + $0x24] sm:$0xf]  ;;  %v6333_v36 = vsel %vm14112_vm5, %v12227_v18, %v6332_v56 }
 0x2da   : > { %v4996_v26 = vadd.f32 %v15462_v13, %v4907_v2  ;;  %v12321_v8 = vld [vmem:[#allocation3 + $0x74] sm:$0xf0]  ;;  %6192 = vst [vmem:[#allocation3 + $0x94] sm:$0xf] %v5833_v42  ;;  %v6497_v13 = vld [vmem:[#allocation2 + $0x28] sm:$0xf]  ;;  %v12316_v12 = vor.u32 %v13413_v33, %v12313_v21 }
 0x2db   : > { %v5352_v14 = vrot.slane %v5350_v19, 7  ;;  %v12324_v57 = vor.u32 %v13414_v46, %v12321_v8  ;;  %6529 = vst [vmem:[#allocation3 + $0xc0] sm:$0xf] %v6497_v13  ;;  %v12527_v10 = vld [vmem:[#allocation3 + $0x1f8] sm:$0xf]  ;;  %v6334_v16 = vrot.slane %v6332_v56, 4 }
 0x2dc   : > { %vm5052_vm4 = vcmp.gt.f32.partialorder %v4996_v26, 0.0  ;;  %v5085_v44 = vmul.f32 %v15118_v27, %v4996_v26  ;;  %6193 = vst [vmem:[#allocation3 + $0xb8] sm:$0xf] %v5843_v32  ;;  %v12319_v28 = vld [vmem:[#allocation3 + $0x50] sm:$0xf]  ;;  %v5845_v35 = vshrl.u32 %v5733_v60, 16 }
 0x2dd   : > { %v5355_v0 = vor.u32 %v5353_v6, %v5352_v14  ;;  %v5357_v15 = vrot.slane %v5352_v14, 4  ;;  %v4819_v58 = vpop.f32.mrf.mxu2  ;;  %v15507_v22 = vpop.f32.mrf.mxu0  ;;  %v13418_v39 = vld [vmem:[#allocation3 + $0x70] sm:$0xf0]  ;;  %6464 = vst [vmem:[#allocation3 + $0x98] sm:$0xf] %v6333_v36  ;;  %v6336_v2 = vsel %vm14112_vm5, %v6334_v16, %v6335_v61  ;;  %v13583_v18 = vld [vmem:[%s17019_s3 + $0x118] sm:$0xff] }
 0x2de   : > { %v5117_v17 = vsel %vm5052_vm4, %v4996_v26, %v5085_v44  ;;  %v4820_v40 = vadd.f32 %v4819_v58, %v4731_v37  ;;  %9913 = vmatmul.bf16.gmra.mxu0 %v12324_v57  ;;  %v5734_v30 = vld [vmem:[#allocation2 + $0x28] sm:$0xf]  ;;  %v12320_v47 = vor.u32 %v13418_v39, %v12319_v28  ;;  %6465 = vst [vmem:[#allocation3 + $0xbc] sm:$0xf] %v6336_v2  ;;  %v5847_v26 = vrot.slane %v5845_v35, 4 }
 0x2df   : > { %v5356_v59 = vsel %vm15175_vm14, %v5348_v5, %v5355_v0  ;;  %v5602_v45 = vsel %vm15182_vm15, %v5357_v15, %v5601_v24  ;;  %v5203_v1 = vpack.c.bf16 %v5117_v17, %v5117_v17  ;;  %v4908_v55 = vpop.f32.mrf.mxu3  ;;  %v5676_v19 = vld [vmem:[#allocation2 + $0x60] sm:$0xf]  ;;  %v5848_v42 = vshll.u32 %v5733_v60, 16  ;;  %v5604_v29 = vld [vmem:[#allocation2 + $0x6c] sm:$0xf]  ;;  %9993 = vmatpush.bf16.msrb.mxu1 %v13583_v18  ;;  %v15532_v60 = vpop.f32.mrf.mxu1 }
 0x2e0   : > { %5600 = vst [vmem:[#allocation2 + $0x64] sm:$0xf] %v5356_v59  ;;  %v4909_v43 = vadd.f32 %v4908_v55, %v4820_v40  ;;  %v13471_v3 = vld [vmem:[#allocation3 + $0x218] sm:$0xf0]  ;;  %v5858_v62 = vshrl.u32 %v5734_v30, 16 }
 0x2e1   : > { %5603 = vst [vmem:[#allocation2 + $0x68] sm:$0x1] %v5602_v45  ;;  %v5359_v5 = vshrl.u32 %v5203_v1, 16  ;;  %v12528_v52 = vor.u32 %v13471_v3, %v12527_v10  ;;  %v5362_v24 = vshll.u32 %v5203_v1, 16  ;;  %v5735_v21 = vld [vmem:[#allocation2 + $0x2c] sm:$0x1] }
 0x2e2   : > { %v4998_v46 = vadd.f32 %v15478_v31, %v4909_v43  ;;  %9735 = vmatmul.bf16.gmra.mxu2 %v12316_v12  ;;  %5708 = vst [vmem:[#allocation3 + $0x240] sm:$0xf] %v5676_v19  ;;  %v5854_v31 = vshll.u32 %v5734_v30, 16  ;;  %v5850_v8 = vrot.slane %v5848_v42, 5  ;;  %v6229_v56 = vld [vmem:[#allocation2 + $0x24] sm:$0xe] }
 0x2e3   : > { %v15523_v6 = vrot.slane %v5359_v5, 7  ;;  %v5860_v32 = vrot.slane %v5858_v62, 4  ;;  %v6230_v61 = vld [vmem:[#allocation2 + $0x28] sm:$0xf]  ;;  %v5864_v40 = vshll.u32 %v5735_v21, 16  ;;  %v12228_v35 = vrot.slane %v6229_v56, 9 }
 0x2e4   : > { %vm5053_vm6 = vcmp.gt.f32.partialorder %v4998_v46, 0.0  ;;  %v5086_v49 = vmul.f32 %v15118_v27, %v4998_v46  ;;  %9824 = vmatmul.bf16.gmra.mxu3 %v12320_v47  ;;  %9676 = vmatmul.bf16.gmra.mxu1 %v12528_v52  ;;  %v5856_v57 = vrot.slane %v5854_v31, 5  ;;  %v5851_v33 = vor.u32 %v5850_v8, %v5847_v26  ;;  %v17050_v10 = vld [vmem:[#allocation7_spill] sm:$0xff]  ;;  %v12357_v59 = vld [vmem:[#allocation3 + $0xbc] sm:$0xf0] }
 0x2e5   : > { %v5364_v48 = vor.u32 %v5362_v24, %v15523_v6  ;;  %v4822_v37 = vpop.f32.mrf.mxu2  ;;  %v15527_v14 = vpop.f32.mrf.mxu0  ;;  %v4736_v36 = vadd.f32 %v17050_v10, %v14919_v53  ;;  %v5608_v1 = vld [vmem:[#allocation2 + $0x74] sm:$0x1]  ;;  %v6231_v39 = vld [vmem:[#allocation2 + $0x2c] sm:$0x1]  ;;  %v6339_v43 = vrot.slane %v6230_v61, 5  ;;  %v5866_v30 = vrot.slane %v5864_v40, 5 }
 0x2e6   : > { %v5118_v50 = vsel %vm5053_vm6, %v4998_v46, %v5086_v49  ;;  %v4823_v44 = vadd.f32 %v4822_v37, %v14909_v41  ;;  %v5365_v41 = vrot.slane %v15523_v6, 4  ;;  %v5861_v45 = vor.u32 %v5860_v32, %v5856_v57  ;;  %v6498_v5 = vld [vmem:[#allocation2 + $0x30] sm:$0xf]  ;;  %v13423_v52 = vld [vmem:[#allocation3 + $0x9c] sm:$0xf] }
 0x2e7   : > { %v5605_v13 = vsel %vm15147_vm10, %v5364_v48, %v5604_v29  ;;  %v5204_v0 = vpack.c.bf16 %v5118_v50, %v5118_v50  ;;  %v4911_v15 = vpop.f32.mrf.mxu3  ;;  %v5677_v58 = vld [vmem:[#allocation2 + $0x64] sm:$0xf]  ;;  %v5852_v28 = vrot.slane %v5851_v33, 4  ;;  %v6340_v46 = vsel %vm14112_vm5, %v12228_v35, %v6339_v43  ;;  %6530 = vst [vmem:[#allocation3 + $0xe4] sm:$0xf] %v6498_v5 }
 0x2e8   : > { %5606 = vst [vmem:[#allocation2 + $0x6c] sm:$0xf] %v5605_v13  ;;  %v4912_v17 = vadd.f32 %v4911_v15, %v4823_v44  ;;  %v5862_v2 = vrot.slane %v5861_v45, 4  ;;  %v13422_v6 = vld [vmem:[#allocation3 + $0x94] sm:$0xf]  ;;  %v6341_v29 = vrot.slane %v6339_v43, 4  ;;  %v12360_v21 = vor.u32 %v13423_v52, %v12357_v59  ;;  %v15551_v15 = vpop.f32.mrf.mxu1 }
 0x2e9   : > { %v5367_v16 = vshrl.u32 %v5204_v0, 16  ;;  %5709 = vst [vmem:[#allocation3 + $0x264] sm:$0xf] %v5677_v58  ;;  %v5370_v12 = vshll.u32 %v5204_v0, 16  ;;  %v5857_v19 = vsel %vm13858_vm2, %v5852_v28, %v5856_v57  ;;  %v12349_v24 = vld [vmem:[#allocation3 + $0xb4] sm:$0xf0] }
 0x2ea   : > { %v5001_v55 = vadd.f32 %v15495_v23, %v4912_v17  ;;  %v5867_v42 = vsel %vm13858_vm2, %v5862_v2, %v5866_v30  ;;  %6194 = vst [vmem:[#allocation3 + $0xdc] sm:$0xf] %v5857_v19  ;;  %v12563_v62 = vld [vmem:[#allocation3 + $0x240] sm:$0xf]  ;;  %v12355_v48 = vld [vmem:[#allocation3 + $0x98] sm:$0xf]  ;;  %v12352_v32 = vor.u32 %v13422_v6, %v12349_v24 }
 0x2eb   : > { %v5369_v3 = vrot.slane %v5367_v16, 7  ;;  %v13427_v37 = vld [vmem:[#allocation3 + $0xb8] sm:$0xf0]  ;;  %6195 = vst [vmem:[#allocation3 + $0x100] sm:$0xf] %v5867_v42  ;;  %v6342_v8 = vrot.slane %v6231_v39, 5 }
 0x2ec   : > { %vm5054_vm7 = vcmp.gt.f32.partialorder %v5001_v55, 0.0  ;;  %v5087_v53 = vmul.f32 %v15118_v27, %v5001_v55  ;;  %6466 = vst [vmem:[#allocation3 + $0xe0] sm:$0xf] %v6340_v46  ;;  %v5736_v13 = vld [vmem:[#allocation2 + $0x30] sm:$0xf] }
 0x2ed   : > { %v5372_v23 = vor.u32 %v5370_v12, %v5369_v3  ;;  %v5374_v47 = vrot.slane %v5369_v3, 4  ;;  %v4824_v18 = vpop.f32.mrf.mxu2  ;;  %v15543_v26 = vpop.f32.mrf.mxu0  ;;  %v5737_v0 = vld [vmem:[#allocation2 + $0x34] sm:$0xf]  ;;  %v6343_v61 = vsel %vm14112_vm5, %v6341_v29, %v6342_v8  ;;  %v5611_v16 = vld [vmem:[#allocation2 + $0x78] sm:$0xf]  ;;  %v5869_v45 = vshrl.u32 %v5736_v13, 16 }
 0x2ee   : > { %v5119_v49 = vsel %vm5054_vm7, %v5001_v55, %v5087_v53  ;;  %v4825_v31 = vadd.f32 %v4824_v18, %v4736_v36  ;;  %9918 = vmatmul.bf16.gmra.mxu0 %v12360_v21  ;;  %v6499_v17 = vld [vmem:[#allocation2 + $0x34] sm:$0xf]  ;;  %v12356_v36 = vor.u32 %v13427_v37, %v12355_v48  ;;  %v5878_v55 = vshll.u32 %v5737_v0, 16  ;;  %6467 = vst [vmem:[#allocation3 + $0x104] sm:$0xf] %v6343_v61 }
 0x2ef   : > { %v5373_v50 = vsel %vm15175_vm14, %v5365_v41, %v5372_v23  ;;  %v5609_v44 = vsel %vm15182_vm15, %v5374_v47, %v5608_v1  ;;  %v5205_v57 = vpack.c.bf16 %v5119_v49, %v5119_v49  ;;  %v4913_v56 = vpop.f32.mrf.mxu3  ;;  %v5678_v41 = vld [vmem:[#allocation2 + $0x6c] sm:$0xf]  ;;  %v5872_v1 = vshll.u32 %v5736_v13, 16  ;;  %6531 = vst [vmem:[#allocation3 + $0x108] sm:$0xf] %v6499_v17  ;;  %v17051_v37 = vld [vmem:[#allocation8_spill] sm:$0xff] }
 0x2f0   : > { %5607 = vst [vmem:[#allocation2 + $0x70] sm:$0xf] %v5373_v50  ;;  %v4914_v58 = vadd.f32 %v4913_v56, %v4825_v31  ;;  %v13480_v33 = vld [vmem:[#allocation3 + $0x260] sm:$0xf0]  ;;  %v5882_v35 = vshrl.u32 %v5737_v0, 16  ;;  %v5871_v12 = vrot.slane %v5869_v45, 4  ;;  %v4741_v21 = vadd.f32 %v17051_v37, %v14952_v11  ;;  %v15568_v13 = vpop.f32.mrf.mxu1 }
 0x2f1   : > { %5610 = vst [vmem:[#allocation2 + $0x74] sm:$0x1] %v5609_v44  ;;  %v5376_v40 = vshrl.u32 %v5205_v57, 16  ;;  %v12564_v10 = vor.u32 %v13480_v33, %v12563_v62  ;;  %v5379_v39 = vshll.u32 %v5205_v57, 16  ;;  %v5738_v3 = vld [vmem:[#allocation2 + $0x38] sm:$0x1] }
 0x2f2   : > { %v5003_v59 = vadd.f32 %v15507_v22, %v4914_v58  ;;  %9740 = vmatmul.bf16.gmra.mxu2 %v12352_v32  ;;  %5710 = vst [vmem:[#allocation3 + $0x288] sm:$0xf] %v5678_v41  ;;  %v5874_v5 = vrot.slane %v5872_v1, 5  ;;  %v6232_v53 = vld [vmem:[#allocation2 + $0x30] sm:$0xe]  ;;  %v5880_v23 = vrot.slane %v5878_v55, 5 }
 0x2f3   : > { %v15556_v28 = vrot.slane %v5376_v40, 7  ;;  %v6233_v52 = vld [vmem:[#allocation2 + $0x34] sm:$0xf]  ;;  %v5884_v29 = vrot.slane %v5882_v35, 4  ;;  %v5888_v31 = vshll.u32 %v5738_v3, 16  ;;  %v12229_v62 = vrot.slane %v6232_v53, 9 }
 0x2f4   : > { %vm5055_vm8 = vcmp.gt.f32.partialorder %v5003_v59, 0.0  ;;  %v5088_v43 = vmul.f32 %v15118_v27, %v5003_v59  ;;  %9829 = vmatmul.bf16.gmra.mxu3 %v12356_v36  ;;  %9681 = vmatmul.bf16.gmra.mxu1 %v12564_v10  ;;  %v5875_v42 = vor.u32 %v5874_v5, %v5871_v12  ;;  %v6346_v48 = vrot.slane %v6233_v52, 5  ;;  %v13432_v50 = vld [vmem:[#allocation3 + $0xe4] sm:$0xf]  ;;  %v5615_v56 = vld [vmem:[#allocation2 + $0x80] sm:$0x1] }
 0x2f5   : > { %v5381_v2 = vor.u32 %v5379_v39, %v15556_v28  ;;  %v4827_v22 = vpop.f32.mrf.mxu2  ;;  %v15560_v30 = vpop.f32.mrf.mxu0  ;;  %v5382_v8 = vrot.slane %v15556_v28, 4  ;;  %v5885_v44 = vor.u32 %v5884_v29, %v5880_v23  ;;  %v6234_v33 = vld [vmem:[#allocation2 + $0x38] sm:$0x1]  ;;  %v6500_v61 = vld [vmem:[#allocation2 + $0x3c] sm:$0xf]  ;;  %v5890_v10 = vrot.slane %v5888_v31, 5 }
 0x2f6   : > { %v5120_v19 = vsel %vm5055_vm8, %v5003_v59, %v5088_v43  ;;  %v4828_v46 = vadd.f32 %v4827_v22, %v14942_v34  ;;  %v5876_v58 = vrot.slane %v5875_v42, 4  ;;  %v6347_v32 = vsel %vm14112_vm5, %v12229_v62, %v6346_v48  ;;  %v12393_v11 = vld [vmem:[#allocation3 + $0x104] sm:$0xf0]  ;;  %v13431_v28 = vld [vmem:[#allocation3 + $0xdc] sm:$0xf] }
 0x2f7   : > { %v5612_v47 = vsel %vm15147_vm10, %v5381_v2, %v5611_v16  ;;  %v5206_v18 = vpack.c.bf16 %v5120_v19, %v5120_v19  ;;  %v4916_v6 = vpop.f32.mrf.mxu3  ;;  %v5679_v24 = vld [vmem:[#allocation2 + $0x70] sm:$0xf]  ;;  %v5886_v40 = vrot.slane %v5885_v44, 4  ;;  %v6348_v36 = vrot.slane %v6346_v48, 4  ;;  %6468 = vst [vmem:[#allocation3 + $0x128] sm:$0xf] %v6347_v32 }
 0x2f8   : > { %5613 = vst [vmem:[#allocation2 + $0x78] sm:$0xf] %v5612_v47  ;;  %v4917_v49 = vadd.f32 %v4916_v6, %v4828_v46  ;;  %v12396_v16 = vor.u32 %v13432_v50, %v12393_v11  ;;  %v5881_v59 = vsel %vm13858_vm2, %v5876_v58, %v5880_v23  ;;  %v12385_v39 = vld [vmem:[#allocation3 + $0xfc] sm:$0xf0]  ;;  %v6349_v3 = vrot.slane %v6234_v33, 5  ;;  %v13582_v44 = vld [vmem:[%s17019_s3 + $0x110] sm:$0xff] }
 0x2f9   : > { %v5384_v34 = vshrl.u32 %v5206_v18, 16  ;;  %5711 = vst [vmem:[#allocation3 + $0x2ac] sm:$0xf] %v5679_v24  ;;  %v5387_v57 = vshll.u32 %v5206_v18, 16  ;;  %v5891_v43 = vsel %vm13858_vm2, %v5886_v40, %v5890_v10  ;;  %v12391_v22 = vld [vmem:[#allocation3 + $0xe0] sm:$0xf]  ;;  %v12388_v29 = vor.u32 %v13431_v28, %v12385_v39  ;;  %9994 = vmatpush.bf16.msrb.mxu1 %v13582_v44 }
 0x2fa   : > { %v5006_v0 = vadd.f32 %v15527_v14, %v4917_v49  ;;  %v5739_v14 = vld [vmem:[#allocation2 + $0x3c] sm:$0xf]  ;;  %6196 = vst [vmem:[#allocation3 + $0x124] sm:$0xf] %v5881_v59  ;;  %v12599_v18 = vld [vmem:[#allocation3 + $0x288] sm:$0xf]  ;;  %v6350_v49 = vsel %vm14112_vm5, %v6348_v36, %v6349_v3 }
 0x2fb   : > { %v5386_v17 = vrot.slane %v5384_v34, 7  ;;  %v13436_v5 = vld [vmem:[#allocation3 + $0x100] sm:$0xf0]  ;;  %6197 = vst [vmem:[#allocation3 + $0x148] sm:$0xf] %v5891_v43  ;;  %v5893_v53 = vshrl.u32 %v5739_v14, 16 }
 0x2fc   : > { %vm5056_vm9 = vcmp.gt.f32.partialorder %v5006_v0, 0.0  ;;  %v5089_v41 = vmul.f32 %v15118_v27, %v5006_v0  ;;  %v5896_v52 = vshll.u32 %v5739_v14, 16  ;;  %6532 = vst [vmem:[#allocation3 + $0x12c] sm:$0xf] %v6500_v61  ;;  %v5740_v6 = vld [vmem:[#allocation2 + $0x40] sm:$0xf]  ;;  %v12392_v37 = vor.u32 %v13436_v5, %v12391_v22 }
 0x2fd   : > { %v5389_v45 = vor.u32 %v5387_v57, %v5386_v17  ;;  %v5391_v1 = vrot.slane %v5386_v17, 4  ;;  %v4829_v55 = vpop.f32.mrf.mxu2  ;;  %v15576_v35 = vpop.f32.mrf.mxu0  ;;  %v6501_v31 = vld [vmem:[#allocation2 + $0x40] sm:$0xf]  ;;  %v5895_v57 = vrot.slane %v5893_v53, 4  ;;  %6469 = vst [vmem:[#allocation3 + $0x14c] sm:$0xf] %v6350_v49 }
 0x2fe   : > { %v5121_v12 = vsel %vm5056_vm9, %v5006_v0, %v5089_v41  ;;  %v4830_v2 = vadd.f32 %v4829_v55, %v4741_v21  ;;  %9923 = vmatmul.bf16.gmra.mxu0 %v12396_v16  ;;  %v5902_v0 = vshll.u32 %v5740_v6, 16  ;;  %v5906_v32 = vshrl.u32 %v5740_v6, 16  ;;  %6533 = vst [vmem:[#allocation3 + $0x150] sm:$0xf] %v6501_v31  ;;  %v6235_v41 = vld [vmem:[#allocation2 + $0x3c] sm:$0xe] }
 0x2ff   : > { %v5390_v19 = vsel %vm15175_vm14, %v5382_v8, %v5389_v45  ;;  %v5616_v46 = vsel %vm15182_vm15, %v5391_v1, %v5615_v56  ;;  %v5207_v23 = vpack.c.bf16 %v5121_v12, %v5121_v12  ;;  %v4918_v47 = vpop.f32.mrf.mxu3  ;;  %v5680_v21 = vld [vmem:[#allocation2 + $0x78] sm:$0xf]  ;;  %v5618_v8 = vld [vmem:[#allocation2 + $0x84] sm:$0xf]  ;;  %v5898_v56 = vrot.slane %v5896_v52, 5 }
 0x300   : > { %5614 = vst [vmem:[#allocation2 + $0x7c] sm:$0xf] %v5390_v19  ;;  %v4919_v24 = vadd.f32 %v4918_v47, %v4830_v2  ;;  %v13489_v42 = vld [vmem:[#allocation3 + $0x2a8] sm:$0xf0]  ;;  %v15587_v50 = vpop.f32.mrf.mxu1  ;;  %v5904_v11 = vrot.slane %v5902_v0, 5  ;;  %v5908_v36 = vrot.slane %v5906_v32, 4 }
 0x301   : > { %5617 = vst [vmem:[#allocation2 + $0x80] sm:$0x1] %v5616_v46  ;;  %v5393_v62 = vshrl.u32 %v5207_v23, 16  ;;  %v12600_v48 = vor.u32 %v13489_v42, %v12599_v18  ;;  %v5396_v33 = vshll.u32 %v5207_v23, 16  ;;  %v5899_v17 = vor.u32 %v5898_v56, %v5895_v57  ;;  %v6236_v16 = vld [vmem:[#allocation2 + $0x40] sm:$0xf] }
 0x302   : > { %v5008_v34 = vadd.f32 %v15543_v26, %v4919_v24  ;;  %9745 = vmatmul.bf16.gmra.mxu2 %v12388_v29  ;;  %5712 = vst [vmem:[#allocation3 + $0x2d0] sm:$0xf] %v5680_v21  ;;  %v5741_v26 = vld [vmem:[#allocation2 + $0x44] sm:$0x1]  ;;  %v5909_v3 = vor.u32 %v5908_v36, %v5904_v11  ;;  %v12230_v5 = vrot.slane %v6235_v41, 9  ;;  %v6353_v53 = vrot.slane %v6236_v16, 5 }
 0x303   : > { %v15592_v58 = vrot.slane %v5393_v62, 7  ;;  %v5900_v1 = vrot.slane %v5899_v17, 4  ;;  %v5912_v12 = vshll.u32 %v5741_v26, 16  ;;  %v6502_v19 = vld [vmem:[#allocation2 + $0x48] sm:$0xf]  ;;  %v17052_v29 = vld [vmem:[#allocation9_spill] sm:$0xff] }
 0x304   : > { %vm5057_vm11 = vcmp.gt.f32.partialorder %v5008_v34, 0.0  ;;  %v5090_v61 = vmul.f32 %v15118_v27, %v5008_v34  ;;  %9834 = vmatmul.bf16.gmra.mxu3 %v12392_v37  ;;  %9686 = vmatmul.bf16.gmra.mxu1 %v12600_v48  ;;  %v5622_v46 = vld [vmem:[#allocation2 + $0x8c] sm:$0x1]  ;;  %v5910_v18 = vrot.slane %v5909_v3, 4  ;;  %v6354_v24 = vsel %vm14112_vm5, %v12230_v5, %v6353_v53  ;;  %v12421_v48 = vld [vmem:[#allocation3 + $0x144] sm:$0xf0] }
 0x305   : > { %v5398_v40 = vor.u32 %v5396_v33, %v15592_v58  ;;  %v4832_v10 = vpop.f32.mrf.mxu2  ;;  %v15597_v45 = vpop.f32.mrf.mxu0  ;;  %v5905_v22 = vsel %vm13858_vm2, %v5900_v1, %v5904_v11  ;;  %v5914_v6 = vrot.slane %v5912_v12, 5  ;;  %v6503_v42 = vld [vmem:[#allocation2 + $0x4c] sm:$0xf]  ;;  %v4746_v49 = vadd.f32 %v17052_v29, %v14982_v38  ;;  %v12429_v37 = vld [vmem:[#allocation3 + $0x14c] sm:$0xf0] }
 0x306   : > { %v5122_v59 = vsel %vm5057_vm11, %v5008_v34, %v5090_v61  ;;  %v4833_v14 = vadd.f32 %v4832_v10, %v14972_v7  ;;  %v6237_v7 = vld [vmem:[#allocation2 + $0x44] sm:$0x1]  ;;  %6198 = vst [vmem:[#allocation3 + $0x16c] sm:$0xf] %v5905_v22  ;;  %v5742_v34 = vld [vmem:[#allocation2 + $0x48] sm:$0xf] }
 0x307   : > { %v5619_v55 = vsel %vm15147_vm10, %v5398_v40, %v5618_v8  ;;  %v5208_v28 = vpack.c.bf16 %v5122_v59, %v5122_v59  ;;  %v4921_v39 = vpop.f32.mrf.mxu3  ;;  %v5681_v43 = vld [vmem:[#allocation2 + $0x7c] sm:$0xf]  ;;  %6470 = vst [vmem:[#allocation3 + $0x170] sm:$0xf] %v6354_v24  ;;  %v5915_v21 = vsel %vm13858_vm2, %v5910_v18, %v5914_v6  ;;  %v6355_v8 = vrot.slane %v6353_v53, 4 }
 0x308   : > { %5620 = vst [vmem:[#allocation2 + $0x84] sm:$0xf] %v5619_v55  ;;  %v4922_v2 = vadd.f32 %v4921_v39, %v4833_v14  ;;  %v15604_v47 = vpop.f32.mrf.mxu1  ;;  %v5399_v44 = vrot.slane %v15592_v58, 4  ;;  %v13440_v38 = vld [vmem:[#allocation3 + $0x124] sm:$0xf]  ;;  %v6356_v11 = vrot.slane %v6237_v7, 5 }
 0x309   : > { %v5401_v52 = vshrl.u32 %v5208_v28, 16  ;;  %5713 = vst [vmem:[#allocation3 + $0x2f4] sm:$0xf] %v5681_v43  ;;  %v5404_v62 = vshll.u32 %v5208_v28, 16  ;;  %v13441_v33 = vld [vmem:[#allocation3 + $0x12c] sm:$0xf]  ;;  %v12424_v28 = vor.u32 %v13440_v38, %v12421_v48 }
 0x30a   : > { %v5011_v23 = vadd.f32 %v15560_v30, %v4922_v2  ;;  %6534 = vst [vmem:[#allocation3 + $0x174] sm:$0xf] %v6502_v19  ;;  %v12635_v26 = vld [vmem:[#allocation3 + $0x2d0] sm:$0xf]  ;;  %v12432_v17 = vor.u32 %v13441_v33, %v12429_v37  ;;  %v12427_v41 = vld [vmem:[#allocation3 + $0x128] sm:$0xf]  ;;  %v6357_v43 = vsel %vm14112_vm5, %v6355_v8, %v6356_v11 }
 0x30b   : > { %v5403_v31 = vrot.slane %v5401_v52, 7  ;;  %6199 = vst [vmem:[#allocation3 + $0x190] sm:$0xf] %v5915_v21  ;;  %v13445_v16 = vld [vmem:[#allocation3 + $0x148] sm:$0xf0]  ;;  %v5917_v14 = vshrl.u32 %v5742_v34, 16 }
 0x30c   : > { %vm5058_vm12 = vcmp.gt.f32.partialorder %v5011_v23, 0.0  ;;  %v5091_v30 = vmul.f32 %v15118_v27, %v5011_v23  ;;  %6535 = vst [vmem:[#allocation3 + $0x198] sm:$0xf] %v6503_v42  ;;  %v5743_v59 = vld [vmem:[#allocation2 + $0x4c] sm:$0xf]  ;;  %v5920_v3 = vshll.u32 %v5742_v34, 16  ;;  %v12428_v52 = vor.u32 %v13445_v16, %v12427_v41 }
 0x30d   : > { %v5406_v57 = vor.u32 %v5404_v62, %v5403_v31  ;;  %v5408_v56 = vrot.slane %v5403_v31, 4  ;;  %v4834_v0 = vpop.f32.mrf.mxu2  ;;  %v15618_v39 = vpop.f32.mrf.mxu0  ;;  %6471 = vst [vmem:[#allocation3 + $0x194] sm:$0xf] %v6357_v43  ;;  %v5926_v24 = vshll.u32 %v5743_v59, 16  ;;  %v5744_v29 = vld [vmem:[#allocation2 + $0x50] sm:$0x1] }
 0x30e   : > { %v5123_v32 = vsel %vm5058_vm12, %v5011_v23, %v5091_v30  ;;  %v4835_v61 = vadd.f32 %v4834_v0, %v4746_v49  ;;  %9928 = vmatmul.bf16.gmra.mxu0 %v12432_v17  ;;  %v5625_v23 = vld [vmem:[#allocation2 + $0x90] sm:$0xf]  ;;  %v5922_v6 = vrot.slane %v5920_v3, 5  ;;  %v5930_v49 = vshrl.u32 %v5743_v59, 16  ;;  %v6238_v31 = vld [vmem:[#allocation2 + $0x48] sm:$0xe] }
 0x30f   : > { %v5407_v40 = vsel %vm15175_vm14, %v5399_v44, %v5406_v57  ;;  %v5623_v10 = vsel %vm15182_vm15, %v5408_v56, %v5622_v46  ;;  %v5209_v36 = vpack.c.bf16 %v5123_v32, %v5123_v32  ;;  %v4923_v58 = vpop.f32.mrf.mxu3  ;;  %v5682_v22 = vld [vmem:[#allocation2 + $0x84] sm:$0xf]  ;;  %v5919_v46 = vrot.slane %v5917_v14, 4  ;;  %v6239_v30 = vld [vmem:[#allocation2 + $0x4c] sm:$0xf] }
 0x310   : > { %5621 = vst [vmem:[#allocation2 + $0x88] sm:$0xf] %v5407_v40  ;;  %v4924_v1 = vadd.f32 %v4923_v58, %v4835_v61  ;;  %v13498_v55 = vld [vmem:[#allocation3 + $0x2f0] sm:$0xf0]  ;;  %v15623_v53 = vpop.f32.mrf.mxu1  ;;  %v6504_v21 = vld [vmem:[#allocation2 + $0x54] sm:$0xf] }
 0x311   : > { %5624 = vst [vmem:[#allocation2 + $0x8c] sm:$0x1] %v5623_v10  ;;  %v5410_v12 = vshrl.u32 %v5209_v36, 16  ;;  %v12636_v2 = vor.u32 %v13498_v55, %v12635_v26  ;;  %v5413_v19 = vshll.u32 %v5209_v36, 16  ;;  %v5923_v37 = vor.u32 %v5922_v6, %v5919_v46  ;;  %v6505_v8 = vld [vmem:[#allocation2 + $0x58] sm:$0xf] }
 0x312   : > { %v5013_v5 = vadd.f32 %v15576_v35, %v4924_v1  ;;  %9750 = vmatmul.bf16.gmra.mxu2 %v12424_v28  ;;  %5714 = vst [vmem:[#allocation3 + $0x318] sm:$0xf] %v5682_v22  ;;  %v5928_v0 = vrot.slane %v5926_v24, 5  ;;  %v5932_v38 = vrot.slane %v5930_v49, 4  ;;  %v5936_v61 = vshll.u32 %v5744_v29, 16  ;;  %v17053_v26 = vld [vmem:[#allocation10_spill] sm:$0xff] }
 0x313   : > { %v15625_v7 = vrot.slane %v5410_v12, 7  ;;  %6536 = vst [vmem:[#allocation3 + $0x1bc] sm:$0xf] %v6504_v21  ;;  %v5924_v32 = vrot.slane %v5923_v37, 4  ;;  %v6240_v40 = vld [vmem:[#allocation2 + $0x50] sm:$0x1] }
 0x314   : > { %vm5059_vm13 = vcmp.gt.f32.partialorder %v5013_v5, 0.0  ;;  %v5092_v18 = vmul.f32 %v15118_v27, %v5013_v5  ;;  %9839 = vmatmul.bf16.gmra.mxu3 %v12428_v52  ;;  %9691 = vmatmul.bf16.gmra.mxu1 %v12636_v2  ;;  %v5933_v11 = vor.u32 %v5932_v38, %v5928_v0  ;;  %v5629_v10 = vld [vmem:[#allocation2 + $0x98] sm:$0x1]  ;;  %v12465_v16 = vld [vmem:[#allocation3 + $0x194] sm:$0xf0]  ;;  %v12231_v14 = vrot.slane %v6238_v31, 9 }
 0x315   : > { %v5415_v42 = vor.u32 %v5413_v19, %v15625_v7  ;;  %v4837_v35 = vpop.f32.mrf.mxu2  ;;  %v5929_v59 = vsel %vm13858_vm2, %v5924_v32, %v5928_v0  ;;  %v6360_v1 = vrot.slane %v6239_v30, 5  ;;  %6537 = vst [vmem:[#allocation3 + $0x1e0] sm:$0xf] %v6505_v8  ;;  %v5938_v43 = vrot.slane %v5936_v61, 5  ;;  %v5745_v22 = vld [vmem:[#allocation2 + $0x54] sm:$0xf] }
 0x316   : > { %v5124_v62 = vsel %vm5059_vm13, %v5013_v5, %v5092_v18  ;;  %v4838_v48 = vadd.f32 %v4837_v35, %v15005_v63  ;;  %v4751_v63 = vadd.f32 %v17053_v26, %v15015_v4  ;;  %v5934_v28 = vrot.slane %v5933_v11, 4  ;;  %6200 = vst [vmem:[#allocation3 + $0x1b4] sm:$0xf] %v5929_v59  ;;  %v12457_v18 = vld [vmem:[#allocation3 + $0x18c] sm:$0xf0] }
 0x317   : > { %v5626_v34 = vsel %vm15147_vm10, %v5415_v42, %v5625_v23  ;;  %v5210_v44 = vpack.c.bf16 %v5124_v62, %v5124_v62  ;;  %v4926_v57 = vpop.f32.mrf.mxu3  ;;  %v5683_v56 = vld [vmem:[#allocation2 + $0x88] sm:$0xf]  ;;  %v6361_v12 = vsel %vm14112_vm5, %v12231_v14, %v6360_v1  ;;  %v6362_v2 = vrot.slane %v6360_v1, 4  ;;  %v13449_v23 = vld [vmem:[#allocation3 + $0x16c] sm:$0xf] }
 0x318   : > { %5627 = vst [vmem:[#allocation2 + $0x90] sm:$0xf] %v5626_v34  ;;  %v4927_v33 = vadd.f32 %v4926_v57, %v4838_v48  ;;  %v15635_v58 = vpop.f32.mrf.mxu1  ;;  %v5416_v5 = vrot.slane %v15625_v7, 4  ;;  %v5939_v6 = vsel %vm13858_vm2, %v5934_v28, %v5938_v43  ;;  %v6363_v49 = vrot.slane %v6240_v40, 5  ;;  %v12463_v37 = vld [vmem:[#allocation3 + $0x170] sm:$0xf] }
 0x319   : > { %v5418_v17 = vshrl.u32 %v5210_v44, 16  ;;  %5715 = vst [vmem:[#allocation3 + $0x33c] sm:$0xf] %v5683_v56  ;;  %v15637_v41 = vpop.f32.mrf.mxu0  ;;  %v5421_v4 = vshll.u32 %v5210_v44, 16  ;;  %v12671_v35 = vld [vmem:[#allocation3 + $0x318] sm:$0xf]  ;;  %v12460_v57 = vor.u32 %v13449_v23, %v12457_v18 }
 0x31a   : > { %v5016_v36 = vadd.f32 %v15597_v45, %v4927_v33  ;;  %v13450_v45 = vld [vmem:[#allocation3 + $0x174] sm:$0xf]  ;;  %6472 = vst [vmem:[#allocation3 + $0x1b8] sm:$0xf] %v6361_v12  ;;  %v5746_v21 = vld [vmem:[#allocation2 + $0x58] sm:$0xf]  ;;  %v6364_v56 = vsel %vm14112_vm5, %v6362_v2, %v6363_v49 }
 0x31b   : > { %v5420_v55 = vrot.slane %v5418_v17, 7  ;;  %v12468_v29 = vor.u32 %v13450_v45, %v12465_v16  ;;  %6201 = vst [vmem:[#allocation3 + $0x1d8] sm:$0xf] %v5939_v6  ;;  %v13454_v30 = vld [vmem:[#allocation3 + $0x190] sm:$0xf0]  ;;  %v5941_v8 = vshrl.u32 %v5745_v22, 16 }
 0x31c   : > { %vm5060_vm0 = vcmp.gt.f32.partialorder %v5016_v36, 0.0  ;;  %v5093_v3 = vmul.f32 %v15118_v27, %v5016_v36  ;;  %v5944_v0 = vshll.u32 %v5745_v22, 16  ;;  %v5632_v61 = vld [vmem:[#allocation2 + $0x9c] sm:$0xf]  ;;  %v12464_v17 = vor.u32 %v13454_v30, %v12463_v37  ;;  %6473 = vst [vmem:[#allocation3 + $0x1dc] sm:$0xf] %v6364_v56 }
 0x31d   : > { %v5423_v52 = vor.u32 %v5421_v4, %v5420_v55  ;;  %v5425_v19 = vrot.slane %v5420_v55, 4  ;;  %v4839_v46 = vpop.f32.mrf.mxu2  ;;  %v5943_v16 = vrot.slane %v5941_v8, 4  ;;  %v5950_v14 = vshll.u32 %v5746_v21, 16  ;;  %v6506_v1 = vld [vmem:[#allocation2 + $0x60] sm:$0xf]  ;;  %v17054_v45 = vld [vmem:[#allocation12_spill] sm:$0xff] }
 0x31e   : > { %v5125_v24 = vsel %vm5060_vm0, %v5016_v36, %v5093_v3  ;;  %v4840_v42 = vadd.f32 %v4839_v46, %v4751_v63  ;;  %9933 = vmatmul.bf16.gmra.mxu0 %v12468_v29  ;;  %v13581_v36 = vld [vmem:[%s17019_s3 + $0x108] sm:$0xff]  ;;  %v5747_v28 = vld [vmem:[#allocation2 + $0x5c] sm:$0x1]  ;;  %v5954_v43 = vshrl.u32 %v5746_v21, 16  ;;  %v6241_v22 = vld [vmem:[#allocation2 + $0x54] sm:$0xe] }
 0x31f   : > { %v5424_v31 = vsel %vm15175_vm14, %v5416_v5, %v5423_v52  ;;  %v5630_v7 = vsel %vm15182_vm15, %v5425_v19, %v5629_v10  ;;  %v5211_v62 = vpack.c.bf16 %v5125_v24, %v5125_v24  ;;  %v4928_v48 = vpop.f32.mrf.mxu3  ;;  %v5684_v32 = vld [vmem:[#allocation2 + $0x90] sm:$0xf]  ;;  %9995 = vmatpush.bf16.msrb.mxu1 %v13581_v36  ;;  %v6242_v5 = vld [vmem:[#allocation2 + $0x58] sm:$0xf]  ;;  %v6507_v52 = vld [vmem:[#allocation2 + $0x64] sm:$0xf] }
 0x320   : > { %5628 = vst [vmem:[#allocation2 + $0x94] sm:$0xf] %v5424_v31  ;;  %v4929_v34 = vadd.f32 %v4928_v48, %v4840_v42  ;;  %v13507_v44 = vld [vmem:[#allocation3 + $0x338] sm:$0xf0]  ;;  %v15654_v63 = vpop.f32.mrf.mxu1  ;;  %v5952_v6 = vrot.slane %v5950_v14, 5  ;;  %v5956_v24 = vrot.slane %v5954_v43, 4 }
 0x321   : > { %5631 = vst [vmem:[#allocation2 + $0x98] sm:$0x1] %v5630_v7  ;;  %v5427_v38 = vshrl.u32 %v5211_v62, 16  ;;  %v12672_v33 = vor.u32 %v13507_v44, %v12671_v35  ;;  %v15656_v11 = vpop.f32.mrf.mxu0  ;;  %v5430_v10 = vshll.u32 %v5211_v62, 16  ;;  %v5960_v29 = vshll.u32 %v5747_v28, 16  ;;  %v17055_v49 = vld [vmem:[#allocation13_spill] sm:$0xff] }
 0x322   : > { %v5018_v26 = vadd.f32 %v15618_v39, %v4929_v34  ;;  %9755 = vmatmul.bf16.gmra.mxu2 %v12460_v57  ;;  %5716 = vst [vmem:[#allocation3 + $0x360] sm:$0xf] %v5684_v32  ;;  %v5946_v39 = vrot.slane %v5944_v0, 5  ;;  %v17056_v31 = vld [vmem:[#allocation11_spill] sm:$0xff]  ;;  %v5957_v48 = vor.u32 %v5956_v24, %v5952_v6  ;;  %v6243_v37 = vld [vmem:[#allocation2 + $0x5c] sm:$0x1] }
 0x323   : > { %v15658_v40 = vrot.slane %v5427_v38, 7  ;;  %6538 = vst [vmem:[#allocation3 + $0x204] sm:$0xf] %v6506_v1  ;;  %v4756_v7 = vadd.f32 %v17056_v31, %v17055_v49  ;;  %v5636_v30 = vld [vmem:[#allocation2 + $0xa4] sm:$0x1]  ;;  %v12232_v56 = vrot.slane %v6241_v22, 9 }
 0x324   : > { %vm5061_vm1 = vcmp.gt.f32.partialorder %v5018_v26, 0.0  ;;  %v5094_v59 = vmul.f32 %v15118_v27, %v5018_v26  ;;  %9844 = vmatmul.bf16.gmra.mxu3 %v12464_v17  ;;  %9696 = vmatmul.bf16.gmra.mxu1 %v12672_v33  ;;  %v5947_v2 = vor.u32 %v5946_v39, %v5943_v16  ;;  %v12501_v44 = vld [vmem:[#allocation3 + $0x1dc] sm:$0xf0]  ;;  %v6367_v0 = vrot.slane %v6242_v5, 5  ;;  %6539 = vst [vmem:[#allocation3 + $0x228] sm:$0xf] %v6507_v52 }
 0x325   : > { %v5432_v55 = vor.u32 %v5430_v10, %v15658_v40  ;;  %v4842_v4 = vpop.f32.mrf.mxu2  ;;  %v13459_v32 = vld [vmem:[#allocation3 + $0x1bc] sm:$0xf]  ;;  %v15677_v17 = vld [vmem:[#allocation2 + $0xc] sm:$0xf]  ;;  %v12493_v10 = vld [vmem:[#allocation3 + $0x1d4] sm:$0xf0] }
 0x326   : > { %v5126_v3 = vsel %vm5061_vm1, %v5018_v26, %v5094_v59  ;;  %v4843_v12 = vadd.f32 %v4842_v4, %v17054_v45  ;;  %v5948_v35 = vrot.slane %v5947_v2, 4  ;;  %v5962_v26 = vrot.slane %v5960_v29, 5  ;;  %v5748_v59 = vld [vmem:[#allocation2 + $0x60] sm:$0xf]  ;;  %v13458_v4 = vld [vmem:[#allocation3 + $0x1b4] sm:$0xf] }
 0x327   : > { %v5633_v19 = vsel %vm15147_vm10, %v5432_v55, %v5632_v61  ;;  %v5212_v46 = vpack.c.bf16 %v5126_v3, %v5126_v3  ;;  %v4931_v23 = vpop.f32.mrf.mxu3  ;;  %v5685_v18 = vld [vmem:[#allocation2 + $0x94] sm:$0xf]  ;;  %v5958_v61 = vrot.slane %v5957_v48, 4  ;;  %v6368_v36 = vsel %vm14112_vm5, %v12232_v56, %v6367_v0  ;;  %v6508_v43 = vld [vmem:[#allocation2 + $0x6c] sm:$0xf] }
 0x328   : > { %5634 = vst [vmem:[#allocation2 + $0x9c] sm:$0xf] %v5633_v19  ;;  %v4932_v42 = vadd.f32 %v4931_v23, %v4843_v12  ;;  %v15671_v8 = vpop.f32.mrf.mxu1  ;;  %v5953_v57 = vsel %vm13858_vm2, %v5948_v35, %v5952_v6  ;;  %v6369_v16 = vrot.slane %v6367_v0, 4  ;;  %v5433_v39 = vrot.slane %v15658_v40, 4  ;;  %v13463_v23 = vld [vmem:[#allocation3 + $0x1d8] sm:$0xf0] }
 0x329   : > { %v5435_v62 = vshrl.u32 %v5212_v46, 16  ;;  %5717 = vst [vmem:[#allocation3 + $0x384] sm:$0xf] %v5685_v18  ;;  %v15673_v34 = vpop.f32.mrf.mxu0  ;;  %v5438_v33 = vshll.u32 %v5212_v46, 16  ;;  %v5963_v28 = vsel %vm13858_vm2, %v5958_v61, %v5962_v26  ;;  %v12707_v12 = vld [vmem:[#allocation3 + $0x360] sm:$0xf]  ;;  %v12504_v2 = vor.u32 %v13459_v32, %v12501_v44 }
 0x32a   : > { %v5021_v21 = vadd.f32 %v15637_v41, %v4932_v42  ;;  %6202 = vst [vmem:[#allocation3 + $0x1fc] sm:$0xf] %v5953_v57  ;;  %v6370_v22 = vrot.slane %v6243_v37, 5  ;;  %v12499_v46 = vld [vmem:[#allocation3 + $0x1b8] sm:$0xf]  ;;  %v5965_v6 = vshrl.u32 %v5748_v59, 16  ;;  %v12496_v35 = vor.u32 %v13458_v4, %v12493_v10 }
 0x32b   : > { %v5437_v38 = vrot.slane %v5435_v62, 7  ;;  %6474 = vst [vmem:[#allocation3 + $0x200] sm:$0xf] %v6368_v36  ;;  %v5749_v18 = vld [vmem:[#allocation2 + $0x64] sm:$0xf]  ;;  %v5968_v49 = vshll.u32 %v5748_v59, 16 }
 0x32c   : > { %vm5062_vm3 = vcmp.gt.f32.partialorder %v5021_v21, 0.0  ;;  %v5095_v41 = vmul.f32 %v15118_v27, %v5021_v21  ;;  %6203 = vst [vmem:[#allocation3 + $0x220] sm:$0xf] %v5963_v28  ;;  %v6371_v29 = vsel %vm14112_vm5, %v6369_v16, %v6370_v22  ;;  %v6605_v31 = vshrl.u32 %v15677_v17, 16  ;;  %v6509_v44 = vld [vmem:[#allocation2 + $0x70] sm:$0xf] }
 0x32d   : > { %v5440_v14 = vor.u32 %v5438_v33, %v5437_v38  ;;  %v5442_v1 = vrot.slane %v5437_v38, 4  ;;  %v4844_v55 = vpop.f32.mrf.mxu2  ;;  %6540 = vst [vmem:[#allocation3 + $0x24c] sm:$0xf] %v6508_v43  ;;  %v6608_v57 = vshll.u32 %v15677_v17, 16  ;;  %v5967_v33 = vrot.slane %v5965_v6, 4  ;;  %v17057_v59 = vld [vmem:[#allocation16_spill] sm:$0xff] }
 0x32e   : > { %v5127_v3 = vsel %vm5062_vm3, %v5021_v21, %v5095_v41  ;;  %v4845_v45 = vadd.f32 %v4844_v55, %v4756_v7  ;;  %9938 = vmatmul.bf16.gmra.mxu0 %v12504_v2  ;;  %v12500_v21 = vor.u32 %v13463_v23, %v12499_v46  ;;  %6475 = vst [vmem:[#allocation3 + $0x224] sm:$0xf] %v6371_v29  ;;  %v5639_v32 = vld [vmem:[#allocation2 + $0xa8] sm:$0xf]  ;;  %v5974_v26 = vshll.u32 %v5749_v18, 16  ;;  %v17059_v4 = vld [vmem:[#allocation14_spill] sm:$0xff] }
 0x32f   : > { %v5441_v5 = vsel %vm15175_vm14, %v5433_v39, %v5440_v14  ;;  %v5637_v40 = vsel %vm15182_vm15, %v5442_v1, %v5636_v30  ;;  %v5213_v52 = vpack.c.bf16 %v5127_v3, %v5127_v3  ;;  %v4933_v19 = vpop.f32.mrf.mxu3  ;;  %v5686_v48 = vld [vmem:[#allocation2 + $0x9c] sm:$0xf]  ;;  %v15701_v41 = vrot.slane %v6605_v31, 4  ;;  %v5750_v36 = vld [vmem:[#allocation2 + $0x68] sm:$0x1] }
 0x330   : > { %5635 = vst [vmem:[#allocation2 + $0xa0] sm:$0xf] %v5441_v5  ;;  %v4934_v24 = vadd.f32 %v4933_v19, %v4845_v45  ;;  %v13516_v42 = vld [vmem:[#allocation3 + $0x380] sm:$0xf0]  ;;  %v15693_v30 = vpop.f32.mrf.mxu1  ;;  %v5978_v16 = vshrl.u32 %v5749_v18, 16  ;;  %v17058_v39 = vld [vmem:[#allocation15_spill] sm:$0xff] }
 0x331   : > { %5638 = vst [vmem:[#allocation2 + $0xa4] sm:$0x1] %v5637_v40  ;;  %v5444_v7 = vshrl.u32 %v5213_v52, 16  ;;  %v12708_v62 = vor.u32 %v13516_v42, %v12707_v12  ;;  %v5447_v0 = vshll.u32 %v5213_v52, 16  ;;  %v15698_v38 = vpop.f32.mrf.mxu0  ;;  %v4761_v14 = vadd.f32 %v17058_v39, %v17057_v59  ;;  %v15706_v1 = vld [vmem:[#allocation2 + $0x10] sm:$0xf] }
 0x332   : > { %v5023_v37 = vadd.f32 %v15656_v11, %v4934_v24  ;;  %9760 = vmatmul.bf16.gmra.mxu2 %v12496_v35  ;;  %5718 = vst [vmem:[#allocation3 + $0x3a8] sm:$0xf] %v5686_v48  ;;  %v5970_v11 = vrot.slane %v5968_v49, 5  ;;  %v6244_v3 = vld [vmem:[#allocation2 + $0x60] sm:$0xe]  ;;  %v5976_v5 = vrot.slane %v5974_v26, 5 }
 0x333   : > { %v15696_v56 = vrot.slane %v5444_v7, 7  ;;  %6541 = vst [vmem:[#allocation3 + $0x270] sm:$0xf] %v6509_v44  ;;  %v5980_v40 = vrot.slane %v5978_v16, 4  ;;  %v6245_v52 = vld [vmem:[#allocation2 + $0x64] sm:$0xf] }
 0x334   : > { %vm5063_vm4 = vcmp.gt.f32.partialorder %v5023_v37, 0.0  ;;  %v5096_v61 = vmul.f32 %v15118_v27, %v5023_v37  ;;  %9849 = vmatmul.bf16.gmra.mxu3 %v12500_v21  ;;  %9701 = vmatmul.bf16.gmra.mxu1 %v12708_v62  ;;  %v5971_v43 = vor.u32 %v5970_v11, %v5967_v33  ;;  %v15711_v19 = vrot.slane %v6608_v57, 5  ;;  %v5643_v29 = vld [vmem:[#allocation2 + $0xb0] sm:$0x1]  ;;  %v12537_v7 = vld [vmem:[#allocation3 + $0x224] sm:$0xf0] }
 0x335   : > { %v5449_v10 = vor.u32 %v5447_v0, %v15696_v56  ;;  %v4847_v17 = vpop.f32.mrf.mxu2  ;;  %v5984_v18 = vshll.u32 %v5750_v36, 16  ;;  %v6614_v6 = vshll.u32 %v15706_v1, 16  ;;  %v6618_v24 = vshrl.u32 %v15706_v1, 16  ;;  %v6246_v48 = vld [vmem:[#allocation2 + $0x68] sm:$0x1] }
 0x336   : > { %v5128_v55 = vsel %vm5063_vm4, %v5023_v37, %v5096_v61  ;;  %v4848_v28 = vadd.f32 %v4847_v17, %v17059_v4  ;;  %v5972_v23 = vrot.slane %v5971_v43, 4  ;;  %v5981_v35 = vor.u32 %v5980_v40, %v5976_v5  ;;  %v13468_v0 = vld [vmem:[#allocation3 + $0x204] sm:$0xf]  ;;  %v15723_v26 = vld [vmem:[#allocation2 + $0x6c] sm:$0xf] }
 0x337   : > { %v5640_v45 = vsel %vm15147_vm10, %v5449_v10, %v5639_v32  ;;  %v5214_v12 = vpack.c.bf16 %v5128_v55, %v5128_v55  ;;  %v4936_v2 = vpop.f32.mrf.mxu3  ;;  %v5687_v22 = vld [vmem:[#allocation2 + $0xa0] sm:$0xf]  ;;  %v12233_v37 = vrot.slane %v6244_v3, 9  ;;  %v6374_v21 = vrot.slane %v6245_v52, 5  ;;  %v6510_v10 = vld [vmem:[#allocation2 + $0x78] sm:$0xf] }
 0x338   : > { %5641 = vst [vmem:[#allocation2 + $0xa8] sm:$0xf] %v5640_v45  ;;  %v4937_v46 = vadd.f32 %v4936_v2, %v4848_v28  ;;  %v15716_v31 = vpop.f32.mrf.mxu1  ;;  %v5977_v62 = vsel %vm13858_vm2, %v5972_v23, %v5976_v5  ;;  %v5982_v33 = vrot.slane %v5981_v35, 4  ;;  %v5986_v32 = vrot.slane %v5984_v18, 5  ;;  %v13467_v55 = vld [vmem:[#allocation3 + $0x1fc] sm:$0xf] }
 0x339   : > { %v5452_v42 = vshrl.u32 %v5214_v12, 16  ;;  %5719 = vst [vmem:[#allocation3 + $0x3cc] sm:$0xf] %v5687_v22  ;;  %v5455_v57 = vshll.u32 %v5214_v12, 16  ;;  %v6376_v11 = vrot.slane %v6374_v21, 4  ;;  %v5450_v17 = vrot.slane %v15696_v56, 4 }
 0x33a   : > { %v5026_v49 = vadd.f32 %v15673_v34, %v4937_v46  ;;  %6204 = vst [vmem:[#allocation3 + $0x244] sm:$0xf] %v5977_v62  ;;  %v6375_v34 = vsel %vm14112_vm5, %v12233_v37, %v6374_v21  ;;  %v12529_v4 = vld [vmem:[#allocation3 + $0x21c] sm:$0xf0]  ;;  %v5987_v28 = vsel %vm13858_vm2, %v5982_v33, %v5986_v32  ;;  %v12540_v45 = vor.u32 %v13468_v0, %v12537_v7  ;;  %v5752_v2 = vld [vmem:[#allocation2 + $0x70] sm:$0xf] }
 0x33b   : > { %v5454_v44 = vrot.slane %v5452_v42, 7  ;;  %v15726_v39 = vpop.f32.mrf.mxu0  ;;  %6476 = vst [vmem:[#allocation3 + $0x248] sm:$0xf] %v6375_v34  ;;  %v6377_v12 = vrot.slane %v6246_v48, 5  ;;  %v12535_v52 = vld [vmem:[#allocation3 + $0x200] sm:$0xf]  ;;  %v12532_v35 = vor.u32 %v13467_v55, %v12529_v4 }
 0x33c   : > { %vm5064_vm6 = vcmp.gt.f32.partialorder %v5026_v49, 0.0  ;;  %v5097_v61 = vmul.f32 %v15118_v27, %v5026_v49  ;;  %6205 = vst [vmem:[#allocation3 + $0x268] sm:$0xf] %v5987_v28  ;;  %v13472_v46 = vld [vmem:[#allocation3 + $0x220] sm:$0xf0]  ;;  %v5989_v23 = vshrl.u32 %v15723_v26, 16 }
 0x33d   : > { %v5457_v36 = vor.u32 %v5455_v57, %v5454_v44  ;;  %v5459_v16 = vrot.slane %v5454_v44, 4  ;;  %v4849_v59 = vpop.f32.mrf.mxu2  ;;  %6542 = vst [vmem:[#allocation3 + $0x294] sm:$0xf] %v6510_v10  ;;  %v5753_v7 = vld [vmem:[#allocation2 + $0x74] sm:$0x1]  ;;  %v15737_v62 = vrot.slane %v6614_v6, 5  ;;  %v12536_v0 = vor.u32 %v13472_v46, %v12535_v52 }
 0x33e   : > { %v5129_v43 = vsel %vm5064_vm6, %v5026_v49, %v5097_v61  ;;  %v4850_v3 = vadd.f32 %v4849_v59, %v4761_v14  ;;  %v12743_v14 = vld [vmem:[#allocation3 + $0x3a8] sm:$0xf]  ;;  %9943 = vmatmul.bf16.gmra.mxu0 %v12540_v45  ;;  %v6378_v49 = vsel %vm14112_vm5, %v6376_v11, %v6377_v12  ;;  %v6511_v32 = vld [vmem:[#allocation2 + $0x7c] sm:$0xf]  ;;  %v6611_v6 = vor.u32 %v15711_v19, %v15701_v41  ;;  %v5646_v10 = vld [vmem:[#allocation2 + $0xb4] sm:$0xf] }
 0x33f   : > { %v5458_v56 = vsel %vm15175_vm14, %v5450_v17, %v5457_v36  ;;  %v5644_v22 = vsel %vm15182_vm15, %v5459_v16, %v5643_v29  ;;  %v5215_v5 = vpack.c.bf16 %v5129_v43, %v5129_v43  ;;  %v4938_v40 = vpop.f32.mrf.mxu3  ;;  %v5688_v37 = vld [vmem:[#allocation2 + $0xa8] sm:$0xf]  ;;  %v13580_v33 = vld [vmem:[%s17019_s3 + $0x100] sm:$0xff]  ;;  %6477 = vst [vmem:[#allocation3 + $0x26c] sm:$0xf] %v6378_v49  ;;  %v5991_v34 = vrot.slane %v5989_v23, 4 }
 0x340   : > { %5642 = vst [vmem:[#allocation2 + $0xac] sm:$0xf] %v5458_v56  ;;  %v4939_v18 = vadd.f32 %v4938_v40, %v4850_v3  ;;  %v13525_v42 = vld [vmem:[#allocation3 + $0x3c8] sm:$0xf0]  ;;  %v5992_v11 = vshll.u32 %v15723_v26, 16  ;;  %9996 = vmatpush.bf16.msrb.mxu1 %v13580_v33  ;;  %v6002_v36 = vshrl.u32 %v5752_v2, 16 }
 0x341   : > { %5645 = vst [vmem:[#allocation2 + $0xb0] sm:$0x1] %v5644_v22  ;;  %v5461_v29 = vshrl.u32 %v5215_v5, 16  ;;  %v12744_v48 = vor.u32 %v13525_v42, %v12743_v14  ;;  %v5464_v21 = vshll.u32 %v5215_v5, 16  ;;  %v15740_v57 = vpop.f32.mrf.mxu1  ;;  %v6247_v16 = vld [vmem:[#allocation2 + $0x6c] sm:$0xe] }
 0x342   : > { %v5028_v44 = vadd.f32 %v15698_v38, %v4939_v18  ;;  %9765 = vmatmul.bf16.gmra.mxu2 %v12532_v35  ;;  %5720 = vst [vmem:[#allocation3 + $0x3f0] sm:$0xf] %v5688_v37  ;;  %v5998_v38 = vshll.u32 %v5752_v2, 16  ;;  %v5994_v19 = vrot.slane %v5992_v11, 5  ;;  %v6008_v28 = vshll.u32 %v5753_v7, 16  ;;  %v17060_v45 = vld [vmem:[#allocation17_spill] sm:$0xff] }
 0x343   : > { %v15747_v61 = vrot.slane %v5461_v29, 7  ;;  %v15752_v41 = vpop.f32.mrf.mxu0  ;;  %v6248_v43 = vld [vmem:[#allocation2 + $0x70] sm:$0xf]  ;;  %v15756_v26 = vrot.slane %v6618_v24, 4  ;;  %v6004_v56 = vrot.slane %v6002_v36, 4  ;;  %v15761_v46 = vrot.slane %v6611_v6, 4 }
 0x344   : > { %vm5065_vm7 = vcmp.gt.f32.partialorder %v5028_v44, 0.0  ;;  %v5098_v17 = vmul.f32 %v15118_v27, %v5028_v44  ;;  %9854 = vmatmul.bf16.gmra.mxu3 %v12536_v0  ;;  %9706 = vmatmul.bf16.gmra.mxu1 %v12744_v48  ;;  %v6000_v4 = vrot.slane %v5998_v38, 5  ;;  %6543 = vst [vmem:[#allocation3 + $0x2b8] sm:$0xf] %v6511_v32  ;;  %v5995_v52 = vor.u32 %v5994_v19, %v5991_v34  ;;  %v13595_v14 = vld [vmem:[%s17019_s3 + $0x178] sm:$0xff]  ;;  %v17061_v6 = vld [vmem:[#allocation18_spill] sm:$0xff] }
 0x345   : > { %v5466_v59 = vor.u32 %v5464_v21, %v15747_v61  ;;  %v4852_v55 = vpop.f32.mrf.mxu2  ;;  %v12234_v1 = vrot.slane %v6247_v16, 9  ;;  %v6381_v24 = vrot.slane %v6248_v43, 5  ;;  %v6010_v35 = vrot.slane %v6008_v28, 5  ;;  %v6249_v49 = vld [vmem:[#allocation2 + $0x74] sm:$0x1]  ;;  %10078 = vmatpush.bf16.msra.mxu2 %v13595_v14 }
 0x346   : > { %v5130_v3 = vsel %vm5065_vm7, %v5028_v44, %v5098_v17  ;;  %v4853_v12 = vadd.f32 %v4852_v55, %v17060_v45  ;;  %v6005_v18 = vor.u32 %v6004_v56, %v6000_v4  ;;  %v5650_v7 = vld [vmem:[#allocation2 + $0xbc] sm:$0x1]  ;;  %v13477_v37 = vld [vmem:[#allocation3 + $0x24c] sm:$0xf]  ;;  %v12573_v21 = vld [vmem:[#allocation3 + $0x26c] sm:$0xf0]  ;;  %v4766_v34 = vadd.f32 %v15532_v60, %v17061_v6 }
 0x347   : > { %v5647_v2 = vsel %vm15147_vm10, %v5466_v59, %v5646_v10  ;;  %v5216_v22 = vpack.c.bf16 %v5130_v3, %v5130_v3  ;;  %v4941_v5 = vpop.f32.mrf.mxu3  ;;  %v5689_v40 = vld [vmem:[#allocation2 + $0xac] sm:$0xf]  ;;  %v5996_v44 = vrot.slane %v5995_v52, 4  ;;  %v6382_v33 = vsel %vm14112_vm5, %v12234_v1, %v6381_v24  ;;  %v5754_v32 = vld [vmem:[#allocation2 + $0x78] sm:$0xf] }
 0x348   : > { %5648 = vst [vmem:[#allocation2 + $0xb4] sm:$0xf] %v5647_v2  ;;  %v4942_v23 = vadd.f32 %v4941_v5, %v4853_v12  ;;  %v6006_v0 = vrot.slane %v6005_v18, 4  ;;  %v6383_v10 = vrot.slane %v6381_v24, 4  ;;  %v12565_v36 = vld [vmem:[#allocation3 + $0x264] sm:$0xf0]  ;;  %v12576_v2 = vor.u32 %v13477_v37, %v12573_v21 }
 0x349   : > { %v5469_v42 = vshrl.u32 %v5216_v22, 16  ;;  %5721 = vst [vmem:[#allocation3 + $0x414] sm:$0xf] %v5689_v40  ;;  %v15767_v48 = vpop.f32.mrf.mxu1  ;;  %v5472_v38 = vshll.u32 %v5216_v22, 16  ;;  %v6001_v16 = vsel %vm13858_vm2, %v5996_v44, %v6000_v4  ;;  %v5755_v55 = vld [vmem:[#allocation2 + $0x7c] sm:$0xf] }
 0x34a   : > { %v5031_v29 = vadd.f32 %v15726_v39, %v4942_v23  ;;  %6478 = vst [vmem:[#allocation3 + $0x290] sm:$0xf] %v6382_v33  ;;  %v13603_v39 = vld [vmem:[%s17019_s3 + $0x1b8] sm:$0xff]  ;;  %v6011_v59 = vsel %vm13858_vm2, %v6006_v0, %v6010_v35  ;;  %v6512_v60 = vld [vmem:[#allocation2 + $0x84] sm:$0xf]  ;;  %v5467_v28 = vrot.slane %v15747_v61, 4 }
 0x34b   : > { %v5471_v11 = vrot.slane %v5469_v42, 7  ;;  %v15784_v19 = vld [vmem:[%s17020_s4] ss:$0 sm:$0xff]  ;;  %v15787_v12 = vpop.f32.mrf.mxu0  ;;  %v13476_v56 = vld [vmem:[#allocation3 + $0x244] sm:$0xf]  ;;  %10167 = vmatpush.bf16.msra.mxu3 %v13603_v39  ;;  %v6384_v40 = vrot.slane %v6249_v49, 5 }
 0x34c   : > { %vm5066_vm8 = vcmp.gt.f32.partialorder %v5031_v29, 0.0  ;;  %v5099_v17 = vmul.f32 %v15118_v27, %v5031_v29  ;;  %6206 = vst [vmem:[#allocation3 + $0x28c] sm:$0xf] %v6001_v16  ;;  %v12779_v5 = vld [vmem:[#allocation3 + $0x3f0] sm:$0xf]  ;;  %v6013_v52 = vshrl.u32 %v5754_v32, 16  ;;  %v12568_v24 = vor.u32 %v13476_v56, %v12565_v36 }
 0x34d   : > { %v5474_v43 = vor.u32 %v5472_v38, %v5471_v11  ;;  %v5476_v3 = vrot.slane %v5471_v11, 4  ;;  %v4854_v45 = vpop.f32.mrf.mxu2  ;;  %6207 = vst [vmem:[#allocation3 + $0x2b0] sm:$0xf] %v6011_v59  ;;  %v12571_v14 = vld [vmem:[#allocation3 + $0x248] sm:$0xf]  ;;  %v6385_v49 = vsel %vm14112_vm5, %v6383_v10, %v6384_v40  ;;  %v6016_v0 = vshll.u32 %v5754_v32, 16 }
 0x34e   : > { %v5131_v4 = vsel %vm5066_vm8, %v5031_v29, %v5099_v17  ;;  %v4855_v22 = vadd.f32 %v4854_v45, %v4766_v34  ;;  %v13481_v42 = vld [vmem:[#allocation3 + $0x268] sm:$0xf0]  ;;  %6544 = vst [vmem:[#allocation3 + $0x2dc] sm:$0xf] %v6512_v60  ;;  %v15794_v37 = vld [vmem:[#allocation2 + $0x14] sm:$0x1]  ;;  %9948 = vmatmul.bf16.gmra.mxu0 %v12576_v2  ;;  %v6617_v38 = vsel %vm13858_vm2, %v15761_v46, %v15737_v62 }
 0x34f   : > { %v5475_v23 = vsel %vm15175_vm14, %v5467_v28, %v5474_v43  ;;  %v5651_v61 = vsel %vm15182_vm15, %v5476_v3, %v5650_v7  ;;  %v5217_v18 = vpack.c.bf16 %v5131_v4, %v5131_v4  ;;  %v4943_v1 = vpop.f32.mrf.mxu3  ;;  %v5690_v35 = vld [vmem:[#allocation2 + $0xb4] sm:$0xf]  ;;  %v6015_v44 = vrot.slane %v6013_v52, 4  ;;  %v6250_v34 = vld [vmem:[#allocation2 + $0x78] sm:$0xe] }
 0x350   : > { %5649 = vst [vmem:[#allocation2 + $0xb8] sm:$0xf] %v5475_v23  ;;  %v4944_v29 = vadd.f32 %v4943_v1, %v4855_v22  ;;  %v13534_v21 = vld [vmem:[#allocation3 + $0x410] sm:$0xf0]  ;;  %v6022_v6 = vshll.u32 %v5755_v55, 16  ;;  %v12572_v10 = vor.u32 %v13481_v42, %v12571_v14  ;;  %v6018_v16 = vrot.slane %v6016_v0, 5 }
 0x351   : > { %5652 = vst [vmem:[#allocation2 + $0xbc] sm:$0x1] %v5651_v61  ;;  %v5478_v7 = vshrl.u32 %v5217_v18, 16  ;;  %v12780_v33 = vor.u32 %v13534_v21, %v12779_v5  ;;  %v6513_v11 = vld [vmem:[#allocation2 + $0x88] sm:$0xf]  ;;  %v15803_v36 = vpop.f32.mrf.mxu1  ;;  %v6026_v59 = vshrl.u32 %v5755_v55, 16  ;;  %v9643_v60 = vadd.f32 %v15784_v19, %v15551_v15 }
 0x352   : > { %v5653_v39 = vld [vmem:[#allocation2 + $0xc0] sm:$0xf]  ;;  %v5033_v17 = vadd.f32 %v15752_v41, %v4944_v29  ;;  %9770 = vmatmul.bf16.gmra.mxu2 %v12568_v24  ;;  %5722 = vst [vmem:[#allocation3 + $0x438] sm:$0xf] %v5690_v35  ;;  %v5481_v43 = vshll.u32 %v5217_v18, 16  ;;  %v13611_v46 = vld [vmem:[%s17019_s3 + $0x1f8] sm:$0xff]  ;;  %v6019_v45 = vor.u32 %v6018_v16, %v6015_v44  ;;  %v6621_v40 = vor.u32 %v15756_v26, %v15737_v62 }
 0x353   : > { %v5756_v32 = vld [vmem:[#allocation2 + $0x80] sm:$0x1]  ;;  %v15807_v28 = vrot.slane %v5478_v7, 7  ;;  %6479 = vst [vmem:[#allocation3 + $0x2b4] sm:$0xf] %v6385_v49  ;;  %v6024_v41 = vrot.slane %v6022_v6, 5  ;;  %v15815_v22 = vpop.f32.mrf.mxu0  ;;  %10256 = vmatpush.bf16.msra.mxu0 %v13611_v46  ;;  %v9645_v20 = vadd.f32 %v15784_v19, %v15568_v13 }
 0x354   : > { %vm5067_vm9 = vcmp.gt.f32.partialorder %v5033_v17, 0.0  ;;  %v5100_v3 = vmul.f32 %v15118_v27, %v5033_v17  ;;  %9859 = vmatmul.bf16.gmra.mxu3 %v12572_v10  ;;  %v6028_v56 = vrot.slane %v6026_v59, 4  ;;  %v6251_v2 = vld [vmem:[#allocation2 + $0x7c] sm:$0xf]  ;;  %6545 = vst [vmem:[#allocation3 + $0x300] sm:$0xf] %v6513_v11  ;;  %9711 = vmatmul.bf16.gmra.mxu1 %v12780_v33 }
 0x355   : > { %v6624_v55 = vshll.u32 %v15794_v37, 16  ;;  %v5483_v15 = vor.u32 %v5481_v43, %v15807_v28  ;;  %v9731_v4 = vpop.f32.mrf.mxu2  ;;  %v6032_v5 = vshll.u32 %v5756_v32, 16  ;;  %v13619_v27 = vld [vmem:[%s17019_s3 + $0x238] sm:$0xff]  ;;  %v6020_v61 = vrot.slane %v6019_v45, 4  ;;  %7020 = vst [vmem:[#allocation3 + $0x10] sm:$0xf] %v6617_v38 }
 0x356   : > { %v5132_v52 = vsel %vm5067_vm9, %v5033_v17, %v5100_v3  ;;  %v9732_v23 = vadd.f32 %v9731_v4, %v9643_v60  ;;  %v12235_v18 = vrot.slane %v6250_v34, 9  ;;  %v6029_v35 = vor.u32 %v6028_v56, %v6024_v41  ;;  %v6252_v37 = vld [vmem:[#allocation2 + $0x80] sm:$0x1]  ;;  %10345 = vmatpush.bf16.msra.mxu1 %v13619_v27  ;;  %v13486_v26 = vld [vmem:[#allocation3 + $0x294] sm:$0xf] }
 0x357   : > { %v5654_v1 = vsel %vm15147_vm10, %v5483_v15, %v5653_v39  ;;  %v5218_v24 = vpack.c.bf16 %v5132_v52, %v5132_v52  ;;  %v9820_v14 = vpop.f32.mrf.mxu3  ;;  %v5691_v42 = vld [vmem:[#allocation2 + $0xb8] sm:$0xf]  ;;  %v6388_v29 = vrot.slane %v6251_v2, 5  ;;  %v12609_v21 = vld [vmem:[#allocation3 + $0x2b4] sm:$0xf0]  ;;  %v6025_v49 = vsel %vm13858_vm2, %v6020_v61, %v6024_v41 }
 0x358   : > { %5655 = vst [vmem:[#allocation2 + $0xc0] sm:$0xf] %v5654_v1  ;;  %v15825_v62 = vadd.f32 %v9820_v14, %v9732_v23  ;;  %v6559_v44 = vld [vmem:[#allocation2 + $0x18] sm:$0xf]  ;;  %v6622_v33 = vrot.slane %v6621_v40, 4  ;;  %v6030_v11 = vrot.slane %v6029_v35, 4  ;;  %v12612_v16 = vor.u32 %v13486_v26, %v12609_v21 }
 0x359   : > { %v5486_v0 = vshrl.u32 %v5218_v24, 16  ;;  %5723 = vst [vmem:[#allocation3 + $0x45c] sm:$0xf] %v5691_v42  ;;  %v6389_v7 = vsel %vm14112_vm5, %v12235_v18, %v6388_v29  ;;  %v6560_v6 = vld [vmem:[#allocation2 + $0x1c] sm:$0xf]  ;;  %v15833_v34 = vpop.f32.mrf.mxu1  ;;  %v6034_v38 = vrot.slane %v6032_v5, 5 }
 0x35a   : > { %6208 = vst [vmem:[#allocation3 + $0x2d4] sm:$0xf] %v6025_v49  ;;  %v6390_v39 = vrot.slane %v6388_v29, 4  ;;  %v6391_v17 = vrot.slane %v6252_v37, 5  ;;  %v5489_v32 = vshll.u32 %v5218_v24, 16  ;;  %v6626_v59 = vrot.slane %v6624_v55, 5 }
 0x35b   : > { %v5488_v10 = vrot.slane %v5486_v0, 7  ;;  %6480 = vst [vmem:[#allocation3 + $0x2d8] sm:$0xf] %v6389_v7  ;;  %v5484_v13 = vrot.slane %v15807_v28, 4  ;;  %v5657_v60 = vld [vmem:[#allocation2 + $0xc8] sm:$0x1]  ;;  %v6035_v43 = vsel %vm13858_vm2, %v6030_v11, %v6034_v38  ;;  %v15840_v15 = vpop.f32.mrf.mxu0 }
 0x35c   : > { %v6392_v46 = vsel %vm14112_vm5, %v6390_v39, %v6391_v17  ;;  %v6561_v41 = vld [vmem:[#allocation2 + $0x20] sm:$0x1]  ;;  %v6629_v3 = vshrl.u32 %v6559_v44, 16  ;;  %v13485_v4 = vld [vmem:[#allocation3 + $0x28c] sm:$0xf]  ;;  %v6627_v28 = vsel %vm13858_vm2, %v6622_v33, %v6626_v59  ;;  %v6632_v55 = vshll.u32 %v6559_v44, 16 }
 0x35d   : > { %v5491_v45 = vor.u32 %v5489_v32, %v5488_v10  ;;  %v5493_v56 = vrot.slane %v5488_v10, 4  ;;  %v9733_v2 = vpop.f32.mrf.mxu2  ;;  %v12601_v5 = vld [vmem:[#allocation3 + $0x2ac] sm:$0xf0]  ;;  %6209 = vst [vmem:[#allocation3 + $0x2f8] sm:$0xf] %v6035_v43  ;;  %v6638_v52 = vshll.u32 %v6560_v6, 16  ;;  %v9648_v33 = vadd.f32 %v15784_v19, %v15587_v50 }
 0x35e   : > { %v9734_v40 = vadd.f32 %v9733_v2, %v9645_v20  ;;  %6481 = vst [vmem:[#allocation3 + $0x2fc] sm:$0xf] %v6392_v46  ;;  %v6631_v27 = vrot.slane %v6629_v3, 4  ;;  %v6642_v23 = vshrl.u32 %v6560_v6, 16  ;;  %v13490_v24 = vld [vmem:[#allocation3 + $0x2b0] sm:$0xf0]  ;;  %v12604_v26 = vor.u32 %v13485_v4, %v12601_v5  ;;  %9953 = vmatmul.bf16.gmra.mxu0 %v12612_v16 }
 0x35f   : > { %v5492_v61 = vsel %vm15175_vm14, %v5484_v13, %v5491_v45  ;;  %v5658_v18 = vsel %vm15182_vm15, %v5493_v56, %v5657_v60  ;;  %v9822_v1 = vpop.f32.mrf.mxu3  ;;  %7021 = vst [vmem:[#allocation3 + $0x34] sm:$0xf] %v6627_v28  ;;  %v6634_v14 = vrot.slane %v6632_v55, 5  ;;  %v6648_v42 = vshll.u32 %v6561_v41, 16  ;;  %v12815_v37 = vld [vmem:[#allocation3 + $0x438] sm:$0xf] }
 0x360   : > { %5656 = vst [vmem:[#allocation2 + $0xc4] sm:$0xf] %v5492_v61  ;;  %v15848_v35 = vadd.f32 %v9822_v1, %v9734_v40  ;;  %v13543_v29 = vld [vmem:[#allocation3 + $0x458] sm:$0xf0]  ;;  %v12607_v49 = vld [vmem:[#allocation3 + $0x290] sm:$0xf] }
 0x361   : > { %5659 = vst [vmem:[#allocation2 + $0xc8] sm:$0x1] %v5658_v18  ;;  %v12816_v21 = vor.u32 %v13543_v29, %v12815_v37  ;;  %v15850_v51 = vrot.slane %v6638_v52, 5  ;;  %v6644_v44 = vrot.slane %v6642_v23, 4  ;;  %v15852_v9 = vpop.f32.mrf.mxu1  ;;  %v12608_v20 = vor.u32 %v13490_v24, %v12607_v49  ;;  %v6562_v0 = vld [vmem:[#allocation2 + $0x24] sm:$0xf] }
 0x362   : > { %9775 = vmatmul.bf16.gmra.mxu2 %v12604_v26  ;;  %v15854_v7 = vld [vmem:[#allocation2 + $0x28] sm:$0xf]  ;;  %v5757_v6 = vld [vmem:[#allocation2 + $0x84] sm:$0xf]  ;;  %v6635_v38 = vor.u32 %v6634_v14, %v6631_v27  ;;  %v15858_v39 = vrot.slane %v6648_v42, 5  ;;  %v6653_v41 = vshrl.u32 %v6562_v0, 16 }
 0x363   : > { %v5758_v11 = vld [vmem:[#allocation2 + $0x88] sm:$0xf]  ;;  %v5759_v17 = vld [vmem:[#allocation2 + $0x8c] sm:$0x1]  ;;  %v6037_v10 = vshrl.u32 %v5757_v6, 16  ;;  %v6040_v32 = vshll.u32 %v5757_v6, 16  ;;  %v15860_v60 = vpop.f32.mrf.mxu0  ;;  %v6645_v46 = vor.u32 %v6644_v44, %v15850_v51 }
 0x364   : > { %9864 = vmatmul.bf16.gmra.mxu3 %v12608_v20  ;;  %v6046_v16 = vshll.u32 %v5758_v11, 16  ;;  %v6050_v59 = vshrl.u32 %v5758_v11, 16  ;;  %9716 = vmatmul.bf16.gmra.mxu1 %v12816_v21  ;;  %v6253_v43 = vld [vmem:[#allocation2 + $0x84] sm:$0xe]  ;;  %v6656_v50 = vshll.u32 %v6562_v0, 16  ;;  %v6662_v3 = vshll.u32 %v15854_v7, 16 }
 0x365   : > { %v9736_v13 = vpop.f32.mrf.mxu2  ;;  %v6039_v56 = vrot.slane %v6037_v10, 4  ;;  %v6042_v2 = vrot.slane %v6040_v32, 5  ;;  %v6254_v4 = vld [vmem:[#allocation2 + $0x88] sm:$0xf]  ;;  %v6666_v5 = vshrl.u32 %v15854_v7, 16  ;;  %v6056_v27 = vshll.u32 %v5759_v17, 16 }
 0x366   : > { %v9737_v45 = vadd.f32 %v9736_v13, %v9648_v33  ;;  %v6048_v55 = vrot.slane %v6046_v16, 5  ;;  %v6052_v40 = vrot.slane %v6050_v59, 4  ;;  %v6255_v52 = vld [vmem:[#allocation2 + $0x8c] sm:$0x1]  ;;  %v6636_v23 = vrot.slane %v6635_v38, 4  ;;  %v13594_v44 = vld [vmem:[%s17019_s3 + $0x170] sm:$0xff] }
 0x367   : > { %v9825_v28 = vpop.f32.mrf.mxu3  ;;  %v6043_v18 = vor.u32 %v6042_v2, %v6039_v56  ;;  %v12236_v1 = vrot.slane %v6253_v43, 9  ;;  %v6395_v24 = vrot.slane %v6254_v4, 5  ;;  %v6514_v14 = vld [vmem:[#allocation2 + $0x90] sm:$0xf]  ;;  %v6515_v42 = vld [vmem:[#allocation2 + $0x94] sm:$0xf]  ;;  %10079 = vmatpush.bf16.msra.mxu2 %v13594_v44  ;;  %v9650_v16 = vadd.f32 %v15784_v19, %v15604_v47 }
 0x368   : > { %v15865_v61 = vadd.f32 %v9825_v28, %v9737_v45  ;;  %v12645_v37 = vld [vmem:[#allocation3 + $0x2fc] sm:$0xf0]  ;;  %v6053_v29 = vor.u32 %v6052_v40, %v6048_v55  ;;  %v6398_v26 = vrot.slane %v6255_v52, 5  ;;  %6546 = vst [vmem:[#allocation3 + $0x324] sm:$0xf] %v6514_v14  ;;  %v6641_v21 = vsel %vm13858_vm2, %v6636_v23, %v15850_v51  ;;  %v13602_v51 = vld [vmem:[%s17019_s3 + $0x1b0] sm:$0xff] }
 0x369   : > { %v6646_v49 = vrot.slane %v6645_v46, 4  ;;  %v15873_v20 = vpop.f32.mrf.mxu1  ;;  %v6044_v0 = vrot.slane %v6043_v18, 4  ;;  %v6396_v7 = vsel %vm14112_vm5, %v12236_v1, %v6395_v24  ;;  %v6397_v33 = vrot.slane %v6395_v24, 4  ;;  %6547 = vst [vmem:[#allocation3 + $0x348] sm:$0xf] %v6515_v42  ;;  %10168 = vmatpush.bf16.msra.mxu3 %v13602_v51 }
 0x36a   : > { %v6655_v6 = vrot.slane %v6653_v41, 4  ;;  %v13495_v11 = vld [vmem:[#allocation3 + $0x2dc] sm:$0xf]  ;;  %v6054_v38 = vrot.slane %v6053_v29, 4  ;;  %v6058_v17 = vrot.slane %v6056_v27, 5  ;;  %v6658_v10 = vrot.slane %v6656_v50, 5 }
 0x36b   : > { %6482 = vst [vmem:[#allocation3 + $0x320] sm:$0xf] %v6396_v7  ;;  %v15880_v32 = vld [vmem:[#allocation2 + $0xc] sm:$0xe]  ;;  %v12637_v59 = vld [vmem:[#allocation3 + $0x2f4] sm:$0xf0]  ;;  %v6049_v13 = vsel %vm13858_vm2, %v6044_v0, %v6048_v55  ;;  %v6399_v43 = vsel %vm14112_vm5, %v6397_v33, %v6398_v26  ;;  %v15890_v56 = vpop.f32.mrf.mxu0  ;;  %v6651_v47 = vsel %vm13858_vm2, %v6646_v49, %v15858_v39  ;;  %v12648_v18 = vor.u32 %v13495_v11, %v12645_v37 }
 0x36c   : > { %7022 = vst [vmem:[#allocation3 + $0x58] sm:$0xf] %v6641_v21  ;;  %v6565_v46 = vld [vmem:[#allocation2 + $0x30] sm:$0xf]  ;;  %v13494_v50 = vld [vmem:[#allocation3 + $0x2d4] sm:$0xf]  ;;  %v6059_v2 = vsel %vm13858_vm2, %v6054_v38, %v6058_v17  ;;  %v6659_v28 = vor.u32 %v6658_v10, %v6655_v6 }
 0x36d   : > { %v15888_v41 = vld [vmem:[#allocation2 + $0x10] sm:$0xf]  ;;  %v9738_v45 = vpop.f32.mrf.mxu2  ;;  %6210 = vst [vmem:[#allocation3 + $0x31c] sm:$0xf] %v6049_v13  ;;  %v6564_v4 = vld [vmem:[#allocation2 + $0x2c] sm:$0x1]  ;;  %v12640_v39 = vor.u32 %v13494_v50, %v12637_v59 }
 0x36e   : > { %v6664_v55 = vrot.slane %v6662_v3, 5  ;;  %v6566_v40 = vld [vmem:[#allocation2 + $0x34] sm:$0xf]  ;;  %v15897_v27 = vld [vmem:[#allocation2 + $0x18] sm:$0xf]  ;;  %v9739_v52 = vadd.f32 %v9738_v45, %v9650_v16  ;;  %v6668_v1 = vrot.slane %v6666_v5, 4  ;;  %9958 = vmatmul.bf16.gmra.mxu0 %v12648_v18  ;;  %v9653_v45 = vadd.f32 %v15784_v19, %v15623_v53 }
 0x36f   : > { %v13499_v23 = vld [vmem:[#allocation3 + $0x2f8] sm:$0xf0]  ;;  %6211 = vst [vmem:[#allocation3 + $0x340] sm:$0xf] %v6059_v2  ;;  %v9827_v24 = vpop.f32.mrf.mxu3  ;;  %v6660_v14 = vrot.slane %v6659_v28, 4  ;;  %v6677_v42 = vshrl.u32 %v6565_v46, 16 }
 0x370   : > { %6483 = vst [vmem:[#allocation3 + $0x344] sm:$0xf] %v6399_v43  ;;  %v6680_v29 = vshll.u32 %v6565_v46, 16  ;;  %v15899_v26 = vadd.f32 %v9827_v24, %v9739_v52  ;;  %v13410_v21 = vld [vmem:[#allocation3 + $0x30] sm:$0xf0]  ;;  %v6686_v3 = vshll.u32 %v6566_v40, 16  ;;  %v6669_v11 = vor.u32 %v6668_v1, %v6664_v55 }
 0x371   : > { %7023 = vst [vmem:[#allocation3 + $0x7c] sm:$0xf] %v6651_v47  ;;  %v6690_v49 = vshrl.u32 %v6566_v40, 16  ;;  %v12643_v0 = vld [vmem:[#allocation3 + $0x2d8] sm:$0xf]  ;;  %v6665_v5 = vsel %vm13858_vm2, %v6660_v14, %v6664_v55  ;;  %v15905_v33 = vpop.f32.mrf.mxu1  ;;  %v6672_v38 = vshll.u32 %v6564_v4, 16 }
 0x372   : > { %v12291_v7 = vld [vmem:[#allocation3 + $0x10] sm:$0xf]  ;;  %9780 = vmatmul.bf16.gmra.mxu2 %v12640_v39  ;;  %v12644_v6 = vor.u32 %v13499_v23, %v12643_v0  ;;  %7024 = vst [vmem:[#allocation3 + $0xa0] sm:$0xf] %v6665_v5  ;;  %v6567_v17 = vld [vmem:[#allocation2 + $0x38] sm:$0x1] }
 0x373   : > { %v7438_v51 = vshrl.u32 %v15897_v27, 16  ;;  %v12292_v10 = vor.u32 %v13410_v21, %v12291_v7  ;;  %v13610_v16 = vld [vmem:[%s17019_s3 + $0x1f0] sm:$0xff]  ;;  %v6679_v13 = vrot.slane %v6677_v42, 4  ;;  %v6682_v43 = vrot.slane %v6680_v29, 5  ;;  %v15916_v28 = vpop.f32.mrf.mxu0  ;;  %v5762_v55 = vld [vmem:[#allocation2 + $0x98] sm:$0x1] }
 0x374   : > { %v5760_v59 = vld [vmem:[#allocation2 + $0x90] sm:$0xf]  ;;  %9869 = vmatmul.bf16.gmra.mxu3 %v12644_v6  ;;  %v5761_v50 = vld [vmem:[#allocation2 + $0x94] sm:$0xf]  ;;  %v15914_v2 = vrot.slane %v6686_v3, 5  ;;  %v6692_v47 = vrot.slane %v6690_v49, 4  ;;  %10257 = vmatpush.bf16.msra.mxu0 %v13610_v16 }
 0x375   : > { %9997 = vmatmul.bf16.vlgmr.msrb.gmra.mxu1 %v12292_v10  ;;  %v9741_v4 = vpop.f32.mrf.mxu2  ;;  %v6061_v40 = vshrl.u32 %v5760_v59, 16  ;;  %v6064_v52 = vshll.u32 %v5760_v59, 16  ;;  %v6070_v23 = vshll.u32 %v5761_v50, 16  ;;  %v6074_v18 = vshrl.u32 %v5761_v50, 16  ;;  %v6256_v24 = vld [vmem:[#allocation2 + $0x90] sm:$0xe] }
 0x376   : > { %v9742_v1 = vadd.f32 %v9741_v4, %v9653_v45  ;;  %v6670_v14 = vrot.slane %v6669_v11, 4  ;;  %v6674_v42 = vrot.slane %v6672_v38, 5  ;;  %v13618_v53 = vld [vmem:[%s17019_s3 + $0x230] sm:$0xff]  ;;  %v6696_v29 = vshll.u32 %v6567_v17, 16  ;;  %v6258_v16 = vld [vmem:[#allocation2 + $0x98] sm:$0x1] }
 0x377   : > { %v9830_v39 = vpop.f32.mrf.mxu3  ;;  %v6063_v21 = vrot.slane %v6061_v40, 4  ;;  %v6066_v3 = vrot.slane %v6064_v52, 5  ;;  %v6072_v49 = vrot.slane %v6070_v23, 5  ;;  %v6683_v0 = vor.u32 %v6682_v43, %v6679_v13  ;;  %v6257_v10 = vld [vmem:[#allocation2 + $0x94] sm:$0xf]  ;;  %10346 = vmatpush.bf16.msra.mxu1 %v13618_v53 }
 0x378   : > { %v15921_v7 = vadd.f32 %v9830_v39, %v9742_v1  ;;  %v6076_v5 = vrot.slane %v6074_v18, 4  ;;  %v6080_v6 = vshll.u32 %v5762_v55, 16  ;;  %v6693_v11 = vor.u32 %v6692_v47, %v15914_v2  ;;  %v12681_v38 = vld [vmem:[#allocation3 + $0x344] sm:$0xf0]  ;;  %v6516_v4 = vld [vmem:[#allocation2 + $0x9c] sm:$0xf] }
 0x379   : > { %v6067_v59 = vor.u32 %v6066_v3, %v6063_v21  ;;  %v12237_v45 = vrot.slane %v6256_v24, 9  ;;  %v6402_v50 = vrot.slane %v6257_v10, 5  ;;  %v9655_v17 = vadd.f32 %v15784_v19, %v15635_v58  ;;  %v15926_v40 = vpop.f32.mrf.mxu1  ;;  %v6517_v43 = vld [vmem:[#allocation2 + $0xa0] sm:$0xf]  ;;  %6548 = vst [vmem:[#allocation3 + $0x36c] sm:$0xf] %v6516_v4 }
 0x37a   : > { %v6077_v13 = vor.u32 %v6076_v5, %v6072_v49  ;;  %v6675_v55 = vsel %vm13858_vm2, %v6670_v14, %v6674_v42  ;;  %v6698_v52 = vrot.slane %v6696_v29, 5  ;;  %v6568_v23 = vld [vmem:[#allocation2 + $0x3c] sm:$0xf]  ;;  %v6405_v53 = vrot.slane %v6258_v16, 5  ;;  %6549 = vst [vmem:[#allocation3 + $0x390] sm:$0xf] %v6517_v43 }
 0x37b   : > { %v13504_v18 = vld [vmem:[#allocation3 + $0x324] sm:$0xf]  ;;  %v6068_v47 = vrot.slane %v6067_v59, 4  ;;  %v6403_v1 = vsel %vm14112_vm5, %v12237_v45, %v6402_v50  ;;  %v6404_v24 = vrot.slane %v6402_v50, 4  ;;  %v6082_v58 = vrot.slane %v6080_v6, 5  ;;  %v15932_v10 = vpop.f32.mrf.mxu0 }
 0x37c   : > { %v6078_v39 = vrot.slane %v6077_v13, 4  ;;  %6484 = vst [vmem:[#allocation3 + $0x368] sm:$0xf] %v6403_v1  ;;  %v6684_v21 = vrot.slane %v6683_v0, 4  ;;  %v6694_v3 = vrot.slane %v6693_v11, 4  ;;  %v12684_v45 = vor.u32 %v13504_v18, %v12681_v38 }
 0x37d   : > { %v9743_v5 = vpop.f32.mrf.mxu2  ;;  %17062 = vst [vmem:[#allocation5_spill] sm:$0xff] %v15932_v10  ;;  %v12673_v4 = vld [vmem:[#allocation3 + $0x33c] sm:$0xf0]  ;;  %v6073_v14 = vsel %vm13858_vm2, %v6068_v47, %v6072_v49  ;;  %v6406_v42 = vsel %vm14112_vm5, %v6404_v24, %v6405_v53  ;;  %v6569_v29 = vld [vmem:[#allocation2 + $0x40] sm:$0xf]  ;;  %v6701_v13 = vshrl.u32 %v6568_v23, 16 }
 0x37e   : > { %7025 = vst [vmem:[#allocation3 + $0xc4] sm:$0xf] %v6675_v55  ;;  %v9744_v59 = vadd.f32 %v9743_v5, %v9655_v17  ;;  %v13503_v16 = vld [vmem:[#allocation3 + $0x31c] sm:$0xf]  ;;  %v6083_v6 = vsel %vm13858_vm2, %v6078_v39, %v6082_v58  ;;  %v6689_v0 = vsel %vm13858_vm2, %v6684_v21, %v15914_v2  ;;  %v13508_v50 = vld [vmem:[#allocation3 + $0x340] sm:$0xf0]  ;;  %v6699_v49 = vsel %vm13858_vm2, %v6694_v3, %v6698_v52 }
 0x37f   : > { %6212 = vst [vmem:[#allocation3 + $0x364] sm:$0xf] %v6073_v14  ;;  %v9832_v11 = vpop.f32.mrf.mxu3  ;;  %v6704_v43 = vshll.u32 %v6568_v23, 16  ;;  %v12676_v17 = vor.u32 %v13503_v16, %v12673_v4  ;;  %9963 = vmatmul.bf16.gmra.mxu0 %v12684_v45  ;;  %v13419_v38 = vld [vmem:[#allocation3 + $0x78] sm:$0xf0]  ;;  %v6710_v18 = vshll.u32 %v6569_v29, 16  ;;  %v9658_v23 = vadd.f32 %v15784_v19, %v15654_v63 }
 0x380   : > { %6213 = vst [vmem:[#allocation3 + $0x388] sm:$0xf] %v6083_v6  ;;  %v15945_v55 = vadd.f32 %v9832_v11, %v9744_v59  ;;  %v6714_v47 = vshrl.u32 %v6569_v29, 16  ;;  %v15947_v1 = vld [vmem:[#allocation2 + $0x1c] sm:$0xf]  ;;  %v6703_v5 = vrot.slane %v6701_v13, 4 }
 0x381   : > { %6485 = vst [vmem:[#allocation3 + $0x38c] sm:$0xf] %v6406_v42  ;;  %v12679_v24 = vld [vmem:[#allocation3 + $0x320] sm:$0xf]  ;;  %v15949_v2 = vpop.f32.mrf.mxu1  ;;  %v12327_v39 = vld [vmem:[#allocation3 + $0x58] sm:$0xf] }
 0x382   : > { %7026 = vst [vmem:[#allocation3 + $0xe8] sm:$0xf] %v6689_v0  ;;  %9785 = vmatmul.bf16.gmra.mxu2 %v12676_v17  ;;  %v12680_v53 = vor.u32 %v13508_v50, %v12679_v24  ;;  %v6570_v52 = vld [vmem:[#allocation2 + $0x44] sm:$0x1]  ;;  %v12328_v58 = vor.u32 %v13419_v38, %v12327_v39  ;;  %v5763_v21 = vld [vmem:[#allocation2 + $0x9c] sm:$0xf] }
 0x383   : > { %7027 = vst [vmem:[#allocation3 + $0x10c] sm:$0xf] %v6699_v49  ;;  %v5764_v3 = vld [vmem:[#allocation2 + $0xa0] sm:$0xf]  ;;  %v6706_v4 = vrot.slane %v6704_v43, 5  ;;  %v6085_v42 = vshrl.u32 %v5763_v21, 16  ;;  %v15960_v0 = vpop.f32.mrf.mxu0 }
 0x384   : > { %9874 = vmatmul.bf16.gmra.mxu3 %v12680_v53  ;;  %v5765_v14 = vld [vmem:[#allocation2 + $0xa4] sm:$0x1]  ;;  %v6088_v29 = vshll.u32 %v5763_v21, 16  ;;  %v15953_v59 = vrot.slane %v6710_v18, 5  ;;  %v6716_v16 = vrot.slane %v6714_v47, 4  ;;  %v15957_v45 = vrot.slane %v7438_v51, 4 }
 0x385   : > { %10002 = vmatmul.bf16.gmra.mxu1 %v12328_v58  ;;  %v9746_v63 = vpop.f32.mrf.mxu2  ;;  %17063 = vst [vmem:[#allocation6_spill] sm:$0xff] %v15960_v0  ;;  %v6094_v11 = vshll.u32 %v5764_v3, 16  ;;  %v6098_v50 = vshrl.u32 %v5764_v3, 16  ;;  %v6571_v49 = vld [vmem:[#allocation2 + $0x48] sm:$0xf]  ;;  %v6087_v43 = vrot.slane %v6085_v42, 4  ;;  %v6707_v39 = vor.u32 %v6706_v4, %v6703_v5 }
 0x386   : > { %v9747_v13 = vadd.f32 %v9746_v63, %v9658_v23  ;;  %v6090_v17 = vrot.slane %v6088_v29, 5  ;;  %v6104_v38 = vshll.u32 %v5765_v14, 16  ;;  %v6259_v18 = vld [vmem:[#allocation2 + $0x9c] sm:$0xe]  ;;  %v6720_v51 = vshll.u32 %v6570_v52, 16  ;;  %v13593_v3 = vld [vmem:[%s17019_s3 + $0x168] sm:$0xff] }
 0x387   : > { %v9835_v24 = vpop.f32.mrf.mxu3  ;;  %v6096_v47 = vrot.slane %v6094_v11, 5  ;;  %v6100_v53 = vrot.slane %v6098_v50, 4  ;;  %v6260_v58 = vld [vmem:[#allocation2 + $0xa0] sm:$0xf]  ;;  %v6261_v46 = vld [vmem:[#allocation2 + $0xa4] sm:$0x1]  ;;  %v6717_v23 = vor.u32 %v6716_v16, %v15953_v59  ;;  %10080 = vmatpush.bf16.msra.mxu2 %v13593_v3 }
 0x388   : > { %v15962_v21 = vadd.f32 %v9835_v24, %v9747_v13  ;;  %v6091_v6 = vor.u32 %v6090_v17, %v6087_v43  ;;  %v6725_v42 = vshrl.u32 %v6571_v49, 16  ;;  %v12717_v29 = vld [vmem:[#allocation3 + $0x38c] sm:$0xf0]  ;;  %v12238_v63 = vrot.slane %v6259_v18, 9  ;;  %v6519_v50 = vld [vmem:[#allocation2 + $0xac] sm:$0xf] }
 0x389   : > { %v6101_v14 = vor.u32 %v6100_v53, %v6096_v47  ;;  %v6409_v44 = vrot.slane %v6260_v58, 5  ;;  %v6518_v11 = vld [vmem:[#allocation2 + $0xa8] sm:$0xf]  ;;  %v15968_v5 = vpop.f32.mrf.mxu1  ;;  %v6106_v4 = vrot.slane %v6104_v38, 5  ;;  %v6412_v13 = vrot.slane %v6261_v46, 5 }
 0x38a   : > { %v6092_v52 = vrot.slane %v6091_v6, 4  ;;  %6550 = vst [vmem:[#allocation3 + $0x3b4] sm:$0xf] %v6518_v11  ;;  %v6728_v43 = vshll.u32 %v6571_v49, 16  ;;  %v13513_v17 = vld [vmem:[#allocation3 + $0x36c] sm:$0xf]  ;;  %v9660_v18 = vadd.f32 %v15784_v19, %v15671_v8 }
 0x38b   : > { %v6102_v24 = vrot.slane %v6101_v14, 4  ;;  %v6410_v16 = vsel %vm14112_vm5, %v12238_v63, %v6409_v44  ;;  %v6411_v37 = vrot.slane %v6409_v44, 4  ;;  %6551 = vst [vmem:[#allocation3 + $0x3d8] sm:$0xf] %v6519_v50  ;;  %v6708_v53 = vrot.slane %v6707_v39, 4  ;;  %v13601_v46 = vld [vmem:[%s17019_s3 + $0x1a8] sm:$0xff]  ;;  %v15979_v3 = vpop.f32.mrf.mxu0 }
 0x38c   : > { %v6097_v58 = vsel %vm13858_vm2, %v6092_v52, %v6096_v47  ;;  %6486 = vst [vmem:[#allocation3 + $0x3b0] sm:$0xf] %v6410_v16  ;;  %v6718_v6 = vrot.slane %v6717_v23, 4  ;;  %v6722_v49 = vrot.slane %v6720_v51, 5  ;;  %v12709_v14 = vld [vmem:[#allocation3 + $0x384] sm:$0xf0]  ;;  %v12720_v11 = vor.u32 %v13513_v17, %v12717_v29  ;;  %10169 = vmatpush.bf16.msra.mxu3 %v13601_v46 }
 0x38d   : > { %v9748_v38 = vpop.f32.mrf.mxu2  ;;  %17064 = vst [vmem:[#allocation7_spill] sm:$0xff] %v15979_v3  ;;  %v6107_v44 = vsel %vm13858_vm2, %v6102_v24, %v6106_v4  ;;  %v6413_v8 = vsel %vm14112_vm5, %v6411_v37, %v6412_v13  ;;  %v6713_v47 = vsel %vm13858_vm2, %v6708_v53, %v15953_v59  ;;  %v6572_v39 = vld [vmem:[#allocation2 + $0x4c] sm:$0xf]  ;;  %v7451_v63 = vshrl.u32 %v15947_v1, 16  ;;  %v13512_v51 = vld [vmem:[#allocation3 + $0x364] sm:$0xf] }
 0x38e   : > { %6214 = vst [vmem:[#allocation3 + $0x3ac] sm:$0xf] %v6097_v58  ;;  %v9749_v23 = vadd.f32 %v9748_v38, %v9660_v18  ;;  %v6723_v50 = vsel %vm13858_vm2, %v6718_v6, %v6722_v49  ;;  %v13517_v4 = vld [vmem:[#allocation3 + $0x388] sm:$0xf0]  ;;  %v6727_v24 = vrot.slane %v6725_v42, 4  ;;  %v6730_v37 = vrot.slane %v6728_v43, 5 }
 0x38f   : > { %6215 = vst [vmem:[#allocation3 + $0x3d0] sm:$0xf] %v6107_v44  ;;  %v9837_v52 = vpop.f32.mrf.mxu3  ;;  %v17065_v13 = vrot.slane %v15888_v41, 5  ;;  %v17066_v59 = vrot.slane %v15880_v32, 9  ;;  %v12712_v29 = vor.u32 %v13512_v51, %v12709_v14  ;;  %9968 = vmatmul.bf16.gmra.mxu0 %v12720_v11  ;;  %v13428_v17 = vld [vmem:[#allocation3 + $0xc0] sm:$0xf0] }
 0x390   : > { %6487 = vst [vmem:[#allocation3 + $0x3d4] sm:$0xf] %v6413_v8  ;;  %v15997_v53 = vadd.f32 %v9837_v52, %v9749_v23  ;;  %v6734_v18 = vshll.u32 %v6572_v39, 16  ;;  %v6738_v58 = vshrl.u32 %v6572_v39, 16  ;;  %v12715_v46 = vld [vmem:[#allocation3 + $0x368] sm:$0xf]  ;;  %v9663_v39 = vadd.f32 %v15784_v19, %v15693_v30 }
 0x391   : > { %v7151_v16 = vsel %vm14112_vm5, %v17066_v59, %v17065_v13  ;;  %7028 = vst [vmem:[#allocation3 + $0x130] sm:$0xf] %v6713_v47  ;;  %v15999_v6 = vld [vmem:[#allocation2 + $0x50] sm:$0x1]  ;;  %v17068_v42 = vshll.u32 %v15897_v27, 16  ;;  %v17069_v32 = vshll.u32 %v15947_v1, 16  ;;  %v16009_v38 = vpop.f32.mrf.mxu1  ;;  %v12716_v14 = vor.u32 %v13517_v4, %v12715_v46 }
 0x392   : > { %17067 = vst [vmem:[#allocation8_spill] sm:$0xff] %v15997_v53  ;;  %9790 = vmatmul.bf16.gmra.mxu2 %v12712_v29  ;;  %v12363_v44 = vld [vmem:[#allocation3 + $0xa0] sm:$0xf]  ;;  %v16011_v8 = vld [vmem:[#allocation2 + $0x14] sm:$0x1]  ;;  %v16013_v47 = vrot.slane %v7451_v63, 4  ;;  %v6731_v51 = vor.u32 %v6730_v37, %v6727_v24 }
 0x393   : > { %7029 = vst [vmem:[#allocation3 + $0x154] sm:$0xf] %v6723_v50  ;;  %v16003_v43 = vrot.slane %v17068_v42, 5  ;;  %v16007_v49 = vrot.slane %v17069_v32, 5  ;;  %v12364_v27 = vor.u32 %v13428_v17, %v12363_v44  ;;  %v13609_v1 = vld [vmem:[%s17019_s3 + $0x1e8] sm:$0xff]  ;;  %v6736_v50 = vrot.slane %v6734_v18, 5  ;;  %v16025_v30 = vpop.f32.mrf.mxu0 }
 0x394   : > { %7292 = vst [vmem:[#allocation3 + $0x14] sm:$0xf] %v7151_v16  ;;  %v5766_v23 = vld [vmem:[#allocation2 + $0xa8] sm:$0xf]  ;;  %9879 = vmatmul.bf16.gmra.mxu3 %v12716_v14  ;;  %v5767_v11 = vld [vmem:[#allocation2 + $0xac] sm:$0xf]  ;;  %10258 = vmatpush.bf16.msra.mxu0 %v13609_v1 }
 0x395   : > { %v6740_v52 = vrot.slane %v6738_v58, 4  ;;  %v6744_v4 = vshll.u32 %v15999_v6, 16  ;;  %v16023_v63 = vrot.slane %v17065_v13, 4  ;;  %10007 = vmatmul.bf16.gmra.mxu1 %v12364_v27  ;;  %v9751_v59 = vpop.f32.mrf.mxu2  ;;  %17070 = vst [vmem:[#allocation9_spill] sm:$0xff] %v16025_v30  ;;  %v5768_v16 = vld [vmem:[#allocation2 + $0xb0] sm:$0x1] }
 0x396   : > { %v6109_v29 = vshrl.u32 %v5766_v23, 16  ;;  %v6112_v17 = vshll.u32 %v5766_v23, 16  ;;  %v6118_v46 = vshll.u32 %v5767_v11, 16  ;;  %v6122_v24 = vshrl.u32 %v5767_v11, 16  ;;  %v6262_v42 = vld [vmem:[#allocation2 + $0xa8] sm:$0xe] }
 0x397   : > { %v9752_v37 = vadd.f32 %v9751_v59, %v9663_v39  ;;  %v13617_v18 = vld [vmem:[%s17019_s3 + $0x228] sm:$0xff]  ;;  %v6574_v58 = vld [vmem:[#allocation2 + $0x54] sm:$0xf]  ;;  %v7153_v41 = vrot.slane %v16011_v8, 5  ;;  %v9840_v6 = vpop.f32.mrf.mxu3  ;;  %v6732_v1 = vrot.slane %v6731_v51, 4  ;;  %v6128_v30 = vshll.u32 %v5768_v16, 16 }
 0x398   : > { %v6111_v32 = vrot.slane %v6109_v29, 4  ;;  %v6114_v14 = vrot.slane %v6112_v17, 5  ;;  %v6120_v44 = vrot.slane %v6118_v46, 5  ;;  %v6263_v27 = vld [vmem:[#allocation2 + $0xac] sm:$0xf]  ;;  %v6124_v23 = vrot.slane %v6122_v24, 4  ;;  %10347 = vmatpush.bf16.msra.mxu1 %v13617_v18 }
 0x399   : > { %v16031_v13 = vadd.f32 %v9840_v6, %v9752_v37  ;;  %v6264_v11 = vld [vmem:[#allocation2 + $0xb0] sm:$0x1]  ;;  %v6741_v39 = vor.u32 %v6740_v52, %v6736_v50  ;;  %v9665_v59 = vadd.f32 %v15784_v19, %v15716_v31  ;;  %v12239_v0 = vrot.slane %v6262_v42, 9  ;;  %v6520_v8 = vld [vmem:[#allocation2 + $0xb4] sm:$0xf]  ;;  %v16035_v29 = vpop.f32.mrf.mxu1 }
 0x39a   : > { %v6115_v3 = vor.u32 %v6114_v14, %v6111_v32  ;;  %v6416_v53 = vrot.slane %v6263_v27, 5  ;;  %v6521_v10 = vld [vmem:[#allocation2 + $0xb8] sm:$0xf]  ;;  %v12753_v17 = vld [vmem:[#allocation3 + $0x3d4] sm:$0xf0]  ;;  %v6125_v46 = vor.u32 %v6124_v23, %v6120_v44  ;;  %v6737_v51 = vsel %vm13858_vm2, %v6732_v1, %v6736_v50 }
 0x39b   : > { %6552 = vst [vmem:[#allocation3 + $0x3fc] sm:$0xf] %v6520_v8  ;;  %v6749_v16 = vshrl.u32 %v6574_v58, 16  ;;  %v6752_v24 = vshll.u32 %v6574_v58, 16  ;;  %v6419_v19 = vrot.slane %v6264_v11, 5  ;;  %v6130_v18 = vrot.slane %v6128_v30, 5 }
 0x39c   : > { %v6116_v37 = vrot.slane %v6115_v3, 4  ;;  %v6417_v52 = vsel %vm14112_vm5, %v12239_v0, %v6416_v53  ;;  %v6418_v31 = vrot.slane %v6416_v53, 4  ;;  %6553 = vst [vmem:[#allocation3 + $0x420] sm:$0xf] %v6521_v10  ;;  %v6126_v42 = vrot.slane %v6125_v46, 4  ;;  %v16047_v53 = vpop.f32.mrf.mxu0 }
 0x39d   : > { %6488 = vst [vmem:[#allocation3 + $0x3f8] sm:$0xf] %v6417_v52  ;;  %v6742_v6 = vrot.slane %v6741_v39, 4  ;;  %v6746_v32 = vrot.slane %v6744_v4, 5  ;;  %v9753_v14 = vpop.f32.mrf.mxu2  ;;  %v12745_v27 = vld [vmem:[#allocation3 + $0x3cc] sm:$0xf0] }
 0x39e   : > { %v13522_v23 = vld [vmem:[#allocation3 + $0x3b4] sm:$0xf]  ;;  %v6121_v50 = vsel %vm13858_vm2, %v6116_v37, %v6120_v44  ;;  %v6420_v3 = vsel %vm14112_vm5, %v6418_v31, %v6419_v19  ;;  %7030 = vst [vmem:[#allocation3 + $0x178] sm:$0xf] %v6737_v51  ;;  %v16045_v58 = vld [vmem:[#allocation2 + $0x20] sm:$0x1]  ;;  %v9754_v0 = vadd.f32 %v9753_v14, %v9665_v59  ;;  %v6131_v4 = vsel %vm13858_vm2, %v6126_v42, %v6130_v18 }
 0x39f   : > { %17071 = vst [vmem:[#allocation10_spill] sm:$0xff] %v16047_v53  ;;  %v13521_v10 = vld [vmem:[#allocation3 + $0x3ac] sm:$0xf]  ;;  %v12756_v30 = vor.u32 %v13522_v23, %v12753_v17  ;;  %v6747_v11 = vsel %vm13858_vm2, %v6742_v6, %v6746_v32  ;;  %v6575_v44 = vld [vmem:[#allocation2 + $0x58] sm:$0xf]  ;;  %v9842_v39 = vpop.f32.mrf.mxu3  ;;  %v6751_v46 = vrot.slane %v6749_v16, 4  ;;  %v7154_v59 = vsel %vm14112_vm5, %v16023_v63, %v7153_v41 }
 0x3a0   : > { %v13437_v1 = vld [vmem:[#allocation3 + $0x108] sm:$0xf0]  ;;  %6216 = vst [vmem:[#allocation3 + $0x3f4] sm:$0xf] %v6121_v50  ;;  %v13526_v8 = vld [vmem:[#allocation3 + $0x3d0] sm:$0xf0]  ;;  %v7444_v17 = vor.u32 %v16003_v43, %v15957_v45  ;;  %v16058_v37 = vadd.f32 %v9842_v39, %v9754_v0  ;;  %v12748_v52 = vor.u32 %v13521_v10, %v12745_v27  ;;  %v7454_v45 = vor.u32 %v16013_v47, %v16007_v49 }
 0x3a1   : > { %6217 = vst [vmem:[#allocation3 + $0x418] sm:$0xf] %v6131_v4  ;;  %v6754_v51 = vrot.slane %v6752_v24, 5  ;;  %v12751_v31 = vld [vmem:[#allocation3 + $0x3b0] sm:$0xf]  ;;  %9973 = vmatmul.bf16.gmra.mxu0 %v12756_v30  ;;  %v6758_v18 = vshll.u32 %v6575_v44, 16  ;;  %v16062_v24 = vpop.f32.mrf.mxu1 }
 0x3a2   : > { %6489 = vst [vmem:[#allocation3 + $0x41c] sm:$0xf] %v6420_v3  ;;  %v7325_v19 = vld [vmem:[#allocation2 + $0x18] sm:$0xf]  ;;  %v16060_v42 = vld [vmem:[#allocation2 + $0x5c] sm:$0x1]  ;;  %9795 = vmatmul.bf16.gmra.mxu2 %v12748_v52  ;;  %v12752_v6 = vor.u32 %v13526_v8, %v12751_v31 }
 0x3a3   : > { %7031 = vst [vmem:[#allocation3 + $0x19c] sm:$0xf] %v6747_v11  ;;  %v6762_v16 = vshrl.u32 %v6575_v44, 16  ;;  %v12399_v63 = vld [vmem:[#allocation3 + $0xe8] sm:$0xf]  ;;  %v7457_v43 = vshll.u32 %v16045_v58, 16  ;;  %v6755_v27 = vor.u32 %v6754_v51, %v6751_v46 }
 0x3a4   : > { %7293 = vst [vmem:[#allocation3 + $0x38] sm:$0xf] %v7154_v59  ;;  %v12400_v41 = vor.u32 %v13437_v1, %v12399_v63  ;;  %v13592_v32 = vld [vmem:[%s17019_s3 + $0x160] sm:$0xff]  ;;  %v16073_v23 = vrot.slane %v7444_v17, 4  ;;  %9884 = vmatmul.bf16.gmra.mxu3 %v12752_v6  ;;  %v5769_v58 = vld [vmem:[#allocation2 + $0xb4] sm:$0xf] }
 0x3a5   : > { %v13600_v14 = vld [vmem:[%s17019_s3 + $0x1a0] sm:$0xff]  ;;  %7357 = vst [vmem:[#allocation3 + $0x18] sm:$0xf] %v7325_v19  ;;  %v5770_v0 = vld [vmem:[#allocation2 + $0xb8] sm:$0xf]  ;;  %v9756_v30 = vpop.f32.mrf.mxu2  ;;  %10081 = vmatpush.bf16.msra.mxu2 %v13592_v32  ;;  %v6133_v4 = vshrl.u32 %v5769_v58, 16 }
 0x3a6   : > { %v16078_v50 = vld [vmem:[%s17020_s4] ss:$0 sm:$0xff]  ;;  %10012 = vmatmul.bf16.gmra.mxu1 %v12400_v41  ;;  %v5771_v1 = vld [vmem:[#allocation2 + $0xbc] sm:$0x1]  ;;  %v6136_v11 = vshll.u32 %v5769_v58, 16  ;;  %v6760_v44 = vrot.slane %v6758_v18, 5  ;;  %10170 = vmatpush.bf16.msra.mxu3 %v13600_v14 }
 0x3a7   : > { %v9668_v47 = vadd.f32 %v16078_v50, %v15740_v57  ;;  %v13608_v3 = vld [vmem:[%s17019_s3 + $0x1e0] sm:$0xff]  ;;  %v6764_v39 = vrot.slane %v6762_v16, 4  ;;  %v6142_v57 = vshll.u32 %v5770_v0, 16  ;;  %v6146_v46 = vshrl.u32 %v5770_v0, 16  ;;  %v13591_v51 = vld [vmem:[%s17019_s3 + $0x158] sm:$0xff]  ;;  %v9845_v17 = vpop.f32.mrf.mxu3  ;;  %v16095_v16 = vpop.f32.mrf.mxu0 }
 0x3a8   : > { %10259 = vmatpush.bf16.msra.mxu0 %v13608_v3  ;;  %v16089_v59 = vrot.slane %v7454_v45, 4  ;;  %v6135_v52 = vrot.slane %v6133_v4, 4  ;;  %v6138_v31 = vrot.slane %v6136_v11, 5  ;;  %v6152_v19 = vshll.u32 %v5771_v1, 16  ;;  %v6265_v6 = vld [vmem:[#allocation2 + $0xb4] sm:$0xe] }
 0x3a9   : > { %v9757_v8 = vadd.f32 %v9756_v30, %v9668_v47  ;;  %v6756_v63 = vrot.slane %v6755_v27, 4  ;;  %v16091_v41 = vld [vmem:[#allocation2 + $0x1c] sm:$0xf]  ;;  %17072 = vst [vmem:[#allocation12_spill] sm:$0xff] %v16095_v16  ;;  %v6144_v32 = vrot.slane %v6142_v57, 5  ;;  %v6148_v14 = vrot.slane %v6146_v46, 4  ;;  %10082 = vmatpush.bf16.msra.mxu2 %v13591_v51  ;;  %v16100_v4 = vpop.f32.mrf.mxu1 }
 0x3aa   : > { %v6266_v47 = vld [vmem:[#allocation2 + $0xb8] sm:$0xf]  ;;  %v6267_v3 = vld [vmem:[#allocation2 + $0xbc] sm:$0x1]  ;;  %v6139_v0 = vor.u32 %v6138_v31, %v6135_v52  ;;  %v12240_v45 = vrot.slane %v6265_v6, 9  ;;  %v6765_v1 = vor.u32 %v6764_v39, %v6760_v44  ;;  %v6154_v53 = vrot.slane %v6152_v19, 5 }
 0x3ab   : > { %v16093_v18 = vadd.f32 %v9845_v17, %v9757_v8  ;;  %v12789_v58 = vld [vmem:[#allocation3 + $0x41c] sm:$0xf0]  ;;  %v6423_v30 = vrot.slane %v6266_v47, 5  ;;  %v6522_v10 = vld [vmem:[#allocation2 + $0xc0] sm:$0xf]  ;;  %v6149_v11 = vor.u32 %v6148_v14, %v6144_v32  ;;  %v6761_v46 = vsel %vm13858_vm2, %v6756_v63, %v6760_v44  ;;  %v13606_v19 = vld [vmem:[%s17019_s3 + $0x1d0] sm:$0xff] }
 0x3ac   : > { %v13599_v27 = vld [vmem:[%s17019_s3 + $0x198] sm:$0xff]  ;;  %v6523_v8 = vld [vmem:[#allocation2 + $0xc4] sm:$0xf]  ;;  %6554 = vst [vmem:[#allocation3 + $0x444] sm:$0xf] %v6522_v10  ;;  %v16107_v17 = vrot.slane %v7457_v43, 5  ;;  %v9670_v14 = vadd.f32 %v16078_v50, %v15767_v48 }
 0x3ad   : > { %v13607_v57 = vld [vmem:[%s17019_s3 + $0x1d8] sm:$0xff]  ;;  %v12781_v51 = vld [vmem:[#allocation3 + $0x414] sm:$0xf0]  ;;  %v13531_v52 = vld [vmem:[#allocation3 + $0x3fc] sm:$0xf]  ;;  %v6140_v31 = vrot.slane %v6139_v0, 4  ;;  %v6424_v39 = vsel %vm14112_vm5, %v12240_v45, %v6423_v30  ;;  %10171 = vmatpush.bf16.msra.mxu3 %v13599_v27  ;;  %v9758_v63 = vpop.f32.mrf.mxu2 }
 0x3ae   : > { %v6425_v6 = vrot.slane %v6423_v30, 4  ;;  %v6426_v47 = vrot.slane %v6267_v3, 5  ;;  %6555 = vst [vmem:[#allocation3 + $0x468] sm:$0xf] %v6523_v8  ;;  %v7055_v10 = vld [vmem:[#allocation2 + $0x18] sm:$0xe]  ;;  %10260 = vmatpush.bf16.msra.mxu0 %v13607_v57  ;;  %v12792_v57 = vor.u32 %v13531_v52, %v12789_v58 }
 0x3af   : > { %v6150_v16 = vrot.slane %v6149_v11, 4  ;;  %6490 = vst [vmem:[#allocation3 + $0x440] sm:$0xf] %v6424_v39  ;;  %v13590_v43 = vld [vmem:[%s17019_s3 + $0x150] sm:$0xff]  ;;  %v7157_v44 = vrot.slane %v16091_v41, 5  ;;  %v6145_v3 = vsel %vm13858_vm2, %v6140_v31, %v6144_v32  ;;  %v6766_v45 = vrot.slane %v6765_v1, 4  ;;  %v9847_v39 = vpop.f32.mrf.mxu3 }
 0x3b0   : > { %v6427_v0 = vsel %vm14112_vm5, %v6425_v6, %v6426_v47  ;;  %v13598_v48 = vld [vmem:[%s17019_s3 + $0x190] sm:$0xff]  ;;  %v17073_v30 = vshll.u32 %v16060_v42, 16  ;;  %7032 = vst [vmem:[#allocation3 + $0x1c0] sm:$0xf] %v6761_v46  ;;  %v7326_v41 = vld [vmem:[#allocation2 + $0x1c] sm:$0xf]  ;;  %v9759_v11 = vadd.f32 %v9758_v63, %v9670_v14  ;;  %10083 = vmatpush.bf16.msra.mxu2 %v13590_v43 }
 0x3b1   : > { %v13530_v8 = vld [vmem:[#allocation3 + $0x3f4] sm:$0xf]  ;;  %v13535_v32 = vld [vmem:[#allocation3 + $0x418] sm:$0xf0]  ;;  %v6155_v31 = vsel %vm13858_vm2, %v6150_v16, %v6154_v53  ;;  %6218 = vst [vmem:[#allocation3 + $0x43c] sm:$0xf] %v6145_v3  ;;  %10172 = vmatpush.bf16.msra.mxu3 %v13598_v48  ;;  %v7450_v53 = vsel %vm13858_vm2, %v16073_v23, %v16007_v49  ;;  %9978 = vmatmul.bf16.gmra.mxu0 %v12792_v57  ;;  %v16152_v3 = vpop.f32.mrf.mxu1 }
 0x3b2   : > { %v6770_v27 = vrot.slane %v17073_v30, 5  ;;  %6219 = vst [vmem:[#allocation3 + $0x460] sm:$0xf] %v6155_v31  ;;  %v13589_v1 = vld [vmem:[%s17019_s3 + $0x148] sm:$0xff]  ;;  %v7057_v16 = vld [vmem:[#allocation2 + $0x20] sm:$0x1]  ;;  %v16143_v58 = vadd.f32 %v9847_v39, %v9759_v11  ;;  %v12784_v52 = vor.u32 %v13530_v8, %v12781_v51  ;;  %10261 = vmatpush.bf16.msra.mxu0 %v13606_v19  ;;  %v7460_v49 = vsel %vm13858_vm2, %v16089_v59, %v16107_v17  ;;  %v16154_v51 = vpop.f32.mrf.mxu0 }
 0x3b3   : > { %v13597_v42 = vld [vmem:[%s17019_s3 + $0x188] sm:$0xff]  ;;  %6491 = vst [vmem:[#allocation3 + $0x464] sm:$0xf] %v6427_v0  ;;  %v12242_v47 = vrot.slane %v7055_v10, 9  ;;  %v7159_v14 = vrot.slane %v7157_v44, 4  ;;  %v7160_v23 = vrot.slane %v7057_v16, 5 }
 0x3b4   : > { %v6771_v46 = vsel %vm13858_vm2, %v6766_v45, %v6770_v27  ;;  %v13446_v6 = vld [vmem:[#allocation3 + $0x150] sm:$0xf0]  ;;  %v12787_v43 = vld [vmem:[#allocation3 + $0x3f8] sm:$0xf]  ;;  %17074 = vst [vmem:[#allocation13_spill] sm:$0xff] %v16154_v51  ;;  %9800 = vmatmul.bf16.gmra.mxu2 %v12784_v52  ;;  %v13588_v59 = vld [vmem:[%s17019_s3 + $0x140] sm:$0xff] }
 0x3b5   : > { %v13605_v63 = vld [vmem:[%s17019_s3 + $0x1c8] sm:$0xff]  ;;  %7033 = vst [vmem:[#allocation3 + $0x1e4] sm:$0xf] %v6771_v46  ;;  %v12788_v10 = vor.u32 %v13535_v32, %v12787_v43  ;;  %v7158_v48 = vsel %vm14112_vm5, %v12242_v47, %v7157_v44  ;;  %v7392_v19 = vld [vmem:[#allocation2 + $0x24] sm:$0xf]  ;;  %10084 = vmatpush.bf16.msra.mxu2 %v13589_v1  ;;  %10173 = vmatpush.bf16.msra.mxu3 %v13597_v42  ;;  %v9761_v8 = vpop.f32.mrf.mxu2 }
 0x3b6   : > { %v12435_v0 = vld [vmem:[#allocation3 + $0x130] sm:$0xf]  ;;  %7358 = vst [vmem:[#allocation3 + $0x3c] sm:$0xf] %v7326_v41  ;;  %v13596_v17 = vld [vmem:[%s17019_s3 + $0x180] sm:$0xff]  ;;  %v7161_v30 = vsel %vm14112_vm5, %v7159_v14, %v7160_v23  ;;  %v9673_v44 = vadd.f32 %v16078_v50, %v15803_v36  ;;  %v7462_v11 = vshrl.u32 %v7392_v19, 16  ;;  %10262 = vmatpush.bf16.msra.mxu0 %v13605_v63 }
 0x3b7   : > { %v12436_v45 = vor.u32 %v13446_v6, %v12435_v0  ;;  %7853 = vst [vmem:[#allocation3 + $0x1c] sm:$0xf] %v7450_v53  ;;  %v7327_v27 = vld [vmem:[#allocation2 + $0x24] sm:$0xf]  ;;  %9889 = vmatmul.bf16.gmra.mxu3 %v12788_v10  ;;  %v7328_v41 = vld [vmem:[#allocation2 + $0x28] sm:$0xf]  ;;  %v9850_v1 = vpop.f32.mrf.mxu3 }
 0x3b8   : > { %7854 = vst [vmem:[#allocation3 + $0x40] sm:$0xf] %v7460_v49  ;;  %v13604_v32 = vld [vmem:[%s17019_s3 + $0x1c0] sm:$0xff]  ;;  %v7465_v31 = vshll.u32 %v7392_v19, 16  ;;  %v9762_v39 = vadd.f32 %v9761_v8, %v9673_v44  ;;  %v7393_v36 = vld [vmem:[#allocation2 + $0x28] sm:$0xf]  ;;  %v9675_v19 = vadd.f32 %v16078_v50, %v15833_v34 }
 0x3b9   : > { %10017 = vmatmul.bf16.gmra.mxu1 %v12436_v45  ;;  %v13616_v57 = vld [vmem:[%s17019_s3 + $0x220] sm:$0xff]  ;;  %7294 = vst [vmem:[#allocation3 + $0x5c] sm:$0xf] %v7158_v48  ;;  %10085 = vmatpush.bf16.msra.mxu2 %v13588_v59  ;;  %v7394_v42 = vld [vmem:[#allocation2 + $0x2c] sm:$0x1]  ;;  %v7464_v53 = vrot.slane %v7462_v11, 4  ;;  %v16176_v47 = vpop.f32.mrf.mxu1 }
 0x3ba   : > { %7295 = vst [vmem:[#allocation3 + $0x80] sm:$0xf] %v7161_v30  ;;  %10174 = vmatpush.bf16.msra.mxu3 %v13596_v17  ;;  %v16174_v46 = vadd.f32 %v9850_v1, %v9762_v39  ;;  %10348 = vmatpush.bf16.msra.mxu1 %v13616_v57  ;;  %v7467_v16 = vrot.slane %v7465_v31, 5  ;;  %v7471_v52 = vshll.u32 %v7393_v36, 16  ;;  %v7475_v6 = vshrl.u32 %v7393_v36, 16  ;;  %v16180_v45 = vpop.f32.mrf.mxu0 }
 0x3bb   : > { %7359 = vst [vmem:[#allocation3 + $0x60] sm:$0xf] %v7327_v27  ;;  %10263 = vmatpush.bf16.msra.mxu0 %v13604_v32  ;;  %v7481_v43 = vshll.u32 %v7394_v42, 16  ;;  %v7058_v63 = vld [vmem:[#allocation2 + $0x24] sm:$0xe] }
 0x3bc   : > { %7360 = vst [vmem:[#allocation3 + $0x84] sm:$0xf] %v7328_v41  ;;  %v7468_v14 = vor.u32 %v7467_v16, %v7464_v53  ;;  %v7059_v49 = vld [vmem:[#allocation2 + $0x28] sm:$0xf]  ;;  %v13540_v23 = vld [vmem:[#allocation3 + $0x444] sm:$0xf] }
 0x3bd   : > { %v12825_v10 = vld [vmem:[#allocation3 + $0x464] sm:$0xf0]  ;;  %v7473_v0 = vrot.slane %v7471_v52, 5  ;;  %v7477_v48 = vrot.slane %v7475_v6, 4  ;;  %17075 = vst [vmem:[#allocation11_spill] sm:$0xff] %v16180_v45  ;;  %v9763_v27 = vpop.f32.mrf.mxu2  ;;  %v12243_v8 = vrot.slane %v7058_v63, 9 }
 0x3be   : > { %v12817_v59 = vld [vmem:[#allocation3 + $0x45c] sm:$0xf0]  ;;  %v7469_v17 = vrot.slane %v7468_v14, 4  ;;  %v7060_v30 = vld [vmem:[#allocation2 + $0x2c] sm:$0x1]  ;;  %v7164_v32 = vrot.slane %v7059_v49, 5  ;;  %v9764_v31 = vadd.f32 %v9763_v27, %v9675_v19  ;;  %v12828_v39 = vor.u32 %v13540_v23, %v12825_v10 }
 0x3bf   : > { %v13539_v44 = vld [vmem:[#allocation3 + $0x43c] sm:$0xf]  ;;  %v13544_v41 = vld [vmem:[#allocation3 + $0x460] sm:$0xf0]  ;;  %v7478_v11 = vor.u32 %v7477_v48, %v7473_v0  ;;  %v7329_v57 = vld [vmem:[#allocation2 + $0x30] sm:$0xf]  ;;  %v9852_v53 = vpop.f32.mrf.mxu3 }
 0x3c0   : > { %v13455_v36 = vld [vmem:[#allocation3 + $0x198] sm:$0xf0]  ;;  %v7474_v1 = vsel %vm13858_vm2, %v7469_v17, %v7473_v0  ;;  %v7483_v42 = vrot.slane %v7481_v43, 5  ;;  %7361 = vst [vmem:[#allocation3 + $0xa8] sm:$0xf] %v7329_v57  ;;  %v7165_v6 = vsel %vm14112_vm5, %v12243_v8, %v7164_v32  ;;  %v7166_v14 = vrot.slane %v7164_v32, 4 }
 0x3c1   : > { %v7330_v34 = vld [vmem:[#allocation2 + $0x34] sm:$0xf]  ;;  %v12823_v16 = vld [vmem:[#allocation3 + $0x440] sm:$0xf]  ;;  %v7479_v52 = vrot.slane %v7478_v11, 4  ;;  %v7167_v63 = vrot.slane %v7060_v30, 5  ;;  %v16186_v49 = vadd.f32 %v9852_v53, %v9764_v31  ;;  %v12820_v48 = vor.u32 %v13539_v44, %v12817_v59  ;;  %9983 = vmatmul.bf16.gmra.mxu0 %v12828_v39  ;;  %v16192_v8 = vpop.f32.mrf.mxu1 }
 0x3c2   : > { %7855 = vst [vmem:[#allocation3 + $0x64] sm:$0xf] %v7474_v1  ;;  %v12471_v23 = vld [vmem:[#allocation3 + $0x178] sm:$0xf]  ;;  %v7396_v0 = vld [vmem:[#allocation2 + $0x34] sm:$0xf]  ;;  %v12824_v30 = vor.u32 %v13544_v41, %v12823_v16  ;;  %v9678_v57 = vadd.f32 %v16078_v50, %v15852_v9 }
 0x3c3   : > { %17076 = vst [vmem:[#allocation16_spill] sm:$0xff] %v16186_v49  ;;  %v7395_v10 = vld [vmem:[#allocation2 + $0x30] sm:$0xf]  ;;  %v7484_v43 = vsel %vm13858_vm2, %v7479_v52, %v7483_v42  ;;  %v7168_v19 = vsel %vm14112_vm5, %v7166_v14, %v7167_v63  ;;  %v7397_v17 = vld [vmem:[#allocation2 + $0x38] sm:$0x1]  ;;  %v7495_v59 = vshll.u32 %v7396_v0, 16  ;;  %v12472_v31 = vor.u32 %v13455_v36, %v12471_v23 }
 0x3c4   : > { %7296 = vst [vmem:[#allocation3 + $0xa4] sm:$0xf] %v7165_v6  ;;  %v7486_v27 = vshrl.u32 %v7395_v10, 16  ;;  %v7489_v11 = vshll.u32 %v7395_v10, 16  ;;  %9805 = vmatmul.bf16.gmra.mxu2 %v12820_v48  ;;  %v7499_v44 = vshrl.u32 %v7396_v0, 16  ;;  %v7505_v32 = vshll.u32 %v7397_v17, 16  ;;  %v16196_v10 = vpop.f32.mrf.mxu0 }
 0x3c5   : > { %7362 = vst [vmem:[#allocation3 + $0xcc] sm:$0xf] %v7330_v34  ;;  %v6577_v39 = vld [vmem:[#allocation2 + $0x60] sm:$0xf]  ;;  %v6578_v1 = vld [vmem:[#allocation2 + $0x64] sm:$0xf]  ;;  %v9766_v14 = vpop.f32.mrf.mxu2 }
 0x3c6   : > { %7856 = vst [vmem:[#allocation3 + $0x88] sm:$0xf] %v7484_v43  ;;  %v6579_v42 = vld [vmem:[#allocation2 + $0x68] sm:$0x1]  ;;  %v6773_v34 = vshrl.u32 %v6577_v39, 16  ;;  %v6776_v53 = vshll.u32 %v6577_v39, 16  ;;  %v9767_v0 = vadd.f32 %v9766_v14, %v9678_v57 }
 0x3c7   : > { %9894 = vmatmul.bf16.gmra.mxu3 %v12824_v30  ;;  %v6782_v52 = vshll.u32 %v6578_v1, 16  ;;  %v6786_v6 = vshrl.u32 %v6578_v1, 16  ;;  %7297 = vst [vmem:[#allocation3 + $0xc8] sm:$0xf] %v7168_v19  ;;  %v6792_v41 = vshll.u32 %v6579_v42, 16  ;;  %v7488_v16 = vrot.slane %v7486_v27, 4  ;;  %v9855_v43 = vpop.f32.mrf.mxu3 }
 0x3c8   : > { %v7491_v63 = vrot.slane %v7489_v11, 5  ;;  %v7497_v48 = vrot.slane %v7495_v59, 5  ;;  %17077 = vst [vmem:[#allocation15_spill] sm:$0xff] %v16196_v10  ;;  %v6775_v9 = vrot.slane %v6773_v34, 4  ;;  %v6778_v36 = vrot.slane %v6776_v53, 5 }
 0x3c9   : > { %10022 = vmatmul.bf16.gmra.mxu1 %v12472_v31  ;;  %v6784_v23 = vrot.slane %v6782_v52, 5  ;;  %v6788_v17 = vrot.slane %v6786_v6, 4  ;;  %v7501_v45 = vrot.slane %v7499_v44, 4  ;;  %v16198_v39 = vadd.f32 %v9855_v43, %v9767_v0  ;;  %v7061_v19 = vld [vmem:[#allocation2 + $0x30] sm:$0xe]  ;;  %v16200_v11 = vpop.f32.mrf.mxu1 }
 0x3ca   : > { %v7492_v30 = vor.u32 %v7491_v63, %v7488_v16  ;;  %v6779_v1 = vor.u32 %v6778_v36, %v6775_v9  ;;  %v7062_v27 = vld [vmem:[#allocation2 + $0x34] sm:$0xf]  ;;  %v6794_v10 = vrot.slane %v6792_v41, 5  ;;  %v7507_v57 = vrot.slane %v7505_v32, 5  ;;  %v7063_v34 = vld [vmem:[#allocation2 + $0x38] sm:$0x1] }
 0x3cb   : > { %17078 = vst [vmem:[#allocation14_spill] sm:$0xff] %v16198_v39  ;;  %v6789_v31 = vor.u32 %v6788_v17, %v6784_v23  ;;  %v7502_v42 = vor.u32 %v7501_v45, %v7497_v48  ;;  %v7171_v53 = vrot.slane %v7062_v27, 5  ;;  %v12293_v52 = vld [vmem:[#allocation3 + $0x34] sm:$0xf0]  ;;  %v12301_v14 = vld [vmem:[#allocation3 + $0x3c] sm:$0xf0]  ;;  %v9680_v0 = vadd.f32 %v16078_v50, %v15873_v20 }
 0x3cc   : > { %v7493_v49 = vrot.slane %v7492_v30, 4  ;;  %v6780_v59 = vrot.slane %v6779_v1, 4  ;;  %v12244_v63 = vrot.slane %v7061_v19, 9  ;;  %v13407_v45 = vld [vmem:[#allocation3 + $0x1c] sm:$0xf]  ;;  %v7174_v20 = vrot.slane %v7063_v34, 5 }
 0x3cd   : > { %v6790_v6 = vrot.slane %v6789_v31, 4  ;;  %v7503_v16 = vrot.slane %v7502_v42, 4  ;;  %v7173_v41 = vrot.slane %v7171_v53, 4  ;;  %v9768_v32 = vpop.f32.mrf.mxu2  ;;  %v13406_v36 = vld [vmem:[#allocation3 + $0x14] sm:$0xf]  ;;  %v12304_v19 = vor.u32 %v13407_v45, %v12301_v14 }
 0x3ce   : > { %v7498_v44 = vsel %vm13858_vm2, %v7493_v49, %v7497_v48  ;;  %v6785_v9 = vsel %vm13858_vm2, %v6780_v59, %v6784_v23  ;;  %v13411_v43 = vld [vmem:[#allocation3 + $0x38] sm:$0xf0]  ;;  %v7172_v48 = vsel %vm14112_vm5, %v12244_v63, %v7171_v53  ;;  %v7398_v30 = vld [vmem:[#allocation2 + $0x3c] sm:$0xf]  ;;  %v9769_v1 = vadd.f32 %v9768_v32, %v9680_v0  ;;  %v7399_v31 = vld [vmem:[#allocation2 + $0x40] sm:$0xf] }
 0x3cf   : > { %7857 = vst [vmem:[#allocation3 + $0xac] sm:$0xf] %v7498_v44  ;;  %v6795_v17 = vsel %vm13858_vm2, %v6790_v6, %v6794_v10  ;;  %v7508_v49 = vsel %vm13858_vm2, %v7503_v16, %v7507_v57  ;;  %v7331_v23 = vld [vmem:[#allocation2 + $0x3c] sm:$0xf]  ;;  %v9857_v42 = vpop.f32.mrf.mxu3  ;;  %v12299_v27 = vld [vmem:[#allocation3 + $0x18] sm:$0xf]  ;;  %v7175_v10 = vsel %vm14112_vm5, %v7173_v41, %v7174_v20  ;;  %v16216_v57 = vpop.f32.mrf.mxu0  ;;  %v12296_v63 = vor.u32 %v13406_v36, %v12293_v52 }
 0x3d0   : > { %7034 = vst [vmem:[#allocation3 + $0x208] sm:$0xf] %v6785_v9  ;;  %v7510_v59 = vshrl.u32 %v7398_v30, 16  ;;  %v7513_v6 = vshll.u32 %v7398_v30, 16  ;;  %v7519_v44 = vshll.u32 %v7399_v31, 16  ;;  %v16218_v16 = vadd.f32 %v9857_v42, %v9769_v1 }
 0x3d1   : > { %7035 = vst [vmem:[#allocation3 + $0x22c] sm:$0xf] %v6795_v17  ;;  %v12507_v34 = vld [vmem:[#allocation3 + $0x1c0] sm:$0xf]  ;;  %v13464_v53 = vld [vmem:[#allocation3 + $0x1e0] sm:$0xf0]  ;;  %10264 = vmatmul.bf16.vlgmr.msra.gmra.mxu0 %v12304_v19  ;;  %v16220_v17 = vpop.f32.mrf.mxu1  ;;  %v12300_v41 = vor.u32 %v13411_v43, %v12299_v27  ;;  %v9683_v30 = vadd.f32 %v16078_v50, %v15905_v33 }
 0x3d2   : > { %7858 = vst [vmem:[#allocation3 + $0xd0] sm:$0xf] %v7508_v49  ;;  %v7523_v14 = vshrl.u32 %v7399_v31, 16  ;;  %v7332_v0 = vld [vmem:[#allocation2 + $0x40] sm:$0xf]  ;;  %v7512_v45 = vrot.slane %v7510_v59, 4  ;;  %v12508_v1 = vor.u32 %v13464_v53, %v12507_v34 }
 0x3d3   : > { %17079 = vst [vmem:[#allocation17_spill] sm:$0xff] %v16216_v57  ;;  %v7515_v9 = vrot.slane %v7513_v6, 5  ;;  %v7521_v32 = vrot.slane %v7519_v44, 5  ;;  %v7400_v49 = vld [vmem:[#allocation2 + $0x44] sm:$0x1]  ;;  %v13615_v43 = vld [vmem:[%s17019_s3 + $0x218] sm:$0xff] }
 0x3d4   : > { %17080 = vst [vmem:[#allocation18_spill] sm:$0xff] %v16218_v16  ;;  %10086 = vmatmul.bf16.vlgmr.msra.gmra.mxu2 %v12296_v63  ;;  %v7525_v20 = vrot.slane %v7523_v14, 4  ;;  %v6580_v52 = vld [vmem:[#allocation2 + $0x6c] sm:$0xf]  ;;  %v6581_v36 = vld [vmem:[#allocation2 + $0x70] sm:$0xf]  ;;  %10349 = vmatpush.bf16.msra.mxu1 %v13615_v43 }
 0x3d5   : > { %7298 = vst [vmem:[#allocation3 + $0xec] sm:$0xf] %v7172_v48  ;;  %v6582_v48 = vld [vmem:[#allocation2 + $0x74] sm:$0x1]  ;;  %v7516_v19 = vor.u32 %v7515_v9, %v7512_v45  ;;  %v6797_v31 = vshrl.u32 %v6580_v52, 16  ;;  %v6800_v42 = vshll.u32 %v6580_v52, 16  ;;  %v9771_v6 = vpop.f32.mrf.mxu2 }
 0x3d6   : > { %7299 = vst [vmem:[#allocation3 + $0x110] sm:$0xf] %v7175_v10  ;;  %v6806_v10 = vshll.u32 %v6581_v36, 16  ;;  %v6810_v59 = vshrl.u32 %v6581_v36, 16  ;;  %v7529_v27 = vshll.u32 %v7400_v49, 16  ;;  %v9772_v33 = vadd.f32 %v9771_v6, %v9683_v30 }
 0x3d7   : > { %7363 = vst [vmem:[#allocation3 + $0xf0] sm:$0xf] %v7331_v23  ;;  %10175 = vmatmul.bf16.vlgmr.msra.gmra.mxu3 %v12300_v41  ;;  %v7526_v23 = vor.u32 %v7525_v20, %v7521_v32  ;;  %v7065_v44 = vld [vmem:[#allocation2 + $0x40] sm:$0xf]  ;;  %v6799_v34 = vrot.slane %v6797_v31, 4  ;;  %v6802_v53 = vrot.slane %v6800_v42, 5  ;;  %v9860_v14 = vpop.f32.mrf.mxu3  ;;  %v16229_v31 = vpop.f32.mrf.mxu0 }
 0x3d8   : > { %v6816_v63 = vshll.u32 %v6582_v48, 16  ;;  %7364 = vst [vmem:[#allocation3 + $0x114] sm:$0xf] %v7332_v0  ;;  %v6808_v45 = vrot.slane %v6806_v10, 5  ;;  %v6812_v9 = vrot.slane %v6810_v59, 4  ;;  %v16227_v52 = vadd.f32 %v9860_v14, %v9772_v33 }
 0x3d9   : > { %10027 = vmatmul.bf16.gmra.mxu1 %v12508_v1  ;;  %v7064_v41 = vld [vmem:[#allocation2 + $0x3c] sm:$0xe]  ;;  %v6803_v1 = vor.u32 %v6802_v53, %v6799_v34  ;;  %v7517_v36 = vrot.slane %v7516_v19, 4  ;;  %v7066_v57 = vld [vmem:[#allocation2 + $0x44] sm:$0x1]  ;;  %v7527_v20 = vrot.slane %v7526_v23, 4  ;;  %v16231_v48 = vpop.f32.mrf.mxu1  ;;  %v9685_v19 = vadd.f32 %v16078_v50, %v15926_v40 }
 0x3da   : > { %v12337_v16 = vld [vmem:[#allocation3 + $0x84] sm:$0xf0]  ;;  %v6813_v39 = vor.u32 %v6812_v9, %v6808_v45  ;;  %v7531_v49 = vrot.slane %v7529_v27, 5  ;;  %v7178_v51 = vrot.slane %v7065_v44, 5  ;;  %v7333_v30 = vld [vmem:[#allocation2 + $0x48] sm:$0xf] }
 0x3db   : > { %17081 = vst [vmem:[#allocation19_spill] sm:$0xff] %v16229_v31  ;;  %v6804_v0 = vrot.slane %v6803_v1, 4  ;;  %v6818_v42 = vrot.slane %v6816_v63, 5  ;;  %v7522_v10 = vsel %vm13858_vm2, %v7517_v36, %v7521_v32  ;;  %v12245_v59 = vrot.slane %v7064_v41, 9  ;;  %v12329_v6 = vld [vmem:[#allocation3 + $0x7c] sm:$0xf0] }
 0x3dc   : > { %7365 = vst [vmem:[#allocation3 + $0x138] sm:$0xf] %v7333_v30  ;;  %v6814_v43 = vrot.slane %v6813_v39, 4  ;;  %v7532_v23 = vsel %vm13858_vm2, %v7527_v20, %v7531_v49  ;;  %v7181_v27 = vrot.slane %v7066_v57, 5  ;;  %v7401_v44 = vld [vmem:[#allocation2 + $0x48] sm:$0xf] }
 0x3dd   : > { %7859 = vst [vmem:[#allocation3 + $0xf4] sm:$0xf] %v7522_v10  ;;  %v13420_v33 = vld [vmem:[#allocation3 + $0x80] sm:$0xf0]  ;;  %v6809_v34 = vsel %vm13858_vm2, %v6804_v0, %v6808_v45  ;;  %v7179_v32 = vsel %vm14112_vm5, %v12245_v59, %v7178_v51  ;;  %v7180_v53 = vrot.slane %v7178_v51, 4  ;;  %v7534_v14 = vshrl.u32 %v7401_v44, 16  ;;  %v9773_v40 = vpop.f32.mrf.mxu2 }
 0x3de   : > { %7860 = vst [vmem:[#allocation3 + $0x118] sm:$0xf] %v7532_v23  ;;  %v7402_v63 = vld [vmem:[#allocation2 + $0x4c] sm:$0xf]  ;;  %v13415_v9 = vld [vmem:[#allocation3 + $0x5c] sm:$0xf]  ;;  %v6819_v41 = vsel %vm13858_vm2, %v6814_v43, %v6818_v42  ;;  %v9774_v1 = vadd.f32 %v9773_v40, %v9685_v19 }
 0x3df   : > { %v13416_v39 = vld [vmem:[#allocation3 + $0x64] sm:$0xf]  ;;  %7036 = vst [vmem:[#allocation3 + $0x250] sm:$0xf] %v6809_v34  ;;  %v7334_v57 = vld [vmem:[#allocation2 + $0x4c] sm:$0xf]  ;;  %v7182_v45 = vsel %vm14112_vm5, %v7180_v53, %v7181_v27  ;;  %v9862_v51 = vpop.f32.mrf.mxu3  ;;  %v12332_v43 = vor.u32 %v13415_v9, %v12329_v6 }
 0x3e0   : > { %v12335_v36 = vld [vmem:[#allocation3 + $0x60] sm:$0xf]  ;;  %v12340_v20 = vor.u32 %v13416_v39, %v12337_v16  ;;  %7037 = vst [vmem:[#allocation3 + $0x274] sm:$0xf] %v6819_v41  ;;  %v7403_v49 = vld [vmem:[#allocation2 + $0x50] sm:$0x1]  ;;  %v16247_v31 = vadd.f32 %v9862_v51, %v9774_v1 }
 0x3e1   : > { %v7067_v30 = vld [vmem:[#allocation2 + $0x48] sm:$0xe]  ;;  %7300 = vst [vmem:[#allocation3 + $0x134] sm:$0xf] %v7179_v32  ;;  %v7536_v0 = vrot.slane %v7534_v14, 4  ;;  %v7537_v10 = vshll.u32 %v7401_v44, 16  ;;  %v12336_v16 = vor.u32 %v13420_v33, %v12335_v36  ;;  %v16249_v27 = vpop.f32.mrf.mxu1  ;;  %v16253_v33 = vpop.f32.mrf.mxu0 }
 0x3e2   : > { %v7543_v59 = vshll.u32 %v7402_v63, 16  ;;  %v7547_v23 = vshrl.u32 %v7402_v63, 16  ;;  %17082 = vst [vmem:[#allocation20_spill] sm:$0xff] %v16247_v31  ;;  %v13473_v42 = vld [vmem:[#allocation3 + $0x228] sm:$0xf0]  ;;  %10269 = vmatmul.bf16.gmra.mxu0 %v12340_v20  ;;  %v7553_v14 = vshll.u32 %v7403_v49, 16  ;;  %v9688_v63 = vadd.f32 %v16078_v50, %v15949_v2 }
 0x3e3   : > { %7301 = vst [vmem:[#allocation3 + $0x158] sm:$0xf] %v7182_v45  ;;  %v7068_v19 = vld [vmem:[#allocation2 + $0x4c] sm:$0xf]  ;;  %v7539_v34 = vrot.slane %v7537_v10, 5  ;;  %v12246_v44 = vrot.slane %v7067_v30, 9 }
 0x3e4   : > { %7366 = vst [vmem:[#allocation3 + $0x15c] sm:$0xf] %v7334_v57  ;;  %v7545_v40 = vrot.slane %v7543_v59, 5  ;;  %v12543_v53 = vld [vmem:[#allocation3 + $0x208] sm:$0xf]  ;;  %10091 = vmatmul.bf16.gmra.mxu2 %v12332_v43  ;;  %v7549_v32 = vrot.slane %v7547_v23, 4 }
 0x3e5   : > { %v7185_v39 = vrot.slane %v7068_v19, 5  ;;  %v12544_v41 = vor.u32 %v13473_v42, %v12543_v53  ;;  %v6583_v6 = vld [vmem:[#allocation2 + $0x78] sm:$0xf]  ;;  %v6584_v9 = vld [vmem:[#allocation2 + $0x7c] sm:$0xf]  ;;  %v7540_v20 = vor.u32 %v7539_v34, %v7536_v0  ;;  %17083 = vst [vmem:[#allocation21_spill] sm:$0xff] %v16253_v33  ;;  %v9776_v10 = vpop.f32.mrf.mxu2 }
 0x3e6   : > { %v6585_v1 = vld [vmem:[#allocation2 + $0x80] sm:$0x1]  ;;  %v6821_v57 = vshrl.u32 %v6583_v6, 16  ;;  %v6824_v36 = vshll.u32 %v6583_v6, 16  ;;  %v6830_v45 = vshll.u32 %v6584_v9, 16  ;;  %v6834_v51 = vshrl.u32 %v6584_v9, 16 }
 0x3e7   : > { %10180 = vmatmul.bf16.gmra.mxu3 %v12336_v16  ;;  %v6840_v49 = vshll.u32 %v6585_v1, 16  ;;  %v7550_v30 = vor.u32 %v7549_v32, %v7545_v40  ;;  %v7186_v59 = vsel %vm14112_vm5, %v12246_v44, %v7185_v39  ;;  %v9777_v2 = vadd.f32 %v9776_v10, %v9688_v63  ;;  %v9865_v43 = vpop.f32.mrf.mxu3  ;;  %v7069_v16 = vld [vmem:[#allocation2 + $0x50] sm:$0x1]  ;;  %v7336_v33 = vld [vmem:[#allocation2 + $0x58] sm:$0xf] }
 0x3e8   : > { %v6823_v23 = vrot.slane %v6821_v57, 4  ;;  %v6826_v42 = vrot.slane %v6824_v36, 5  ;;  %7302 = vst [vmem:[#allocation3 + $0x17c] sm:$0xf] %v7186_v59  ;;  %v6832_v0 = vrot.slane %v6830_v45, 5  ;;  %v6836_v19 = vrot.slane %v6834_v51, 4 }
 0x3e9   : > { %10032 = vmatmul.bf16.gmra.mxu1 %v12544_v41  ;;  %v7541_v34 = vrot.slane %v7540_v20, 4  ;;  %v16257_v53 = vadd.f32 %v9865_v43, %v9777_v2  ;;  %v7555_v9 = vrot.slane %v7553_v14, 5  ;;  %v7335_v41 = vld [vmem:[#allocation2 + $0x54] sm:$0xf]  ;;  %v12373_v1 = vld [vmem:[#allocation3 + $0xcc] sm:$0xf0]  ;;  %v16261_v36 = vpop.f32.mrf.mxu1  ;;  %v9690_v14 = vadd.f32 %v16078_v50, %v15968_v5 }
 0x3ea   : > { %v6827_v6 = vor.u32 %v6826_v42, %v6823_v23  ;;  %v6837_v32 = vor.u32 %v6836_v19, %v6832_v0  ;;  %v6842_v31 = vrot.slane %v6840_v49, 5  ;;  %v7551_v63 = vrot.slane %v7550_v30, 4  ;;  %7367 = vst [vmem:[#allocation3 + $0x180] sm:$0xf] %v7335_v41  ;;  %v7404_v57 = vld [vmem:[#allocation2 + $0x54] sm:$0xf]  ;;  %v16273_v41 = vpop.f32.mrf.mxu0 }
 0x3eb   : > { %v7546_v44 = vsel %vm13858_vm2, %v7541_v34, %v7545_v40  ;;  %v7187_v20 = vrot.slane %v7185_v39, 4  ;;  %v7188_v51 = vrot.slane %v7069_v16, 5  ;;  %v7558_v10 = vshrl.u32 %v7404_v57, 16  ;;  %7368 = vst [vmem:[#allocation3 + $0x1a4] sm:$0xf] %v7336_v33 }
 0x3ec   : > { %v6828_v45 = vrot.slane %v6827_v6, 4  ;;  %7861 = vst [vmem:[#allocation3 + $0x13c] sm:$0xf] %v7546_v44  ;;  %v6838_v59 = vrot.slane %v6837_v32, 4  ;;  %v7556_v49 = vsel %vm13858_vm2, %v7551_v63, %v7555_v9  ;;  %v7405_v2 = vld [vmem:[#allocation2 + $0x58] sm:$0xf] }
 0x3ed   : > { %v7561_v40 = vshll.u32 %v7404_v57, 16  ;;  %v12365_v30 = vld [vmem:[#allocation3 + $0xc4] sm:$0xf0]  ;;  %7862 = vst [vmem:[#allocation3 + $0x160] sm:$0xf] %v7556_v49  ;;  %v7189_v39 = vsel %vm14112_vm5, %v7187_v20, %v7188_v51  ;;  %v7560_v42 = vrot.slane %v7558_v10, 4  ;;  %v9778_v19 = vpop.f32.mrf.mxu2  ;;  %v9693_v49 = vadd.f32 %v16078_v50, %v16009_v38 }
 0x3ee   : > { %v6833_v23 = vsel %vm13858_vm2, %v6828_v45, %v6832_v0  ;;  %v7567_v43 = vshll.u32 %v7405_v2, 16  ;;  %v13424_v34 = vld [vmem:[#allocation3 + $0xa4] sm:$0xf]  ;;  %v13429_v5 = vld [vmem:[#allocation3 + $0xc8] sm:$0xf0]  ;;  %v6843_v6 = vsel %vm13858_vm2, %v6838_v59, %v6842_v31  ;;  %v7571_v9 = vshrl.u32 %v7405_v2, 16 }
 0x3ef   : > { %v13425_v16 = vld [vmem:[#allocation3 + $0xac] sm:$0xf]  ;;  %7038 = vst [vmem:[#allocation3 + $0x298] sm:$0xf] %v6833_v23  ;;  %v7563_v33 = vrot.slane %v7561_v40, 5  ;;  %v9779_v32 = vadd.f32 %v9778_v19, %v9690_v14  ;;  %v9867_v57 = vpop.f32.mrf.mxu3  ;;  %v12368_v40 = vor.u32 %v13424_v34, %v12365_v30  ;;  %v9910_v23 = vadd.f32 %v15787_v12, %v15825_v62 }
 0x3f0   : > { %v12376_v0 = vor.u32 %v13425_v16, %v12373_v1  ;;  %7039 = vst [vmem:[#allocation3 + $0x2bc] sm:$0xf] %v6843_v6  ;;  %v7406_v44 = vld [vmem:[#allocation2 + $0x5c] sm:$0x1]  ;;  %v7070_v63 = vld [vmem:[#allocation2 + $0x54] sm:$0xe] }
 0x3f1   : > { %v12371_v45 = vld [vmem:[#allocation3 + $0xa8] sm:$0xf]  ;;  %7303 = vst [vmem:[#allocation3 + $0x1a0] sm:$0xf] %v7189_v39  ;;  %v7564_v20 = vor.u32 %v7563_v33, %v7560_v42  ;;  %v7569_v51 = vrot.slane %v7567_v43, 5  ;;  %v16277_v31 = vadd.f32 %v9867_v57, %v9779_v32  ;;  %v7573_v16 = vrot.slane %v7571_v9, 4 }
 0x3f2   : > { %v7071_v10 = vld [vmem:[#allocation2 + $0x58] sm:$0xf]  ;;  %v12579_v59 = vld [vmem:[#allocation3 + $0x250] sm:$0xf]  ;;  %v13482_v2 = vld [vmem:[#allocation3 + $0x270] sm:$0xf0]  ;;  %10274 = vmatmul.bf16.gmra.mxu0 %v12376_v0  ;;  %v9998_v43 = vpop.f32.mrf.mxu1  ;;  %v12372_v6 = vor.u32 %v13429_v5, %v12371_v45 }
 0x3f3   : > { %v7072_v14 = vld [vmem:[#allocation2 + $0x5c] sm:$0x1]  ;;  %v7192_v1 = vrot.slane %v7071_v10, 5  ;;  %v7565_v19 = vrot.slane %v7564_v20, 4  ;;  %v12247_v39 = vrot.slane %v7070_v63, 9  ;;  %v7577_v33 = vshll.u32 %v7406_v44, 16 }
 0x3f4   : > { %v7337_v42 = vld [vmem:[#allocation2 + $0x60] sm:$0xf]  ;;  %10096 = vmatmul.bf16.gmra.mxu2 %v12368_v40  ;;  %v7195_v50 = vrot.slane %v7072_v14, 5  ;;  %v16281_v32 = vadd.f32 %v9998_v43, %v9910_v23  ;;  %v12580_v30 = vor.u32 %v13482_v2, %v12579_v59  ;;  %v6586_v34 = vld [vmem:[#allocation2 + $0x84] sm:$0xf]  ;;  %v13614_v10 = vld [vmem:[%s17019_s3 + $0x210] sm:$0xff]  ;;  %v7574_v59 = vor.u32 %v7573_v16, %v7569_v51  ;;  %v16292_v43 = vpop.f32.mrf.mxu0 }
 0x3f5   : > { %v7194_v38 = vrot.slane %v7192_v1, 4  ;;  %7369 = vst [vmem:[#allocation3 + $0x1c8] sm:$0xf] %v7337_v42  ;;  %v6587_v0 = vld [vmem:[#allocation2 + $0x88] sm:$0xf]  ;;  %v7570_v12 = vsel %vm13858_vm2, %v7565_v19, %v7569_v51  ;;  %v7193_v62 = vsel %vm14112_vm5, %v12247_v39, %v7192_v1  ;;  %v6845_v9 = vshrl.u32 %v6586_v34, 16  ;;  %v9781_v45 = vpop.f32.mrf.mxu2  ;;  %10350 = vmatpush.bf16.msra.mxu1 %v13614_v10 }
 0x3f6   : > { %v6588_v57 = vld [vmem:[#allocation2 + $0x8c] sm:$0x1]  ;;  %v6848_v63 = vshll.u32 %v6586_v34, 16  ;;  %v6854_v5 = vshll.u32 %v6587_v0, 16  ;;  %v6858_v44 = vshrl.u32 %v6587_v0, 16  ;;  %v9782_v40 = vadd.f32 %v9781_v45, %v9693_v49 }
 0x3f7   : > { %10185 = vmatmul.bf16.gmra.mxu3 %v12372_v6  ;;  %v6864_v20 = vshll.u32 %v6588_v57, 16  ;;  %v7196_v2 = vsel %vm14112_vm5, %v7194_v38, %v7195_v50  ;;  %v6847_v14 = vrot.slane %v6845_v9, 4  ;;  %7863 = vst [vmem:[#allocation3 + $0x184] sm:$0xf] %v7570_v12  ;;  %v9870_v1 = vpop.f32.mrf.mxu3  ;;  %v7579_v42 = vrot.slane %v7577_v33, 5 }
 0x3f8   : > { %v6850_v23 = vrot.slane %v6848_v63, 5  ;;  %v6856_v19 = vrot.slane %v6854_v5, 5  ;;  %v6860_v39 = vrot.slane %v6858_v44, 4  ;;  %7304 = vst [vmem:[#allocation3 + $0x1c4] sm:$0xf] %v7193_v62  ;;  %v16294_v6 = vadd.f32 %v9870_v1, %v9782_v40 }
 0x3f9   : > { %10037 = vmatmul.bf16.gmra.mxu1 %v12580_v30  ;;  %v9912_v51 = vadd.f32 %v15815_v22, %v15848_v35  ;;  %v12409_v16 = vld [vmem:[#allocation3 + $0x114] sm:$0xf0]  ;;  %7305 = vst [vmem:[#allocation3 + $0x1e8] sm:$0xf] %v7196_v2  ;;  %v7338_v49 = vld [vmem:[#allocation2 + $0x64] sm:$0xf] }
 0x3fa   : > { %17084 = vst [vmem:[#allocation22_spill] sm:$0xff] %v16294_v6  ;;  %v6851_v30 = vor.u32 %v6850_v23, %v6847_v14  ;;  %v7407_v38 = vld [vmem:[#allocation2 + $0x60] sm:$0xf]  ;;  %v6861_v50 = vor.u32 %v6860_v39, %v6856_v19  ;;  %v6866_v34 = vrot.slane %v6864_v20, 5  ;;  %v7575_v0 = vrot.slane %v7574_v59, 4  ;;  %v10000_v62 = vpop.f32.mrf.mxu1 }
 0x3fb   : > { %7370 = vst [vmem:[#allocation3 + $0x1ec] sm:$0xf] %v7338_v49  ;;  %v7582_v57 = vshrl.u32 %v7407_v38, 16  ;;  %v16301_v33 = vld [vmem:[%s17020_s4] ss:$0 sm:$0xff]  ;;  %v7585_v5 = vshll.u32 %v7407_v38, 16  ;;  %v16305_v44 = vadd.f32 %v10000_v62, %v9912_v51 }
 0x3fc   : > { %v9695_v12 = vadd.f32 %v16301_v33, %v16035_v29  ;;  %v13434_v22 = vld [vmem:[#allocation3 + $0xf4] sm:$0xf]  ;;  %v6852_v35 = vrot.slane %v6851_v30, 4  ;;  %v7408_v9 = vld [vmem:[#allocation2 + $0x64] sm:$0xf]  ;;  %v6862_v45 = vrot.slane %v6861_v50, 4  ;;  %v7580_v20 = vsel %vm13858_vm2, %v7575_v0, %v7579_v42 }
 0x3fd   : > { %v7409_v63 = vld [vmem:[#allocation2 + $0x68] sm:$0x1]  ;;  %v7584_v10 = vrot.slane %v7582_v57, 4  ;;  %v7073_v59 = vld [vmem:[#allocation2 + $0x60] sm:$0xe]  ;;  %v7587_v29 = vrot.slane %v7585_v5, 5  ;;  %v9783_v1 = vpop.f32.mrf.mxu2  ;;  %v12412_v49 = vor.u32 %v13434_v22, %v12409_v16  ;;  %v9915_v16 = vadd.f32 %v15840_v15, %v15865_v61 }
 0x3fe   : > { %v7074_v2 = vld [vmem:[#allocation2 + $0x64] sm:$0xf]  ;;  %v6857_v40 = vsel %vm13858_vm2, %v6852_v35, %v6856_v19  ;;  %7864 = vst [vmem:[#allocation3 + $0x1a8] sm:$0xf] %v7580_v20  ;;  %v7591_v14 = vshll.u32 %v7408_v9, 16  ;;  %v7595_v23 = vshrl.u32 %v7408_v9, 16  ;;  %v6867_v51 = vsel %vm13858_vm2, %v6862_v45, %v6866_v34 }
 0x3ff   : > { %v13433_v39 = vld [vmem:[#allocation3 + $0xec] sm:$0xf]  ;;  %v12401_v30 = vld [vmem:[#allocation3 + $0x10c] sm:$0xf0]  ;;  %7040 = vst [vmem:[#allocation3 + $0x2e0] sm:$0xf] %v6857_v40  ;;  %v9784_v38 = vadd.f32 %v9783_v1, %v9695_v12  ;;  %v7588_v50 = vor.u32 %v7587_v29, %v7584_v10  ;;  %v9872_v62 = vpop.f32.mrf.mxu3 }
 0x400   : > { %v13438_v42 = vld [vmem:[#allocation3 + $0x110] sm:$0xf0]  ;;  %7041 = vst [vmem:[#allocation3 + $0x304] sm:$0xf] %v6867_v51  ;;  %v7593_v0 = vrot.slane %v7591_v14, 5  ;;  %v7597_v57 = vrot.slane %v7595_v23, 4  ;;  %v12404_v22 = vor.u32 %v13433_v39, %v12401_v30 }
 0x401   : > { %v13491_v19 = vld [vmem:[#allocation3 + $0x2b8] sm:$0xf0]  ;;  %v7601_v35 = vshll.u32 %v7409_v63, 16  ;;  %v12248_v5 = vrot.slane %v7073_v59, 9  ;;  %v7199_v20 = vrot.slane %v7074_v2, 5  ;;  %v16313_v9 = vadd.f32 %v9872_v62, %v9784_v38  ;;  %v16321_v59 = vpop.f32.mrf.mxu0 }
 0x402   : > { %v12407_v6 = vld [vmem:[#allocation3 + $0xf0] sm:$0xf]  ;;  %10279 = vmatmul.bf16.gmra.mxu0 %v12412_v49  ;;  %v7339_v12 = vld [vmem:[#allocation2 + $0x6c] sm:$0xf]  ;;  %v12615_v45 = vld [vmem:[#allocation3 + $0x298] sm:$0xf]  ;;  %v7598_v10 = vor.u32 %v7597_v57, %v7593_v0  ;;  %v9698_v63 = vadd.f32 %v16301_v33, %v16062_v24  ;;  %v10003_v2 = vpop.f32.mrf.mxu1 }
 0x403   : > { %v7075_v34 = vld [vmem:[#allocation2 + $0x68] sm:$0x1]  ;;  %v7589_v40 = vrot.slane %v7588_v50, 4  ;;  %v7200_v29 = vsel %vm14112_vm5, %v12248_v5, %v7199_v20  ;;  %v7201_v14 = vrot.slane %v7199_v20, 4  ;;  %7371 = vst [vmem:[#allocation3 + $0x210] sm:$0xf] %v7339_v12  ;;  %v12616_v15 = vor.u32 %v13491_v19, %v12615_v45 }
 0x404   : > { %10101 = vmatmul.bf16.gmra.mxu2 %v12404_v22  ;;  %v12408_v61 = vor.u32 %v13438_v42, %v12407_v6  ;;  %7306 = vst [vmem:[#allocation3 + $0x20c] sm:$0xf] %v7200_v29  ;;  %v7410_v23 = vld [vmem:[#allocation2 + $0x6c] sm:$0xf]  ;;  %v16323_v1 = vadd.f32 %v10003_v2, %v9915_v16  ;;  %v6589_v39 = vld [vmem:[#allocation2 + $0x90] sm:$0xf] }
 0x405   : > { %v6590_v30 = vld [vmem:[#allocation2 + $0x94] sm:$0xf]  ;;  %v7594_v49 = vsel %vm13858_vm2, %v7589_v40, %v7593_v0  ;;  %v7603_v51 = vrot.slane %v7601_v35, 5  ;;  %v7202_v38 = vrot.slane %v7075_v34, 5  ;;  %v6591_v50 = vld [vmem:[#allocation2 + $0x98] sm:$0x1]  ;;  %v9786_v19 = vpop.f32.mrf.mxu2 }
 0x406   : > { %v6869_v24 = vshrl.u32 %v6589_v39, 16  ;;  %v6872_v57 = vshll.u32 %v6589_v39, 16  ;;  %v6878_v62 = vshll.u32 %v6590_v30, 16  ;;  %v6882_v5 = vshrl.u32 %v6590_v30, 16  ;;  %7865 = vst [vmem:[#allocation3 + $0x1cc] sm:$0xf] %v7594_v49 }
 0x407   : > { %10190 = vmatmul.bf16.gmra.mxu3 %v12408_v61  ;;  %v7599_v6 = vrot.slane %v7598_v10, 4  ;;  %v7203_v42 = vsel %vm14112_vm5, %v7201_v14, %v7202_v38  ;;  %v7606_v20 = vshrl.u32 %v7410_v23, 16  ;;  %v7609_v16 = vshll.u32 %v7410_v23, 16  ;;  %v7340_v0 = vld [vmem:[#allocation2 + $0x70] sm:$0xf]  ;;  %v9875_v35 = vpop.f32.mrf.mxu3 }
 0x408   : > { %v9787_v22 = vadd.f32 %v9786_v19, %v9698_v63  ;;  %v6871_v12 = vrot.slane %v6869_v24, 4  ;;  %v6874_v45 = vrot.slane %v6872_v57, 5  ;;  %v6880_v34 = vrot.slane %v6878_v62, 5  ;;  %7307 = vst [vmem:[#allocation3 + $0x230] sm:$0xf] %v7203_v42 }
 0x409   : > { %10042 = vmatmul.bf16.gmra.mxu1 %v12616_v15  ;;  %v6884_v40 = vrot.slane %v6882_v5, 4  ;;  %v6888_v29 = vshll.u32 %v6591_v50, 16  ;;  %v7604_v10 = vsel %vm13858_vm2, %v7599_v6, %v7603_v51  ;;  %7372 = vst [vmem:[#allocation3 + $0x234] sm:$0xf] %v7340_v0  ;;  %v7411_v14 = vld [vmem:[#allocation2 + $0x70] sm:$0xf]  ;;  %v9700_v63 = vadd.f32 %v16301_v33, %v16100_v4  ;;  %v16339_v4 = vpop.f32.mrf.mxu0 }
 0x40a   : > { %v16329_v2 = vadd.f32 %v9875_v35, %v9787_v22  ;;  %v6875_v15 = vor.u32 %v6874_v45, %v6871_v12  ;;  %v9917_v61 = vadd.f32 %v15860_v60, %v15899_v26  ;;  %7866 = vst [vmem:[#allocation3 + $0x1f0] sm:$0xf] %v7604_v10  ;;  %v7412_v39 = vld [vmem:[#allocation2 + $0x74] sm:$0x1]  ;;  %v10005_v30 = vpop.f32.mrf.mxu1  ;;  %v12437_v49 = vld [vmem:[#allocation3 + $0x154] sm:$0xf0] }
 0x40b   : > { %v6885_v23 = vor.u32 %v6884_v40, %v6880_v34  ;;  %v12445_v38 = vld [vmem:[#allocation3 + $0x15c] sm:$0xf0]  ;;  %v7608_v24 = vrot.slane %v7606_v20, 4  ;;  %v7611_v57 = vrot.slane %v7609_v16, 5  ;;  %v7615_v62 = vshll.u32 %v7411_v14, 16 }
 0x40c   : > { %v6876_v50 = vrot.slane %v6875_v15, 4  ;;  %v16337_v5 = vadd.f32 %v10005_v30, %v9917_v61  ;;  %v6890_v19 = vrot.slane %v6888_v29, 5  ;;  %v7619_v6 = vshrl.u32 %v7411_v14, 16  ;;  %v7077_v42 = vld [vmem:[#allocation2 + $0x70] sm:$0xf] }
 0x40d   : > { %v6886_v51 = vrot.slane %v6885_v23, 4  ;;  %v13442_v22 = vld [vmem:[#allocation3 + $0x134] sm:$0xf]  ;;  %v7612_v26 = vor.u32 %v7611_v57, %v7608_v24  ;;  %v7617_v12 = vrot.slane %v7615_v62, 5  ;;  %v7625_v45 = vshll.u32 %v7412_v39, 16  ;;  %v9788_v20 = vpop.f32.mrf.mxu2 }
 0x40e   : > { %v6881_v60 = vsel %vm13858_vm2, %v6876_v50, %v6880_v34  ;;  %v7076_v0 = vld [vmem:[#allocation2 + $0x6c] sm:$0xe]  ;;  %v7341_v35 = vld [vmem:[#allocation2 + $0x78] sm:$0xf]  ;;  %v13443_v16 = vld [vmem:[#allocation3 + $0x13c] sm:$0xf]  ;;  %v9789_v15 = vadd.f32 %v9788_v20, %v9700_v63  ;;  %v12440_v34 = vor.u32 %v13442_v22, %v12437_v49 }
 0x40f   : > { %v6891_v40 = vsel %vm13858_vm2, %v6886_v51, %v6890_v19  ;;  %7042 = vst [vmem:[#allocation3 + $0x328] sm:$0xf] %v6881_v60  ;;  %v7621_v29 = vrot.slane %v7619_v6, 4  ;;  %v12448_v10 = vor.u32 %v13443_v16, %v12445_v38  ;;  %v7613_v14 = vrot.slane %v7612_v26, 4  ;;  %v7078_v61 = vld [vmem:[#allocation2 + $0x74] sm:$0x1]  ;;  %v9877_v30 = vpop.f32.mrf.mxu3 }
 0x410   : > { %7043 = vst [vmem:[#allocation3 + $0x34c] sm:$0xf] %v6891_v40  ;;  %v7206_v23 = vrot.slane %v7077_v42, 5  ;;  %v12443_v50 = vld [vmem:[#allocation3 + $0x138] sm:$0xf]  ;;  %v12249_v57 = vrot.slane %v7076_v0, 9  ;;  %v16345_v62 = vadd.f32 %v9877_v30, %v9789_v15  ;;  %v9920_v51 = vadd.f32 %v15890_v56, %v15921_v7 }
 0x411   : > { %v13447_v24 = vld [vmem:[#allocation3 + $0x158] sm:$0xf0]  ;;  %v7622_v39 = vor.u32 %v7621_v29, %v7617_v12  ;;  %7373 = vst [vmem:[#allocation3 + $0x258] sm:$0xf] %v7341_v35  ;;  %v13500_v19 = vld [vmem:[#allocation3 + $0x300] sm:$0xf0]  ;;  %v7618_v63 = vsel %vm13858_vm2, %v7613_v14, %v7617_v12  ;;  %v9703_v26 = vadd.f32 %v16301_v33, %v16152_v3 }
 0x412   : > { %10284 = vmatmul.bf16.gmra.mxu0 %v12448_v10  ;;  %v7627_v38 = vrot.slane %v7625_v45, 5  ;;  %v7413_v6 = vld [vmem:[#allocation2 + $0x78] sm:$0xf]  ;;  %7867 = vst [vmem:[#allocation3 + $0x214] sm:$0xf] %v7618_v63  ;;  %v7207_v49 = vsel %vm14112_vm5, %v12249_v57, %v7206_v23  ;;  %v7208_v22 = vrot.slane %v7206_v23, 4  ;;  %v10008_v0 = vpop.f32.mrf.mxu1  ;;  %v12444_v56 = vor.u32 %v13447_v24, %v12443_v50 }
 0x413   : > { %v7623_v42 = vrot.slane %v7622_v39, 4  ;;  %v7209_v60 = vrot.slane %v7078_v61, 5  ;;  %v12651_v35 = vld [vmem:[#allocation3 + $0x2e0] sm:$0xf]  ;;  %7308 = vst [vmem:[#allocation3 + $0x254] sm:$0xf] %v7207_v49  ;;  %v16355_v20 = vadd.f32 %v10008_v0, %v9920_v51  ;;  %v16364_v39 = vpop.f32.mrf.mxu0 }
 0x414   : > { %10106 = vmatmul.bf16.gmra.mxu2 %v12440_v34  ;;  %v7630_v7 = vshrl.u32 %v7413_v6, 16  ;;  %v12652_v12 = vor.u32 %v13500_v19, %v12651_v35  ;;  %v6592_v45 = vld [vmem:[#allocation2 + $0x9c] sm:$0xf]  ;;  %v6593_v16 = vld [vmem:[#allocation2 + $0xa0] sm:$0xf]  ;;  %v13613_v34 = vld [vmem:[%s17019_s3 + $0x208] sm:$0xff] }
 0x415   : > { %v6594_v40 = vld [vmem:[#allocation2 + $0xa4] sm:$0x1]  ;;  %v7628_v29 = vsel %vm13858_vm2, %v7623_v42, %v7627_v38  ;;  %v7210_v15 = vsel %vm14112_vm5, %v7208_v22, %v7209_v60  ;;  %v6893_v3 = vshrl.u32 %v6592_v45, 16  ;;  %v6896_v10 = vshll.u32 %v6592_v45, 16  ;;  %v9791_v23 = vpop.f32.mrf.mxu2  ;;  %v7079_v24 = vld [vmem:[#allocation2 + $0x78] sm:$0xe]  ;;  %10351 = vmatpush.bf16.msra.mxu1 %v13613_v34 }
 0x416   : > { %v6902_v14 = vshll.u32 %v6593_v16, 16  ;;  %v6906_v61 = vshrl.u32 %v6593_v16, 16  ;;  %v6912_v30 = vshll.u32 %v6594_v40, 16  ;;  %7868 = vst [vmem:[#allocation3 + $0x238] sm:$0xf] %v7628_v29  ;;  %v7633_v50 = vshll.u32 %v7413_v6, 16 }
 0x417   : > { %10195 = vmatmul.bf16.gmra.mxu3 %v12444_v56  ;;  %v9792_v57 = vadd.f32 %v9791_v23, %v9703_v26  ;;  %v6895_v51 = vrot.slane %v6893_v3, 4  ;;  %v6898_v19 = vrot.slane %v6896_v10, 5  ;;  %7309 = vst [vmem:[#allocation3 + $0x278] sm:$0xf] %v7210_v15  ;;  %v7342_v63 = vld [vmem:[#allocation2 + $0x7c] sm:$0xf]  ;;  %v9880_v38 = vpop.f32.mrf.mxu3  ;;  %v9705_v60 = vadd.f32 %v16301_v33, %v16176_v47 }
 0x418   : > { %v6904_v42 = vrot.slane %v6902_v14, 5  ;;  %v6908_v49 = vrot.slane %v6906_v61, 4  ;;  %7374 = vst [vmem:[#allocation3 + $0x27c] sm:$0xf] %v7342_v63  ;;  %v7632_v22 = vrot.slane %v7630_v7, 4  ;;  %v9922_v26 = vadd.f32 %v15916_v28, %v15945_v55 }
 0x419   : > { %10047 = vmatmul.bf16.gmra.mxu1 %v12652_v12  ;;  %v16368_v0 = vadd.f32 %v9880_v38, %v9792_v57  ;;  %v6899_v6 = vor.u32 %v6898_v19, %v6895_v51  ;;  %v7414_v35 = vld [vmem:[#allocation2 + $0x7c] sm:$0xf]  ;;  %v12473_v56 = vld [vmem:[#allocation3 + $0x19c] sm:$0xf0]  ;;  %v7415_v45 = vld [vmem:[#allocation2 + $0x80] sm:$0x1] }
 0x41a   : > { %v6909_v12 = vor.u32 %v6908_v49, %v6904_v42  ;;  %v7635_v16 = vrot.slane %v7633_v50, 5  ;;  %v7639_v40 = vshll.u32 %v7414_v35, 16  ;;  %v10010_v29 = vpop.f32.mrf.mxu1  ;;  %v6914_v3 = vrot.slane %v6912_v30, 5  ;;  %v7080_v7 = vld [vmem:[#allocation2 + $0x7c] sm:$0xf] }
 0x41b   : > { %17085 = vst [vmem:[#allocation23_spill] sm:$0xff] %v16368_v0  ;;  %v6900_v15 = vrot.slane %v6899_v6, 4  ;;  %v7643_v10 = vshrl.u32 %v7414_v35, 16  ;;  %v12250_v14 = vrot.slane %v7079_v24, 9  ;;  %v16372_v61 = vadd.f32 %v10010_v29, %v9922_v26  ;;  %v13451_v47 = vld [vmem:[#allocation3 + $0x17c] sm:$0xf] }
 0x41c   : > { %v12481_v23 = vld [vmem:[#allocation3 + $0x1a4] sm:$0xf0]  ;;  %v6910_v34 = vrot.slane %v6909_v12, 4  ;;  %v7636_v57 = vor.u32 %v7635_v16, %v7632_v22  ;;  %v7641_v51 = vrot.slane %v7639_v40, 5  ;;  %v16374_v19 = vld [vmem:[#allocation2 + $0x1c] sm:$0xf]  ;;  %v12476_v49 = vor.u32 %v13451_v47, %v12473_v56  ;;  %v16384_v47 = vpop.f32.mrf.mxu0 }
 0x41d   : > { %v6905_v28 = vsel %vm13858_vm2, %v6900_v15, %v6904_v42  ;;  %v7645_v55 = vrot.slane %v7643_v10, 4  ;;  %v7649_v50 = vshll.u32 %v7415_v45, 16  ;;  %v7081_v63 = vld [vmem:[#allocation2 + $0x80] sm:$0x1]  ;;  %v7213_v38 = vrot.slane %v7080_v7, 5  ;;  %v9793_v30 = vpop.f32.mrf.mxu2 }
 0x41e   : > { %v13456_v6 = vld [vmem:[#allocation3 + $0x1a0] sm:$0xf0]  ;;  %v6915_v35 = vsel %vm13858_vm2, %v6910_v34, %v6914_v3  ;;  %7044 = vst [vmem:[#allocation3 + $0x370] sm:$0xf] %v6905_v28  ;;  %v7637_v26 = vrot.slane %v7636_v57, 4  ;;  %v9794_v22 = vadd.f32 %v9793_v30, %v9705_v60  ;;  %v7216_v7 = vrot.slane %v7081_v63, 5 }
 0x41f   : > { %v13452_v24 = vld [vmem:[#allocation3 + $0x184] sm:$0xf]  ;;  %v13509_v12 = vld [vmem:[#allocation3 + $0x348] sm:$0xf0]  ;;  %7045 = vst [vmem:[#allocation3 + $0x394] sm:$0xf] %v6915_v35  ;;  %v7646_v40 = vor.u32 %v7645_v55, %v7641_v51  ;;  %v7214_v42 = vsel %vm14112_vm5, %v12250_v14, %v7213_v38  ;;  %v9882_v15 = vpop.f32.mrf.mxu3 }
 0x420   : > { %v12484_v16 = vor.u32 %v13452_v24, %v12481_v23  ;;  %v7343_v45 = vld [vmem:[#allocation2 + $0x84] sm:$0xf]  ;;  %v7642_v56 = vsel %vm13858_vm2, %v7637_v26, %v7641_v51  ;;  %v7215_v10 = vrot.slane %v7213_v38, 4  ;;  %7310 = vst [vmem:[#allocation3 + $0x29c] sm:$0xf] %v7214_v42  ;;  %v16386_v60 = vadd.f32 %v9882_v15, %v9794_v22  ;;  %v17087_v28 = vld [vmem:[#allocation5_spill] sm:$0xff] }
 0x421   : > { %v7416_v29 = vld [vmem:[#allocation2 + $0x84] sm:$0xf]  ;;  %v7647_v23 = vrot.slane %v7646_v40, 4  ;;  %v7651_v34 = vrot.slane %v7649_v50, 5  ;;  %7869 = vst [vmem:[#allocation3 + $0x25c] sm:$0xf] %v7642_v56  ;;  %v9925_v55 = vadd.f32 %v17087_v28, %v15962_v21  ;;  %v9708_v22 = vadd.f32 %v16301_v33, %v16192_v8 }
 0x422   : > { %v7654_v3 = vshrl.u32 %v7416_v29, 16  ;;  %17086 = vst [vmem:[#allocation24_spill] sm:$0xff] %v16386_v60  ;;  %10289 = vmatmul.bf16.gmra.mxu0 %v12484_v16  ;;  %v7657_v57 = vshll.u32 %v7416_v29, 16  ;;  %v17023_v14 = vrot.slane %v16374_v19, 5  ;;  %v12479_v30 = vld [vmem:[#allocation3 + $0x180] sm:$0xf]  ;;  %v7217_v51 = vsel %vm14112_vm5, %v7215_v10, %v7216_v7 }
 0x423   : > { %7375 = vst [vmem:[#allocation3 + $0x2a0] sm:$0xf] %v7343_v45  ;;  %v10013_v63 = vpop.f32.mrf.mxu1  ;;  %v12687_v38 = vld [vmem:[#allocation3 + $0x328] sm:$0xf]  ;;  %v12480_v24 = vor.u32 %v13456_v6, %v12479_v30  ;;  %v7652_v35 = vsel %vm13858_vm2, %v7647_v23, %v7651_v34  ;;  %v6595_v40 = vld [vmem:[#allocation2 + $0xa8] sm:$0xf] }
 0x424   : > { %10111 = vmatmul.bf16.gmra.mxu2 %v12476_v49  ;;  %7311 = vst [vmem:[#allocation3 + $0x2c0] sm:$0xf] %v7217_v51  ;;  %v7656_v50 = vrot.slane %v7654_v3, 4  ;;  %v7659_v26 = vrot.slane %v7657_v57, 5  ;;  %v16397_v16 = vadd.f32 %v10013_v63, %v9925_v55  ;;  %v12688_v21 = vor.u32 %v13509_v12, %v12687_v38  ;;  %v6596_v42 = vld [vmem:[#allocation2 + $0xac] sm:$0xf] }
 0x425   : > { %v6597_v29 = vld [vmem:[#allocation2 + $0xb0] sm:$0x1]  ;;  %v16399_v45 = vld [vmem:[#allocation2 + $0x18] sm:$0xe]  ;;  %v6917_v49 = vshrl.u32 %v6595_v40, 16  ;;  %v6920_v6 = vshll.u32 %v6595_v40, 16  ;;  %v9796_v10 = vpop.f32.mrf.mxu2  ;;  %v9710_v63 = vadd.f32 %v16301_v33, %v16200_v11 }
 0x426   : > { %v6926_v15 = vshll.u32 %v6596_v42, 16  ;;  %v6930_v56 = vshrl.u32 %v6596_v42, 16  ;;  %v6936_v7 = vshll.u32 %v6597_v29, 16  ;;  %7870 = vst [vmem:[#allocation3 + $0x280] sm:$0xf] %v7652_v35  ;;  %v9797_v3 = vadd.f32 %v9796_v10, %v9708_v22 }
 0x427   : > { %10200 = vmatmul.bf16.gmra.mxu3 %v12480_v24  ;;  %v6919_v23 = vrot.slane %v6917_v49, 4  ;;  %v6922_v8 = vrot.slane %v6920_v6, 5  ;;  %v7344_v34 = vld [vmem:[#allocation2 + $0x88] sm:$0xf]  ;;  %v7660_v57 = vor.u32 %v7659_v26, %v7656_v50  ;;  %v9885_v28 = vpop.f32.mrf.mxu3  ;;  %v16404_v51 = vrot.slane %v17023_v14, 4  ;;  %v17090_v50 = vld [vmem:[#allocation6_spill] sm:$0xff] }
 0x428   : > { %v6928_v55 = vrot.slane %v6926_v15, 5  ;;  %v6932_v30 = vrot.slane %v6930_v56, 4  ;;  %v16408_v38 = vadd.f32 %v9885_v28, %v9797_v3  ;;  %v12517_v24 = vld [vmem:[#allocation3 + $0x1ec] sm:$0xf0]  ;;  %7376 = vst [vmem:[#allocation3 + $0x2c4] sm:$0xf] %v7344_v34  ;;  %v16412_v15 = vpop.f32.mrf.mxu0 }
 0x429   : > { %10052 = vmatmul.bf16.gmra.mxu1 %v12688_v21  ;;  %v6923_v35 = vor.u32 %v6922_v8, %v6919_v23  ;;  %v7417_v22 = vld [vmem:[#allocation2 + $0x88] sm:$0xf]  ;;  %v17089_v21 = vld [vmem:[#allocation8_spill] sm:$0xff]  ;;  %v7418_v42 = vld [vmem:[#allocation2 + $0x8c] sm:$0x1]  ;;  %v6938_v12 = vrot.slane %v6936_v7, 5 }
 0x42a   : > { %17088 = vst [vmem:[#allocation5_spill] sm:$0xff] %v16408_v38  ;;  %v9927_v26 = vadd.f32 %v17090_v50, %v17089_v21  ;;  %v6933_v40 = vor.u32 %v6932_v30, %v6928_v55  ;;  %v7663_v29 = vshll.u32 %v7417_v22, 16  ;;  %v7667_v49 = vshrl.u32 %v7417_v22, 16  ;;  %v7082_v6 = vld [vmem:[#allocation2 + $0x84] sm:$0xe] }
 0x42b   : > { %17091 = vst [vmem:[#allocation8_spill] sm:$0xff] %v16412_v15  ;;  %v10015_v56 = vpop.f32.mrf.mxu1  ;;  %v6924_v10 = vrot.slane %v6923_v35, 4  ;;  %v7661_v11 = vrot.slane %v7660_v57, 4  ;;  %v7673_v3 = vshll.u32 %v7418_v42, 16  ;;  %v7083_v28 = vld [vmem:[#allocation2 + $0x88] sm:$0xf] }
 0x42c   : > { %v16414_v14 = vld [vmem:[#allocation2 + $0x20] sm:$0x1]  ;;  %v16416_v23 = vadd.f32 %v10015_v56, %v9927_v26  ;;  %v13461_v34 = vld [vmem:[#allocation3 + $0x1cc] sm:$0xf]  ;;  %v6934_v21 = vrot.slane %v6933_v40, 4  ;;  %v7665_v30 = vrot.slane %v7663_v29, 5 }
 0x42d   : > { %v12509_v8 = vld [vmem:[#allocation3 + $0x1e4] sm:$0xf0]  ;;  %v7669_v50 = vrot.slane %v7667_v49, 4  ;;  %v13465_v38 = vld [vmem:[#allocation3 + $0x1e8] sm:$0xf0]  ;;  %v12520_v22 = vor.u32 %v13461_v34, %v12517_v24  ;;  %v6929_v60 = vsel %vm13858_vm2, %v6924_v10, %v6928_v55  ;;  %v12251_v35 = vrot.slane %v7082_v6, 9  ;;  %v9798_v57 = vpop.f32.mrf.mxu2 }
 0x42e   : > { %v7084_v15 = vld [vmem:[#allocation2 + $0x8c] sm:$0x1]  ;;  %v7220_v7 = vrot.slane %v7083_v28, 5  ;;  %v13460_v42 = vld [vmem:[#allocation3 + $0x1c4] sm:$0xf]  ;;  %v6939_v0 = vsel %vm13858_vm2, %v6934_v21, %v6938_v12  ;;  %v7666_v26 = vsel %vm13858_vm2, %v7661_v11, %v7665_v30  ;;  %v7675_v29 = vrot.slane %v7673_v3, 5 }
 0x42f   : > { %7046 = vst [vmem:[#allocation3 + $0x3b8] sm:$0xf] %v6929_v60  ;;  %v7670_v40 = vor.u32 %v7669_v50, %v7665_v30  ;;  %v7419_v49 = vld [vmem:[#allocation2 + $0x90] sm:$0xf]  ;;  %v9799_v56 = vadd.f32 %v9798_v57, %v9710_v63  ;;  %v16426_v10 = vld [vmem:[#allocation2 + $0x24] sm:$0xe]  ;;  %v9887_v28 = vpop.f32.mrf.mxu3  ;;  %v12512_v3 = vor.u32 %v13460_v42, %v12509_v8 }
 0x430   : > { %7047 = vst [vmem:[#allocation3 + $0x3dc] sm:$0xf] %v6939_v0  ;;  %v7221_v55 = vsel %vm14112_vm5, %v12251_v35, %v7220_v7  ;;  %v7222_v24 = vrot.slane %v7220_v7, 4  ;;  %v7678_v6 = vshrl.u32 %v7419_v49, 16  ;;  %v7681_v12 = vshll.u32 %v7419_v49, 16  ;;  %v17092_v50 = vld [vmem:[#allocation7_spill] sm:$0xff] }
 0x431   : > { %v7671_v34 = vrot.slane %v7670_v40, 4  ;;  %7871 = vst [vmem:[#allocation3 + $0x2a4] sm:$0xf] %v7666_v26  ;;  %v16428_v60 = vld [vmem:[#allocation2 + $0x28] sm:$0xf]  ;;  %v16430_v21 = vadd.f32 %v9887_v28, %v9799_v56  ;;  %v7223_v0 = vrot.slane %v7084_v15, 5  ;;  %v9930_v35 = vadd.f32 %v17092_v50, %v16031_v13 }
 0x432   : > { %v13518_v11 = vld [vmem:[#allocation3 + $0x390] sm:$0xf0]  ;;  %v12515_v30 = vld [vmem:[#allocation3 + $0x1c8] sm:$0xf]  ;;  %10294 = vmatmul.bf16.gmra.mxu0 %v12520_v22  ;;  %v7986_v63 = vrot.slane %v16414_v14, 5  ;;  %v12258_v40 = vrot.slane %v16426_v10, 9  ;;  %v9713_v13 = vadd.f32 %v16301_v33, %v16220_v17  ;;  %v16445_v10 = vpop.f32.mrf.mxu0 }
 0x433   : > { %v12723_v7 = vld [vmem:[#allocation3 + $0x370] sm:$0xf]  ;;  %v12516_v57 = vor.u32 %v13465_v38, %v12515_v30  ;;  %v7676_v26 = vsel %vm13858_vm2, %v7671_v34, %v7675_v29  ;;  %7312 = vst [vmem:[#allocation3 + $0x2e4] sm:$0xf] %v7221_v55  ;;  %v7224_v8 = vsel %vm14112_vm5, %v7222_v24, %v7223_v0  ;;  %v7680_v15 = vrot.slane %v7678_v6, 4  ;;  %v13612_v17 = vld [vmem:[%s17019_s3 + $0x200] sm:$0xff] }
 0x434   : > { %10116 = vmatmul.bf16.gmra.mxu2 %v12512_v3  ;;  %7872 = vst [vmem:[#allocation3 + $0x2c8] sm:$0xf] %v7676_v26  ;;  %v7683_v22 = vrot.slane %v7681_v12, 5  ;;  %v7990_v14 = vrot.slane %v16428_v60, 5  ;;  %v12724_v42 = vor.u32 %v13518_v11, %v12723_v7  ;;  %v6598_v29 = vld [vmem:[#allocation2 + $0xb4] sm:$0xf]  ;;  %10352 = vmatpush.bf16.msra.mxu1 %v13612_v17 }
 0x435   : > { %v6599_v56 = vld [vmem:[#allocation2 + $0xb8] sm:$0xf]  ;;  %v6600_v55 = vld [vmem:[#allocation2 + $0xbc] sm:$0x1]  ;;  %v6941_v28 = vshrl.u32 %v6598_v29, 16  ;;  %v6944_v34 = vshll.u32 %v6598_v29, 16 }
 0x436   : > { %v10018_v49 = vpop.f32.mrf.mxu1  ;;  %v6950_v3 = vshll.u32 %v6599_v56, 16  ;;  %v6954_v24 = vshrl.u32 %v6599_v56, 16  ;;  %v7345_v6 = vld [vmem:[#allocation2 + $0x90] sm:$0xf]  ;;  %v6960_v60 = vshll.u32 %v6600_v55, 16  ;;  %v17094_v11 = vrot.slane %v16374_v19, 5 }
 0x437   : > { %v16443_v38 = vadd.f32 %v10018_v49, %v9930_v35  ;;  %10205 = vmatmul.bf16.gmra.mxu3 %v12516_v57  ;;  %v9801_v12 = vpop.f32.mrf.mxu2  ;;  %7313 = vst [vmem:[#allocation3 + $0x308] sm:$0xf] %v7224_v8  ;;  %v17095_v30 = vrot.slane %v16399_v45, 9  ;;  %v7890_v50 = vld [vmem:[#allocation2 + $0x2c] sm:$0x1]  ;;  %v6943_v7 = vrot.slane %v6941_v28, 4  ;;  %v7684_v49 = vor.u32 %v7683_v22, %v7680_v15 }
 0x438   : > { %v9802_v35 = vadd.f32 %v9801_v12, %v9713_v13  ;;  %v6946_v57 = vrot.slane %v6944_v34, 5  ;;  %v7346_v26 = vld [vmem:[#allocation2 + $0x94] sm:$0xf]  ;;  %v17096_v29 = vld [vmem:[#allocation9_spill] sm:$0xff]  ;;  %v6952_v55 = vrot.slane %v6950_v3, 5  ;;  %v7987_v19 = vsel %vm14112_vm5, %v16404_v51, %v7986_v63 }
 0x439   : > { %17093 = vst [vmem:[#allocation6_spill] sm:$0xff] %v16443_v38  ;;  %10057 = vmatmul.bf16.gmra.mxu1 %v12724_v42  ;;  %v7984_v0 = vsel %vm14112_vm5, %v17095_v30, %v17094_v11  ;;  %v9932_v56 = vadd.f32 %v17096_v29, %v16058_v37  ;;  %v6956_v38 = vrot.slane %v6954_v24, 4  ;;  %v7420_v13 = vld [vmem:[#allocation2 + $0x94] sm:$0xf]  ;;  %v7991_v15 = vsel %vm14112_vm5, %v12258_v40, %v7990_v14  ;;  %v12553_v28 = vld [vmem:[#allocation3 + $0x234] sm:$0xf0] }
 0x43a   : > { %v9890_v42 = vpop.f32.mrf.mxu3  ;;  %7377 = vst [vmem:[#allocation3 + $0x2e8] sm:$0xf] %v7345_v6  ;;  %v6947_v8 = vor.u32 %v6946_v57, %v6943_v7  ;;  %v7993_v22 = vrot.slane %v7890_v50, 5  ;;  %v6962_v37 = vrot.slane %v6960_v60, 5  ;;  %v7421_v3 = vld [vmem:[#allocation2 + $0x98] sm:$0x1]  ;;  %v9715_v40 = vadd.f32 %v16301_v33, %v16231_v48 }
 0x43b   : > { %v16461_v45 = vadd.f32 %v9890_v42, %v9802_v35  ;;  %7378 = vst [vmem:[#allocation3 + $0x30c] sm:$0xf] %v7346_v26  ;;  %v6957_v34 = vor.u32 %v6956_v38, %v6952_v55  ;;  %v7687_v24 = vshll.u32 %v7420_v13, 16  ;;  %v7691_v12 = vshrl.u32 %v7420_v13, 16  ;;  %v12545_v38 = vld [vmem:[#allocation3 + $0x22c] sm:$0xf0] }
 0x43c   : > { %v6948_v17 = vrot.slane %v6947_v8, 4  ;;  %v7685_v11 = vrot.slane %v7684_v49, 4  ;;  %v7697_v30 = vshll.u32 %v7421_v3, 16  ;;  %8125 = vst [vmem:[#allocation3 + $0x20] sm:$0xf] %v7984_v0  ;;  %v7992_v51 = vrot.slane %v7990_v14, 4 }
 0x43d   : > { %v6958_v35 = vrot.slane %v6957_v34, 4  ;;  %v7689_v7 = vrot.slane %v7687_v24, 5  ;;  %v7693_v57 = vrot.slane %v7691_v12, 4  ;;  %8126 = vst [vmem:[#allocation3 + $0x44] sm:$0xf] %v7987_v19  ;;  %v16477_v19 = vpop.f32.mrf.mxu0 }
 0x43e   : > { %v10020_v6 = vpop.f32.mrf.mxu1  ;;  %v6953_v60 = vsel %vm13858_vm2, %v6948_v17, %v6952_v55  ;;  %8127 = vst [vmem:[#allocation3 + $0x68] sm:$0xf] %v7991_v15  ;;  %v13469_v26 = vld [vmem:[#allocation3 + $0x20c] sm:$0xf]  ;;  %v13474_v49 = vld [vmem:[#allocation3 + $0x230] sm:$0xf0]  ;;  %v7994_v48 = vsel %vm14112_vm5, %v7992_v51, %v7993_v22 }
 0x43f   : > { %v16465_v63 = vadd.f32 %v10020_v6, %v9932_v56  ;;  %v9803_v50 = vpop.f32.mrf.mxu2  ;;  %v13470_v42 = vld [vmem:[#allocation3 + $0x214] sm:$0xf]  ;;  %v6963_v14 = vsel %vm13858_vm2, %v6958_v35, %v6962_v37  ;;  %7048 = vst [vmem:[#allocation3 + $0x400] sm:$0xf] %v6953_v60  ;;  %v7690_v0 = vsel %vm13858_vm2, %v7685_v11, %v7689_v7  ;;  %v7694_v29 = vor.u32 %v7693_v57, %v7689_v7  ;;  %v7892_v56 = vld [vmem:[#allocation2 + $0x34] sm:$0xf] }
 0x440   : > { %v9804_v55 = vadd.f32 %v9803_v50, %v9715_v40  ;;  %v12556_v8 = vor.u32 %v13470_v42, %v12553_v28  ;;  %7049 = vst [vmem:[#allocation3 + $0x424] sm:$0xf] %v6963_v14  ;;  %v7891_v13 = vld [vmem:[#allocation2 + $0x30] sm:$0xe]  ;;  %v7997_v15 = vrot.slane %v7892_v56, 5  ;;  %v7699_v24 = vrot.slane %v7697_v30, 5 }
 0x441   : > { %v7695_v3 = vrot.slane %v7694_v29, 4  ;;  %7873 = vst [vmem:[#allocation3 + $0x2ec] sm:$0xf] %v7690_v0  ;;  %v7893_v37 = vld [vmem:[#allocation2 + $0x38] sm:$0x1]  ;;  %v12548_v17 = vor.u32 %v13469_v26, %v12545_v38  ;;  %v17097_v22 = vld [vmem:[#allocation10_spill] sm:$0xff]  ;;  %v9718_v38 = vadd.f32 %v16301_v33, %v16249_v27 }
 0x442   : > { %v9892_v34 = vpop.f32.mrf.mxu3  ;;  %v13527_v6 = vld [vmem:[#allocation3 + $0x3d8] sm:$0xf0]  ;;  %10299 = vmatmul.bf16.gmra.mxu0 %v12556_v8  ;;  %8128 = vst [vmem:[#allocation3 + $0x8c] sm:$0xf] %v7994_v48  ;;  %v9935_v11 = vadd.f32 %v17097_v22, %v16093_v18  ;;  %v12551_v51 = vld [vmem:[#allocation3 + $0x210] sm:$0xf] }
 0x443   : > { %v16479_v12 = vadd.f32 %v9892_v34, %v9804_v55  ;;  %v7700_v28 = vsel %vm13858_vm2, %v7695_v3, %v7699_v24  ;;  %v12259_v35 = vrot.slane %v7891_v13, 9  ;;  %v7999_v7 = vrot.slane %v7997_v15, 4  ;;  %v12759_v40 = vld [vmem:[#allocation3 + $0x3b8] sm:$0xf]  ;;  %v6601_v42 = vld [vmem:[#allocation2 + $0xc0] sm:$0xf] }
 0x444   : > { %10121 = vmatmul.bf16.gmra.mxu2 %v12548_v17  ;;  %v12552_v30 = vor.u32 %v13474_v49, %v12551_v51  ;;  %7874 = vst [vmem:[#allocation3 + $0x310] sm:$0xf] %v7700_v28  ;;  %v8000_v60 = vrot.slane %v7893_v37, 5  ;;  %v12760_v26 = vor.u32 %v13527_v6, %v12759_v40  ;;  %v6602_v18 = vld [vmem:[#allocation2 + $0xc4] sm:$0xf]  ;;  %v6965_v29 = vshrl.u32 %v6601_v42, 16 }
 0x445   : > { %v6603_v14 = vld [vmem:[#allocation2 + $0xc8] sm:$0x1]  ;;  %v7998_v0 = vsel %vm14112_vm5, %v12259_v35, %v7997_v15  ;;  %v6968_v48 = vshll.u32 %v6601_v42, 16  ;;  %v6974_v56 = vshll.u32 %v6602_v18, 16  ;;  %v6978_v55 = vshrl.u32 %v6602_v18, 16  ;;  %v16493_v15 = vpop.f32.mrf.mxu0  ;;  %v17098_v35 = vld [vmem:[#allocation12_spill] sm:$0xff] }
 0x446   : > { %v10023_v57 = vpop.f32.mrf.mxu1  ;;  %v8001_v8 = vsel %vm14112_vm5, %v7999_v7, %v8000_v60  ;;  %v7894_v27 = vld [vmem:[#allocation2 + $0x3c] sm:$0xe]  ;;  %v6967_v34 = vrot.slane %v6965_v29, 4  ;;  %v6984_v24 = vshll.u32 %v6603_v14, 16  ;;  %8129 = vst [vmem:[#allocation3 + $0xb0] sm:$0xf] %v7998_v0  ;;  %v9937_v7 = vadd.f32 %v17098_v35, %v16143_v58 }
 0x447   : > { %v16487_v50 = vadd.f32 %v10023_v57, %v9935_v11  ;;  %10210 = vmatmul.bf16.gmra.mxu3 %v12552_v30  ;;  %v9806_v49 = vpop.f32.mrf.mxu2  ;;  %v6970_v3 = vrot.slane %v6968_v48, 5  ;;  %v6976_v6 = vrot.slane %v6974_v56, 5  ;;  %v6980_v17 = vrot.slane %v6978_v55, 4  ;;  %8130 = vst [vmem:[#allocation3 + $0xd4] sm:$0xf] %v8001_v8 }
 0x448   : > { %v9807_v13 = vadd.f32 %v9806_v49, %v9718_v38  ;;  %v7895_v51 = vld [vmem:[#allocation2 + $0x40] sm:$0xf]  ;;  %v7896_v28 = vld [vmem:[#allocation2 + $0x44] sm:$0x1]  ;;  %v12260_v40 = vrot.slane %v7894_v27, 9  ;;  %v9720_v56 = vadd.f32 %v16301_v33, %v16261_v36 }
 0x449   : > { %10062 = vmatmul.bf16.gmra.mxu1 %v12760_v26  ;;  %v6971_v11 = vor.u32 %v6970_v3, %v6967_v34  ;;  %v6981_v57 = vor.u32 %v6980_v17, %v6976_v6  ;;  %v8004_v30 = vrot.slane %v7895_v51, 5  ;;  %v6986_v26 = vrot.slane %v6984_v24, 5  ;;  %v12589_v14 = vld [vmem:[#allocation3 + $0x27c] sm:$0xf0]  ;;  %v12581_v49 = vld [vmem:[#allocation3 + $0x274] sm:$0xf0] }
 0x44a   : > { %v9895_v37 = vpop.f32.mrf.mxu3  ;;  %v8007_v42 = vrot.slane %v7896_v28, 5  ;;  %v13479_v8 = vld [vmem:[#allocation3 + $0x25c] sm:$0xf]  ;;  %v12587_v28 = vld [vmem:[#allocation3 + $0x258] sm:$0xf] }
 0x44b   : > { %v16495_v22 = vadd.f32 %v9895_v37, %v9807_v13  ;;  %v6972_v38 = vrot.slane %v6971_v11, 4  ;;  %v6982_v0 = vrot.slane %v6981_v57, 4  ;;  %v8005_v29 = vsel %vm14112_vm5, %v12260_v40, %v8004_v30  ;;  %v13478_v37 = vld [vmem:[#allocation3 + $0x254] sm:$0xf]  ;;  %v13483_v36 = vld [vmem:[#allocation3 + $0x278] sm:$0xf0] }
 0x44c   : > { %v8006_v48 = vrot.slane %v8004_v30, 4  ;;  %8131 = vst [vmem:[#allocation3 + $0xf8] sm:$0xf] %v8005_v29  ;;  %v12592_v3 = vor.u32 %v13479_v8, %v12589_v14  ;;  %v12584_v17 = vor.u32 %v13478_v37, %v12581_v49  ;;  %v17099_v11 = vld [vmem:[#allocation13_spill] sm:$0xff]  ;;  %v12588_v40 = vor.u32 %v13483_v36, %v12587_v28  ;;  %v7898_v14 = vld [vmem:[#allocation2 + $0x4c] sm:$0xf] }
 0x44d   : > { %v6977_v58 = vsel %vm13858_vm2, %v6972_v38, %v6976_v6  ;;  %v6987_v27 = vsel %vm13858_vm2, %v6982_v0, %v6986_v26  ;;  %v13536_v6 = vld [vmem:[#allocation3 + $0x420] sm:$0xf0]  ;;  %v9940_v51 = vadd.f32 %v17099_v11, %v16174_v46  ;;  %v16515_v35 = vpop.f32.mrf.mxu0  ;;  %v12795_v57 = vld [vmem:[#allocation3 + $0x400] sm:$0xf]  ;;  %v7897_v38 = vld [vmem:[#allocation2 + $0x48] sm:$0xe] }
 0x44e   : > { %v10025_v60 = vpop.f32.mrf.mxu1  ;;  %7050 = vst [vmem:[#allocation3 + $0x448] sm:$0xf] %v6977_v58  ;;  %v8008_v13 = vsel %vm14112_vm5, %v8006_v48, %v8007_v42  ;;  %v7899_v0 = vld [vmem:[#allocation2 + $0x50] sm:$0x1]  ;;  %v12261_v46 = vrot.slane %v7897_v38, 9  ;;  %v8011_v48 = vrot.slane %v7898_v14, 5 }
 0x44f   : > { %v16499_v18 = vadd.f32 %v10025_v60, %v9937_v7  ;;  %v9808_v55 = vpop.f32.mrf.mxu2  ;;  %7051 = vst [vmem:[#allocation3 + $0x46c] sm:$0xf] %v6987_v27  ;;  %v12796_v60 = vor.u32 %v13536_v6, %v12795_v57  ;;  %v17100_v58 = vld [vmem:[#allocation16_spill] sm:$0xff]  ;;  %v12617_v6 = vld [vmem:[#allocation3 + $0x2bc] sm:$0xf0] }
 0x450   : > { %v9809_v34 = vadd.f32 %v9808_v55, %v9720_v56  ;;  %8132 = vst [vmem:[#allocation3 + $0x11c] sm:$0xf] %v8008_v13  ;;  %v17101_v55 = vld [vmem:[#allocation11_spill] sm:$0xff]  ;;  %v8012_v8 = vsel %vm14112_vm5, %v12261_v46, %v8011_v48  ;;  %v8013_v27 = vrot.slane %v8011_v48, 4  ;;  %v8014_v13 = vrot.slane %v7899_v0, 5 }
 0x451   : > { %v9942_v49 = vadd.f32 %v17101_v55, %v17100_v58  ;;  %8133 = vst [vmem:[#allocation3 + $0x140] sm:$0xf] %v8012_v8  ;;  %v13492_v57 = vld [vmem:[#allocation3 + $0x2c0] sm:$0xf0]  ;;  %v12623_v0 = vld [vmem:[#allocation3 + $0x2a0] sm:$0xf] }
 0x452   : > { %v9897_v24 = vpop.f32.mrf.mxu3  ;;  %10304 = vmatmul.bf16.gmra.mxu0 %v12592_v3  ;;  %v12624_v48 = vor.u32 %v13492_v57, %v12623_v0  ;;  %v7085_v55 = vld [vmem:[#allocation2 + $0x90] sm:$0xe]  ;;  %v7087_v8 = vld [vmem:[#allocation2 + $0x98] sm:$0x1]  ;;  %v7423_v57 = vld [vmem:[#allocation2 + $0xa0] sm:$0xf] }
 0x453   : > { %v16511_v33 = vadd.f32 %v9897_v24, %v9809_v34  ;;  %v8015_v24 = vsel %vm14112_vm5, %v8013_v27, %v8014_v13  ;;  %v12252_v27 = vrot.slane %v7085_v55, 9  ;;  %v17107_v55 = vld [vmem:[#allocation17_spill] sm:$0xff] }
 0x454   : > { %10126 = vmatmul.bf16.gmra.mxu2 %v12584_v17  ;;  %8134 = vst [vmem:[#allocation3 + $0x164] sm:$0xf] %v8015_v24  ;;  %v13488_v17 = vld [vmem:[#allocation3 + $0x2a4] sm:$0xf] }
 0x455   : > { %v16530_v37 = vpop.f32.mrf.mxu0  ;;  %v12831_v46 = vld [vmem:[#allocation3 + $0x448] sm:$0xf] }
 0x456   : > { %v10028_v7 = vpop.f32.mrf.mxu1 }
 0x457   : > { %v16517_v30 = vadd.f32 %v10028_v7, %v9940_v51  ;;  %10215 = vmatmul.bf16.gmra.mxu3 %v12588_v40  ;;  %v10087_v26 = vpop.f32.mrf.mxu2  ;;  %v13487_v7 = vld [vmem:[#allocation3 + $0x29c] sm:$0xf] }
 0x458   : > { %v10088_v42 = vadd.f32 %v10087_v26, %v16281_v32  ;;  %v12625_v32 = vld [vmem:[#allocation3 + $0x2c4] sm:$0xf0]  ;;  %v12620_v38 = vor.u32 %v13487_v7, %v12617_v6  ;;  %v7422_v6 = vld [vmem:[#allocation2 + $0x9c] sm:$0xf] }
 0x459   : > { %10067 = vmatmul.bf16.gmra.mxu1 %v12796_v60  ;;  %v12628_v51 = vor.u32 %v13488_v17, %v12625_v32  ;;  %v13545_v60 = vld [vmem:[#allocation3 + $0x468] sm:$0xf0]  ;;  %v7347_v32 = vld [vmem:[#allocation2 + $0x9c] sm:$0xf]  ;;  %v7900_v17 = vld [vmem:[#allocation2 + $0x54] sm:$0xe] }
 0x45a   : > { %v10176_v29 = vpop.f32.mrf.mxu3  ;;  %v17103_v26 = vld [vmem:[#allocation14_spill] sm:$0xff]  ;;  %7379 = vst [vmem:[#allocation3 + $0x330] sm:$0xf] %v7347_v32 }
 0x45b   : > { %v16520_v56 = vadd.f32 %v10176_v29, %v10088_v42  ;;  %v17104_v42 = vld [vmem:[#allocation15_spill] sm:$0xff] }
 0x45c   : > { %v9945_v14 = vadd.f32 %v17104_v42, %v17103_v26  ;;  %v7424_v26 = vld [vmem:[#allocation2 + $0xa4] sm:$0x1]  ;;  %v7705_v42 = vshll.u32 %v7422_v6, 16 }
 0x45e   : > { %v10030_v34 = vpop.f32.mrf.mxu1 }
 0x45f   : > { %v16526_v3 = vadd.f32 %v10030_v34, %v9942_v49  ;;  %v10089_v36 = vpop.f32.mrf.mxu2  ;;  %v7086_v49 = vld [vmem:[#allocation2 + $0x94] sm:$0xf]  ;;  %v7230_v34 = vrot.slane %v7087_v8, 5  ;;  %v12661_v8 = vld [vmem:[#allocation3 + $0x30c] sm:$0xf0] }
 0x460   : > { %v10090_v11 = vadd.f32 %v10089_v36, %v16305_v44  ;;  %v12832_v44 = vor.u32 %v13545_v60, %v12831_v46  ;;  %v7227_v13 = vrot.slane %v7086_v49, 5  ;;  %v7348_v36 = vld [vmem:[#allocation2 + $0xa0] sm:$0xf]  ;;  %v7702_v60 = vshrl.u32 %v7422_v6, 16  ;;  %v7902_v6 = vld [vmem:[#allocation2 + $0x5c] sm:$0x1] }
 0x461   : > { %17102 = vst [vmem:[#allocation7_spill] sm:$0xff] %v16526_v3 }
 0x462   : > { %v10178_v28 = vpop.f32.mrf.mxu3  ;;  %10309 = vmatmul.bf16.gmra.mxu0 %v12628_v51  ;;  %v7229_v7 = vrot.slane %v7227_v13, 4  ;;  %7380 = vst [vmem:[#allocation3 + $0x354] sm:$0xf] %v7348_v36  ;;  %v7704_v46 = vrot.slane %v7702_v60, 4  ;;  %v7721_v36 = vshll.u32 %v7424_v26, 16 }
 0x463   : > { %v16533_v40 = vadd.f32 %v10178_v28, %v10090_v11  ;;  %v16539_v11 = vpop.f32.mrf.mxu0  ;;  %v7228_v28 = vsel %vm14112_vm5, %v12252_v27, %v7227_v13  ;;  %v7707_v27 = vrot.slane %v7705_v42, 5 }
 0x464   : > { %10131 = vmatmul.bf16.gmra.mxu2 %v12620_v38  ;;  %7314 = vst [vmem:[#allocation3 + $0x32c] sm:$0xf] %v7228_v28  ;;  %v12262_v28 = vrot.slane %v7900_v17, 9  ;;  %v7723_v17 = vrot.slane %v7721_v36, 5  ;;  %v17109_v36 = vld [vmem:[#allocation19_spill] sm:$0xff] }
 0x466   : > { %v10033_v29 = vpop.f32.mrf.mxu1 }
 0x467   : > { %v16537_v58 = vadd.f32 %v10033_v29, %v9945_v14  ;;  %10220 = vmatmul.bf16.gmra.mxu3 %v12624_v48  ;;  %v10092_v24 = vpop.f32.mrf.mxu2  ;;  %v7711_v14 = vshll.u32 %v7423_v57, 16  ;;  %v7231_v29 = vsel %vm14112_vm5, %v7229_v7, %v7230_v34  ;;  %v7715_v48 = vshrl.u32 %v7423_v57, 16  ;;  %v13497_v34 = vld [vmem:[#allocation3 + $0x2ec] sm:$0xf] }
 0x468   : > { %v10093_v51 = vadd.f32 %v10092_v24, %v16323_v1  ;;  %v7901_v1 = vld [vmem:[#allocation2 + $0x58] sm:$0xf]  ;;  %7315 = vst [vmem:[#allocation3 + $0x350] sm:$0xf] %v7231_v29  ;;  %v12653_v29 = vld [vmem:[#allocation3 + $0x304] sm:$0xf0]  ;;  %v12664_v42 = vor.u32 %v13497_v34, %v12661_v8 }
 0x469   : > { %17105 = vst [vmem:[#allocation9_spill] sm:$0xff] %v16537_v58  ;;  %10072 = vmatmul.bf16.gmra.mxu1 %v12832_v44  ;;  %v17106_v44 = vld [vmem:[#allocation18_spill] sm:$0xff]  ;;  %v7713_v13 = vrot.slane %v7711_v14, 5  ;;  %v7717_v24 = vrot.slane %v7715_v48, 4  ;;  %v7708_v58 = vor.u32 %v7707_v27, %v7704_v46  ;;  %v13412_v8 = vld [vmem:[#allocation3 + $0x40] sm:$0xf0] }
 0x46a   : > { %v10181_v38 = vpop.f32.mrf.mxu3  ;;  %v9947_v49 = vadd.f32 %v17107_v55, %v17106_v44  ;;  %v8021_v44 = vrot.slane %v7902_v6, 5  ;;  %v13501_v27 = vld [vmem:[#allocation3 + $0x308] sm:$0xf0] }
 0x46b   : > { %v16544_v0 = vadd.f32 %v10181_v38, %v10093_v51  ;;  %v8018_v51 = vrot.slane %v7901_v1, 5  ;;  %v7718_v7 = vor.u32 %v7717_v24, %v7713_v13  ;;  %v7709_v14 = vrot.slane %v7708_v58, 4  ;;  %v16559_v24 = vpop.f32.mrf.mxu0 }
 0x46d   : > { %v8019_v57 = vsel %vm14112_vm5, %v12262_v28, %v8018_v51  ;;  %v8020_v60 = vrot.slane %v8018_v51, 4  ;;  %v7719_v48 = vrot.slane %v7718_v7, 4  ;;  %v9950_v28 = vadd.f32 %v17109_v36, %v16227_v52  ;;  %v12659_v51 = vld [vmem:[#allocation3 + $0x2e8] sm:$0xf]  ;;  %v12307_v7 = vld [vmem:[#allocation3 + $0x20] sm:$0xf] }
 0x46e   : > { %v10035_v32 = vpop.f32.mrf.mxu1  ;;  %8135 = vst [vmem:[#allocation3 + $0x188] sm:$0xf] %v8019_v57  ;;  %v7350_v52 = vld [vmem:[#allocation2 + $0xac] sm:$0xf] }
 0x46f   : > { %v16550_v38 = vadd.f32 %v10035_v32, %v9947_v49  ;;  %v10094_v55 = vpop.f32.mrf.mxu2  ;;  %v8022_v1 = vsel %vm14112_vm5, %v8020_v60, %v8021_v44  ;;  %v13496_v49 = vld [vmem:[#allocation3 + $0x2e4] sm:$0xf]  ;;  %v7714_v32 = vsel %vm13858_vm2, %v7709_v14, %v7713_v13  ;;  %v12660_v13 = vor.u32 %v13501_v27, %v12659_v51  ;;  %7382 = vst [vmem:[#allocation3 + $0x39c] sm:$0xf] %v7350_v52 }
 0x470   : > { %v10095_v26 = vadd.f32 %v10094_v55, %v16337_v5  ;;  %8136 = vst [vmem:[#allocation3 + $0x1ac] sm:$0xf] %v8022_v1  ;;  %v12656_v58 = vor.u32 %v13496_v49, %v12653_v29  ;;  %v7724_v5 = vsel %vm13858_vm2, %v7719_v48, %v7723_v17  ;;  %v12308_v60 = vor.u32 %v13412_v8, %v12307_v7  ;;  %v7088_v44 = vld [vmem:[#allocation2 + $0x9c] sm:$0xe]  ;;  %v7089_v55 = vld [vmem:[#allocation2 + $0xa0] sm:$0xf] }
 0x471   : > { %17108 = vst [vmem:[#allocation10_spill] sm:$0xff] %v16550_v38  ;;  %v7090_v29 = vld [vmem:[#allocation2 + $0xa4] sm:$0x1]  ;;  %v7234_v14 = vrot.slane %v7089_v55, 5  ;;  %v7349_v48 = vld [vmem:[#allocation2 + $0xa8] sm:$0xf] }
 0x472   : > { %v10183_v46 = vpop.f32.mrf.mxu3  ;;  %10314 = vmatmul.bf16.gmra.mxu0 %v12664_v42  ;;  %7875 = vst [vmem:[#allocation3 + $0x334] sm:$0xf] %v7714_v32  ;;  %v12253_v42 = vrot.slane %v7088_v44, 9  ;;  %v7425_v1 = vld [vmem:[#allocation2 + $0xa8] sm:$0xf]  ;;  %v17112_v7 = vld [vmem:[#allocation21_spill] sm:$0xff] }
 0x473   : > { %v16561_v6 = vadd.f32 %v10183_v46, %v10095_v26  ;;  %7876 = vst [vmem:[#allocation3 + $0x358] sm:$0xf] %v7724_v5  ;;  %v7237_v26 = vrot.slane %v7090_v29, 5  ;;  %v7236_v27 = vrot.slane %v7234_v14, 4  ;;  %v7426_v32 = vld [vmem:[#allocation2 + $0xac] sm:$0xf]  ;;  %v16578_v29 = vpop.f32.mrf.mxu0 }
 0x474   : > { %10136 = vmatmul.bf16.gmra.mxu2 %v12656_v58  ;;  %7381 = vst [vmem:[#allocation3 + $0x378] sm:$0xf] %v7349_v48  ;;  %v7235_v49 = vsel %vm14112_vm5, %v12253_v42, %v7234_v14  ;;  %v7726_v58 = vshrl.u32 %v7425_v1, 16  ;;  %v7739_v44 = vshrl.u32 %v7426_v32, 16  ;;  %v7903_v55 = vld [vmem:[#allocation2 + $0x60] sm:$0xe] }
 0x475   : > { %7316 = vst [vmem:[#allocation3 + $0x374] sm:$0xf] %v7235_v49  ;;  %v7238_v36 = vsel %vm14112_vm5, %v7236_v27, %v7237_v26  ;;  %v7904_v48 = vld [vmem:[#allocation2 + $0x64] sm:$0xf]  ;;  %v13510_v38 = vld [vmem:[#allocation3 + $0x350] sm:$0xf0] }
 0x476   : > { %v10038_v34 = vpop.f32.mrf.mxu1  ;;  %v7728_v51 = vrot.slane %v7726_v58, 4  ;;  %7317 = vst [vmem:[#allocation3 + $0x398] sm:$0xf] %v7238_v36  ;;  %v7741_v26 = vrot.slane %v7739_v44, 4  ;;  %v8025_v58 = vrot.slane %v7904_v48, 5  ;;  %v9955_v48 = vadd.f32 %v16273_v41, %v16257_v53 }
 0x477   : > { %v16567_v57 = vadd.f32 %v10038_v34, %v9950_v28  ;;  %10225 = vmatmul.bf16.gmra.mxu3 %v12660_v13  ;;  %v10097_v17 = vpop.f32.mrf.mxu2  ;;  %v7427_v28 = vld [vmem:[#allocation2 + $0xb0] sm:$0x1]  ;;  %v7729_v34 = vshll.u32 %v7425_v1, 16  ;;  %v12263_v1 = vrot.slane %v7903_v55, 9 }
 0x478   : > { %v10098_v46 = vadd.f32 %v10097_v17, %v16355_v20  ;;  %v17111_v13 = vld [vmem:[#allocation20_spill] sm:$0xff]  ;;  %v7745_v49 = vshll.u32 %v7427_v28, 16  ;;  %v7905_v28 = vld [vmem:[#allocation2 + $0x68] sm:$0x1] }
 0x479   : > { %17110 = vst [vmem:[#allocation12_spill] sm:$0xff] %v16567_v57  ;;  %10353 = vmatmul.bf16.vlgmr.msra.gmra.mxu1 %v12308_v60  ;;  %v9952_v20 = vadd.f32 %v17112_v7, %v17111_v13  ;;  %v7735_v60 = vshll.u32 %v7426_v32, 16  ;;  %v7731_v14 = vrot.slane %v7729_v34, 5  ;;  %v12689_v13 = vld [vmem:[#allocation3 + $0x34c] sm:$0xf0] }
 0x47a   : > { %v10186_v8 = vpop.f32.mrf.mxu3  ;;  %v12697_v52 = vld [vmem:[#allocation3 + $0x354] sm:$0xf0]  ;;  %v13506_v36 = vld [vmem:[#allocation3 + $0x334] sm:$0xf]  ;;  %v13505_v57 = vld [vmem:[#allocation3 + $0x32c] sm:$0xf] }
 0x47b   : > { %v16572_v5 = vadd.f32 %v10186_v8, %v10098_v46  ;;  %v7737_v46 = vrot.slane %v7735_v60, 5  ;;  %v7732_v27 = vor.u32 %v7731_v14, %v7728_v51  ;;  %v12700_v3 = vor.u32 %v13506_v36, %v12697_v52  ;;  %v13421_v14 = vld [vmem:[#allocation3 + $0x88] sm:$0xf0]  ;;  %v12695_v52 = vld [vmem:[#allocation3 + $0x330] sm:$0xf] }
 0x47c   : > { %v7747_v44 = vrot.slane %v7745_v49, 5  ;;  %v12692_v55 = vor.u32 %v13505_v57, %v12689_v13  ;;  %v8028_v57 = vrot.slane %v7905_v28, 5  ;;  %v7091_v36 = vld [vmem:[#allocation2 + $0xa8] sm:$0xe] }
 0x47d   : > { %v7742_v7 = vor.u32 %v7741_v26, %v7737_v46  ;;  %v7733_v34 = vrot.slane %v7732_v27, 4  ;;  %v8027_v27 = vrot.slane %v8025_v58, 4  ;;  %v12254_v53 = vrot.slane %v7091_v36, 9 }
 0x47e   : > { %v10040_v42 = vpop.f32.mrf.mxu1 }
 0x47f   : > { %v16580_v17 = vadd.f32 %v10040_v42, %v9952_v20  ;;  %v10099_v8 = vpop.f32.mrf.mxu2  ;;  %v8026_v20 = vsel %vm14112_vm5, %v12263_v1, %v8025_v58  ;;  %v7743_v60 = vrot.slane %v7742_v7, 4  ;;  %v12696_v1 = vor.u32 %v13510_v38, %v12695_v52  ;;  %v7093_v7 = vld [vmem:[#allocation2 + $0xb0] sm:$0x1]  ;;  %v7428_v38 = vld [vmem:[#allocation2 + $0xb4] sm:$0xf] }
 0x480   : > { %v10100_v32 = vadd.f32 %v10099_v8, %v16372_v61  ;;  %8137 = vst [vmem:[#allocation3 + $0x1d0] sm:$0xf] %v8026_v20  ;;  %v7738_v61 = vsel %vm13858_vm2, %v7733_v34, %v7737_v46  ;;  %v12343_v8 = vld [vmem:[#allocation3 + $0x68] sm:$0xf]  ;;  %v7092_v46 = vld [vmem:[#allocation2 + $0xac] sm:$0xf] }
 0x481   : > { %v7748_v26 = vsel %vm13858_vm2, %v7743_v60, %v7747_v44  ;;  %7877 = vst [vmem:[#allocation3 + $0x37c] sm:$0xf] %v7738_v61  ;;  %v12344_v13 = vor.u32 %v13421_v14, %v12343_v8  ;;  %v7241_v41 = vrot.slane %v7092_v46, 5  ;;  %v7244_v34 = vrot.slane %v7093_v7, 5  ;;  %v7351_v20 = vld [vmem:[#allocation2 + $0xb4] sm:$0xf] }
 0x482   : > { %v10188_v42 = vpop.f32.mrf.mxu3  ;;  %10319 = vmatmul.bf16.gmra.mxu0 %v12700_v3  ;;  %7878 = vst [vmem:[#allocation3 + $0x3a0] sm:$0xf] %v7748_v26  ;;  %v8029_v60 = vsel %vm14112_vm5, %v8027_v27, %v8028_v57  ;;  %v7429_v14 = vld [vmem:[#allocation2 + $0xb8] sm:$0xf]  ;;  %v7750_v61 = vshrl.u32 %v7428_v38, 16  ;;  %v7753_v26 = vshll.u32 %v7428_v38, 16 }
 0x483   : > { %v16585_v51 = vadd.f32 %v10188_v42, %v10100_v32  ;;  %v16595_v32 = vpop.f32.mrf.mxu0  ;;  %v7352_v42 = vld [vmem:[#allocation2 + $0xb8] sm:$0xf]  ;;  %7383 = vst [vmem:[#allocation3 + $0x3c0] sm:$0xf] %v7351_v20  ;;  %v7242_v28 = vsel %vm14112_vm5, %v12254_v53, %v7241_v41  ;;  %v7430_v52 = vld [vmem:[#allocation2 + $0xbc] sm:$0x1] }
 0x484   : > { %10141 = vmatmul.bf16.gmra.mxu2 %v12692_v55  ;;  %v7243_v55 = vrot.slane %v7241_v41, 4  ;;  %7384 = vst [vmem:[#allocation3 + $0x3e4] sm:$0xf] %v7352_v42  ;;  %v7752_v27 = vrot.slane %v7750_v61, 4  ;;  %v7763_v57 = vshrl.u32 %v7429_v14, 16  ;;  %v7755_v36 = vrot.slane %v7753_v26, 5 }
 0x485   : > { %7318 = vst [vmem:[#allocation3 + $0x3bc] sm:$0xf] %v7242_v28  ;;  %v7769_v41 = vshll.u32 %v7430_v52, 16  ;;  %v7907_v20 = vld [vmem:[#allocation2 + $0x70] sm:$0xf] }
 0x486   : > { %v10043_v49 = vpop.f32.mrf.mxu1  ;;  %v7245_v8 = vsel %vm14112_vm5, %v7243_v55, %v7244_v34  ;;  %8138 = vst [vmem:[#allocation3 + $0x1f4] sm:$0xf] %v8029_v60  ;;  %v7765_v53 = vrot.slane %v7763_v57, 4  ;;  %v7756_v38 = vor.u32 %v7755_v36, %v7752_v27  ;;  %v8032_v28 = vrot.slane %v7907_v20, 5  ;;  %v12725_v55 = vld [vmem:[#allocation3 + $0x394] sm:$0xf0] }
 0x487   : > { %v16593_v3 = vadd.f32 %v10043_v49, %v9955_v48  ;;  %10230 = vmatmul.bf16.gmra.mxu3 %v12696_v1  ;;  %v10102_v58 = vpop.f32.mrf.mxu2  ;;  %v7759_v49 = vshll.u32 %v7429_v14, 16  ;;  %7319 = vst [vmem:[#allocation3 + $0x3e0] sm:$0xf] %v7245_v8  ;;  %v7771_v27 = vrot.slane %v7769_v41, 5  ;;  %v13519_v36 = vld [vmem:[#allocation3 + $0x398] sm:$0xf0] }
 0x488   : > { %v10103_v44 = vadd.f32 %v10102_v58, %v16397_v16  ;;  %v7906_v16 = vld [vmem:[#allocation2 + $0x6c] sm:$0xe]  ;;  %v13515_v61 = vld [vmem:[#allocation3 + $0x37c] sm:$0xf]  ;;  %v17113_v41 = vld [vmem:[#allocation22_spill] sm:$0xff] }
 0x489   : > { %10358 = vmatmul.bf16.gmra.mxu1 %v12344_v13  ;;  %v9957_v13 = vadd.f32 %v16292_v43, %v16277_v31  ;;  %v7761_v46 = vrot.slane %v7759_v49, 5  ;;  %v12733_v42 = vld [vmem:[#allocation3 + $0x39c] sm:$0xf0]  ;;  %v12264_v34 = vrot.slane %v7906_v16, 9  ;;  %v8034_v43 = vrot.slane %v8032_v28, 4 }
 0x48a   : > { %v10191_v48 = vpop.f32.mrf.mxu3  ;;  %v12736_v8 = vor.u32 %v13515_v61, %v12733_v42  ;;  %v9960_v42 = vadd.f32 %v16321_v59, %v17113_v41  ;;  %v7354_v59 = vld [vmem:[#allocation2 + $0xc4] sm:$0xf]  ;;  %v9962_v41 = vadd.f32 %v16339_v4, %v16313_v9 }
 0x48b   : > { %v16602_v1 = vadd.f32 %v10191_v48, %v10103_v44  ;;  %v7908_v44 = vld [vmem:[#allocation2 + $0x74] sm:$0x1]  ;;  %v7766_v60 = vor.u32 %v7765_v53, %v7761_v46  ;;  %v7757_v48 = vrot.slane %v7756_v38, 4  ;;  %v8033_v31 = vsel %vm14112_vm5, %v12264_v34, %v8032_v28  ;;  %v16612_v49 = vpop.f32.mrf.mxu0  ;;  %v12731_v34 = vld [vmem:[#allocation3 + $0x378] sm:$0xf] }
 0x48c   : > { %v8035_v26 = vrot.slane %v7908_v44, 5  ;;  %8139 = vst [vmem:[#allocation3 + $0x218] sm:$0xf] %v8033_v31  ;;  %v13430_v44 = vld [vmem:[#allocation3 + $0xd0] sm:$0xf0]  ;;  %v10271_v54 = vadd.f32 %v16612_v49, %v16544_v0 }
 0x48d   : > { %v7767_v57 = vrot.slane %v7766_v60, 4  ;;  %v12379_v60 = vld [vmem:[#allocation3 + $0xb0] sm:$0xf]  ;;  %v7096_v31 = vld [vmem:[#allocation2 + $0xbc] sm:$0x1] }
 0x48e   : > { %v10045_v7 = vpop.f32.mrf.mxu1  ;;  %v8036_v53 = vsel %vm14112_vm5, %v8034_v43, %v8035_v26  ;;  %v12380_v61 = vor.u32 %v13430_v44, %v12379_v60  ;;  %7386 = vst [vmem:[#allocation3 + $0x42c] sm:$0xf] %v7354_v59  ;;  %v13523_v4 = vld [vmem:[#allocation3 + $0x3bc] sm:$0xf] }
 0x48f   : > { %v16608_v58 = vadd.f32 %v10045_v7, %v9957_v13  ;;  %v10104_v14 = vpop.f32.mrf.mxu2  ;;  %v13514_v13 = vld [vmem:[#allocation3 + $0x374] sm:$0xf]  ;;  %v7762_v7 = vsel %vm13858_vm2, %v7757_v48, %v7761_v46  ;;  %v12732_v46 = vor.u32 %v13519_v36, %v12731_v34  ;;  %8140 = vst [vmem:[#allocation3 + $0x23c] sm:$0xf] %v8036_v53  ;;  %v7095_v48 = vld [vmem:[#allocation2 + $0xb8] sm:$0xf] }
 0x490   : > { %v10105_v52 = vadd.f32 %v10104_v14, %v16416_v23  ;;  %v12728_v38 = vor.u32 %v13514_v13, %v12725_v55  ;;  %v7772_v23 = vsel %vm13858_vm2, %v7767_v57, %v7771_v27  ;;  %7879 = vst [vmem:[#allocation3 + $0x3c4] sm:$0xf] %v7762_v7  ;;  %v7094_v55 = vld [vmem:[#allocation2 + $0xb4] sm:$0xe]  ;;  %v7248_v26 = vrot.slane %v7095_v48, 5 }
 0x491   : > { %7880 = vst [vmem:[#allocation3 + $0x3e8] sm:$0xf] %v7772_v23  ;;  %v12255_v43 = vrot.slane %v7094_v55, 9  ;;  %v7431_v57 = vld [vmem:[#allocation2 + $0xc0] sm:$0xf] }
 0x492   : > { %v10193_v16 = vpop.f32.mrf.mxu3  ;;  %10324 = vmatmul.bf16.gmra.mxu0 %v12736_v8  ;;  %v7353_v8 = vld [vmem:[#allocation2 + $0xc0] sm:$0xf]  ;;  %v7432_v13 = vld [vmem:[#allocation2 + $0xc4] sm:$0xf]  ;;  %v7774_v36 = vshrl.u32 %v7431_v57, 16  ;;  %v7777_v23 = vshll.u32 %v7431_v57, 16 }
 0x493   : > { %v16619_v20 = vadd.f32 %v10193_v16, %v10105_v52  ;;  %v7251_v52 = vrot.slane %v7096_v31, 5  ;;  %7385 = vst [vmem:[#allocation3 + $0x408] sm:$0xf] %v7353_v8  ;;  %v7249_v27 = vsel %vm14112_vm5, %v12255_v43, %v7248_v26  ;;  %v7250_v16 = vrot.slane %v7248_v26, 4  ;;  %v16629_v7 = vpop.f32.mrf.mxu0  ;;  %v7911_v8 = vld [vmem:[#allocation2 + $0x80] sm:$0x1] }
 0x494   : > { %10146 = vmatmul.bf16.gmra.mxu2 %v12728_v38  ;;  %7320 = vst [vmem:[#allocation3 + $0x404] sm:$0xf] %v7249_v27  ;;  %v7433_v38 = vld [vmem:[#allocation2 + $0xc8] sm:$0x1]  ;;  %v7776_v44 = vrot.slane %v7774_v36, 4  ;;  %v7787_v34 = vshrl.u32 %v7432_v13, 16 }
 0x495   : > { %v7252_v53 = vsel %vm14112_vm5, %v7250_v16, %v7251_v52  ;;  %v7779_v60 = vrot.slane %v7777_v23, 5  ;;  %v7793_v26 = vshll.u32 %v7433_v38, 16  ;;  %v12761_v27 = vld [vmem:[#allocation3 + $0x3dc] sm:$0xf0]  ;;  %v13528_v36 = vld [vmem:[#allocation3 + $0x3e0] sm:$0xf0] }
 0x496   : > { %v10048_v28 = vpop.f32.mrf.mxu1  ;;  %7321 = vst [vmem:[#allocation3 + $0x428] sm:$0xf] %v7252_v53  ;;  %v7789_v43 = vrot.slane %v7787_v34, 4  ;;  %v12764_v38 = vor.u32 %v13523_v4, %v12761_v27 }
 0x497   : > { %v16625_v14 = vadd.f32 %v10048_v28, %v9960_v42  ;;  %10235 = vmatmul.bf16.gmra.mxu3 %v12732_v46  ;;  %v7783_v42 = vshll.u32 %v7432_v13, 16  ;;  %v7909_v28 = vld [vmem:[#allocation2 + $0x78] sm:$0xe]  ;;  %v7780_v52 = vor.u32 %v7779_v60, %v7776_v44  ;;  %v13524_v16 = vld [vmem:[#allocation3 + $0x3c4] sm:$0xf] }
 0x498   : > { %v12769_v48 = vld [vmem:[#allocation3 + $0x3e4] sm:$0xf0]  ;;  %v12265_v59 = vrot.slane %v7909_v28, 9  ;;  %v13439_v44 = vld [vmem:[#allocation3 + $0x118] sm:$0xf0]  ;;  %v9965_v28 = vadd.f32 %v16364_v39, %v16329_v2 }
 0x499   : > { %10363 = vmatmul.bf16.gmra.mxu1 %v12380_v61  ;;  %v7910_v61 = vld [vmem:[#allocation2 + $0x7c] sm:$0xf]  ;;  %v7785_v31 = vrot.slane %v7783_v42, 5  ;;  %v12772_v13 = vor.u32 %v13524_v16, %v12769_v48  ;;  %v7781_v53 = vrot.slane %v7780_v52, 4  ;;  %v8042_v42 = vrot.slane %v7911_v8, 5 }
 0x49a   : > { %v8039_v57 = vrot.slane %v7910_v61, 5  ;;  %v12767_v60 = vld [vmem:[#allocation3 + $0x3c0] sm:$0xf]  ;;  %v12415_v8 = vld [vmem:[#allocation3 + $0xf8] sm:$0xf] }
 0x49b   : > { %v7790_v9 = vor.u32 %v7789_v43, %v7785_v31  ;;  %v7786_v34 = vsel %vm13858_vm2, %v7781_v53, %v7785_v31  ;;  %v16647_v43 = vpop.f32.mrf.mxu0  ;;  %v12768_v52 = vor.u32 %v13528_v36, %v12767_v60  ;;  %v12416_v31 = vor.u32 %v13439_v44, %v12415_v8  ;;  %v7098_v2 = vld [vmem:[#allocation2 + $0xc4] sm:$0xf]  ;;  %v7099_v39 = vld [vmem:[#allocation2 + $0xc8] sm:$0x1]  ;;  %v7914_v53 = vld [vmem:[#allocation2 + $0x8c] sm:$0x1] }
 0x49c   : > { %v8040_v23 = vsel %vm14112_vm5, %v12265_v59, %v8039_v57  ;;  %7881 = vst [vmem:[#allocation3 + $0x40c] sm:$0xf] %v7786_v34  ;;  %v7255_v16 = vrot.slane %v7098_v2, 5  ;;  %v7913_v36 = vld [vmem:[#allocation2 + $0x88] sm:$0xf]  ;;  %v8049_v34 = vrot.slane %v7914_v53, 5 }
 0x49d   : > { %8141 = vst [vmem:[#allocation3 + $0x260] sm:$0xf] %v8040_v23  ;;  %v13448_v2 = vld [vmem:[#allocation3 + $0x160] sm:$0xf0] }
 0x49e   : > { %v10050_v46 = vpop.f32.mrf.mxu1  ;;  %v7257_v4 = vrot.slane %v7255_v16, 4 }
 0x49f   : > { %v16635_v55 = vadd.f32 %v10050_v46, %v9962_v41  ;;  %v7791_v41 = vrot.slane %v7790_v9, 4  ;;  %v7795_v46 = vrot.slane %v7793_v26, 5  ;;  %v7912_v9 = vld [vmem:[#allocation2 + $0x84] sm:$0xe] }
 0x4a0   : > { %v12266_v23 = vrot.slane %v7912_v9, 9  ;;  %v12803_v9 = vld [vmem:[#allocation3 + $0x408] sm:$0xf] }
 0x4a1   : > { %17114 = vst [vmem:[#allocation13_spill] sm:$0xff] %v16635_v55  ;;  %v8041_v55 = vrot.slane %v8039_v57, 4  ;;  %v7796_v61 = vsel %vm13858_vm2, %v7791_v41, %v7795_v46  ;;  %v7097_v57 = vld [vmem:[#allocation2 + $0xc0] sm:$0xe]  ;;  %v8046_v41 = vrot.slane %v7913_v36, 5 }
 0x4a2   : > { %10329 = vmatmul.bf16.gmra.mxu0 %v12772_v13  ;;  %7882 = vst [vmem:[#allocation3 + $0x430] sm:$0xf] %v7796_v61  ;;  %v12256_v27 = vrot.slane %v7097_v57, 9  ;;  %v7258_v13 = vrot.slane %v7099_v39, 5  ;;  %v17115_v39 = vld [vmem:[#allocation23_spill] sm:$0xff] }
 0x4a3   : > { %v8043_v48 = vsel %vm14112_vm5, %v8041_v55, %v8042_v42  ;;  %v9967_v42 = vadd.f32 %v16384_v47, %v16345_v62  ;;  %v8048_v44 = vrot.slane %v8046_v41, 4  ;;  %v13533_v8 = vld [vmem:[#allocation3 + $0x40c] sm:$0xf]  ;;  %v13532_v47 = vld [vmem:[#allocation3 + $0x404] sm:$0xf] }
 0x4a4   : > { %10151 = vmatmul.bf16.gmra.mxu2 %v12764_v38  ;;  %8142 = vst [vmem:[#allocation3 + $0x284] sm:$0xf] %v8043_v48  ;;  %v7256_v55 = vsel %vm14112_vm5, %v12256_v27, %v7255_v16  ;;  %v7259_v46 = vsel %vm14112_vm5, %v7257_v4, %v7258_v13  ;;  %v8047_v38 = vsel %vm14112_vm5, %v12266_v23, %v8046_v41  ;;  %v17116_v27 = vld [vmem:[#allocation8_spill] sm:$0xff]  ;;  %v12451_v13 = vld [vmem:[#allocation3 + $0x140] sm:$0xf] }
 0x4a5   : > { %7322 = vst [vmem:[#allocation3 + $0x44c] sm:$0xf] %v7256_v55  ;;  %v8050_v48 = vsel %vm14112_vm5, %v8048_v44, %v8049_v34  ;;  %v9970_v16 = vadd.f32 %v17116_v27, %v17115_v39  ;;  %v12452_v53 = vor.u32 %v13448_v2, %v12451_v13  ;;  %v7915_v23 = vld [vmem:[#allocation2 + $0x90] sm:$0xe]  ;;  %v12839_v27 = vld [vmem:[#allocation3 + $0x450] sm:$0xf] }
 0x4a6   : > { %v10053_v26 = vpop.f32.mrf.mxu1  ;;  %7323 = vst [vmem:[#allocation3 + $0x470] sm:$0xf] %v7259_v46  ;;  %v7916_v46 = vld [vmem:[#allocation2 + $0x94] sm:$0xf] }
 0x4a7   : > { %v16649_v59 = vadd.f32 %v10053_v26, %v9965_v28  ;;  %10240 = vmatmul.bf16.gmra.mxu3 %v12768_v52  ;;  %8143 = vst [vmem:[#allocation3 + $0x2a8] sm:$0xf] %v8047_v38  ;;  %v16663_v26 = vpop.f32.mrf.mxu0  ;;  %v12797_v52 = vld [vmem:[#allocation3 + $0x424] sm:$0xf0]  ;;  %v12267_v38 = vrot.slane %v7915_v23, 9  ;;  %v8053_v44 = vrot.slane %v7916_v46, 5 }
 0x4a8   : > { %8144 = vst [vmem:[#allocation3 + $0x2cc] sm:$0xf] %v8050_v48  ;;  %v12800_v57 = vor.u32 %v13532_v47, %v12797_v52  ;;  %v17117_v34 = vld [vmem:[#allocation24_spill] sm:$0xff] }
 0x4a9   : > { %10368 = vmatmul.bf16.gmra.mxu1 %v12416_v31  ;;  %v12805_v61 = vld [vmem:[#allocation3 + $0x42c] sm:$0xf0]  ;;  %v13537_v31 = vld [vmem:[#allocation3 + $0x428] sm:$0xf0]  ;;  %v12841_v48 = vld [vmem:[#allocation3 + $0x474] sm:$0xf0]  ;;  %v8054_v52 = vsel %vm14112_vm5, %v12267_v38, %v8053_v44 }
 0x4aa   : > { %v12808_v62 = vor.u32 %v13533_v8, %v12805_v61  ;;  %v12804_v4 = vor.u32 %v13537_v31, %v12803_v9  ;;  %v13542_v61 = vld [vmem:[#allocation3 + $0x454] sm:$0xf]  ;;  %v8055_v8 = vrot.slane %v8053_v44, 4  ;;  %8145 = vst [vmem:[#allocation3 + $0x2f0] sm:$0xf] %v8054_v52 }
 0x4ab   : > { %v12844_v2 = vor.u32 %v13542_v61, %v12841_v48  ;;  %v7920_v61 = vld [vmem:[#allocation2 + $0xa4] sm:$0x1] }
 0x4ad   : > { %v12833_v39 = vld [vmem:[#allocation3 + $0x46c] sm:$0xf0] }
 0x4ae   : > { %v10055_v28 = vpop.f32.mrf.mxu1 }
 0x4af   : > { %v16659_v60 = vadd.f32 %v10055_v28, %v9967_v42  ;;  %v16669_v41 = vpop.f32.mrf.mxu0  ;;  %v7917_v42 = vld [vmem:[#allocation2 + $0x98] sm:$0x1]  ;;  %v9972_v28 = vadd.f32 %v16445_v10, %v17117_v34  ;;  %v13541_v10 = vld [vmem:[#allocation3 + $0x44c] sm:$0xf]  ;;  %v7918_v34 = vld [vmem:[#allocation2 + $0x9c] sm:$0xe] }
 0x4b0   : > { %v12268_v48 = vrot.slane %v7918_v34, 9 }
 0x4b2   : > { %10334 = vmatmul.bf16.gmra.mxu0 %v12808_v62  ;;  %v8056_v62 = vrot.slane %v7917_v42, 5  ;;  %v12487_v42 = vld [vmem:[#allocation3 + $0x188] sm:$0xf] }
 0x4b4   : > { %10156 = vmatmul.bf16.gmra.mxu2 %v12800_v57  ;;  %v8057_v57 = vsel %vm14112_vm5, %v8055_v8, %v8056_v62  ;;  %v9977_v8 = vadd.f32 %v16493_v15, %v16430_v21 }
 0x4b5   : > { %8146 = vst [vmem:[#allocation3 + $0x314] sm:$0xf] %v8057_v57 }
 0x4b6   : > { %v10058_v55 = vpop.f32.mrf.mxu1 }
 0x4b7   : > { %v16667_v36 = vadd.f32 %v10058_v55, %v9970_v16  ;;  %10245 = vmatmul.bf16.gmra.mxu3 %v12804_v4  ;;  %v13546_v16 = vld [vmem:[#allocation3 + $0x470] sm:$0xf0]  ;;  %v16679_v9 = vpop.f32.mrf.mxu0  ;;  %v12836_v55 = vor.u32 %v13541_v10, %v12833_v39  ;;  %v13457_v4 = vld [vmem:[#allocation3 + $0x1a8] sm:$0xf0] }
 0x4b8   : > { %v12840_v13 = vor.u32 %v13546_v16, %v12839_v27  ;;  %v12488_v44 = vor.u32 %v13457_v4, %v12487_v42  ;;  %v13466_v27 = vld [vmem:[#allocation3 + $0x1f0] sm:$0xf0]  ;;  %v9980_v16 = vadd.f32 %v16515_v35, %v16461_v45  ;;  %v7921_v4 = vld [vmem:[#allocation2 + $0xa8] sm:$0xe]  ;;  %v9982_v42 = vadd.f32 %v16530_v37, %v16479_v12 }
 0x4b9   : > { %10373 = vmatmul.bf16.gmra.mxu1 %v12452_v53  ;;  %v17118_v53 = vld [vmem:[#allocation5_spill] sm:$0xff]  ;;  %v9985_v12 = vadd.f32 %v16539_v11, %v16495_v22  ;;  %v9987_v22 = vadd.f32 %v16559_v24, %v16511_v33 }
 0x4ba   : > { %v9975_v23 = vadd.f32 %v16477_v19, %v17118_v53  ;;  %v7923_v53 = vld [vmem:[#allocation2 + $0xb0] sm:$0x1] }
 0x4bb   : > { %v8070_v45 = vrot.slane %v7923_v53, 5  ;;  %v7926_v53 = vld [vmem:[#allocation2 + $0xbc] sm:$0x1] }
 0x4be   : > { %v10060_v47 = vpop.f32.mrf.mxu1 }
 0x4bf   : > { %v16675_v31 = vadd.f32 %v10060_v47, %v9972_v28  ;;  %v7919_v28 = vld [vmem:[#allocation2 + $0xa0] sm:$0xf]  ;;  %v8063_v47 = vrot.slane %v7920_v61, 5  ;;  %v13137_v61 = vld [vmem:[%s13734_s15 + $0xc] sm:$0xf] }
 0x4c0   : > { %v8060_v52 = vrot.slane %v7919_v28, 5 }
 0x4c2   : > { %10339 = vmatmul.bf16.gmra.mxu0 %v12844_v2  ;;  %v8061_v62 = vsel %vm14112_vm5, %v12268_v48, %v8060_v52  ;;  %v8062_v19 = vrot.slane %v8060_v52, 4  ;;  %v10483_v52 = vshrl.u32 %v13137_v61, 16 }
 0x4c3   : > { %8147 = vst [vmem:[#allocation3 + $0x338] sm:$0xf] %v8061_v62  ;;  %v13475_v62 = vld [vmem:[#allocation3 + $0x238] sm:$0xf0] }
 0x4c4   : > { %10161 = vmatmul.bf16.gmra.mxu2 %v12836_v55  ;;  %v8064_v39 = vsel %vm14112_vm5, %v8062_v19, %v8063_v47  ;;  %v12523_v55 = vld [vmem:[#allocation3 + $0x1d0] sm:$0xf]  ;;  %v12559_v19 = vld [vmem:[#allocation3 + $0x218] sm:$0xf]  ;;  %v10485_v47 = vrot.slane %v10483_v52, 4 }
 0x4c5   : > { %8148 = vst [vmem:[#allocation3 + $0x35c] sm:$0xf] %v8064_v39  ;;  %v12524_v15 = vor.u32 %v13466_v27, %v12523_v55  ;;  %v12560_v27 = vor.u32 %v13475_v62, %v12559_v19 }
 0x4c6   : > { %v10063_v46 = vpop.f32.mrf.mxu1 }
 0x4c7   : > { %v16683_v38 = vadd.f32 %v10063_v46, %v9975_v23  ;;  %10250 = vmatmul.bf16.gmra.mxu3 %v12840_v13  ;;  %v7922_v13 = vld [vmem:[#allocation2 + $0xac] sm:$0xf]  ;;  %v12269_v23 = vrot.slane %v7921_v4, 9 }
 0x4c8   : > { %v8067_v46 = vrot.slane %v7922_v13, 5  ;;  %v7925_v13 = vld [vmem:[#allocation2 + $0xb8] sm:$0xf] }
 0x4c9   : > { %10378 = vmatmul.bf16.gmra.mxu1 %v12488_v44 }
 0x4ca   : > { %v8068_v44 = vsel %vm14112_vm5, %v12269_v23, %v8067_v46  ;;  %v8069_v34 = vrot.slane %v8067_v46, 4  ;;  %v8074_v46 = vrot.slane %v7925_v13, 5 }
 0x4cb   : > { %8149 = vst [vmem:[#allocation3 + $0x380] sm:$0xf] %v8068_v44 }
 0x4cc   : > { %v8071_v48 = vsel %vm14112_vm5, %v8069_v34, %v8070_v45  ;;  %v8076_v44 = vrot.slane %v8074_v46, 4  ;;  %v8077_v34 = vrot.slane %v7926_v53, 5 }
 0x4cd   : > { %8150 = vst [vmem:[#allocation3 + $0x3a4] sm:$0xf] %v8071_v48  ;;  %v13139_v48 = vld [vmem:[%s13734_s15 + $0x14] sm:$0x1] }
 0x4ce   : > { %v10065_v57 = vpop.f32.mrf.mxu1  ;;  %v8078_v62 = vsel %vm14112_vm5, %v8076_v44, %v8077_v34  ;;  %v10502_v24 = vshll.u32 %v13139_v48, 16  ;;  %v7928_v34 = vld [vmem:[#allocation2 + $0xc4] sm:$0xf]  ;;  %v16735_v48 = vpop.f32.mrf.mxu2 }
 0x4cf   : > { %v16689_v2 = vadd.f32 %v10065_v57, %v9977_v8  ;;  %v10486_v8 = vshll.u32 %v13137_v61, 16  ;;  %8152 = vst [vmem:[#allocation3 + $0x3ec] sm:$0xf] %v8078_v62 }
 0x4d1   : > { %v10488_v57 = vrot.slane %v10486_v8, 5  ;;  %v13140_v8 = vld [vmem:[%s13734_s15 + $0x18] sm:$0xf] }
 0x4d2   : > { %v10510_v19 = vshll.u32 %v13140_v8, 16 }
 0x4d4   : > { %v10512_v13 = vrot.slane %v10510_v19, 5 }
 0x4d6   : > { %v10068_v10 = vpop.f32.mrf.mxu1 }
 0x4d7   : > { %v16695_v21 = vadd.f32 %v10068_v10, %v9980_v16  ;;  %v13138_v16 = vld [vmem:[%s13734_s15 + $0x10] sm:$0xf]  ;;  %v7924_v10 = vld [vmem:[#allocation2 + $0xb4] sm:$0xe] }
 0x4d8   : > { %v10496_v55 = vshrl.u32 %v13138_v16, 16  ;;  %v10492_v4 = vshll.u32 %v13138_v16, 16  ;;  %v12270_v23 = vrot.slane %v7924_v10, 9  ;;  %v10504_v10 = vrot.slane %v10502_v24, 5 }
 0x4d9   : > { %10383 = vmatmul.bf16.gmra.mxu1 %v12524_v15  ;;  %v10489_v15 = vor.u32 %v10488_v57, %v10485_v47  ;;  %v13484_v47 = vld [vmem:[#allocation3 + $0x280] sm:$0xf0]  ;;  %v10266_v57 = vadd.f32 %v16578_v29, %v16520_v56 }
 0x4da   : > { %v10498_v11 = vrot.slane %v10496_v55, 4  ;;  %v10494_v61 = vrot.slane %v10492_v4, 5 }
 0x4dc   : > { %v10499_v33 = vor.u32 %v10498_v11, %v10494_v61 }
 0x4de   : > { %v10070_v35 = vpop.f32.mrf.mxu1  ;;  %v10500_v16 = vrot.slane %v10499_v33, 4 }
 0x4df   : > { %v16701_v28 = vadd.f32 %v10070_v35, %v9982_v42  ;;  %v8075_v42 = vsel %vm14112_vm5, %v12270_v23, %v8074_v46  ;;  %v10490_v35 = vrot.slane %v10489_v15, 4  ;;  %v12595_v15 = vld [vmem:[#allocation3 + $0x260] sm:$0xf]  ;;  %v13141_v46 = vld [vmem:[%s13734_s15 + $0x1c] sm:$0xf] }
 0x4e0   : > { %8151 = vst [vmem:[#allocation3 + $0x3c8] sm:$0xf] %v8075_v42  ;;  %v12596_v23 = vor.u32 %v13484_v47, %v12595_v15  ;;  %v10505_v56 = vsel %vm13858_vm2, %v10500_v16, %v10504_v10  ;;  %v10520_v29 = vshrl.u32 %v13141_v46, 16  ;;  %v10516_v44 = vshll.u32 %v13141_v46, 16  ;;  %v13142_v16 = vld [vmem:[%s13734_s15 + $0x20] sm:$0x1]  ;;  %v16745_v15 = vpop.f32.mrf.mxu3 }
 0x4e1   : > { %v10899_v62 = vunpack.c.l.bf16 %v10505_v56  ;;  %v13143_v10 = vld [vmem:[%s13734_s15 + $0x24] sm:$0xf]  ;;  %v16754_v56 = vpop.f32.mrf.mxu2 }
 0x4e2   : > { %v10522_v33 = vrot.slane %v10520_v29, 4  ;;  %v13493_v46 = vld [vmem:[#allocation3 + $0x2c8] sm:$0xf0] }
 0x4e6   : > { %v10073_v37 = vpop.f32.mrf.mxu1 }
 0x4e7   : > { %v16708_v39 = vadd.f32 %v10073_v37, %v9985_v12  ;;  %v10495_v12 = vsel %vm13858_vm2, %v10490_v35, %v10494_v61  ;;  %v10507_v37 = vshrl.u32 %v13140_v8, 16  ;;  %v8081_v61 = vrot.slane %v7928_v34, 5 }
 0x4e8   : > { %v10268_v8 = vadd.f32 %v16595_v32, %v16533_v40 }
 0x4e9   : > { %10388 = vmatmul.bf16.gmra.mxu1 %v12560_v27  ;;  %v10898_v27 = vunpack.c.l.bf16 %v10495_v12  ;;  %v10509_v4 = vrot.slane %v10507_v37, 4  ;;  %v8083_v12 = vrot.slane %v8081_v61, 4 }
 0x4eb   : > { %v10513_v42 = vor.u32 %v10512_v13, %v10509_v4  ;;  %v10526_v13 = vshll.u32 %v13142_v16, 16 }
 0x4ed   : > { %v10514_v47 = vrot.slane %v10513_v42, 4  ;;  %v12631_v42 = vld [vmem:[#allocation3 + $0x2a8] sm:$0xf]  ;;  %v10528_v34 = vrot.slane %v10526_v13, 5  ;;  %v16768_v13 = vpop.f32.mrf.mxu2 }
 0x4ee   : > { %v10075_v45 = vpop.f32.mrf.mxu1 }
 0x4ef   : > { %v16716_v52 = vadd.f32 %v10075_v45, %v9987_v22  ;;  %v7927_v22 = vld [vmem:[#allocation2 + $0xc0] sm:$0xe]  ;;  %v7929_v45 = vld [vmem:[#allocation2 + $0xc8] sm:$0x1] }
 0x4f0   : > { %v12271_v35 = vrot.slane %v7927_v22, 9  ;;  %v8084_v37 = vrot.slane %v7929_v45, 5  ;;  %v16750_v22 = vpop.f32.mrf.mxu0 }
 0x4f2   : > { %v8082_v24 = vsel %vm14112_vm5, %v12271_v35, %v8081_v61 }
 0x4f3   : > { %8153 = vst [vmem:[#allocation3 + $0x410] sm:$0xf] %v8082_v24 }
 0x4f6   : > { %v10354_v55 = vpop.f32.mrf.mxu1 }
 0x4f7   : > { %v10355_v53 = vadd.f32 %v10354_v55, %v10266_v57  ;;  %v10518_v57 = vrot.slane %v10516_v44, 5  ;;  %v8085_v55 = vsel %vm14112_vm5, %v8083_v12, %v8084_v37  ;;  %v16760_v37 = vpop.f32.mrf.mxu3 }
 0x4f8   : > { %8154 = vst [vmem:[#allocation3 + $0x434] sm:$0xf] %v8085_v55  ;;  %v16764_v55 = vpop.f32.mrf.mxu0 }
 0x4f9   : > { %v10930_v11 = vadd.f32 %v10898_v27, %v10355_v53  ;;  %10393 = vmatmul.bf16.gmra.mxu1 %v12596_v23  ;;  %v10523_v32 = vor.u32 %v10522_v33, %v10518_v57  ;;  %v10519_v4 = vsel %vm13858_vm2, %v10514_v47, %v10518_v57  ;;  %v10531_v53 = vshrl.u32 %v13143_v10, 16 }
 0x4fa   : > { %v10534_v23 = vshll.u32 %v13143_v10, 16 }
 0x4fb   : > { %10962 = vst [vmem:[%s16730_s20] sm:$0xff] %v10930_v11  ;;  %v10900_v11 = vunpack.c.l.bf16 %v10519_v4  ;;  %v10524_v44 = vrot.slane %v10523_v32, 4  ;;  %v10533_v45 = vrot.slane %v10531_v53, 4  ;;  %v13145_v32 = vld [vmem:[%s13734_s15 + $0x2c] sm:$0x1]  ;;  %v13146_v4 = vld [vmem:[%s13734_s15 + $0x30] sm:$0xf] }
 0x4fc   : > { %v10536_v35 = vrot.slane %v10534_v23, 5 }
 0x4fd   : > { %v10529_v0 = vsel %vm13858_vm2, %v10524_v44, %v10528_v34 }
 0x4fe   : > { %v10356_v19 = vpop.f32.mrf.mxu1  ;;  %v10537_v49 = vor.u32 %v10536_v35, %v10533_v45  ;;  %v10901_v47 = vunpack.c.l.bf16 %v10529_v0  ;;  %v12667_v45 = vld [vmem:[#allocation3 + $0x2f0] sm:$0xf]  ;;  %v13147_v0 = vld [vmem:[%s13734_s15 + $0x34] sm:$0xf] }
 0x4ff   : > { %v10357_v27 = vadd.f32 %v10356_v19, %v10268_v8  ;;  %v12632_v8 = vor.u32 %v13493_v46, %v12631_v42  ;;  %v10273_v19 = vadd.f32 %v16629_v7, %v16561_v6  ;;  %v10555_v6 = vshrl.u32 %v13146_v4, 16  ;;  %v16775_v44 = vpop.f32.mrf.mxu3 }
 0x500   : > { %v10538_v16 = vrot.slane %v10537_v49, 4  ;;  %v10558_v7 = vshll.u32 %v13146_v4, 16  ;;  %v16778_v49 = vpop.f32.mrf.mxu0 }
 0x501   : > { %v10931_v40 = vadd.f32 %v10899_v62, %v10357_v27  ;;  %v13144_v62 = vld [vmem:[%s13734_s15 + $0x28] sm:$0xf] }
 0x502   : > { %v10544_v24 = vshrl.u32 %v13144_v62, 16  ;;  %v10540_v12 = vshll.u32 %v13144_v62, 16  ;;  %v10560_v62 = vrot.slane %v10558_v7, 5 }
 0x503   : > { %10963 = vst [vmem:[%s16730_s20 + $0x8] sm:$0xff] %v10931_v40 }
 0x504   : > { %v10546_v57 = vrot.slane %v10544_v24, 4  ;;  %v10542_v10 = vrot.slane %v10540_v12, 5 }
 0x506   : > { %v10359_v29 = vpop.f32.mrf.mxu1  ;;  %v10547_v23 = vor.u32 %v10546_v57, %v10542_v10  ;;  %v10543_v46 = vsel %vm13858_vm2, %v10538_v16, %v10542_v10  ;;  %v10568_v57 = vshrl.u32 %v13147_v0, 16 }
 0x507   : > { %v10360_v61 = vadd.f32 %v10359_v29, %v10271_v54  ;;  %v10550_v54 = vshll.u32 %v13145_v32, 16  ;;  %v10276_v29 = vadd.f32 %v16647_v43, %v16572_v5  ;;  %v10902_v42 = vunpack.c.l.bf16 %v10543_v46  ;;  %v16780_v5 = vpop.f32.mrf.mxu2  ;;  %v13148_v46 = vld [vmem:[%s13734_s15 + $0x38] sm:$0x1] }
 0x508   : > { %v10548_v35 = vrot.slane %v10547_v23, 4  ;;  %v10570_v4 = vrot.slane %v10568_v57, 4 }
 0x509   : > { %v10932_v33 = vadd.f32 %v10900_v11, %v10360_v61  ;;  %10398 = vmatmul.bf16.gmra.mxu1 %v12632_v8  ;;  %v13502_v11 = vld [vmem:[#allocation3 + $0x310] sm:$0xf0]  ;;  %v10552_v61 = vrot.slane %v10550_v54, 5  ;;  %v10557_v8 = vrot.slane %v10555_v6, 4  ;;  %v16789_v54 = vpop.f32.mrf.mxu3 }
 0x50a   : > { %v12668_v24 = vor.u32 %v13502_v11, %v12667_v45  ;;  %v13511_v45 = vld [vmem:[#allocation3 + $0x358] sm:$0xf0] }
 0x50b   : > { %10964 = vst [vmem:[%s16730_s20 + $0x10] sm:$0xff] %v10932_v33  ;;  %v10553_v43 = vsel %vm13858_vm2, %v10548_v35, %v10552_v61  ;;  %v10281_v35 = vadd.f32 %v16669_v41, %v16602_v1 }
 0x50c   : > { %v10903_v16 = vunpack.c.l.bf16 %v10553_v43  ;;  %v13150_v43 = vld [vmem:[%s13734_s15 + $0x40] sm:$0xf] }
 0x50d   : > { %v10592_v41 = vshrl.u32 %v13150_v43, 16 }
 0x50e   : > { %v10361_v27 = vpop.f32.mrf.mxu1 }
 0x50f   : > { %v10362_v40 = vadd.f32 %v10361_v27, %v10273_v19  ;;  %v10561_v19 = vor.u32 %v10560_v62, %v10557_v8  ;;  %v10278_v27 = vadd.f32 %v16663_v26, %v16585_v51  ;;  %v10574_v51 = vshll.u32 %v13148_v46, 16  ;;  %v16793_v26 = vpop.f32.mrf.mxu0 }
 0x511   : > { %v10933_v53 = vadd.f32 %v10901_v47, %v10362_v40  ;;  %v10564_v47 = vshll.u32 %v13147_v0, 16  ;;  %v10562_v40 = vrot.slane %v10561_v19, 4 }
 0x513   : > { %10965 = vst [vmem:[%s16730_s20 + $0x18] sm:$0xff] %v10933_v53  ;;  %v10566_v32 = vrot.slane %v10564_v47, 5  ;;  %v13149_v53 = vld [vmem:[%s13734_s15 + $0x3c] sm:$0xf] }
 0x514   : > { %v10579_v7 = vshrl.u32 %v13149_v53, 16  ;;  %v10582_v11 = vshll.u32 %v13149_v53, 16  ;;  %v10283_v53 = vadd.f32 %v16679_v9, %v16619_v20 }
 0x516   : > { %v10364_v34 = vpop.f32.mrf.mxu1  ;;  %v10581_v8 = vrot.slane %v10579_v7, 4  ;;  %v10584_v62 = vrot.slane %v10582_v11, 5 }
 0x517   : > { %v10365_v33 = vadd.f32 %v10364_v34, %v10276_v29  ;;  %v10567_v29 = vsel %vm13858_vm2, %v10562_v40, %v10566_v32  ;;  %v16796_v34 = vpop.f32.mrf.mxu2  ;;  %v17119_v40 = vld [vmem:[#allocation6_spill] sm:$0xff] }
 0x518   : > { %v10904_v61 = vunpack.c.l.bf16 %v10567_v29  ;;  %v10594_v29 = vrot.slane %v10592_v41, 4 }
 0x519   : > { %v10934_v12 = vadd.f32 %v10902_v42, %v10365_v33  ;;  %10403 = vmatmul.bf16.gmra.mxu1 %v12668_v24  ;;  %v10571_v42 = vor.u32 %v10570_v4, %v10566_v32  ;;  %v12703_v24 = vld [vmem:[#allocation3 + $0x338] sm:$0xf]  ;;  %v10108_v32 = vadd.f32 %v16735_v48, %v17119_v40  ;;  %v16808_v4 = vpop.f32.mrf.mxu0 }
 0x51a   : > { %v12704_v47 = vor.u32 %v13511_v45, %v12703_v24  ;;  %v13152_v45 = vld [vmem:[%s13734_s15 + $0x48] sm:$0xf]  ;;  %v13520_v24 = vld [vmem:[#allocation3 + $0x3a0] sm:$0xf0] }
 0x51b   : > { %10966 = vst [vmem:[%s16730_s20 + $0x20] sm:$0xff] %v10934_v12  ;;  %v10572_v0 = vrot.slane %v10571_v42, 4  ;;  %v10576_v12 = vrot.slane %v10574_v51, 5  ;;  %v13151_v51 = vld [vmem:[%s13734_s15 + $0x44] sm:$0x1]  ;;  %v10603_v20 = vshrl.u32 %v13152_v45, 16 }
 0x51c   : > { %v10606_v9 = vshll.u32 %v13152_v45, 16 }
 0x51d   : > { %v10577_v1 = vsel %vm13858_vm2, %v10572_v0, %v10576_v12  ;;  %v10110_v0 = vadd.f32 %v16754_v56, %v16465_v63 }
 0x51e   : > { %v10366_v10 = vpop.f32.mrf.mxu1 }
 0x51f   : > { %v10367_v23 = vadd.f32 %v10366_v10, %v10278_v27  ;;  %v10585_v27 = vor.u32 %v10584_v62, %v10581_v8  ;;  %v16801_v10 = vpop.f32.mrf.mxu3  ;;  %v16812_v7 = vpop.f32.mrf.mxu2  ;;  %v10598_v62 = vshll.u32 %v13151_v51, 16 }
 0x521   : > { %v10935_v6 = vadd.f32 %v10903_v16, %v10367_v23  ;;  %v10588_v16 = vshll.u32 %v13150_v43, 16  ;;  %v10905_v23 = vunpack.c.l.bf16 %v10577_v1  ;;  %v10586_v46 = vrot.slane %v10585_v27, 4  ;;  %v16825_v1 = vpop.f32.mrf.mxu0 }
 0x522   : > { %v10605_v27 = vrot.slane %v10603_v20, 4 }
 0x523   : > { %10967 = vst [vmem:[%s16730_s20 + $0x28] sm:$0xff] %v10935_v6  ;;  %v10590_v6 = vrot.slane %v10588_v16, 5  ;;  %v10608_v16 = vrot.slane %v10606_v9, 5 }
 0x525   : > { %v10591_v48 = vsel %vm13858_vm2, %v10586_v46, %v10590_v6  ;;  %v10595_v8 = vor.u32 %v10594_v29, %v10590_v6  ;;  %v10609_v56 = vor.u32 %v10608_v16, %v10605_v27 }
 0x526   : > { %v10369_v33 = vpop.f32.mrf.mxu1  ;;  %v10906_v43 = vunpack.c.l.bf16 %v10591_v48  ;;  %v13155_v48 = vld [vmem:[%s13734_s15 + $0x54] sm:$0xf] }
 0x527   : > { %v10370_v19 = vadd.f32 %v10369_v33, %v10281_v35  ;;  %v10197_v35 = vadd.f32 %v16745_v15, %v10108_v32  ;;  %v16820_v33 = vpop.f32.mrf.mxu3  ;;  %v13153_v32 = vld [vmem:[%s13734_s15 + $0x4c] sm:$0xf]  ;;  %v10610_v45 = vrot.slane %v10609_v56, 4 }
 0x528   : > { %v10612_v46 = vshll.u32 %v13153_v32, 16  ;;  %v10616_v6 = vshrl.u32 %v13153_v32, 16 }
 0x529   : > { %v10936_v57 = vadd.f32 %v10904_v61, %v10370_v19  ;;  %10408 = vmatmul.bf16.gmra.mxu1 %v12704_v47  ;;  %v10286_v12 = vadd.f32 %v16750_v22, %v10197_v35  ;;  %v12739_v19 = vld [vmem:[#allocation3 + $0x380] sm:$0xf]  ;;  %v10596_v47 = vrot.slane %v10595_v8, 4  ;;  %v16842_v9 = vpop.f32.mrf.mxu0 }
 0x52a   : > { %v12740_v40 = vor.u32 %v13520_v24, %v12739_v19  ;;  %v10614_v35 = vrot.slane %v10612_v46, 5  ;;  %v13529_v19 = vld [vmem:[#allocation3 + $0x3e8] sm:$0xf0] }
 0x52b   : > { %10968 = vst [vmem:[%s16730_s20 + $0x30] sm:$0xff] %v10936_v57  ;;  %v10600_v57 = vrot.slane %v10598_v62, 5  ;;  %v13154_v62 = vld [vmem:[%s13734_s15 + $0x50] sm:$0x1] }
 0x52d   : > { %v10601_v22 = vsel %vm13858_vm2, %v10596_v47, %v10600_v57 }
 0x52e   : > { %v10371_v11 = vpop.f32.mrf.mxu1 }
 0x52f   : > { %v10372_v42 = vadd.f32 %v10371_v11, %v10283_v53  ;;  %v16828_v53 = vpop.f32.mrf.mxu2  ;;  %v10113_v11 = vadd.f32 %v16768_v13, %v16487_v50  ;;  %v16837_v51 = vpop.f32.mrf.mxu3  ;;  %v10630_v50 = vshll.u32 %v13155_v48, 16  ;;  %v10615_v13 = vsel %vm13858_vm2, %v10610_v45, %v10614_v35 }
 0x530   : > { %v10908_v47 = vunpack.c.l.bf16 %v10615_v13 }
 0x531   : > { %v10937_v61 = vadd.f32 %v10905_v23, %v10372_v42  ;;  %v10199_v23 = vadd.f32 %v16760_v37, %v10110_v0  ;;  %v10907_v42 = vunpack.c.l.bf16 %v10601_v22  ;;  %v10202_v20 = vadd.f32 %v16775_v44, %v10113_v11 }
 0x532   : > { %v10627_v0 = vshrl.u32 %v13155_v48, 16  ;;  %v10632_v27 = vrot.slane %v10630_v50, 5 }
 0x533   : > { %10969 = vst [vmem:[%s16730_s20 + $0x38] sm:$0xff] %v10937_v61  ;;  %v10288_v29 = vadd.f32 %v16764_v55, %v10199_v23  ;;  %v10618_v61 = vrot.slane %v10616_v6, 4  ;;  %v10291_v44 = vadd.f32 %v16778_v49, %v10202_v20  ;;  %v13156_v23 = vld [vmem:[%s13734_s15 + $0x58] sm:$0xf]  ;;  %v13157_v20 = vld [vmem:[%s13734_s15 + $0x5c] sm:$0x1] }
 0x534   : > { %v10629_v57 = vrot.slane %v10627_v0, 4  ;;  %v10636_v49 = vshll.u32 %v13156_v23, 16  ;;  %v10640_v11 = vshrl.u32 %v13156_v23, 16 }
 0x536   : > { %v10374_v15 = vpop.f32.mrf.mxu1 }
 0x537   : > { %v10375_v41 = vadd.f32 %v10374_v15, %v10286_v12  ;;  %v16844_v55 = vpop.f32.mrf.mxu2  ;;  %v10619_v12 = vor.u32 %v10618_v61, %v10614_v35  ;;  %v10115_v15 = vadd.f32 %v16780_v5, %v16499_v18  ;;  %v16853_v56 = vpop.f32.mrf.mxu3  ;;  %v10633_v18 = vor.u32 %v10632_v27, %v10629_v57 }
 0x538   : > { %v10638_v61 = vrot.slane %v10636_v49, 5 }
 0x539   : > { %v10938_v63 = vadd.f32 %v10906_v43, %v10375_v41  ;;  %10413 = vmatmul.bf16.gmra.mxu1 %v12740_v40  ;;  %v10622_v43 = vshll.u32 %v13154_v62, 16  ;;  %v12775_v41 = vld [vmem:[#allocation3 + $0x3c8] sm:$0xf]  ;;  %v10620_v40 = vrot.slane %v10619_v12, 4  ;;  %v10204_v46 = vadd.f32 %v16789_v54, %v10115_v15  ;;  %v13538_v15 = vld [vmem:[#allocation3 + $0x430] sm:$0xf0] }
 0x53a   : > { %v12776_v22 = vor.u32 %v13529_v19, %v12775_v41  ;;  %v10634_v35 = vrot.slane %v10633_v18, 4  ;;  %v10646_v12 = vshll.u32 %v13157_v20, 16  ;;  %v17120_v19 = vld [vmem:[#allocation7_spill] sm:$0xff] }
 0x53b   : > { %10970 = vst [vmem:[%s16730_s20 + $0x40] sm:$0xff] %v10938_v63  ;;  %v10624_v32 = vrot.slane %v10622_v43, 5  ;;  %v10293_v54 = vadd.f32 %v16793_v26, %v10204_v46  ;;  %v12811_v41 = vld [vmem:[#allocation3 + $0x410] sm:$0xf]  ;;  %v13161_v20 = vld [vmem:[%s13734_s15 + $0x6c] sm:$0xf] }
 0x53c   : > { %v10639_v13 = vsel %vm13858_vm2, %v10634_v35, %v10638_v61  ;;  %v12812_v46 = vor.u32 %v13538_v15, %v12811_v41  ;;  %v13547_v15 = vld [vmem:[#allocation3 + $0x478] sm:$0xf0] }
 0x53d   : > { %v10625_v5 = vsel %vm13858_vm2, %v10620_v40, %v10624_v32  ;;  %v10910_v57 = vunpack.c.l.bf16 %v10639_v13  ;;  %v10648_v32 = vrot.slane %v10646_v12, 5  ;;  %v10675_v12 = vshrl.u32 %v13161_v20, 16 }
 0x53e   : > { %v10376_v37 = vpop.f32.mrf.mxu1  ;;  %v10909_v45 = vunpack.c.l.bf16 %v10625_v5 }
 0x53f   : > { %v10377_v8 = vadd.f32 %v10376_v37, %v10288_v29  ;;  %v16858_v29 = vpop.f32.mrf.mxu0  ;;  %v16863_v37 = vpop.f32.mrf.mxu2 }
 0x541   : > { %v10939_v24 = vadd.f32 %v10907_v42, %v10377_v8  ;;  %v10118_v42 = vadd.f32 %v16796_v34, %v16517_v30  ;;  %v10642_v8 = vrot.slane %v10640_v11, 4  ;;  %v16871_v30 = vpop.f32.mrf.mxu3 }
 0x543   : > { %10971 = vst [vmem:[%s16730_s20 + $0x48] sm:$0xff] %v10939_v24  ;;  %v13158_v24 = vld [vmem:[%s13734_s15 + $0x60] sm:$0xf]  ;;  %v10207_v0 = vadd.f32 %v16801_v10, %v10118_v42  ;;  %v10643_v34 = vor.u32 %v10642_v8, %v10638_v61  ;;  %v17121_v42 = vld [vmem:[#allocation9_spill] sm:$0xff] }
 0x544   : > { %v10651_v26 = vshrl.u32 %v13158_v24, 16  ;;  %v10654_v43 = vshll.u32 %v13158_v24, 16 }
 0x545   : > { %v10296_v10 = vadd.f32 %v16808_v4, %v10207_v0  ;;  %v10644_v40 = vrot.slane %v10643_v34, 4 }
 0x546   : > { %v10379_v16 = vpop.f32.mrf.mxu1  ;;  %v10653_v23 = vrot.slane %v10651_v26, 4  ;;  %v10678_v26 = vshll.u32 %v13161_v20, 16 }
 0x547   : > { %v10380_v63 = vadd.f32 %v10379_v16, %v10291_v44  ;;  %v10120_v44 = vadd.f32 %v16812_v7, %v17120_v19  ;;  %v16879_v27 = vpop.f32.mrf.mxu2  ;;  %v10649_v4 = vsel %vm13858_vm2, %v10644_v40, %v10648_v32  ;;  %v10677_v40 = vrot.slane %v10675_v12, 4 }
 0x548   : > { %v10911_v61 = vunpack.c.l.bf16 %v10649_v4  ;;  %v10680_v32 = vrot.slane %v10678_v26, 5 }
 0x549   : > { %v10940_v6 = vadd.f32 %v10908_v47, %v10380_v63  ;;  %10418 = vmatmul.bf16.gmra.mxu1 %v12776_v22  ;;  %v16876_v47 = vpop.f32.mrf.mxu0  ;;  %v10656_v63 = vrot.slane %v10654_v43, 5  ;;  %v10209_v18 = vadd.f32 %v16820_v33, %v10120_v44  ;;  %v12847_v43 = vld [vmem:[#allocation3 + $0x458] sm:$0xf] }
 0x54a   : > { %v12848_v41 = vor.u32 %v13547_v15, %v12847_v43 }
 0x54b   : > { %10972 = vst [vmem:[%s16730_s20 + $0x50] sm:$0xff] %v10940_v6  ;;  %v13159_v6 = vld [vmem:[%s13734_s15 + $0x64] sm:$0xf]  ;;  %v10657_v49 = vor.u32 %v10656_v63, %v10653_v23  ;;  %v10298_v35 = vadd.f32 %v16825_v1, %v10209_v18 }
 0x54c   : > { %v10660_v5 = vshll.u32 %v13159_v6, 16  ;;  %v10664_v11 = vshrl.u32 %v13159_v6, 16  ;;  %v13162_v6 = vld [vmem:[%s13734_s15 + $0x70] sm:$0xf] }
 0x54e   : > { %v10381_v48 = vpop.f32.mrf.mxu1  ;;  %v10662_v8 = vrot.slane %v10660_v5, 5 }
 0x54f   : > { %v10382_v62 = vadd.f32 %v10381_v48, %v10293_v54  ;;  %v10123_v54 = vadd.f32 %v16828_v53, %v17121_v42  ;;  %v10658_v48 = vrot.slane %v10657_v49, 4  ;;  %v16896_v34 = vpop.f32.mrf.mxu2  ;;  %v10688_v42 = vshrl.u32 %v13162_v6, 16 }
 0x551   : > { %v10941_v50 = vadd.f32 %v10909_v45, %v10382_v62  ;;  %v16888_v45 = vpop.f32.mrf.mxu3  ;;  %v10666_v62 = vrot.slane %v10664_v11, 4  ;;  %v16892_v24 = vpop.f32.mrf.mxu0  ;;  %v10212_v13 = vadd.f32 %v16837_v51, %v10123_v54  ;;  %v10663_v1 = vsel %vm13858_vm2, %v10658_v48, %v10662_v8  ;;  %v17123_v54 = vld [vmem:[#allocation12_spill] sm:$0xff] }
 0x552   : > { %v10912_v51 = vunpack.c.l.bf16 %v10663_v1 }
 0x553   : > { %10973 = vst [vmem:[%s16730_s20 + $0x58] sm:$0xff] %v10941_v50  ;;  %v13160_v50 = vld [vmem:[%s13734_s15 + $0x68] sm:$0x1]  ;;  %v10667_v19 = vor.u32 %v10666_v62, %v10662_v8  ;;  %v10690_v62 = vrot.slane %v10688_v42, 4 }
 0x554   : > { %v10670_v44 = vshll.u32 %v13160_v50, 16  ;;  %v13164_v50 = vld [vmem:[%s13734_s15 + $0x78] sm:$0xf] }
 0x555   : > { %v10702_v43 = vshll.u32 %v13164_v50, 16 }
 0x556   : > { %v10384_v16 = vpop.f32.mrf.mxu1 }
 0x557   : > { %v10385_v22 = vadd.f32 %v10384_v16, %v10296_v10  ;;  %v17122_v10 = vld [vmem:[#allocation10_spill] sm:$0xff]  ;;  %v10301_v16 = vadd.f32 %v16842_v9, %v10212_v13  ;;  %v10681_v9 = vor.u32 %v10680_v32, %v10677_v40  ;;  %v16910_v5 = vpop.f32.mrf.mxu2  ;;  %v10704_v40 = vrot.slane %v10702_v43, 5  ;;  %v13168_v43 = vld [vmem:[%s13734_s15 + $0x88] sm:$0xf] }
 0x559   : > { %v10942_v7 = vadd.f32 %v10910_v57, %v10385_v22  ;;  %10423 = vmatmul.bf16.gmra.mxu1 %v12812_v46  ;;  %v10125_v57 = vadd.f32 %v16844_v55, %v17122_v10  ;;  %v16904_v23 = vpop.f32.mrf.mxu3  ;;  %v10668_v22 = vrot.slane %v10667_v19, 4  ;;  %v10672_v46 = vrot.slane %v10670_v44, 5  ;;  %v16908_v4 = vpop.f32.mrf.mxu0 }
 0x55a   : > { %v10684_v55 = vshll.u32 %v13162_v6, 16  ;;  %v10130_v44 = vadd.f32 %v16879_v27, %v16580_v17 }
 0x55b   : > { %10974 = vst [vmem:[%s16730_s20 + $0x60] sm:$0xff] %v10942_v7  ;;  %v10214_v7 = vadd.f32 %v16853_v56, %v10125_v57  ;;  %v10673_v11 = vsel %vm13858_vm2, %v10668_v22, %v10672_v46 }
 0x55c   : > { %v10686_v48 = vrot.slane %v10684_v55, 5  ;;  %v10219_v22 = vadd.f32 %v16888_v45, %v10130_v44 }
 0x55d   : > { %v10303_v56 = vadd.f32 %v16858_v29, %v10214_v7  ;;  %v10699_v29 = vshrl.u32 %v13164_v50, 16  ;;  %v10133_v7 = vadd.f32 %v16896_v34, %v16593_v3 }
 0x55e   : > { %v10386_v33 = vpop.f32.mrf.mxu1  ;;  %v10691_v1 = vor.u32 %v10690_v62, %v10686_v48 }
 0x55f   : > { %v10387_v0 = vadd.f32 %v10386_v33, %v10298_v35  ;;  %v10128_v35 = vadd.f32 %v16863_v37, %v17123_v54  ;;  %v10682_v33 = vrot.slane %v10681_v9, 4  ;;  %v10137_v19 = vpop.f32.mrf.mxu2  ;;  %v10308_v9 = vadd.f32 %v16892_v24, %v10219_v22 }
 0x561   : > { %v10943_v53 = vadd.f32 %v10911_v61, %v10387_v0  ;;  %v10913_v61 = vunpack.c.l.bf16 %v10673_v11  ;;  %v13163_v0 = vld [vmem:[%s13734_s15 + $0x74] sm:$0x1]  ;;  %v10223_v13 = vpop.f32.mrf.mxu3  ;;  %v10687_v26 = vsel %vm13858_vm2, %v10682_v33, %v10686_v48  ;;  %v10312_v15 = vpop.f32.mrf.mxu0  ;;  %v13166_v33 = vld [vmem:[%s13734_s15 + $0x80] sm:$0x1]  ;;  %v10222_v48 = vadd.f32 %v16904_v23, %v10133_v7 }
 0x562   : > { %v10694_v37 = vshll.u32 %v13163_v0, 16  ;;  %v10914_v57 = vunpack.c.l.bf16 %v10687_v26  ;;  %v10718_v34 = vshll.u32 %v13166_v33, 16  ;;  %v10135_v0 = vadd.f32 %v16910_v5, %v16608_v58 }
 0x563   : > { %10975 = vst [vmem:[%s16730_s20 + $0x68] sm:$0xff] %v10943_v53  ;;  %v10217_v53 = vadd.f32 %v16871_v30, %v10128_v35  ;;  %v10732_v58 = vshll.u32 %v13168_v43, 16  ;;  %v10736_v5 = vshrl.u32 %v13168_v43, 16 }
 0x565   : > { %v10306_v10 = vadd.f32 %v16876_v47, %v10217_v53  ;;  %v10311_v53 = vadd.f32 %v16908_v4, %v10222_v48  ;;  %v10734_v22 = vrot.slane %v10732_v58, 5 }
 0x566   : > { %v10389_v63 = vpop.f32.mrf.mxu1 }
 0x567   : > { %v10390_v18 = vadd.f32 %v10389_v63, %v10301_v16  ;;  %v10692_v16 = vrot.slane %v10691_v1, 4  ;;  %v13165_v63 = vld [vmem:[%s13734_s15 + $0x7c] sm:$0xf]  ;;  %v10139_v45 = vpop.f32.mrf.mxu2 }
 0x568   : > { %v10708_v47 = vshll.u32 %v13165_v63, 16  ;;  %v10712_v27 = vshrl.u32 %v13165_v63, 16 }
 0x569   : > { %v10944_v49 = vadd.f32 %v10912_v51, %v10390_v18  ;;  %10428 = vmatmul.bf16.gmra.mxu1 %v12848_v41  ;;  %v10696_v51 = vrot.slane %v10694_v37, 5  ;;  %v10701_v41 = vrot.slane %v10699_v29, 4  ;;  %v10226_v6 = vpop.f32.mrf.mxu3  ;;  %v10720_v29 = vrot.slane %v10718_v34, 5 }
 0x56a   : > { %v10710_v54 = vrot.slane %v10708_v47, 5  ;;  %v10714_v35 = vrot.slane %v10712_v27, 4  ;;  %v13169_v47 = vld [vmem:[%s13734_s15 + $0x8c] sm:$0x1]  ;;  %v13170_v27 = vld [vmem:[%s13734_s15 + $0x90] sm:$0xf] }
 0x56b   : > { %10976 = vst [vmem:[%s16730_s20 + $0x70] sm:$0xff] %v10944_v49  ;;  %v10697_v18 = vsel %vm13858_vm2, %v10692_v16, %v10696_v51  ;;  %v10705_v17 = vor.u32 %v10704_v40, %v10701_v41  ;;  %v10315_v49 = vpop.f32.mrf.mxu0  ;;  %v10138_v41 = vadd.f32 %v10137_v19, %v16625_v14  ;;  %v10747_v19 = vshrl.u32 %v13170_v27, 16 }
 0x56c   : > { %v10915_v55 = vunpack.c.l.bf16 %v10697_v18  ;;  %v10715_v24 = vor.u32 %v10714_v35, %v10710_v54  ;;  %v17124_v35 = vld [vmem:[#allocation13_spill] sm:$0xff] }
 0x56d   : > { %v10706_v42 = vrot.slane %v10705_v17, 4  ;;  %v10227_v7 = vadd.f32 %v10226_v6, %v10138_v41 }
 0x56e   : > { %v10391_v8 = vpop.f32.mrf.mxu1  ;;  %v10716_v37 = vrot.slane %v10715_v24, 4  ;;  %v13171_v24 = vld [vmem:[%s13734_s15 + $0x94] sm:$0xf] }
 0x56f   : > { %v10392_v20 = vadd.f32 %v10391_v8, %v10303_v56  ;;  %v13167_v56 = vld [vmem:[%s13734_s15 + $0x84] sm:$0xf]  ;;  %v10711_v3 = vsel %vm13858_vm2, %v10706_v42, %v10710_v54  ;;  %v10750_v54 = vshll.u32 %v13170_v27, 16 }
 0x570   : > { %v10723_v62 = vshrl.u32 %v13167_v56, 16  ;;  %v10721_v4 = vsel %vm13858_vm2, %v10716_v37, %v10720_v29 }
 0x571   : > { %v10945_v12 = vadd.f32 %v10913_v61, %v10392_v20  ;;  %v10726_v20 = vshll.u32 %v13167_v56, 16  ;;  %v10228_v50 = vpop.f32.mrf.mxu3  ;;  %v10140_v56 = vadd.f32 %v10139_v45, %v17124_v35  ;;  %v10756_v45 = vshll.u32 %v13171_v24, 16 }
 0x572   : > { %v10725_v26 = vrot.slane %v10723_v62, 4  ;;  %v10749_v62 = vrot.slane %v10747_v19, 4 }
 0x573   : > { %10977 = vst [vmem:[%s16730_s20 + $0x78] sm:$0xff] %v10945_v12  ;;  %v10916_v12 = vunpack.c.l.bf16 %v10711_v3  ;;  %v10728_v23 = vrot.slane %v10726_v20, 5  ;;  %v10317_v44 = vpop.f32.mrf.mxu0  ;;  %v10752_v20 = vrot.slane %v10750_v54, 5 }
 0x575   : > { %v10729_v51 = vor.u32 %v10728_v23, %v10725_v26  ;;  %v10753_v26 = vor.u32 %v10752_v20, %v10749_v62 }
 0x576   : > { %v10394_v30 = vpop.f32.mrf.mxu1 }
 0x577   : > { %v10395_v32 = vadd.f32 %v10394_v30, %v10306_v10  ;;  %v10224_v30 = vadd.f32 %v10223_v13, %v10135_v0  ;;  %v10730_v63 = vrot.slane %v10729_v51, 4  ;;  %v10738_v13 = vrot.slane %v10736_v5, 4  ;;  %v13173_v51 = vld [vmem:[%s13734_s15 + $0x9c] sm:$0xf] }
 0x578   : > { %v10229_v0 = vadd.f32 %v10228_v50, %v10140_v56  ;;  %v10758_v50 = vrot.slane %v10756_v45, 5 }
 0x579   : > { %v10946_v46 = vadd.f32 %v10914_v57, %v10395_v32  ;;  %v10142_v57 = vpop.f32.mrf.mxu2  ;;  %v10313_v40 = vadd.f32 %v10312_v15, %v10224_v30  ;;  %v10917_v32 = vunpack.c.l.bf16 %v10721_v4  ;;  %v10739_v14 = vor.u32 %v10738_v13, %v10734_v22  ;;  %v13172_v4 = vld [vmem:[%s13734_s15 + $0x98] sm:$0x1] }
 0x57a   : > { %v10742_v15 = vshll.u32 %v13169_v47, 16  ;;  %v10143_v37 = vadd.f32 %v10142_v57, %v16649_v59  ;;  %v10318_v29 = vadd.f32 %v10317_v44, %v10229_v0  ;;  %v10754_v30 = vrot.slane %v10753_v26, 4  ;;  %v13176_v0 = vld [vmem:[%s13734_s15 + $0xa8] sm:$0xf] }
 0x57b   : > { %10978 = vst [vmem:[%s16730_s20 + $0x80] sm:$0xff] %v10946_v46  ;;  %v10231_v46 = vpop.f32.mrf.mxu3  ;;  %v10766_v44 = vshll.u32 %v13172_v4, 16 }
 0x57c   : > { %v10744_v6 = vrot.slane %v10742_v15, 5  ;;  %v10232_v5 = vadd.f32 %v10231_v46, %v10143_v37 }
 0x57e   : > { %v10396_v11 = vpop.f32.mrf.mxu1 }
 0x57f   : > { %v10397_v61 = vadd.f32 %v10396_v11, %v10308_v9  ;;  %v10320_v9 = vpop.f32.mrf.mxu0  ;;  %v10735_v11 = vsel %vm13858_vm2, %v10730_v63, %v10734_v22  ;;  %v10759_v22 = vsel %vm13858_vm2, %v10754_v30, %v10758_v50 }
 0x580   : > { %v10918_v33 = vunpack.c.l.bf16 %v10735_v11  ;;  %v10321_v13 = vadd.f32 %v10320_v9, %v10232_v5  ;;  %v10768_v11 = vrot.slane %v10766_v44, 5  ;;  %v13177_v5 = vld [vmem:[%s13734_s15 + $0xac] sm:$0xf] }
 0x581   : > { %v10947_v8 = vadd.f32 %v10915_v55, %v10397_v61  ;;  %v10144_v42 = vpop.f32.mrf.mxu2  ;;  %v10316_v61 = vadd.f32 %v10315_v49, %v10227_v7  ;;  %v10760_v49 = vshrl.u32 %v13171_v24, 16  ;;  %v10808_v44 = vshrl.u32 %v13177_v5, 16 }
 0x582   : > { %v10145_v57 = vadd.f32 %v10144_v42, %v16659_v60 }
 0x583   : > { %10979 = vst [vmem:[%s16730_s20 + $0x88] sm:$0xff] %v10947_v8  ;;  %v10740_v8 = vrot.slane %v10739_v14, 4  ;;  %v10233_v34 = vpop.f32.mrf.mxu3  ;;  %v13174_v14 = vld [vmem:[%s13734_s15 + $0xa0] sm:$0xf] }
 0x584   : > { %v10234_v19 = vadd.f32 %v10233_v34, %v10145_v57  ;;  %v10780_v56 = vshll.u32 %v13174_v14, 16  ;;  %v10784_v9 = vshrl.u32 %v13174_v14, 16  ;;  %v13175_v34 = vld [vmem:[%s13734_s15 + $0xa4] sm:$0x1] }
 0x586   : > { %v10399_v1 = vpop.f32.mrf.mxu1  ;;  %v10786_v20 = vrot.slane %v10784_v9, 4 }
 0x587   : > { %v10400_v10 = vadd.f32 %v10399_v1, %v10311_v53  ;;  %v10322_v23 = vpop.f32.mrf.mxu0 }
 0x589   : > { %v10948_v16 = vadd.f32 %v10916_v12, %v10400_v10  ;;  %v10745_v12 = vsel %vm13858_vm2, %v10740_v8, %v10744_v6  ;;  %v10147_v1 = vpop.f32.mrf.mxu2  ;;  %v10782_v6 = vrot.slane %v10780_v56, 5 }
 0x58a   : > { %v10919_v43 = vunpack.c.l.bf16 %v10745_v12  ;;  %v10148_v42 = vadd.f32 %v10147_v1, %v16667_v36  ;;  %v10798_v1 = vshll.u32 %v13176_v0, 16 }
 0x58b   : > { %10980 = vst [vmem:[%s16730_s20 + $0x90] sm:$0xff] %v10948_v16  ;;  %v10762_v16 = vrot.slane %v10760_v49, 4  ;;  %v10236_v63 = vpop.f32.mrf.mxu3  ;;  %v10787_v36 = vor.u32 %v10786_v20, %v10782_v6  ;;  %v10790_v49 = vshll.u32 %v13175_v34, 16 }
 0x58c   : > { %v10237_v12 = vadd.f32 %v10236_v63, %v10148_v42 }
 0x58d   : > { %v10763_v59 = vor.u32 %v10762_v16, %v10758_v50  ;;  %v10788_v50 = vrot.slane %v10787_v36, 4  ;;  %v10792_v16 = vrot.slane %v10790_v49, 5 }
 0x58e   : > { %v10401_v18 = vpop.f32.mrf.mxu1 }
 0x58f   : > { %v10402_v17 = vadd.f32 %v10401_v18, %v10313_v40  ;;  %v10771_v40 = vshrl.u32 %v13173_v51, 16  ;;  %v10325_v18 = vpop.f32.mrf.mxu0 }
 0x591   : > { %v10949_v55 = vadd.f32 %v10917_v32, %v10402_v17  ;;  %v10774_v32 = vshll.u32 %v13173_v51, 16  ;;  %v10920_v17 = vunpack.c.l.bf16 %v10759_v22  ;;  %v10773_v47 = vrot.slane %v10771_v40, 4  ;;  %v10149_v46 = vpop.f32.mrf.mxu2 }
 0x592   : > { %v10150_v37 = vadd.f32 %v10149_v46, %v16675_v31  ;;  %v10793_v31 = vsel %vm13858_vm2, %v10788_v50, %v10792_v16  ;;  %v10810_v46 = vrot.slane %v10808_v44, 4 }
 0x593   : > { %10981 = vst [vmem:[%s16730_s20 + $0x98] sm:$0xff] %v10949_v55  ;;  %v10776_v27 = vrot.slane %v10774_v32, 5  ;;  %v10764_v55 = vrot.slane %v10763_v59, 4  ;;  %v10804_v59 = vshll.u32 %v13177_v5, 16 }
 0x595   : > { %v10777_v35 = vor.u32 %v10776_v27, %v10773_v47  ;;  %v10769_v60 = vsel %vm13858_vm2, %v10764_v55, %v10768_v11  ;;  %v10806_v27 = vrot.slane %v10804_v59, 5  ;;  %v13178_v11 = vld [vmem:[%s13734_s15 + $0xb0] sm:$0x1] }
 0x596   : > { %v10404_v48 = vpop.f32.mrf.mxu1 }
 0x597   : > { %v10405_v3 = vadd.f32 %v10404_v48, %v10316_v61  ;;  %v10238_v61 = vpop.f32.mrf.mxu3  ;;  %v10921_v48 = vunpack.c.l.bf16 %v10769_v60  ;;  %v10778_v8 = vrot.slane %v10777_v35, 4  ;;  %v10814_v60 = vshll.u32 %v13178_v11, 16 }
 0x599   : > { %v10950_v53 = vadd.f32 %v10918_v33, %v10405_v3  ;;  %v10323_v33 = vadd.f32 %v10322_v23, %v10234_v19  ;;  %v10327_v3 = vpop.f32.mrf.mxu0  ;;  %v10783_v45 = vsel %vm13858_vm2, %v10778_v8, %v10782_v6  ;;  %v10795_v23 = vshrl.u32 %v13176_v0, 16 }
 0x59b   : > { %10982 = vst [vmem:[%s16730_s20 + $0xa0] sm:$0xff] %v10950_v53  ;;  %v10152_v53 = vpop.f32.mrf.mxu2  ;;  %v10797_v51 = vrot.slane %v10795_v23, 4 }
 0x59c   : > { %v10153_v57 = vadd.f32 %v10152_v53, %v16683_v38  ;;  %v10811_v38 = vor.u32 %v10810_v46, %v10806_v27  ;;  %v13183_v46 = vld [vmem:[%s13734_s15 + $0xc4] sm:$0xf] }
 0x59e   : > { %v10406_v10 = vpop.f32.mrf.mxu1  ;;  %v10812_v20 = vrot.slane %v10811_v38, 4 }
 0x59f   : > { %v10407_v58 = vadd.f32 %v10406_v10, %v10318_v29  ;;  %v10326_v29 = vadd.f32 %v10325_v18, %v10237_v12  ;;  %v10241_v10 = vpop.f32.mrf.mxu3 }
 0x5a1   : > { %v10951_v41 = vadd.f32 %v10919_v43, %v10407_v58  ;;  %v10922_v43 = vunpack.c.l.bf16 %v10783_v45  ;;  %v10800_v58 = vrot.slane %v10798_v1, 5  ;;  %v10330_v40 = vpop.f32.mrf.mxu0 }
 0x5a3   : > { %10983 = vst [vmem:[%s16730_s20 + $0xa8] sm:$0xff] %v10951_v41  ;;  %v10239_v41 = vadd.f32 %v10238_v61, %v10150_v37  ;;  %v10154_v63 = vpop.f32.mrf.mxu2  ;;  %v10801_v22 = vor.u32 %v10800_v58, %v10797_v51  ;;  %v13181_v51 = vld [vmem:[%s13734_s15 + $0xbc] sm:$0x1]  ;;  %v13182_v58 = vld [vmem:[%s13734_s15 + $0xc0] sm:$0xf] }
 0x5a4   : > { %v10155_v42 = vadd.f32 %v10154_v63, %v16689_v2  ;;  %v10846_v63 = vshll.u32 %v13182_v58, 16 }
 0x5a5   : > { %v10328_v18 = vadd.f32 %v10327_v3, %v10239_v41  ;;  %v10802_v47 = vrot.slane %v10801_v22, 4  ;;  %v10816_v3 = vrot.slane %v10814_v60, 5 }
 0x5a6   : > { %v10409_v7 = vpop.f32.mrf.mxu1 }
 0x5a7   : > { %v10410_v15 = vadd.f32 %v10409_v7, %v10321_v13  ;;  %v10923_v13 = vunpack.c.l.bf16 %v10793_v31  ;;  %v13179_v7 = vld [vmem:[%s13734_s15 + $0xb4] sm:$0xf]  ;;  %v10243_v14 = vpop.f32.mrf.mxu3  ;;  %v10807_v56 = vsel %vm13858_vm2, %v10802_v47, %v10806_v27  ;;  %v10817_v2 = vsel %vm13858_vm2, %v10812_v20, %v10816_v3 }
 0x5a8   : > { %v10822_v35 = vshll.u32 %v13179_v7, 16  ;;  %v10244_v0 = vadd.f32 %v10243_v14, %v10155_v42  ;;  %v10925_v37 = vunpack.c.l.bf16 %v10817_v2  ;;  %v10848_v47 = vrot.slane %v10846_v63, 5 }
 0x5a9   : > { %v10952_v54 = vadd.f32 %v10920_v17, %v10410_v15  ;;  %v10242_v15 = vadd.f32 %v10241_v10, %v10153_v57  ;;  %v10332_v9 = vpop.f32.mrf.mxu0 }
 0x5aa   : > { %v10824_v6 = vrot.slane %v10822_v35, 5  ;;  %v10333_v1 = vadd.f32 %v10332_v9, %v10244_v0 }
 0x5ab   : > { %10984 = vst [vmem:[%s16730_s20 + $0xb0] sm:$0xff] %v10952_v54  ;;  %v10819_v54 = vshrl.u32 %v13179_v7, 16  ;;  %v10157_v61 = vpop.f32.mrf.mxu2 }
 0x5ac   : > { %v10158_v49 = vadd.f32 %v10157_v61, %v16695_v21  ;;  %v10838_v21 = vshll.u32 %v13181_v51, 16 }
 0x5ad   : > { %v10821_v8 = vrot.slane %v10819_v54, 4  ;;  %v10856_v54 = vshrl.u32 %v13183_v46, 16 }
 0x5ae   : > { %v10411_v62 = vpop.f32.mrf.mxu1 }
 0x5af   : > { %v10412_v24 = vadd.f32 %v10411_v62, %v10323_v33  ;;  %v10331_v33 = vadd.f32 %v10330_v40, %v10242_v15  ;;  %v10825_v12 = vor.u32 %v10824_v6, %v10821_v8  ;;  %v10246_v45 = vpop.f32.mrf.mxu3  ;;  %v13184_v8 = vld [vmem:[%s13734_s15 + $0xc8] sm:$0x1] }
 0x5b0   : > { %v10862_v0 = vshll.u32 %v13184_v8, 16 }
 0x5b1   : > { %v10953_v26 = vadd.f32 %v10921_v48, %v10412_v24  ;;  %v10924_v48 = vunpack.c.l.bf16 %v10807_v56  ;;  %v13180_v24 = vld [vmem:[%s13734_s15 + $0xb8] sm:$0xf]  ;;  %v10335_v23 = vpop.f32.mrf.mxu0 }
 0x5b2   : > { %v10832_v36 = vshrl.u32 %v13180_v24, 16 }
 0x5b3   : > { %10985 = vst [vmem:[%s16730_s20 + $0xb8] sm:$0xff] %v10953_v26  ;;  %v10828_v26 = vshll.u32 %v13180_v24, 16  ;;  %v10159_v10 = vpop.f32.mrf.mxu2 }
 0x5b4   : > { %v10834_v50 = vrot.slane %v10832_v36, 4  ;;  %v10160_v22 = vadd.f32 %v10159_v10, %v16701_v28  ;;  %v10852_v28 = vshll.u32 %v13183_v46, 16  ;;  %v10864_v36 = vrot.slane %v10862_v0, 5 }
 0x5b6   : > { %v10414_v30 = vpop.f32.mrf.mxu1  ;;  %v10854_v61 = vrot.slane %v10852_v28, 5 }
 0x5b7   : > { %v10415_v4 = vadd.f32 %v10414_v30, %v10326_v29  ;;  %v10826_v29 = vrot.slane %v10825_v12, 4  ;;  %v10248_v31 = vpop.f32.mrf.mxu3 }
 0x5b8   : > { %v10249_v11 = vadd.f32 %v10248_v31, %v10160_v22 }
 0x5b9   : > { %v10954_v32 = vadd.f32 %v10922_v43, %v10415_v4  ;;  %v10830_v43 = vrot.slane %v10828_v26, 5  ;;  %v10247_v4 = vadd.f32 %v10246_v45, %v10158_v49  ;;  %v10337_v7 = vpop.f32.mrf.mxu0 }
 0x5ba   : > { %v10338_v38 = vadd.f32 %v10337_v7, %v10249_v11 }
 0x5bb   : > { %10986 = vst [vmem:[%s16730_s20 + $0xc0] sm:$0xff] %v10954_v32  ;;  %v10831_v41 = vsel %vm13858_vm2, %v10826_v29, %v10830_v43  ;;  %v10835_v40 = vor.u32 %v10834_v50, %v10830_v43  ;;  %v10843_v32 = vshrl.u32 %v13182_v58, 16  ;;  %v10336_v59 = vadd.f32 %v10335_v23, %v10247_v4 }
 0x5bc   : > { %v10926_v44 = vunpack.c.l.bf16 %v10831_v41 }
 0x5be   : > { %v10416_v17 = vpop.f32.mrf.mxu1 }
 0x5bf   : > { %v10417_v55 = vadd.f32 %v10416_v17, %v10328_v18  ;;  %v10836_v18 = vrot.slane %v10835_v40, 4  ;;  %v10845_v17 = vrot.slane %v10843_v32, 4  ;;  %v10251_v35 = vpop.f32.mrf.mxu3 }
 0x5c1   : > { %v10955_v19 = vadd.f32 %v10923_v13, %v10417_v55  ;;  %v10840_v13 = vrot.slane %v10838_v21, 5  ;;  %v10162_v55 = vpop.f32.mrf.mxu2  ;;  %v10340_v6 = vpop.f32.mrf.mxu0 }
 0x5c2   : > { %v10163_v56 = vadd.f32 %v10162_v55, %v16708_v39 }
 0x5c3   : > { %10987 = vst [vmem:[%s16730_s20 + $0xc8] sm:$0xff] %v10955_v19  ;;  %v10841_v15 = vsel %vm13858_vm2, %v10836_v18, %v10840_v13  ;;  %v10849_v19 = vor.u32 %v10848_v47, %v10845_v17 }
 0x5c4   : > { %v10927_v60 = vunpack.c.l.bf16 %v10841_v15 }
 0x5c5   : > { %v10850_v42 = vrot.slane %v10849_v19, 4 }
 0x5c6   : > { %v10419_v62 = vpop.f32.mrf.mxu1 }
 0x5c7   : > { %v10420_v34 = vadd.f32 %v10419_v62, %v10331_v33  ;;  %v10858_v33 = vrot.slane %v10856_v54, 4  ;;  %v10252_v62 = vadd.f32 %v10251_v35, %v10163_v56  ;;  %v10855_v24 = vsel %vm13858_vm2, %v10850_v42, %v10854_v61  ;;  %v10253_v26 = vpop.f32.mrf.mxu3 }
 0x5c8   : > { %v10928_v12 = vunpack.c.l.bf16 %v10855_v24 }
 0x5c9   : > { %v10956_v53 = vadd.f32 %v10924_v48, %v10420_v34  ;;  %v10164_v3 = vpop.f32.mrf.mxu2  ;;  %v10859_v34 = vor.u32 %v10858_v33, %v10854_v61  ;;  %v10341_v39 = vadd.f32 %v10340_v6, %v10252_v62 }
 0x5cb   : > { %10988 = vst [vmem:[%s16730_s20 + $0xd0] sm:$0xff] %v10956_v53  ;;  %v10165_v53 = vadd.f32 %v10164_v3, %v16716_v52  ;;  %v10860_v2 = vrot.slane %v10859_v34, 4 }
 0x5cd   : > { %v10254_v23 = vadd.f32 %v10253_v26, %v10165_v53  ;;  %v10865_v29 = vsel %vm13858_vm2, %v10860_v2, %v10864_v36 }
 0x5ce   : > { %v10421_v30 = vpop.f32.mrf.mxu1  ;;  %v10929_v10 = vunpack.c.l.bf16 %v10865_v29 }
 0x5cf   : > { %v10422_v16 = vadd.f32 %v10421_v30, %v10333_v1 }
 0x5d1   : > { %v10957_v5 = vadd.f32 %v10925_v37, %v10422_v16  ;;  %v10342_v37 = vpop.f32.mrf.mxu0 }
 0x5d2   : > { %v10343_v43 = vadd.f32 %v10342_v37, %v10254_v23 }
 0x5d3   : > { %10989 = vst [vmem:[%s16730_s20 + $0xd8] sm:$0xff] %v10957_v5 }
 0x5d6   : > { %v10424_v57 = vpop.f32.mrf.mxu1 }
 0x5d7   : > { %v10425_v27 = vadd.f32 %v10424_v57, %v10336_v59 }
 0x5d9   : > { %v10958_v14 = vadd.f32 %v10926_v44, %v10425_v27 }
 0x5db   : > { %10990 = vst [vmem:[%s16730_s20 + $0xe0] sm:$0xff] %v10958_v14 }
 0x5de   : > { %v10426_v9 = vpop.f32.mrf.mxu1 }
 0x5df   : > { %v10427_v48 = vadd.f32 %v10426_v9, %v10338_v38 }
 0x5e1   : > { %v10959_v20 = vadd.f32 %v10927_v60, %v10427_v48 }
 0x5e3   : > { %10991 = vst [vmem:[%s16730_s20 + $0xe8] sm:$0xff] %v10959_v20 }
 0x5e6   : > { %v10429_v45 = vpop.f32.mrf.mxu1 }
 0x5e7   : > { %v10430_v49 = vadd.f32 %v10429_v45, %v10341_v39 }
 0x5e9   : > { %v10960_v1 = vadd.f32 %v10928_v12, %v10430_v49 }
 0x5eb   : > { %10992 = vst [vmem:[%s16730_s20 + $0xf0] sm:$0xff] %v10960_v1 }
 0x5ee   : > { %v10431_v30 = vpop.f32.mrf.mxu1 }
 0x5ef   : > { %v10432_v50 = vadd.f32 %v10431_v30, %v10343_v43 }
 0x5f1   : > { %v10961_v16 = vadd.f32 %v10929_v10, %v10432_v50 }
 0x5f3   : > { %10993 = vst [vmem:[%s16730_s20 + $0xf8] sm:$0xff] %v10961_v16 }
 0x5f4 PF: > { %s17_s23 = sadd.s32 1, %s13657_s23  }
 0x5f5   : > { %p14_p4 = scmp.ge.s32.totalorder %s17_s23, 4  }
 0x5f7   :  { %16 = sbr.rel (!%p14_p4) target bundleno = 2 (0x2), region = 78 }

</bundles_post_ra>
